<compile_context>
chip_gen: v6e
topology: v6e:2x2x1
jax: 0.10.0
libtpu: 0.0.40
codegen_flags: <defaults>
</compile_context>

<pallas_src>
import functools

import jax
import jax.numpy as jnp
from jax.experimental import pallas as pl
from jax.experimental.pallas import tpu as pltpu

EPS = 1e-5
K = 5      # conv kernel size per spatial dim
PAD = 2    # conv padding


def _round_up(v, m):
    return (v + m - 1) // m * m


def _largest_divisor_leq(n, cap):
    for d in range(min(cap, n), 0, -1):
        if n % d == 0:
            return d
    return 1


def _pick_plane_block(d):
    # Largest multiple-of-8 divisor (pass-2 output sublane constraint), else D.
    for c in (64, 32, 16, 8):
        if d % c == 0:
            return c
    return d


# ---------------------------------------------------------------------------
# Pass 1: conv (per-plane im2col in VMEM) + streamed instance-norm stats.
# One grid step = one output depth plane of one (batch, depth-tile).
# ---------------------------------------------------------------------------
def _conv_stats_kernel(x_ref, w_ref, b_ref, y_ref, xr_ref, stats_ref, *,
                       cin, wp, hwp, w_valid, cp_out, kp):
    """Refs:
    x_ref    : (1, Dwin, Cin, Cp_in)  bf16  padded-input depth window
               (block index constant over the inner grid axis -> DMA'd once
                per (batch, depth-tile))
    w_ref    : (Cout, KP)             bf16  reordered conv weight (zero-padded)
    b_ref    : (Cout, 1)              f32   conv bias
    y_ref    : (1, Td, Cout, Cp_out)  bf16  conv output  (revisited over dd)
    xr_ref   : (1, Td, Cin,  Cp_out)  bf16  residual (= bf16(x)) copy
    stats_ref: (1, 1, Cout, 2)        f32   per-(n,t) [sum(y), sum(y^2)]
    """
    dd = pl.program_id(2)                                   # output plane in tile

    # The K padded (H, W) planes feeding this output plane (leading-dim
    # dynamic index on the resident window).
    planes = [x_ref[0, dd + kd] for kd in range(K)]         # each (Cin, Cp_in)

    # im2col for this single output plane, built in VMEM from static lane
    # slices (sub-tiled patch buffer: KP x Cp_out, ~Td x smaller than before).
    taps = []
    for kd in range(K):
        for kh in range(K):
            for kw in range(K):
                off = kh * wp + kw
                taps.append(planes[kd][:, off:off + cp_out])
    k3c = K * K * K * cin
    if kp > k3c:  # pad contraction dim to a multiple of 128
        taps.append(jnp.zeros((kp - k3c, cp_out), dtype=planes[0].dtype))
    patches = jnp.concatenate(taps, axis=0)                 # (KP, Cp_out) bf16

    # MXU matmul, f32 accumulation; lane-dense output (Cp_out % 128 == 0).
    y = jnp.dot(w_ref[...], patches,
                preferred_element_type=jnp.float32)         # (Cout, Cp_out) f32
    y = y + b_ref[...]

    # Validity mask built in-kernel (no DMA'd mask input): lane p encodes
    # (h, w) as p = h*Wp + w; valid iff h < H and w < W.
    p = jax.lax.broadcasted_iota(jnp.int32, (1, cp_out), 1)
    m = ((p < hwp) & (p % wp < w_valid)).astype(jnp.float32)

    st = jnp.concatenate(
        [jnp.sum(y * m, axis=1, keepdims=True),
         jnp.sum(y * y * m, axis=1, keepdims=True)], axis=1)  # (Cout, 2) f32

    @pl.when(dd == 0)
    def _():
        stats_ref[0, 0] = st

    @pl.when(dd > 0)
    def _():
        stats_ref[0, 0] += st

    # Store the conv output and the residual (centre tap) in bf16 for pass 2.
    y_ref[0, dd] = y.astype(y_ref.dtype)
    c0 = PAD * wp + PAD
    xr_ref[0, dd] = planes[PAD][:, c0:c0 + cp_out]


# ---------------------------------------------------------------------------
# Pass 2: normalize + PReLU + channel-repeated residual, channel-major output.
# ---------------------------------------------------------------------------
def _norm_prelu_kernel(alpha_ref, mean_ref, istd_ref, y_ref, xr_ref, o_ref, *,
                       cout, cin):
    """alpha (1,), mean/istd (N, Cout) in SMEM; y (1,d2,Cout,Cp) / xr
    (1,d2,Cin,Cp) bf16 in VMEM; o (1,Cout,d2,Cp) f32."""
    n = pl.program_id(0)
    a = alpha_ref[0]

    # PReLU on the residual once at Cin width; repeated channels reuse it.
    r = xr_ref[0].astype(jnp.float32)                        # (d2, Cin, Cp_out)
    pr = jnp.where(r > 0, r, a * r)

    for co in range(cout):                                   # per-channel: avoids
        mu = mean_ref[n, co]                                 # in-kernel transposes
        isd = istd_ref[n, co]
        yv = y_ref[0, :, co, :].astype(jnp.float32)          # (d2, Cp_out)
        yn = (yv - mu) * isd
        o_ref[0, co] = jnp.where(yn > 0, yn, a * yn) + pr[:, co % cin, :]


# ---------------------------------------------------------------------------
# Wrapper
# ---------------------------------------------------------------------------
@functools.partial(jax.jit,
                   static_argnames=("in_channels", "out_channels", "d_tile"))
def first_conv_block(x, weight, bias, prelu_alpha, *, in_channels,
                     out_channels, d_tile=8):
    """Forward pass matching the PyTorch module.

    x      : (N, Cin, D, H, W) f32
    weight : (Cout, Cin, 5, 5, 5),  bias : (Cout,),  prelu_alpha : scalar
    returns (N, Cout, D, H, W) f32
    """
    N, Cin, D, H, W = x.shape
    Cout = out_channels
    assert Cin == in_channels and Cout % Cin == 0

    Td = _largest_divisor_leq(D, d_tile)          # depth tile (divides D)
    n_dt = D // Td
    Dwin = Td + K - 1                             # window incl. depth halo
    Hp, Wp = H + 2 * PAD, W + 2 * PAD
    Lrow = Hp * Wp                                # one flattened padded plane
    halo = 2 * PAD * Wp + 2 * PAD                 # max in-plane (kh, kw) shift
    Cp_out = _round_up(H * Wp, 128)               # lane-dense output plane width
    Cp_in = _round_up(max(Lrow, Cp_out + halo), 128)
    K3C = K * K * K * Cin
    KP = _round_up(K3C, 128)
    S = D * H * W

    # ---- pass-1 input: one bf16 padded copy, overlapping depth windows -----
    xb = x.astype(jnp.bfloat16)
    xp = jnp.pad(xb, ((0, 0), (0, 0), (PAD, PAD), (PAD, PAD), (PAD, PAD)))
    xp = xp.reshape(N, Cin, D + 2 * PAD, Lrow)
    xp = jnp.pad(xp, ((0, 0), (0, 0), (0, 0), (0, Cp_in - Lrow)))
    xp = jnp.transpose(xp, (0, 2, 1, 3))          # (N, Dp, Cin, Cp_in)
    x_win = jnp.stack([xp[:, t * Td:t * Td + Dwin] for t in range(n_dt)],
                      axis=1).reshape(N * n_dt, Dwin, Cin, Cp_in)

    wm = jnp.transpose(weight.astype(jnp.float32), (0, 2, 3, 4, 1))
    wm = wm.reshape(Cout, K3C)
    wm = jnp.pad(wm, ((0, 0), (0, KP - K3C))).astype(jnp.bfloat16)
    bm = bias.astype(jnp.float32).reshape(Cout, 1)

    kernel1 = functools.partial(_conv_stats_kernel, cin=Cin, wp=Wp,
                                hwp=H * Wp, w_valid=W, cp_out=Cp_out, kp=KP)
    flops = 2 * N * D * Cout * KP * Cp_out
    bytes_accessed = (x_win.size * 2 + wm.size * 2
                      + N * D * (Cout + Cin) * Cp_out * 2
                      + N * n_dt * Cout * 2 * 4)

    y_f, xr_f, stats = pl.pallas_call(
        kernel1,
        out_shape=(
            jax.ShapeDtypeStruct((N, D, Cout, Cp_out), jnp.bfloat16),
            jax.ShapeDtypeStruct((N, D, Cin, Cp_out), jnp.bfloat16),
            jax.ShapeDtypeStruct((N, n_dt, Cout, 2), jnp.float32),
        ),
        grid_spec=pltpu.PrefetchScalarGridSpec(
            num_scalar_prefetch=0,
            grid=(N, n_dt, Td),
            in_specs=[
                pl.BlockSpec((1, Dwin, Cin, Cp_in),
                             lambda n, t, d: (n * n_dt + t, 0, 0, 0)),
                pl.BlockSpec((Cout, KP), lambda n, t, d: (0, 0)),
                pl.BlockSpec((Cout, 1), lambda n, t, d: (0, 0)),
            ],
            out_specs=(
                pl.BlockSpec((1, Td, Cout, Cp_out), lambda n, t, d: (n, t, 0, 0)),
                pl.BlockSpec((1, Td, Cin, Cp_out), lambda n, t, d: (n, t, 0, 0)),
                pl.BlockSpec((1, 1, Cout, 2), lambda n, t, d: (n, t, 0, 0)),
            ),
        ),
        compiler_params=pltpu.CompilerParams(
            dimension_semantics=("parallel", "parallel", "arbitrary"),
            vmem_limit_bytes=32 * 1024 * 1024),   # fits v5e/v6e and v7x (64 MiB)
        cost_estimate=pl.CostEstimate(flops=flops, transcendentals=0,
                                      bytes_accessed=bytes_accessed),
    )(x_win, wm, bm)

    # ---- instance-norm stats: tiny cross-tile reduction in plain JAX (f32) --
    sums = jnp.sum(stats, axis=1)                  # (N, Cout, 2)
    mean = sums[..., 0] / S
    var = sums[..., 1] / S - mean * mean           # biased variance
    inv_std = jax.lax.rsqrt(var + EPS)             # (N, Cout)

    alpha = jnp.asarray(prelu_alpha, jnp.float32).reshape(1)
    kernel2 = functools.partial(_norm_prelu_kernel, cout=Cout, cin=Cin)

    d2 = _pick_plane_block(D)                      # pass-2 tiling decoupled
    out_f = pl.pallas_call(
        kernel2,
        out_shape=jax.ShapeDtypeStruct((N, Cout, D, Cp_out), jnp.float32),
        grid_spec=pltpu.PrefetchScalarGridSpec(
            num_scalar_prefetch=0,
            grid=(N, D // d2),
            in_specs=[
                pl.BlockSpec(memory_space=pltpu.MemorySpace.SMEM),      # alpha
                pl.BlockSpec(memory_space=pltpu.MemorySpace.SMEM),      # mean
                pl.BlockSpec(memory_space=pltpu.MemorySpace.SMEM),      # inv_std
                pl.BlockSpec((1, d2, Cout, Cp_out), lambda n, t: (n, t, 0, 0)),
                pl.BlockSpec((1, d2, Cin, Cp_out), lambda n, t: (n, t, 0, 0)),
            ],
            out_specs=pl.BlockSpec((1, Cout, d2, Cp_out),
                                   lambda n, t: (n, 0, t, 0)),
        ),
        compiler_params=pltpu.CompilerParams(
            dimension_semantics=("parallel", "parallel"),
            vmem_limit_bytes=32 * 1024 * 1024),
    )(alpha, mean, inv_std, y_f, xr_f)

    # ---- drop padded lanes (slice + reshape; no transpose) ------------------
    o = out_f[:, :, :, :H * Wp].reshape(N, Cout, D, H, Wp)[..., :W]
    return o


# ---------------------------------------------------------------------------
# Pure-JAX reference (mirrors the kernel's numerics: bf16 conv inputs and
# bf16 storage of the conv output; stats / norm math in f32).
# ---------------------------------------------------------------------------
def _reference(x, weight, bias, alpha, out_channels):
    in_channels = x.shape[1]
    xb = x.astype(jnp.bfloat16).astype(jnp.float32)
    wb = weight.astype(jnp.bfloat16).astype(jnp.float32)
    dn = jax.lax.conv_dimension_numbers(x.shape, weight.shape,
                                        ("NCDHW", "OIDHW", "NCDHW"))
    y = jax.lax.conv_general_dilated(xb, wb, (1, 1, 1), [(PAD, PAD)] * 3,
                                     dimension_numbers=dn)
    y = y + bias.reshape(1, -1, 1, 1, 1)
    mean = jnp.mean(y, axis=(2, 3, 4), keepdims=True)
    var = jnp.var(y, axis=(2, 3, 4), keepdims=True)
    yb = y.astype(jnp.bfloat16).astype(jnp.float32)   # mimic bf16 storage of y
    yn = (yb - mean) * jax.lax.rsqrt(var + EPS)
    res = jnp.tile(xb, (1, out_channels // in_channels, 1, 1, 1))
    prelu = lambda t: jnp.where(t > 0, t, alpha * t)
    return prelu(yn) + prelu(res)


if __name__ == "__main__":
    key = jax.random.PRNGKey(0)
    k_x, k_w, k_b = jax.random.split(key, 3)

    N, Cin, Cout = 2, 2, 4
    D = H = W = 16

    x = jax.random.normal(k_x, (N, Cin, D, H, W), dtype=jnp.float32)
    fan_in = Cin * K * K * K
    weight = jax.random.normal(k_w, (Cout, Cin, K, K, K),
                               dtype=jnp.float32) * (fan_in ** -0.5)
    bias = jax.random.normal(k_b, (Cout,), dtype=jnp.float32) * 0.01
    prelu_alpha = 0.25  # PyTorch PReLU default (single shared parameter)

    out = first_conv_block(x, weight, bias, prelu_alpha,
                           in_channels=Cin, out_channels=Cout, d_tile=8)
    out = jax.block_until_ready(out)
    assert out.shape == (N, Cout, D, H, W)

    ref = _reference(x, weight, bias, prelu_alpha, Cout)
    err_max = float(jnp.max(jnp.abs(out - ref)))
    err_mean = float(jnp.mean(jnp.abs(out - ref)))
    # bf16 storage of the conv output bounds rare pointwise differences by
    # ~1 bf16 ulp of |y| (<~3e-2); the mean error stays ~1e-5.
    assert err_max < 5e-2, f"max |err| vs reference: {err_max}"
    assert err_mean < 1e-3, f"mean |err| vs reference: {err_mean}"

    print("KERNEL_OK")
</pallas_src>

<mosaic_0001>
module attributes {stable_mosaic.version = 11 : i64} {
  func.func @_norm_prelu_kernel(%arg0: i32, %arg1: i32, %arg2: memref<1xf32, #tpu.memory_space<smem>>, %arg3: memref<2x4xf32, #tpu.memory_space<smem>>, %arg4: memref<2x4xf32, #tpu.memory_space<smem>>, %arg5: memref<1x16x4x384xbf16, #tpu.memory_space<vmem>>, %arg6: memref<1x16x2x384xbf16, #tpu.memory_space<vmem>>, %arg7: memref<1x4x16x384xf32, #tpu.memory_space<vmem>>) attributes {dimension_semantics = [#tpu.dimension_semantics<parallel>, #tpu.dimension_semantics<parallel>], iteration_bounds = array<i64: 2, 1>, scalar_prefetch = 0 : i64, scratch_operands = 0 : i64, tpu.core_type = #tpu.core_type<tc>, window_params = [{transform_indices = @transform_0, window_bounds = array<i64: 1>}, {transform_indices = @transform_1, window_bounds = array<i64: 2, 4>}, {transform_indices = @transform_2, window_bounds = array<i64: 2, 4>}, {transform_indices = @transform_3, window_bounds = array<i64: 1, 16, 4, 384>}, {transform_indices = @transform_4, window_bounds = array<i64: 1, 16, 2, 384>}, {transform_indices = @transform_5, window_bounds = array<i64: 1, 4, 16, 384>}]} {
    %c0 = arith.constant 0 : index
    %0 = memref.load %arg2[%c0] : memref<1xf32, #tpu.memory_space<smem>>
    %c0_0 = arith.constant 0 : index
    %c0_1 = arith.constant 0 : index
    %c0_2 = arith.constant 0 : index
    %c0_3 = arith.constant 0 : index
    %1 = vector.load %arg6[%c0_0, %c0_1, %c0_2, %c0_3] : memref<1x16x2x384xbf16, #tpu.memory_space<vmem>>, vector<1x16x2x384xbf16>
    %2 = vector.shape_cast %1 : vector<1x16x2x384xbf16> to vector<16x2x384xbf16>
    %3 = arith.extf %2 : vector<16x2x384xbf16> to vector<16x2x384xf32>
    %cst = arith.constant 0.000000e+00 : f32
    %4 = vector.broadcast %cst : f32 to vector<16x2x384xf32>
    %5 = arith.cmpf ogt, %3, %4 : vector<16x2x384xf32>
    %6 = vector.broadcast %0 : f32 to vector<16x2x384xf32>
    %7 = arith.mulf %6, %3 : vector<16x2x384xf32>
    %8 = arith.select %5, %3, %7 : vector<16x2x384xi1>, vector<16x2x384xf32>
    %9 = arith.index_cast %arg0 : i32 to index
    %c0_4 = arith.constant 0 : index
    %10 = memref.load %arg3[%9, %c0_4] : memref<2x4xf32, #tpu.memory_space<smem>>
    %11 = arith.index_cast %arg0 : i32 to index
    %c0_5 = arith.constant 0 : index
    %12 = memref.load %arg4[%11, %c0_5] : memref<2x4xf32, #tpu.memory_space<smem>>
    %c0_6 = arith.constant 0 : index
    %c0_7 = arith.constant 0 : index
    %c0_8 = arith.constant 0 : index
    %c0_9 = arith.constant 0 : index
    %13 = vector.load %arg5[%c0_6, %c0_7, %c0_8, %c0_9] : memref<1x16x4x384xbf16, #tpu.memory_space<vmem>>, vector<1x16x1x384xbf16>
    %14 = vector.shape_cast %13 : vector<1x16x1x384xbf16> to vector<16x384xbf16>
    %15 = arith.extf %14 : vector<16x384xbf16> to vector<16x384xf32>
    %16 = vector.broadcast %10 : f32 to vector<16x384xf32>
    %17 = arith.subf %15, %16 : vector<16x384xf32>
    %18 = vector.broadcast %12 : f32 to vector<16x384xf32>
    %19 = arith.mulf %17, %18 : vector<16x384xf32>
    %cst_10 = arith.constant 0.000000e+00 : f32
    %20 = vector.broadcast %cst_10 : f32 to vector<16x384xf32>
    %21 = arith.cmpf ogt, %19, %20 : vector<16x384xf32>
    %22 = vector.broadcast %0 : f32 to vector<16x384xf32>
    %23 = arith.mulf %22, %19 : vector<16x384xf32>
    %24 = arith.select %21, %19, %23 : vector<16x384xi1>, vector<16x384xf32>
    %25 = vector.extract_strided_slice %8 {offsets = [0, 0, 0], sizes = [16, 1, 384], strides = [1, 1, 1]} : vector<16x2x384xf32> to vector<16x1x384xf32>
    %26 = vector.shape_cast %25 : vector<16x1x384xf32> to vector<16x384xf32>
    %27 = arith.addf %24, %26 : vector<16x384xf32>
    %c0_11 = arith.constant 0 : index
    %c0_12 = arith.constant 0 : index
    %c0_13 = arith.constant 0 : index
    %c0_14 = arith.constant 0 : index
    %28 = vector.load %arg7[%c0_11, %c0_12, %c0_13, %c0_14] : memref<1x4x16x384xf32, #tpu.memory_space<vmem>>, vector<1x1x16x384xf32>
    %29 = vector.shape_cast %28 : vector<1x1x16x384xf32> to vector<16x384xf32>
    %30 = vector.shape_cast %27 : vector<16x384xf32> to vector<1x1x16x384xf32>
    tpu.vector_store %arg7[%c0_11, %c0_12, %c0_13, %c0_14], %30 {strides = array<i32>} : memref<1x4x16x384xf32, #tpu.memory_space<vmem>>, vector<1x1x16x384xf32>,
    %31 = arith.index_cast %arg0 : i32 to index
    %c1 = arith.constant 1 : index
    %32 = memref.load %arg3[%31, %c1] : memref<2x4xf32, #tpu.memory_space<smem>>
    %33 = arith.index_cast %arg0 : i32 to index
    %c1_15 = arith.constant 1 : index
    %34 = memref.load %arg4[%33, %c1_15] : memref<2x4xf32, #tpu.memory_space<smem>>
    %c0_16 = arith.constant 0 : index
    %c0_17 = arith.constant 0 : index
    %c1_18 = arith.constant 1 : index
    %c0_19 = arith.constant 0 : index
    %35 = vector.load %arg5[%c0_16, %c0_17, %c1_18, %c0_19] : memref<1x16x4x384xbf16, #tpu.memory_space<vmem>>, vector<1x16x1x384xbf16>
    %36 = vector.shape_cast %35 : vector<1x16x1x384xbf16> to vector<16x384xbf16>
    %37 = arith.extf %36 : vector<16x384xbf16> to vector<16x384xf32>
    %38 = vector.broadcast %32 : f32 to vector<16x384xf32>
    %39 = arith.subf %37, %38 : vector<16x384xf32>
    %40 = vector.broadcast %34 : f32 to vector<16x384xf32>
    %41 = arith.mulf %39, %40 : vector<16x384xf32>
    %cst_20 = arith.constant 0.000000e+00 : f32
    %42 = vector.broadcast %cst_20 : f32 to vector<16x384xf32>
    %43 = arith.cmpf ogt, %41, %42 : vector<16x384xf32>
    %44 = vector.broadcast %0 : f32 to vector<16x384xf32>
    %45 = arith.mulf %44, %41 : vector<16x384xf32>
    %46 = arith.select %43, %41, %45 : vector<16x384xi1>, vector<16x384xf32>
    %47 = vector.extract_strided_slice %8 {offsets = [0, 1, 0], sizes = [16, 1, 384], strides = [1, 1, 1]} : vector<16x2x384xf32> to vector<16x1x384xf32>
    %48 = vector.shape_cast %47 : vector<16x1x384xf32> to vector<16x384xf32>
    %49 = arith.addf %46, %48 : vector<16x384xf32>
    %c0_21 = arith.constant 0 : index
    %c1_22 = arith.constant 1 : index
    %c0_23 = arith.constant 0 : index
    %c0_24 = arith.constant 0 : index
    %50 = vector.load %arg7[%c0_21, %c1_22, %c0_23, %c0_24] : memref<1x4x16x384xf32, #tpu.memory_space<vmem>>, vector<1x1x16x384xf32>
    %51 = vector.shape_cast %50 : vector<1x1x16x384xf32> to vector<16x384xf32>
    %52 = vector.shape_cast %49 : vector<16x384xf32> to vector<1x1x16x384xf32>
    tpu.vector_store %arg7[%c0_21, %c1_22, %c0_23, %c0_24], %52 {strides = array<i32>} : memref<1x4x16x384xf32, #tpu.memory_space<vmem>>, vector<1x1x16x384xf32>,
    %53 = arith.index_cast %arg0 : i32 to index
    %c2 = arith.constant 2 : index
    %54 = memref.load %arg3[%53, %c2] : memref<2x4xf32, #tpu.memory_space<smem>>
    %55 = arith.index_cast %arg0 : i32 to index
    %c2_25 = arith.constant 2 : index
    %56 = memref.load %arg4[%55, %c2_25] : memref<2x4xf32, #tpu.memory_space<smem>>
    %c0_26 = arith.constant 0 : index
    %c0_27 = arith.constant 0 : index
    %c2_28 = arith.constant 2 : index
    %c0_29 = arith.constant 0 : index
    %57 = vector.load %arg5[%c0_26, %c0_27, %c2_28, %c0_29] : memref<1x16x4x384xbf16, #tpu.memory_space<vmem>>, vector<1x16x1x384xbf16>
    %58 = vector.shape_cast %57 : vector<1x16x1x384xbf16> to vector<16x384xbf16>
    %59 = arith.extf %58 : vector<16x384xbf16> to vector<16x384xf32>
    %60 = vector.broadcast %54 : f32 to vector<16x384xf32>
    %61 = arith.subf %59, %60 : vector<16x384xf32>
    %62 = vector.broadcast %56 : f32 to vector<16x384xf32>
    %63 = arith.mulf %61, %62 : vector<16x384xf32>
    %cst_30 = arith.constant 0.000000e+00 : f32
    %64 = vector.broadcast %cst_30 : f32 to vector<16x384xf32>
    %65 = arith.cmpf ogt, %63, %64 : vector<16x384xf32>
    %66 = vector.broadcast %0 : f32 to vector<16x384xf32>
    %67 = arith.mulf %66, %63 : vector<16x384xf32>
    %68 = arith.select %65, %63, %67 : vector<16x384xi1>, vector<16x384xf32>
    %69 = vector.extract_strided_slice %8 {offsets = [0, 0, 0], sizes = [16, 1, 384], strides = [1, 1, 1]} : vector<16x2x384xf32> to vector<16x1x384xf32>
    %70 = vector.shape_cast %69 : vector<16x1x384xf32> to vector<16x384xf32>
    %71 = arith.addf %68, %70 : vector<16x384xf32>
    %c0_31 = arith.constant 0 : index
    %c2_32 = arith.constant 2 : index
    %c0_33 = arith.constant 0 : index
    %c0_34 = arith.constant 0 : index
    %72 = vector.load %arg7[%c0_31, %c2_32, %c0_33, %c0_34] : memref<1x4x16x384xf32, #tpu.memory_space<vmem>>, vector<1x1x16x384xf32>
    %73 = vector.shape_cast %72 : vector<1x1x16x384xf32> to vector<16x384xf32>
    %74 = vector.shape_cast %71 : vector<16x384xf32> to vector<1x1x16x384xf32>
    tpu.vector_store %arg7[%c0_31, %c2_32, %c0_33, %c0_34], %74 {strides = array<i32>} : memref<1x4x16x384xf32, #tpu.memory_space<vmem>>, vector<1x1x16x384xf32>,
    %75 = arith.index_cast %arg0 : i32 to index
    %c3 = arith.constant 3 : index
    %76 = memref.load %arg3[%75, %c3] : memref<2x4xf32, #tpu.memory_space<smem>>
    %77 = arith.index_cast %arg0 : i32 to index
    %c3_35 = arith.constant 3 : index
    %78 = memref.load %arg4[%77, %c3_35] : memref<2x4xf32, #tpu.memory_space<smem>>
    %c0_36 = arith.constant 0 : index
    %c0_37 = arith.constant 0 : index
    %c3_38 = arith.constant 3 : index
    %c0_39 = arith.constant 0 : index
    %79 = vector.load %arg5[%c0_36, %c0_37, %c3_38, %c0_39] : memref<1x16x4x384xbf16, #tpu.memory_space<vmem>>, vector<1x16x1x384xbf16>
    %80 = vector.shape_cast %79 : vector<1x16x1x384xbf16> to vector<16x384xbf16>
    %81 = arith.extf %80 : vector<16x384xbf16> to vector<16x384xf32>
    %82 = vector.broadcast %76 : f32 to vector<16x384xf32>
    %83 = arith.subf %81, %82 : vector<16x384xf32>
    %84 = vector.broadcast %78 : f32 to vector<16x384xf32>
    %85 = arith.mulf %83, %84 : vector<16x384xf32>
    %cst_40 = arith.constant 0.000000e+00 : f32
    %86 = vector.broadcast %cst_40 : f32 to vector<16x384xf32>
    %87 = arith.cmpf ogt, %85, %86 : vector<16x384xf32>
    %88 = vector.broadcast %0 : f32 to vector<16x384xf32>
    %89 = arith.mulf %88, %85 : vector<16x384xf32>
    %90 = arith.select %87, %85, %89 : vector<16x384xi1>, vector<16x384xf32>
    %91 = vector.extract_strided_slice %8 {offsets = [0, 1, 0], sizes = [16, 1, 384], strides = [1, 1, 1]} : vector<16x2x384xf32> to vector<16x1x384xf32>
    %92 = vector.shape_cast %91 : vector<16x1x384xf32> to vector<16x384xf32>
    %93 = arith.addf %90, %92 : vector<16x384xf32>
    %c0_41 = arith.constant 0 : index
    %c3_42 = arith.constant 3 : index
    %c0_43 = arith.constant 0 : index
    %c0_44 = arith.constant 0 : index
    %94 = vector.load %arg7[%c0_41, %c3_42, %c0_43, %c0_44] : memref<1x4x16x384xf32, #tpu.memory_space<vmem>>, vector<1x1x16x384xf32>
    %95 = vector.shape_cast %94 : vector<1x1x16x384xf32> to vector<16x384xf32>
    %96 = vector.shape_cast %93 : vector<16x384xf32> to vector<1x1x16x384xf32>
    tpu.vector_store %arg7[%c0_41, %c3_42, %c0_43, %c0_44], %96 {strides = array<i32>} : memref<1x4x16x384xf32, #tpu.memory_space<vmem>>, vector<1x1x16x384xf32>,
    return
  }
  func.func @transform_0(%arg0: i32, %arg1: i32) -> i32 {
    %c0_i32 = arith.constant 0 : i32
    %c0_i32_0 = arith.constant 0 : i32
    return %c0_i32 : i32
  }
  func.func @transform_1(%arg0: i32, %arg1: i32) -> (i32, i32) {
    %c0_i32 = arith.constant 0 : i32
    %c0_i32_0 = arith.constant 0 : i32
    %c0_i32_1 = arith.constant 0 : i32
    return %c0_i32, %c0_i32_0 : i32, i32
  }
  func.func @transform_2(%arg0: i32, %arg1: i32) -> (i32, i32) {
    %c0_i32 = arith.constant 0 : i32
    %c0_i32_0 = arith.constant 0 : i32
    %c0_i32_1 = arith.constant 0 : i32
    return %c0_i32, %c0_i32_0 : i32, i32
  }
  func.func @transform_3(%arg0: i32, %arg1: i32) -> (i32, i32, i32, i32) {
    %c0_i32 = arith.constant 0 : i32
    %c0_i32_0 = arith.constant 0 : i32
    %c0_i32_1 = arith.constant 0 : i32
    return %arg0, %arg1, %c0_i32, %c0_i32_0 : i32, i32, i32, i32
  }
  func.func @transform_4(%arg0: i32, %arg1: i32) -> (i32, i32, i32, i32) {
    %c0_i32 = arith.constant 0 : i32
    %c0_i32_0 = arith.constant 0 : i32
    %c0_i32_1 = arith.constant 0 : i32
    return %arg0, %arg1, %c0_i32, %c0_i32_0 : i32, i32, i32, i32
  }
  func.func @transform_5(%arg0: i32, %arg1: i32) -> (i32, i32, i32, i32) {
    %c0_i32 = arith.constant 0 : i32
    %c0_i32_0 = arith.constant 0 : i32
    %c0_i32_1 = arith.constant 0 : i32
    return %arg0, %c0_i32, %arg1, %c0_i32_0 : i32, i32, i32, i32
  }
}

module attributes {stable_mosaic.version = 11 : i64} {
  func.func @_conv_stats_kernel(%arg0: i32, %arg1: i32, %arg2: i32, %arg3: memref<1x12x2x512xbf16, #tpu.memory_space<vmem>>, %arg4: memref<4x256xbf16, #tpu.memory_space<vmem>>, %arg5: memref<4x1xf32, #tpu.memory_space<vmem>>, %arg6: memref<1x8x4x384xbf16, #tpu.memory_space<vmem>>, %arg7: memref<1x8x2x384xbf16, #tpu.memory_space<vmem>>, %arg8: memref<1x1x4x2xf32, #tpu.memory_space<vmem>>) attributes {dimension_semantics = [#tpu.dimension_semantics<parallel>, #tpu.dimension_semantics<parallel>, #tpu.dimension_semantics<arbitrary>], iteration_bounds = array<i64: 2, 2, 8>, scalar_prefetch = 0 : i64, scratch_operands = 0 : i64, tpu.core_type = #tpu.core_type<tc>, window_params = [{transform_indices = @transform_0, window_bounds = array<i64: 1, 12, 2, 512>}, {pipeline_mode = #tpu.pipeline_mode<synchronous>, transform_indices = @transform_1, window_bounds = array<i64: 4, 256>}, {pipeline_mode = #tpu.pipeline_mode<synchronous>, transform_indices = @transform_2, window_bounds = array<i64: 4, 1>}, {transform_indices = @transform_3, window_bounds = array<i64: 1, 8, 4, 384>}, {transform_indices = @transform_4, window_bounds = array<i64: 1, 8, 2, 384>}, {transform_indices = @transform_5, window_bounds = array<i64: 1, 1, 4, 2>}]} {
    %c0_i32 = arith.constant 0 : i32
    %0 = arith.addi %arg2, %c0_i32 : i32
    %c0 = arith.constant 0 : index
    %1 = arith.index_cast %0 : i32 to index
    %c0_0 = arith.constant 0 : index
    %c0_1 = arith.constant 0 : index
    %2 = vector.load %arg3[%c0, %1, %c0_0, %c0_1] : memref<1x12x2x512xbf16, #tpu.memory_space<vmem>>, vector<1x1x2x512xbf16>
    %3 = vector.shape_cast %2 : vector<1x1x2x512xbf16> to vector<2x512xbf16>
    %c1_i32 = arith.constant 1 : i32
    %4 = arith.addi %arg2, %c1_i32 : i32
    %c0_2 = arith.constant 0 : index
    %5 = arith.index_cast %4 : i32 to index
    %c0_3 = arith.constant 0 : index
    %c0_4 = arith.constant 0 : index
    %6 = vector.load %arg3[%c0_2, %5, %c0_3, %c0_4] : memref<1x12x2x512xbf16, #tpu.memory_space<vmem>>, vector<1x1x2x512xbf16>
    %7 = vector.shape_cast %6 : vector<1x1x2x512xbf16> to vector<2x512xbf16>
    %c2_i32 = arith.constant 2 : i32
    %8 = arith.addi %arg2, %c2_i32 : i32
    %c0_5 = arith.constant 0 : index
    %9 = arith.index_cast %8 : i32 to index
    %c0_6 = arith.constant 0 : index
    %c0_7 = arith.constant 0 : index
    %10 = vector.load %arg3[%c0_5, %9, %c0_6, %c0_7] : memref<1x12x2x512xbf16, #tpu.memory_space<vmem>>, vector<1x1x2x512xbf16>
    %11 = vector.shape_cast %10 : vector<1x1x2x512xbf16> to vector<2x512xbf16>
    %c3_i32 = arith.constant 3 : i32
    %12 = arith.addi %arg2, %c3_i32 : i32
    %c0_8 = arith.constant 0 : index
    %13 = arith.index_cast %12 : i32 to index
    %c0_9 = arith.constant 0 : index
    %c0_10 = arith.constant 0 : index
    %14 = vector.load %arg3[%c0_8, %13, %c0_9, %c0_10] : memref<1x12x2x512xbf16, #tpu.memory_space<vmem>>, vector<1x1x2x512xbf16>
    %15 = vector.shape_cast %14 : vector<1x1x2x512xbf16> to vector<2x512xbf16>
    %c4_i32 = arith.constant 4 : i32
    %16 = arith.addi %arg2, %c4_i32 : i32
    %c0_11 = arith.constant 0 : index
    %17 = arith.index_cast %16 : i32 to index
    %c0_12 = arith.constant 0 : index
    %c0_13 = arith.constant 0 : index
    %18 = vector.load %arg3[%c0_11, %17, %c0_12, %c0_13] : memref<1x12x2x512xbf16, #tpu.memory_space<vmem>>, vector<1x1x2x512xbf16>
    %19 = vector.shape_cast %18 : vector<1x1x2x512xbf16> to vector<2x512xbf16>
    %20 = vector.extract_strided_slice %3 {offsets = [0, 0], sizes = [2, 384], strides = [1, 1]} : vector<2x512xbf16> to vector<2x384xbf16>
    %21 = vector.extract_strided_slice %3 {offsets = [0, 1], sizes = [2, 384], strides = [1, 1]} : vector<2x512xbf16> to vector<2x384xbf16>
    %22 = vector.extract_strided_slice %3 {offsets = [0, 2], sizes = [2, 384], strides = [1, 1]} : vector<2x512xbf16> to vector<2x384xbf16>
    %23 = vector.extract_strided_slice %3 {offsets = [0, 3], sizes = [2, 384], strides = [1, 1]} : vector<2x512xbf16> to vector<2x384xbf16>
    %24 = vector.extract_strided_slice %3 {offsets = [0, 4], sizes = [2, 384], strides = [1, 1]} : vector<2x512xbf16> to vector<2x384xbf16>
    %25 = vector.extract_strided_slice %3 {offsets = [0, 20], sizes = [2, 384], strides = [1, 1]} : vector<2x512xbf16> to vector<2x384xbf16>
    %26 = vector.extract_strided_slice %3 {offsets = [0, 21], sizes = [2, 384], strides = [1, 1]} : vector<2x512xbf16> to vector<2x384xbf16>
    %27 = vector.extract_strided_slice %3 {offsets = [0, 22], sizes = [2, 384], strides = [1, 1]} : vector<2x512xbf16> to vector<2x384xbf16>
    %28 = vector.extract_strided_slice %3 {offsets = [0, 23], sizes = [2, 384], strides = [1, 1]} : vector<2x512xbf16> to vector<2x384xbf16>
    %29 = vector.extract_strided_slice %3 {offsets = [0, 24], sizes = [2, 384], strides = [1, 1]} : vector<2x512xbf16> to vector<2x384xbf16>
    %30 = vector.extract_strided_slice %3 {offsets = [0, 40], sizes = [2, 384], strides = [1, 1]} : vector<2x512xbf16> to vector<2x384xbf16>
    %31 = vector.extract_strided_slice %3 {offsets = [0, 41], sizes = [2, 384], strides = [1, 1]} : vector<2x512xbf16> to vector<2x384xbf16>
    %32 = vector.extract_strided_slice %3 {offsets = [0, 42], sizes = [2, 384], strides = [1, 1]} : vector<2x512xbf16> to vector<2x384xbf16>
    %33 = vector.extract_strided_slice %3 {offsets = [0, 43], sizes = [2, 384], strides = [1, 1]} : vector<2x512xbf16> to vector<2x384xbf16>
    %34 = vector.extract_strided_slice %3 {offsets = [0, 44], sizes = [2, 384], strides = [1, 1]} : vector<2x512xbf16> to vector<2x384xbf16>
    %35 = vector.extract_strided_slice %3 {offsets = [0, 60], sizes = [2, 384], strides = [1, 1]} : vector<2x512xbf16> to vector<2x384xbf16>
    %36 = vector.extract_strided_slice %3 {offsets = [0, 61], sizes = [2, 384], strides = [1, 1]} : vector<2x512xbf16> to vector<2x384xbf16>
    %37 = vector.extract_strided_slice %3 {offsets = [0, 62], sizes = [2, 384], strides = [1, 1]} : vector<2x512xbf16> to vector<2x384xbf16>
    %38 = vector.extract_strided_slice %3 {offsets = [0, 63], sizes = [2, 384], strides = [1, 1]} : vector<2x512xbf16> to vector<2x384xbf16>
    %39 = vector.extract_strided_slice %3 {offsets = [0, 64], sizes = [2, 384], strides = [1, 1]} : vector<2x512xbf16> to vector<2x384xbf16>
    %40 = vector.extract_strided_slice %3 {offsets = [0, 80], sizes = [2, 384], strides = [1, 1]} : vector<2x512xbf16> to vector<2x384xbf16>
    %41 = vector.extract_strided_slice %3 {offsets = [0, 81], sizes = [2, 384], strides = [1, 1]} : vector<2x512xbf16> to vector<2x384xbf16>
    %42 = vector.extract_strided_slice %3 {offsets = [0, 82], sizes = [2, 384], strides = [1, 1]} : vector<2x512xbf16> to vector<2x384xbf16>
    %43 = vector.extract_strided_slice %3 {offsets = [0, 83], sizes = [2, 384], strides = [1, 1]} : vector<2x512xbf16> to vector<2x384xbf16>
    %44 = vector.extract_strided_slice %3 {offsets = [0, 84], sizes = [2, 384], strides = [1, 1]} : vector<2x512xbf16> to vector<2x384xbf16>
    %45 = vector.extract_strided_slice %7 {offsets = [0, 0], sizes = [2, 384], strides = [1, 1]} : vector<2x512xbf16> to vector<2x384xbf16>
    %46 = vector.extract_strided_slice %7 {offsets = [0, 1], sizes = [2, 384], strides = [1, 1]} : vector<2x512xbf16> to vector<2x384xbf16>
    %47 = vector.extract_strided_slice %7 {offsets = [0, 2], sizes = [2, 384], strides = [1, 1]} : vector<2x512xbf16> to vector<2x384xbf16>
    %48 = vector.extract_strided_slice %7 {offsets = [0, 3], sizes = [2, 384], strides = [1, 1]} : vector<2x512xbf16> to vector<2x384xbf16>
    %49 = vector.extract_strided_slice %7 {offsets = [0, 4], sizes = [2, 384], strides = [1, 1]} : vector<2x512xbf16> to vector<2x384xbf16>
    %50 = vector.extract_strided_slice %7 {offsets = [0, 20], sizes = [2, 384], strides = [1, 1]} : vector<2x512xbf16> to vector<2x384xbf16>
    %51 = vector.extract_strided_slice %7 {offsets = [0, 21], sizes = [2, 384], strides = [1, 1]} : vector<2x512xbf16> to vector<2x384xbf16>
    %52 = vector.extract_strided_slice %7 {offsets = [0, 22], sizes = [2, 384], strides = [1, 1]} : vector<2x512xbf16> to vector<2x384xbf16>
    %53 = vector.extract_strided_slice %7 {offsets = [0, 23], sizes = [2, 384], strides = [1, 1]} : vector<2x512xbf16> to vector<2x384xbf16>
    %54 = vector.extract_strided_slice %7 {offsets = [0, 24], sizes = [2, 384], strides = [1, 1]} : vector<2x512xbf16> to vector<2x384xbf16>
    %55 = vector.extract_strided_slice %7 {offsets = [0, 40], sizes = [2, 384], strides = [1, 1]} : vector<2x512xbf16> to vector<2x384xbf16>
    %56 = vector.extract_strided_slice %7 {offsets = [0, 41], sizes = [2, 384], strides = [1, 1]} : vector<2x512xbf16> to vector<2x384xbf16>
    %57 = vector.extract_strided_slice %7 {offsets = [0, 42], sizes = [2, 384], strides = [1, 1]} : vector<2x512xbf16> to vector<2x384xbf16>
    %58 = vector.extract_strided_slice %7 {offsets = [0, 43], sizes = [2, 384], strides = [1, 1]} : vector<2x512xbf16> to vector<2x384xbf16>
    %59 = vector.extract_strided_slice %7 {offsets = [0, 44], sizes = [2, 384], strides = [1, 1]} : vector<2x512xbf16> to vector<2x384xbf16>
    %60 = vector.extract_strided_slice %7 {offsets = [0, 60], sizes = [2, 384], strides = [1, 1]} : vector<2x512xbf16> to vector<2x384xbf16>
    %61 = vector.extract_strided_slice %7 {offsets = [0, 61], sizes = [2, 384], strides = [1, 1]} : vector<2x512xbf16> to vector<2x384xbf16>
    %62 = vector.extract_strided_slice %7 {offsets = [0, 62], sizes = [2, 384], strides = [1, 1]} : vector<2x512xbf16> to vector<2x384xbf16>
    %63 = vector.extract_strided_slice %7 {offsets = [0, 63], sizes = [2, 384], strides = [1, 1]} : vector<2x512xbf16> to vector<2x384xbf16>
    %64 = vector.extract_strided_slice %7 {offsets = [0, 64], sizes = [2, 384], strides = [1, 1]} : vector<2x512xbf16> to vector<2x384xbf16>
    %65 = vector.extract_strided_slice %7 {offsets = [0, 80], sizes = [2, 384], strides = [1, 1]} : vector<2x512xbf16> to vector<2x384xbf16>
    %66 = vector.extract_strided_slice %7 {offsets = [0, 81], sizes = [2, 384], strides = [1, 1]} : vector<2x512xbf16> to vector<2x384xbf16>
    %67 = vector.extract_strided_slice %7 {offsets = [0, 82], sizes = [2, 384], strides = [1, 1]} : vector<2x512xbf16> to vector<2x384xbf16>
    %68 = vector.extract_strided_slice %7 {offsets = [0, 83], sizes = [2, 384], strides = [1, 1]} : vector<2x512xbf16> to vector<2x384xbf16>
    %69 = vector.extract_strided_slice %7 {offsets = [0, 84], sizes = [2, 384], strides = [1, 1]} : vector<2x512xbf16> to vector<2x384xbf16>
    %70 = vector.extract_strided_slice %11 {offsets = [0, 0], sizes = [2, 384], strides = [1, 1]} : vector<2x512xbf16> to vector<2x384xbf16>
    %71 = vector.extract_strided_slice %11 {offsets = [0, 1], sizes = [2, 384], strides = [1, 1]} : vector<2x512xbf16> to vector<2x384xbf16>
    %72 = vector.extract_strided_slice %11 {offsets = [0, 2], sizes = [2, 384], strides = [1, 1]} : vector<2x512xbf16> to vector<2x384xbf16>
    %73 = vector.extract_strided_slice %11 {offsets = [0, 3], sizes = [2, 384], strides = [1, 1]} : vector<2x512xbf16> to vector<2x384xbf16>
    %74 = vector.extract_strided_slice %11 {offsets = [0, 4], sizes = [2, 384], strides = [1, 1]} : vector<2x512xbf16> to vector<2x384xbf16>
    %75 = vector.extract_strided_slice %11 {offsets = [0, 20], sizes = [2, 384], strides = [1, 1]} : vector<2x512xbf16> to vector<2x384xbf16>
    %76 = vector.extract_strided_slice %11 {offsets = [0, 21], sizes = [2, 384], strides = [1, 1]} : vector<2x512xbf16> to vector<2x384xbf16>
    %77 = vector.extract_strided_slice %11 {offsets = [0, 22], sizes = [2, 384], strides = [1, 1]} : vector<2x512xbf16> to vector<2x384xbf16>
    %78 = vector.extract_strided_slice %11 {offsets = [0, 23], sizes = [2, 384], strides = [1, 1]} : vector<2x512xbf16> to vector<2x384xbf16>
    %79 = vector.extract_strided_slice %11 {offsets = [0, 24], sizes = [2, 384], strides = [1, 1]} : vector<2x512xbf16> to vector<2x384xbf16>
    %80 = vector.extract_strided_slice %11 {offsets = [0, 40], sizes = [2, 384], strides = [1, 1]} : vector<2x512xbf16> to vector<2x384xbf16>
    %81 = vector.extract_strided_slice %11 {offsets = [0, 41], sizes = [2, 384], strides = [1, 1]} : vector<2x512xbf16> to vector<2x384xbf16>
    %82 = vector.extract_strided_slice %11 {offsets = [0, 42], sizes = [2, 384], strides = [1, 1]} : vector<2x512xbf16> to vector<2x384xbf16>
    %83 = vector.extract_strided_slice %11 {offsets = [0, 43], sizes = [2, 384], strides = [1, 1]} : vector<2x512xbf16> to vector<2x384xbf16>
    %84 = vector.extract_strided_slice %11 {offsets = [0, 44], sizes = [2, 384], strides = [1, 1]} : vector<2x512xbf16> to vector<2x384xbf16>
    %85 = vector.extract_strided_slice %11 {offsets = [0, 60], sizes = [2, 384], strides = [1, 1]} : vector<2x512xbf16> to vector<2x384xbf16>
    %86 = vector.extract_strided_slice %11 {offsets = [0, 61], sizes = [2, 384], strides = [1, 1]} : vector<2x512xbf16> to vector<2x384xbf16>
    %87 = vector.extract_strided_slice %11 {offsets = [0, 62], sizes = [2, 384], strides = [1, 1]} : vector<2x512xbf16> to vector<2x384xbf16>
    %88 = vector.extract_strided_slice %11 {offsets = [0, 63], sizes = [2, 384], strides = [1, 1]} : vector<2x512xbf16> to vector<2x384xbf16>
    %89 = vector.extract_strided_slice %11 {offsets = [0, 64], sizes = [2, 384], strides = [1, 1]} : vector<2x512xbf16> to vector<2x384xbf16>
    %90 = vector.extract_strided_slice %11 {offsets = [0, 80], sizes = [2, 384], strides = [1, 1]} : vector<2x512xbf16> to vector<2x384xbf16>
    %91 = vector.extract_strided_slice %11 {offsets = [0, 81], sizes = [2, 384], strides = [1, 1]} : vector<2x512xbf16> to vector<2x384xbf16>
    %92 = vector.extract_strided_slice %11 {offsets = [0, 82], sizes = [2, 384], strides = [1, 1]} : vector<2x512xbf16> to vector<2x384xbf16>
    %93 = vector.extract_strided_slice %11 {offsets = [0, 83], sizes = [2, 384], strides = [1, 1]} : vector<2x512xbf16> to vector<2x384xbf16>
    %94 = vector.extract_strided_slice %11 {offsets = [0, 84], sizes = [2, 384], strides = [1, 1]} : vector<2x512xbf16> to vector<2x384xbf16>
    %95 = vector.extract_strided_slice %15 {offsets = [0, 0], sizes = [2, 384], strides = [1, 1]} : vector<2x512xbf16> to vector<2x384xbf16>
    %96 = vector.extract_strided_slice %15 {offsets = [0, 1], sizes = [2, 384], strides = [1, 1]} : vector<2x512xbf16> to vector<2x384xbf16>
    %97 = vector.extract_strided_slice %15 {offsets = [0, 2], sizes = [2, 384], strides = [1, 1]} : vector<2x512xbf16> to vector<2x384xbf16>
    %98 = vector.extract_strided_slice %15 {offsets = [0, 3], sizes = [2, 384], strides = [1, 1]} : vector<2x512xbf16> to vector<2x384xbf16>
    %99 = vector.extract_strided_slice %15 {offsets = [0, 4], sizes = [2, 384], strides = [1, 1]} : vector<2x512xbf16> to vector<2x384xbf16>
    %100 = vector.extract_strided_slice %15 {offsets = [0, 20], sizes = [2, 384], strides = [1, 1]} : vector<2x512xbf16> to vector<2x384xbf16>
    %101 = vector.extract_strided_slice %15 {offsets = [0, 21], sizes = [2, 384], strides = [1, 1]} : vector<2x512xbf16> to vector<2x384xbf16>
    %102 = vector.extract_strided_slice %15 {offsets = [0, 22], sizes = [2, 384], strides = [1, 1]} : vector<2x512xbf16> to vector<2x384xbf16>
    %103 = vector.extract_strided_slice %15 {offsets = [0, 23], sizes = [2, 384], strides = [1, 1]} : vector<2x512xbf16> to vector<2x384xbf16>
    %104 = vector.extract_strided_slice %15 {offsets = [0, 24], sizes = [2, 384], strides = [1, 1]} : vector<2x512xbf16> to vector<2x384xbf16>
    %105 = vector.extract_strided_slice %15 {offsets = [0, 40], sizes = [2, 384], strides = [1, 1]} : vector<2x512xbf16> to vector<2x384xbf16>
    %106 = vector.extract_strided_slice %15 {offsets = [0, 41], sizes = [2, 384], strides = [1, 1]} : vector<2x512xbf16> to vector<2x384xbf16>
    %107 = vector.extract_strided_slice %15 {offsets = [0, 42], sizes = [2, 384], strides = [1, 1]} : vector<2x512xbf16> to vector<2x384xbf16>
    %108 = vector.extract_strided_slice %15 {offsets = [0, 43], sizes = [2, 384], strides = [1, 1]} : vector<2x512xbf16> to vector<2x384xbf16>
    %109 = vector.extract_strided_slice %15 {offsets = [0, 44], sizes = [2, 384], strides = [1, 1]} : vector<2x512xbf16> to vector<2x384xbf16>
    %110 = vector.extract_strided_slice %15 {offsets = [0, 60], sizes = [2, 384], strides = [1, 1]} : vector<2x512xbf16> to vector<2x384xbf16>
    %111 = vector.extract_strided_slice %15 {offsets = [0, 61], sizes = [2, 384], strides = [1, 1]} : vector<2x512xbf16> to vector<2x384xbf16>
    %112 = vector.extract_strided_slice %15 {offsets = [0, 62], sizes = [2, 384], strides = [1, 1]} : vector<2x512xbf16> to vector<2x384xbf16>
    %113 = vector.extract_strided_slice %15 {offsets = [0, 63], sizes = [2, 384], strides = [1, 1]} : vector<2x512xbf16> to vector<2x384xbf16>
    %114 = vector.extract_strided_slice %15 {offsets = [0, 64], sizes = [2, 384], strides = [1, 1]} : vector<2x512xbf16> to vector<2x384xbf16>
    %115 = vector.extract_strided_slice %15 {offsets = [0, 80], sizes = [2, 384], strides = [1, 1]} : vector<2x512xbf16> to vector<2x384xbf16>
    %116 = vector.extract_strided_slice %15 {offsets = [0, 81], sizes = [2, 384], strides = [1, 1]} : vector<2x512xbf16> to vector<2x384xbf16>
    %117 = vector.extract_strided_slice %15 {offsets = [0, 82], sizes = [2, 384], strides = [1, 1]} : vector<2x512xbf16> to vector<2x384xbf16>
    %118 = vector.extract_strided_slice %15 {offsets = [0, 83], sizes = [2, 384], strides = [1, 1]} : vector<2x512xbf16> to vector<2x384xbf16>
    %119 = vector.extract_strided_slice %15 {offsets = [0, 84], sizes = [2, 384], strides = [1, 1]} : vector<2x512xbf16> to vector<2x384xbf16>
    %120 = vector.extract_strided_slice %19 {offsets = [0, 0], sizes = [2, 384], strides = [1, 1]} : vector<2x512xbf16> to vector<2x384xbf16>
    %121 = vector.extract_strided_slice %19 {offsets = [0, 1], sizes = [2, 384], strides = [1, 1]} : vector<2x512xbf16> to vector<2x384xbf16>
    %122 = vector.extract_strided_slice %19 {offsets = [0, 2], sizes = [2, 384], strides = [1, 1]} : vector<2x512xbf16> to vector<2x384xbf16>
    %123 = vector.extract_strided_slice %19 {offsets = [0, 3], sizes = [2, 384], strides = [1, 1]} : vector<2x512xbf16> to vector<2x384xbf16>
    %124 = vector.extract_strided_slice %19 {offsets = [0, 4], sizes = [2, 384], strides = [1, 1]} : vector<2x512xbf16> to vector<2x384xbf16>
    %125 = vector.extract_strided_slice %19 {offsets = [0, 20], sizes = [2, 384], strides = [1, 1]} : vector<2x512xbf16> to vector<2x384xbf16>
    %126 = vector.extract_strided_slice %19 {offsets = [0, 21], sizes = [2, 384], strides = [1, 1]} : vector<2x512xbf16> to vector<2x384xbf16>
    %127 = vector.extract_strided_slice %19 {offsets = [0, 22], sizes = [2, 384], strides = [1, 1]} : vector<2x512xbf16> to vector<2x384xbf16>
    %128 = vector.extract_strided_slice %19 {offsets = [0, 23], sizes = [2, 384], strides = [1, 1]} : vector<2x512xbf16> to vector<2x384xbf16>
    %129 = vector.extract_strided_slice %19 {offsets = [0, 24], sizes = [2, 384], strides = [1, 1]} : vector<2x512xbf16> to vector<2x384xbf16>
    %130 = vector.extract_strided_slice %19 {offsets = [0, 40], sizes = [2, 384], strides = [1, 1]} : vector<2x512xbf16> to vector<2x384xbf16>
    %131 = vector.extract_strided_slice %19 {offsets = [0, 41], sizes = [2, 384], strides = [1, 1]} : vector<2x512xbf16> to vector<2x384xbf16>
    %132 = vector.extract_strided_slice %19 {offsets = [0, 42], sizes = [2, 384], strides = [1, 1]} : vector<2x512xbf16> to vector<2x384xbf16>
    %133 = vector.extract_strided_slice %19 {offsets = [0, 43], sizes = [2, 384], strides = [1, 1]} : vector<2x512xbf16> to vector<2x384xbf16>
    %134 = vector.extract_strided_slice %19 {offsets = [0, 44], sizes = [2, 384], strides = [1, 1]} : vector<2x512xbf16> to vector<2x384xbf16>
    %135 = vector.extract_strided_slice %19 {offsets = [0, 60], sizes = [2, 384], strides = [1, 1]} : vector<2x512xbf16> to vector<2x384xbf16>
    %136 = vector.extract_strided_slice %19 {offsets = [0, 61], sizes = [2, 384], strides = [1, 1]} : vector<2x512xbf16> to vector<2x384xbf16>
    %137 = vector.extract_strided_slice %19 {offsets = [0, 62], sizes = [2, 384], strides = [1, 1]} : vector<2x512xbf16> to vector<2x384xbf16>
    %138 = vector.extract_strided_slice %19 {offsets = [0, 63], sizes = [2, 384], strides = [1, 1]} : vector<2x512xbf16> to vector<2x384xbf16>
    %139 = vector.extract_strided_slice %19 {offsets = [0, 64], sizes = [2, 384], strides = [1, 1]} : vector<2x512xbf16> to vector<2x384xbf16>
    %140 = vector.extract_strided_slice %19 {offsets = [0, 80], sizes = [2, 384], strides = [1, 1]} : vector<2x512xbf16> to vector<2x384xbf16>
    %141 = vector.extract_strided_slice %19 {offsets = [0, 81], sizes = [2, 384], strides = [1, 1]} : vector<2x512xbf16> to vector<2x384xbf16>
    %142 = vector.extract_strided_slice %19 {offsets = [0, 82], sizes = [2, 384], strides = [1, 1]} : vector<2x512xbf16> to vector<2x384xbf16>
    %143 = vector.extract_strided_slice %19 {offsets = [0, 83], sizes = [2, 384], strides = [1, 1]} : vector<2x512xbf16> to vector<2x384xbf16>
    %144 = vector.extract_strided_slice %19 {offsets = [0, 84], sizes = [2, 384], strides = [1, 1]} : vector<2x512xbf16> to vector<2x384xbf16>
    %cst = arith.constant 0.000000e+00 : bf16
    %145 = vector.broadcast %cst : bf16 to vector<6x384xbf16>
    %146 = tpu.concatenate %20, %21, %22, %23, %24, %25, %26, %27, %28, %29, %30, %31, %32, %33, %34, %35 in 0 : vector<2x384xbf16>, vector<2x384xbf16>, vector<2x384xbf16>, vector<2x384xbf16>, vector<2x384xbf16>, vector<2x384xbf16>, vector<2x384xbf16>, vector<2x384xbf16>, vector<2x384xbf16>, vector<2x384xbf16>, vector<2x384xbf16>, vector<2x384xbf16>, vector<2x384xbf16>, vector<2x384xbf16>, vector<2x384xbf16>, vector<2x384xbf16> -> vector<32x384xbf16>
    %147 = tpu.concatenate %36, %37, %38, %39, %40, %41, %42, %43, %44, %45, %46, %47, %48, %49, %50, %51 in 0 : vector<2x384xbf16>, vector<2x384xbf16>, vector<2x384xbf16>, vector<2x384xbf16>, vector<2x384xbf16>, vector<2x384xbf16>, vector<2x384xbf16>, vector<2x384xbf16>, vector<2x384xbf16>, vector<2x384xbf16>, vector<2x384xbf16>, vector<2x384xbf16>, vector<2x384xbf16>, vector<2x384xbf16>, vector<2x384xbf16>, vector<2x384xbf16> -> vector<32x384xbf16>
    %148 = tpu.concatenate %52, %53, %54, %55, %56, %57, %58, %59, %60, %61, %62, %63, %64, %65, %66, %67 in 0 : vector<2x384xbf16>, vector<2x384xbf16>, vector<2x384xbf16>, vector<2x384xbf16>, vector<2x384xbf16>, vector<2x384xbf16>, vector<2x384xbf16>, vector<2x384xbf16>, vector<2x384xbf16>, vector<2x384xbf16>, vector<2x384xbf16>, vector<2x384xbf16>, vector<2x384xbf16>, vector<2x384xbf16>, vector<2x384xbf16>, vector<2x384xbf16> -> vector<32x384xbf16>
    %149 = tpu.concatenate %68, %69, %70, %71, %72, %73, %74, %75, %76, %77, %78, %79, %80, %81, %82, %83 in 0 : vector<2x384xbf16>, vector<2x384xbf16>, vector<2x384xbf16>, vector<2x384xbf16>, vector<2x384xbf16>, vector<2x384xbf16>, vector<2x384xbf16>, vector<2x384xbf16>, vector<2x384xbf16>, vector<2x384xbf16>, vector<2x384xbf16>, vector<2x384xbf16>, vector<2x384xbf16>, vector<2x384xbf16>, vector<2x384xbf16>, vector<2x384xbf16> -> vector<32x384xbf16>
    %150 = tpu.concatenate %84, %85, %86, %87, %88, %89, %90, %91, %92, %93, %94, %95, %96, %97, %98, %99 in 0 : vector<2x384xbf16>, vector<2x384xbf16>, vector<2x384xbf16>, vector<2x384xbf16>, vector<2x384xbf16>, vector<2x384xbf16>, vector<2x384xbf16>, vector<2x384xbf16>, vector<2x384xbf16>, vector<2x384xbf16>, vector<2x384xbf16>, vector<2x384xbf16>, vector<2x384xbf16>, vector<2x384xbf16>, vector<2x384xbf16>, vector<2x384xbf16> -> vector<32x384xbf16>
    %151 = tpu.concatenate %100, %101, %102, %103, %104, %105, %106, %107, %108, %109, %110, %111, %112, %113, %114, %115 in 0 : vector<2x384xbf16>, vector<2x384xbf16>, vector<2x384xbf16>, vector<2x384xbf16>, vector<2x384xbf16>, vector<2x384xbf16>, vector<2x384xbf16>, vector<2x384xbf16>, vector<2x384xbf16>, vector<2x384xbf16>, vector<2x384xbf16>, vector<2x384xbf16>, vector<2x384xbf16>, vector<2x384xbf16>, vector<2x384xbf16>, vector<2x384xbf16> -> vector<32x384xbf16>
    %152 = tpu.concatenate %116, %117, %118, %119, %120, %121, %122, %123, %124, %125, %126, %127, %128, %129, %130, %131 in 0 : vector<2x384xbf16>, vector<2x384xbf16>, vector<2x384xbf16>, vector<2x384xbf16>, vector<2x384xbf16>, vector<2x384xbf16>, vector<2x384xbf16>, vector<2x384xbf16>, vector<2x384xbf16>, vector<2x384xbf16>, vector<2x384xbf16>, vector<2x384xbf16>, vector<2x384xbf16>, vector<2x384xbf16>, vector<2x384xbf16>, vector<2x384xbf16> -> vector<32x384xbf16>
    %153 = tpu.concatenate %132, %133, %134, %135, %136, %137, %138, %139, %140, %141, %142, %143, %144, %145 in 0 : vector<2x384xbf16>, vector<2x384xbf16>, vector<2x384xbf16>, vector<2x384xbf16>, vector<2x384xbf16>, vector<2x384xbf16>, vector<2x384xbf16>, vector<2x384xbf16>, vector<2x384xbf16>, vector<2x384xbf16>, vector<2x384xbf16>, vector<2x384xbf16>, vector<2x384xbf16>, vector<6x384xbf16> -> vector<32x384xbf16>
    %154 = tpu.concatenate %146, %147, %148, %149, %150, %151, %152, %153 in 0 : vector<32x384xbf16>, vector<32x384xbf16>, vector<32x384xbf16>, vector<32x384xbf16>, vector<32x384xbf16>, vector<32x384xbf16>, vector<32x384xbf16>, vector<32x384xbf16> -> vector<256x384xbf16>
    %c0_14 = arith.constant 0 : index
    %c0_15 = arith.constant 0 : index
    %155 = vector.load %arg4[%c0_14, %c0_15] : memref<4x256xbf16, #tpu.memory_space<vmem>>, vector<4x256xbf16>
    %cst_16 = arith.constant dense<0.000000e+00> : vector<4x384xf32>
    %156 = tpu.matmul %155, %154, %cst_16 {dimension_numbers = #tpu.dot_dimension_numbers<[1], [0], [0], [1], [0, 0, 1, 1], [], []>} : vector<4x256xbf16>, vector<256x384xbf16>, vector<4x384xf32> -> vector<4x384xf32>
    %c0_17 = arith.constant 0 : index
    %c0_18 = arith.constant 0 : index
    %157 = vector.load %arg5[%c0_17, %c0_18] : memref<4x1xf32, #tpu.memory_space<vmem>>, vector<4x1xf32>
    %158 = vector.broadcast %157 : vector<4x1xf32> to vector<4x384xf32>
    %159 = arith.addf %156, %158 : vector<4x384xf32>
    %160 = tpu.iota {dimensions = array<i32: 1>} : vector<1x384xi32>
    %c320_i32 = arith.constant 320 : i32
    %161 = vector.broadcast %c320_i32 : i32 to vector<1x384xi32>
    %162 = arith.cmpi slt, %160, %161 : vector<1x384xi32>
    %c20_i32 = arith.constant 20 : i32
    %c0_i32_19 = arith.constant 0 : i32
    %163 = arith.cmpi eq, %c20_i32, %c0_i32_19 : i32
    %c1_i32_20 = arith.constant 1 : i32
    %164 = arith.select %163, %c1_i32_20, %c20_i32 : i32
    %165 = vector.broadcast %164 : i32 to vector<1x384xi32>
    %166 = arith.remsi %160, %165 : vector<1x384xi32>
    %c0_i32_21 = arith.constant 0 : i32
    %167 = vector.broadcast %c0_i32_21 : i32 to vector<1x384xi32>
    %168 = arith.cmpi ne, %166, %167 : vector<1x384xi32>
    %c0_i32_22 = arith.constant 0 : i32
    %169 = vector.broadcast %c0_i32_22 : i32 to vector<1x384xi32>
    %170 = arith.cmpi slt, %166, %169 : vector<1x384xi32>
    %c0_i32_23 = arith.constant 0 : i32
    %171 = arith.cmpi slt, %164, %c0_i32_23 : i32
    %172 = vector.broadcast %171 : i1 to vector<1x384xi1>
    %173 = vector.broadcast %172 : vector<1x384xi1> to vector<1x384xi1>
    %174 = arith.xori %170, %173 : vector<1x384xi1>
    %175 = arith.andi %174, %168 : vector<1x384xi1>
    %176 = vector.broadcast %164 : i32 to vector<1x384xi32>
    %177 = arith.addi %166, %176 : vector<1x384xi32>
    %178 = arith.select %175, %177, %166 : vector<1x384xi1>, vector<1x384xi32>
    %c16_i32 = arith.constant 16 : i32
    %179 = vector.broadcast %c16_i32 : i32 to vector<1x384xi32>
    %180 = arith.cmpi slt, %178, %179 : vector<1x384xi32>
    %181 = arith.andi %162, %180 : vector<1x384xi1>
    %182 = arith.extui %181 : vector<1x384xi1> to vector<1x384xi32>
    %183 = arith.sitofp %182 : vector<1x384xi32> to vector<1x384xf32>
    %184 = vector.broadcast %183 : vector<1x384xf32> to vector<4x384xf32>
    %185 = arith.mulf %159, %184 : vector<4x384xf32>
    %cst_24 = arith.constant dense<0.000000e+00> : vector<4xf32>
    %186 = vector.multi_reduction <add>, %185, %cst_24 [1] : vector<4x384xf32> to vector<4xf32>
    %187 = vector.shape_cast %186 : vector<4xf32> to vector<4x1xf32>
    %188 = arith.mulf %159, %159 : vector<4x384xf32>
    %189 = vector.broadcast %183 : vector<1x384xf32> to vector<4x384xf32>
    %190 = arith.mulf %188, %189 : vector<4x384xf32>
    %cst_25 = arith.constant dense<0.000000e+00> : vector<4xf32>
    %191 = vector.multi_reduction <add>, %190, %cst_25 [1] : vector<4x384xf32> to vector<4xf32>
    %192 = vector.shape_cast %191 : vector<4xf32> to vector<4x1xf32>
    %193 = tpu.concatenate %187, %192 in 1 : vector<4x1xf32>, vector<4x1xf32> -> vector<4x2xf32>
    %c0_i32_26 = arith.constant 0 : i32
    %194 = arith.cmpi eq, %arg2, %c0_i32_26 : i32
    %195 = arith.extui %194 : i1 to i32
    %c0_i32_27 = arith.constant 0 : i32
    %196 = arith.cmpi ne, %195, %c0_i32_27 : i32
    scf.if %196 {
      %c0_36 = arith.constant 0 : index
      %c0_37 = arith.constant 0 : index
      %c0_38 = arith.constant 0 : index
      %c0_39 = arith.constant 0 : index
      %210 = vector.load %arg8[%c0_36, %c0_37, %c0_38, %c0_39] : memref<1x1x4x2xf32, #tpu.memory_space<vmem>>, vector<1x1x4x2xf32>
      %211 = vector.shape_cast %210 : vector<1x1x4x2xf32> to vector<4x2xf32>
      %212 = vector.shape_cast %193 : vector<4x2xf32> to vector<1x1x4x2xf32>
      tpu.vector_store %arg8[%c0_36, %c0_37, %c0_38, %c0_39], %212 {strides = array<i32>} : memref<1x1x4x2xf32, #tpu.memory_space<vmem>>, vector<1x1x4x2xf32>,
    } else {
    }
    %c0_i32_28 = arith.constant 0 : i32
    %197 = arith.cmpi sgt, %arg2, %c0_i32_28 : i32
    %198 = arith.extui %197 : i1 to i32
    %c0_i32_29 = arith.constant 0 : i32
    %199 = arith.cmpi ne, %198, %c0_i32_29 : i32
    scf.if %199 {
      %c0_36 = arith.constant 0 : index
      %c0_37 = arith.constant 0 : index
      %c0_38 = arith.constant 0 : index
      %c0_39 = arith.constant 0 : index
      %210 = vector.load %arg8[%c0_36, %c0_37, %c0_38, %c0_39] : memref<1x1x4x2xf32, #tpu.memory_space<vmem>>, vector<1x1x4x2xf32>
      %211 = vector.shape_cast %210 : vector<1x1x4x2xf32> to vector<4x2xf32>
      %212 = arith.addf %211, %193 : vector<4x2xf32>
      %c0_40 = arith.constant 0 : index
      %c0_41 = arith.constant 0 : index
      %c0_42 = arith.constant 0 : index
      %c0_43 = arith.constant 0 : index
      %213 = vector.load %arg8[%c0_40, %c0_41, %c0_42, %c0_43] : memref<1x1x4x2xf32, #tpu.memory_space<vmem>>, vector<1x1x4x2xf32>
      %214 = vector.shape_cast %213 : vector<1x1x4x2xf32> to vector<4x2xf32>
      %215 = vector.shape_cast %212 : vector<4x2xf32> to vector<1x1x4x2xf32>
      tpu.vector_store %arg8[%c0_40, %c0_41, %c0_42, %c0_43], %215 {strides = array<i32>} : memref<1x1x4x2xf32, #tpu.memory_space<vmem>>, vector<1x1x4x2xf32>,
    } else {
    }
    %200 = arith.truncf %159 : vector<4x384xf32> to vector<4x384xbf16>
    %c0_30 = arith.constant 0 : index
    %201 = arith.index_cast %arg2 : i32 to index
    %c0_31 = arith.constant 0 : index
    %c0_32 = arith.constant 0 : index
    %202 = vector.load %arg6[%c0_30, %201, %c0_31, %c0_32] : memref<1x8x4x384xbf16, #tpu.memory_space<vmem>>, vector<1x1x4x384xbf16>
    %203 = vector.shape_cast %202 : vector<1x1x4x384xbf16> to vector<4x384xbf16>
    %204 = vector.shape_cast %200 : vector<4x384xbf16> to vector<1x1x4x384xbf16>
    tpu.vector_store %arg6[%c0_30, %201, %c0_31, %c0_32], %204 {strides = array<i32>} : memref<1x8x4x384xbf16, #tpu.memory_space<vmem>>, vector<1x1x4x384xbf16>,
    %205 = vector.extract_strided_slice %11 {offsets = [0, 42], sizes = [2, 384], strides = [1, 1]} : vector<2x512xbf16> to vector<2x384xbf16>
    %c0_33 = arith.constant 0 : index
    %206 = arith.index_cast %arg2 : i32 to index
    %c0_34 = arith.constant 0 : index
    %c0_35 = arith.constant 0 : index
    %207 = vector.load %arg7[%c0_33, %206, %c0_34, %c0_35] : memref<1x8x2x384xbf16, #tpu.memory_space<vmem>>, vector<1x1x2x384xbf16>
    %208 = vector.shape_cast %207 : vector<1x1x2x384xbf16> to vector<2x384xbf16>
    %209 = vector.shape_cast %205 : vector<2x384xbf16> to vector<1x1x2x384xbf16>
    tpu.vector_store %arg7[%c0_33, %206, %c0_34, %c0_35], %209 {strides = array<i32>} : memref<1x8x2x384xbf16, #tpu.memory_space<vmem>>, vector<1x1x2x384xbf16>,
    return
  }
  func.func @transform_0(%arg0: i32, %arg1: i32, %arg2: i32) -> (i32, i32, i32, i32) {
    %c2_i32 = arith.constant 2 : i32
    %0 = arith.muli %arg0, %c2_i32 : i32
    %1 = arith.addi %0, %arg1 : i32
    %c0_i32 = arith.constant 0 : i32
    %c0_i32_0 = arith.constant 0 : i32
    %c0_i32_1 = arith.constant 0 : i32
    %c0_i32_2 = arith.constant 0 : i32
    return %1, %c0_i32, %c0_i32_0, %c0_i32_1 : i32, i32, i32, i32
  }
  func.func @transform_1(%arg0: i32, %arg1: i32, %arg2: i32) -> (i32, i32) {
    %c0_i32 = arith.constant 0 : i32
    %c0_i32_0 = arith.constant 0 : i32
    %c0_i32_1 = arith.constant 0 : i32
    return %c0_i32, %c0_i32_0 : i32, i32
  }
  func.func @transform_2(%arg0: i32, %arg1: i32, %arg2: i32) -> (i32, i32) {
    %c0_i32 = arith.constant 0 : i32
    %c0_i32_0 = arith.constant 0 : i32
    %c0_i32_1 = arith.constant 0 : i32
    return %c0_i32, %c0_i32_0 : i32, i32
  }
  func.func @transform_3(%arg0: i32, %arg1: i32, %arg2: i32) -> (i32, i32, i32, i32) {
    %c0_i32 = arith.constant 0 : i32
    %c0_i32_0 = arith.constant 0 : i32
    %c0_i32_1 = arith.constant 0 : i32
    return %arg0, %arg1, %c0_i32, %c0_i32_0 : i32, i32, i32, i32
  }
  func.func @transform_4(%arg0: i32, %arg1: i32, %arg2: i32) -> (i32, i32, i32, i32) {
    %c0_i32 = arith.constant 0 : i32
    %c0_i32_0 = arith.constant 0 : i32
    %c0_i32_1 = arith.constant 0 : i32
    return %arg0, %arg1, %c0_i32, %c0_i32_0 : i32, i32, i32, i32
  }
  func.func @transform_5(%arg0: i32, %arg1: i32, %arg2: i32) -> (i32, i32, i32, i32) {
    %c0_i32 = arith.constant 0 : i32
    %c0_i32_0 = arith.constant 0 : i32
    %c0_i32_1 = arith.constant 0 : i32
    return %arg0, %arg1, %c0_i32, %c0_i32_0 : i32, i32, i32, i32
  }
}

</mosaic_0001>

<bundles_post_ra>
// kernel: first_conv_block.3
= control target key start
LH: loop header
LB: loop body
LE: loop exit
PB: predicated region body
PF: predicated region fallthrough
CT: control target
= control target key end

     0   :  { %s6144_s0 = inlined_call_operand.<no memory space> [shape: f32[1], index: 0, kind: input, shape index: {}]   ;;  %s6145_s1 = inlined_call_operand.vmem [shape: f32[2,4], index: 1, kind: input, shape index: {}]   ;;  %s6146_s2 = inlined_call_operand.vmem [shape: f32[2,4], index: 2, kind: input, shape index: {}]   ;;  %s6147_s3 = inlined_call_operand.vmem [shape: bf16[2,16,4,384], index: 3, kind: input, shape index: {}]   ;;  %s6148_s4 = inlined_call_operand.vmem [shape: bf16[2,16,2,384], index: 4, kind: input, shape index: {}]   ;;  %s6149_s5 = inlined_call_operand.vmem [shape: f32[2,4,16,384], index: 5, kind: output, shape index: {}]  }
   0x1   :  { %10 = sst [smem:[#allocation2]] %s6144_s0 }
   0x2   :  { %11 = vsyncpa [#allocation4], 0 }
   0x3   :  { %12 = vsyncpa [#allocation6], 0  ;;  %s3366_s20 = smov 0   ;;  %s3368_s21 = smov 0  }
   0x4   :  { %s3370_s22 = smov 0  }
   0x5 LB: > { %s3181_s0 = sadd.s32 4294967295, %s3325_s22   ;;  %s30_s23 = sadd.s32 1, %s3321_s21  ;;  %s3325_s22 = sphi %s3370_s22, %s18_s22   ;;  %s3321_s21 = sphi %s3368_s21, %s6768_s21   ;;  %s3317_s20 = sphi %s3366_s20, %s6767_s20  }
   0x6   : > { %p32_p0 = scmp.ge.s32.totalorder %s30_s23, 2  ;;  %p3183_p1 = scmp.ge.s32.totalorder %s3325_s22, 1 }
   0x7   : > { %p182_p2 = scmp.lt.s32.totalorder %s3325_s22, 3  ;;  %p3391_p4 = scmp.eq.s32.totalorder %s3181_s0, 0 }
   0x8   : > { %s6770_s23 = smov (%p32_p0, %s30_s23), 0  ;;  %s198_s28 = sshll.u32 %s6145_s1, 4  ;;  %s199_s28 = int_to_ptr.vmem [resolvable:$true] %s198_s28 }
   0x9   : > { %p3387_p3 = pnand %p3183_p1, %p182_p2  ;;  %s209_s6 = sshll.u32 %s6146_s2, 4  ;;  %s210_s6 = int_to_ptr.vmem [resolvable:$true] %s209_s6 }
   0xa   : > { %s6314_s25 = scalar_select %p3391_p4, 1, 0 }
   0xb   : > { %s6313_s24 = scalar_select %p3387_p3, 1, 0 }
   0xc   : > { %p3224_p5 = pneg %p3387_p3  ;;  %s3265_s8 = scalar_lea.vmem %s199_s28, 32 }
   0xd   : > { %p3266_p7 = scmp.ne.s32.totalorder %s199_s28, %s3265_s8  ;;  %p3273_p11 = scmp.lt.s32.totalorder %s199_s28, %s199_s28 }
   0xe   : > { %p3405_p6 = pnand %p3391_p4, %p3224_p5  ;;  %p3274_p12 = scmp.lt.s32.totalorder %s3265_s8, %s3265_s8 }
  0x10   : > { %p3267_p8 = pneg %p3405_p6  ;;  %p3275_p13 = por %p3274_p12, %p3273_p11 }
  0x12   : > { %p3268_p9 = pnand %p3267_p8, %p3266_p7 }
  0x14   : > { %p3269_p10 = pneg %p3268_p9 }
  0x16   : > { %p3276_p0 = pnand %p3275_p13, %p3269_p10 }
  0x18   : > { %3279 = shalt.err (!%p3276_p0)
}
  0x19   : > { %s3327_s9 = smov [#allocation3]   ;;  %s3280_s10 = scalar_lea.vmem %s210_s6, 32 }
  0x1a   : > { %3227 = dma.vmem_to_smem (!%p3405_p6), %s199_s28, 32, %s3327_s9, [#allocation4]  }
  0x1b   : > { %p3281_p1 = scmp.ne.s32.totalorder %s210_s6, %s3280_s10  ;;  %p3288_p4 = scmp.lt.s32.totalorder %s210_s6, %s210_s6 }
  0x1c   : > { %p3289_p3 = scmp.lt.s32.totalorder %s3280_s10, %s3280_s10 }
  0x1d   : > { %p3283_p2 = pnand %p3281_p1, %p3267_p8 }
  0x1e   : > { %p3290_p7 = por %p3289_p3, %p3288_p4 }
  0x1f   : > { %p3284_p5 = pneg %p3283_p2 }
  0x21   : > { %p3291_p9 = pnand %p3290_p7, %p3284_p5 }
  0x23   : > { %3294 = shalt.err (!%p3291_p9)
}
  0x24   : > { %s3328_s11 = smov [#allocation5]   ;;  %p6316_p10 = scmp.ne.s32.totalorder %s6313_s24, 0 }
  0x25   : > { %3230 = dma.vmem_to_smem (!%p3405_p6), %s210_s6, 32, %s3328_s11, [#allocation6]  }
  0x26   : > { %249 = sbr.rel (%p6316_p10) target bundleno = 450 (0x1c2), region = 40 }
  0x2b   : > { %p6317_p11 = scmp.ne.s32.totalorder %s6314_s25, 0 }
  0x2d   : > { %3308 = dma.done.wait (%p6317_p11), [#allocation4], 32  }
  0x2e   : > { %3310 = vsyncadd (%p6317_p11), [#allocation4], 4294967264 }
  0x2f   : > { %3312 = dma.done.wait (%p6317_p11), [#allocation6], 32  }
  0x30   : > { %3314 = vsyncadd (%p6317_p11), [#allocation6], 4294967264 }
  0x31   : > { %259 = sfence }
  0x32   : > { %p302_p3 = scmp.lt.s32.totalorder %s3317_s20, 1  ;;  %v647_v0 = vlaneseq  ;;  %v3329_v1 = vmov 572653568   ;;  %v3330_v3 = vmov 1717978180   ;;  %s333_s15 = sld [smem:[#allocation2]] }
  0x33   : > { %v645_v2 = vunpack.c.l.s4 %v3329_v1  ;;  %v652_v4 = vunpack.c.l.s4 %v3330_v3  ;;  %s3507_s25 = sshll.u32 %s3317_s20, 7 }
  0x34   : > { %s3427_s12 = scalar_select %p302_p3, %s3317_s20, 1  ;;  %v3441_v5 = vshrl.u32 %v647_v0, 7 }
  0x35   : > { %v646_v6 = vunpack.c.0.s8 %v645_v2  ;;  %v653_v7 = vunpack.c.0.s8 %v652_v4  ;;  %s3538_s20 = sld [smem:[#allocation3 + %s3507_s25]]  ;;  %s1217_s6 = sadd.s32 1, %s3507_s25 }
  0x36   : > { %s3213_s13 = smul.u32 96, %s3427_s12  ;;  %6318 = vst [vmem:[#allocation9_spill] sm:$0xff] %v3441_v5  ;;  %v3445_v9 = vsub.s32 0, %v3441_v5  ;;  %v3448_v10 = vsub.s32 4, %v3441_v5  ;;  %s3568_s26 = sld [smem:[#allocation5 + %s3507_s25]] }
  0x37   : > { %s3214_s14 = smul.u32 48, %s3427_s12  ;;  %v3468_v21 = vsub.s32 %v646_v6, %v3441_v5  ;;  %v3471_v22 = vsub.s32 %v653_v7, %v3441_v5  ;;  %s4266_s7 = sld [smem:[#allocation3 + %s1217_s6]] }
  0x38   : > { %s3439_s24 = scalar_lea.vmem %s6147_s3, %s3213_s13  ;;  %6319 = vst [vmem:[#allocation10_spill] sm:$0xff] %v3445_v9  ;;  %6320 = vst [vmem:[#allocation11_spill] sm:$0xff] %v3448_v10  ;;  %v3478_v27 = vstv %s333_s15  ;;  %s3215_s27 = smul.u32 192, %s3427_s12 }
  0x39   : > { %s3434_s18 = scalar_lea.vmem %s6148_s4, %s3214_s14  ;;  %v3452_v12 = vld [vmem:[%s3439_s24] sm:$0x15]  ;;  %v3455_v13 = vld [vmem:[%s3439_s24 + $0x6] sm:$0x15]  ;;  %v3460_v16 = vld [vmem:[%s3439_s24 + $0xc] sm:$0x15] }
  0x3a   : > { %v334_v8 = vld [vmem:[%s3434_s18] sm:$0x7]  ;;  %v335_v11 = vld [vmem:[%s3434_s18 + $0x3] sm:$0x7]  ;;  %v336_v14 = vld [vmem:[%s3434_s18 + $0x6] sm:$0x7]  ;;  %v434_v28 = vunpack.c.l.bf16 %v3452_v12  ;;  %v435_v29 = vunpack.c.h.bf16 %v3452_v12  ;;  %v436_v34 = vunpack.c.l.bf16 %v3455_v13  ;;  %v6344_v10 = vunpack.c.h.bf16 %v3460_v16  ;;  %s4220_s30 = scalar_lea.vmem %s6149_s5, %s3215_s27 }
  0x3b   : > { %v337_v15 = vld [vmem:[%s3434_s18 + $0x9] sm:$0x7]  ;;  %v338_v17 = vld [vmem:[%s3434_s18 + $0xc] sm:$0x7]  ;;  %v339_v18 = vld [vmem:[%s3434_s18 + $0xf] sm:$0x7]  ;;  %v3465_v20 = vunpack.c.l.bf16 %v334_v8  ;;  %v3476_v26 = vunpack.c.l.bf16 %v335_v11  ;;  %v352_v33 = vunpack.c.l.bf16 %v336_v14 }
  0x3c   : > { %v340_v19 = vld [vmem:[%s3434_s18 + $0x12] sm:$0x7]  ;;  %6321 = vst [vmem:[#allocation12_spill] sm:$0xff] %v3468_v21  ;;  %6322 = vst [vmem:[#allocation13_spill] sm:$0xff] %v3471_v22  ;;  %v341_v23 = vld [vmem:[%s3434_s18 + $0x15] sm:$0x7]  ;;  %v353_v40 = vunpack.c.l.bf16 %v337_v15  ;;  %v354_v41 = vunpack.c.l.bf16 %v338_v17  ;;  %v355_v42 = vunpack.c.l.bf16 %v339_v18  ;;  %v3588_v35 = vstv %s3568_s26 }
  0x3d   : > { %v342_v24 = vld [vmem:[%s3434_s18 + $0x18] sm:$0x7]  ;;  %v343_v25 = vld [vmem:[%s3434_s18 + $0x1b] sm:$0x7]  ;;  %6323 = vst [vmem:[#allocation14_spill] sm:$0xff] %v3478_v27  ;;  %v356_v44 = vunpack.c.l.bf16 %v340_v19  ;;  %v357_v45 = vunpack.c.l.bf16 %v341_v23  ;;  %v383_v47 = vmul.f32 %v3478_v27, %v3465_v20  ;;  %v384_v51 = vmul.f32 %v3478_v27, %v3476_v26  ;;  %s4272_s8 = sld [smem:[#allocation5 + %s1217_s6]] }
  0x3e   : > { %v344_v30 = vld [vmem:[%s3434_s18 + $0x1e] sm:$0x7]  ;;  %v345_v31 = vld [vmem:[%s3434_s18 + $0x21] sm:$0x7]  ;;  %v346_v32 = vld [vmem:[%s3434_s18 + $0x24] sm:$0x7]  ;;  %v358_v46 = vunpack.c.l.bf16 %v342_v24  ;;  %v359_v48 = vunpack.c.l.bf16 %v343_v25  ;;  %v385_v56 = vmul.f32 %v3478_v27, %v352_v33  ;;  %v386_v57 = vmul.f32 %v3478_v27, %v353_v40 }
  0x3f   : > { %v347_v37 = vld [vmem:[%s3434_s18 + $0x27] sm:$0x7]  ;;  %v348_v38 = vld [vmem:[%s3434_s18 + $0x2a] sm:$0x7]  ;;  %v349_v39 = vld [vmem:[%s3434_s18 + $0x2d] sm:$0x7]  ;;  %v360_v49 = vunpack.c.l.bf16 %v344_v30  ;;  %v361_v50 = vunpack.c.l.bf16 %v345_v31  ;;  %v362_v52 = vunpack.c.l.bf16 %v346_v32  ;;  %v387_v58 = vmul.f32 %v3478_v27, %v354_v41 }
  0x40   : > { %v363_v53 = vunpack.c.l.bf16 %v347_v37  ;;  %v364_v54 = vunpack.c.l.bf16 %v348_v38  ;;  %v365_v55 = vunpack.c.l.bf16 %v349_v39  ;;  %vm366_vm0 = vcmp.gt.f32.partialorder %v3465_v20, 0.0  ;;  %v421_v18 = vld [vmem:[%s3439_s24 + $0x12] sm:$0x15]  ;;  %v422_v25 = vld [vmem:[%s3439_s24 + $0x18] sm:$0x15]  ;;  %s1997_s9 = sadd.s32 2, %s3507_s25 }
  0x41   : > { %vm367_vm1 = vcmp.gt.f32.partialorder %v3476_v26, 0.0  ;;  %vm368_vm2 = vcmp.gt.f32.partialorder %v352_v33, 0.0  ;;  %vm369_vm3 = vcmp.gt.f32.partialorder %v353_v40, 0.0  ;;  %vm370_vm4 = vcmp.gt.f32.partialorder %v354_v41, 0.0  ;;  %v424_v37 = vld [vmem:[%s3439_s24 + $0x24] sm:$0x15] }
  0x42   : > { %vm371_vm5 = vcmp.gt.f32.partialorder %v355_v42, 0.0  ;;  %vm372_vm6 = vcmp.gt.f32.partialorder %v356_v44, 0.0  ;;  %vm373_vm7 = vcmp.gt.f32.partialorder %v357_v45, 0.0  ;;  %vm374_vm8 = vcmp.gt.f32.partialorder %v358_v46, 0.0  ;;  %v425_v38 = vld [vmem:[%s3439_s24 + $0x2a] sm:$0x15] }
  0x43   : > { %vm375_vm9 = vcmp.gt.f32.partialorder %v359_v48, 0.0  ;;  %vm376_vm10 = vcmp.gt.f32.partialorder %v360_v49, 0.0  ;;  %vm377_vm11 = vcmp.gt.f32.partialorder %v361_v50, 0.0  ;;  %vm378_vm12 = vcmp.gt.f32.partialorder %v362_v52, 0.0  ;;  %s5015_s10 = sld [smem:[#allocation3 + %s1997_s9]]  ;;  %s2521_s12 = sadd.s32 3, %s3507_s25 }
  0x44   : > { %vm379_vm13 = vcmp.gt.f32.partialorder %v363_v53, 0.0  ;;  %vm380_vm14 = vcmp.gt.f32.partialorder %v364_v54, 0.0  ;;  %vm381_vm15 = vcmp.gt.f32.partialorder %v365_v55, 0.0  ;;  %v388_v59 = vmul.f32 %v3478_v27, %v355_v42  ;;  %s5025_s11 = sld [smem:[#allocation5 + %s1997_s9]] }
  0x45   : > { %v389_v60 = vmul.f32 %v3478_v27, %v356_v44  ;;  %v390_v61 = vmul.f32 %v3478_v27, %v357_v45  ;;  %v391_v62 = vmul.f32 %v3478_v27, %v358_v46  ;;  %v392_v63 = vmul.f32 %v3478_v27, %v359_v48  ;;  %s5576_s13 = sld [smem:[#allocation3 + %s2521_s12]] }
  0x46   : > { %v393_v0 = vmul.f32 %v3478_v27, %v360_v49  ;;  %v394_v1 = vmul.f32 %v3478_v27, %v361_v50  ;;  %v395_v2 = vmul.f32 %v3478_v27, %v362_v52  ;;  %v396_v3 = vmul.f32 %v3478_v27, %v363_v53  ;;  %s5584_s14 = sld [smem:[#allocation5 + %s2521_s12]] }
  0x47   : > { %v397_v4 = vmul.f32 %v3478_v27, %v364_v54  ;;  %v398_v6 = vmul.f32 %v3478_v27, %v365_v55  ;;  %v3518_v7 = vsel %vm366_vm0, %v3465_v20, %v383_v47  ;;  %v3523_v8 = vsel %vm367_vm1, %v3476_v26, %v384_v51  ;;  %v423_v26 = vld [vmem:[%s3439_s24 + $0x1e] sm:$0x15] }
  0x48   : > { %6324 = vst [vmem:[#allocation15_spill] sm:$0xff] %v3518_v7  ;;  %6325 = vst [vmem:[#allocation16_spill] sm:$0xff] %v3523_v8  ;;  %v3526_v11 = vsel %vm368_vm2, %v352_v33, %v385_v56  ;;  %v3529_v14 = vsel %vm369_vm3, %v353_v40, %v386_v57  ;;  %v3532_v15 = vsel %vm370_vm4, %v354_v41, %v387_v58  ;;  %v426_v41 = vld [vmem:[%s3439_s24 + $0x30] sm:$0x15]  ;;  %v429_v47 = vld [vmem:[%s3439_s24 + $0x42] sm:$0x15]  ;;  %v445_v51 = vunpack.c.h.bf16 %v423_v26 }
  0x49   : > { %6326 = vst [vmem:[#allocation17_spill] sm:$0xff] %v3526_v11  ;;  %6327 = vst [vmem:[#allocation18_spill] sm:$0xff] %v3529_v14  ;;  %v3535_v17 = vsel %vm371_vm5, %v355_v42, %v388_v59  ;;  %v3542_v19 = vsel %vm372_vm6, %v356_v44, %v389_v60  ;;  %v3545_v20 = vsel %vm373_vm7, %v357_v45, %v390_v61  ;;  %v427_v42 = vld [vmem:[%s3439_s24 + $0x36] sm:$0x15]  ;;  %v440_v44 = vunpack.c.l.bf16 %v421_v18 }
  0x4a   : > { %6328 = vst [vmem:[#allocation19_spill] sm:$0xff] %v3532_v15  ;;  %6329 = vst [vmem:[#allocation20_spill] sm:$0xff] %v3535_v17  ;;  %v3548_v23 = vsel %vm374_vm8, %v358_v46, %v391_v62  ;;  %v3551_v24 = vsel %vm375_vm9, %v359_v48, %v392_v63  ;;  %v3556_v30 = vsel %vm376_vm10, %v360_v49, %v393_v0  ;;  %v441_v45 = vunpack.c.h.bf16 %v421_v18  ;;  %v428_v46 = vld [vmem:[%s3439_s24 + $0x3c] sm:$0x15]  ;;  %v432_v58 = vld [vmem:[%s3439_s24 + $0x54] sm:$0x15] }
  0x4b   : > { %6330 = vst [vmem:[#allocation21_spill] sm:$0xff] %v3542_v19  ;;  %6331 = vst [vmem:[#allocation22_spill] sm:$0xff] %v3545_v20  ;;  %v3559_v31 = vsel %vm377_vm11, %v361_v50, %v394_v1  ;;  %v3562_v32 = vsel %vm378_vm12, %v362_v52, %v395_v2  ;;  %v3565_v33 = vsel %vm379_vm13, %v363_v53, %v396_v3  ;;  %v442_v48 = vunpack.c.l.bf16 %v422_v25  ;;  %v430_v52 = vld [vmem:[%s3439_s24 + $0x48] sm:$0x15]  ;;  %v431_v53 = vld [vmem:[%s3439_s24 + $0x4e] sm:$0x15] }
  0x4c   : > { %6332 = vst [vmem:[#allocation23_spill] sm:$0xff] %v3548_v23  ;;  %6333 = vst [vmem:[#allocation24_spill] sm:$0xff] %v3551_v24  ;;  %v3573_v39 = vsel %vm380_vm14, %v364_v54, %v397_v4  ;;  %v3576_v40 = vsel %vm381_vm15, %v365_v55, %v398_v6  ;;  %v443_v49 = vunpack.c.h.bf16 %v422_v25  ;;  %v444_v50 = vunpack.c.l.bf16 %v423_v26  ;;  %v433_v59 = vld [vmem:[%s3439_s24 + $0x5a] sm:$0x15] }
  0x4d   : > { %6334 = vst [vmem:[#allocation25_spill] sm:$0xff] %v3556_v30  ;;  %6335 = vst [vmem:[#allocation26_spill] sm:$0xff] %v3559_v31  ;;  %v446_v56 = vunpack.c.l.bf16 %v424_v37  ;;  %v447_v54 = vunpack.c.h.bf16 %v424_v37  ;;  %v448_v57 = vunpack.c.l.bf16 %v425_v38  ;;  %v449_v55 = vunpack.c.h.bf16 %v425_v38 }
  0x4e   : > { %6336 = vst [vmem:[#allocation27_spill] sm:$0xff] %v3562_v32  ;;  %6337 = vst [vmem:[#allocation28_spill] sm:$0xff] %v3565_v33  ;;  %v450_v60 = vunpack.c.l.bf16 %v426_v41  ;;  %v451_v61 = vunpack.c.h.bf16 %v426_v41  ;;  %v452_v62 = vunpack.c.l.bf16 %v427_v42  ;;  %v453_v63 = vunpack.c.h.bf16 %v427_v42 }
  0x4f   : > { %6338 = vst [vmem:[#allocation29_spill] sm:$0xff] %v3573_v39  ;;  %6339 = vst [vmem:[#allocation30_spill] sm:$0xff] %v3576_v40  ;;  %v454_v0 = vunpack.c.l.bf16 %v428_v46  ;;  %v455_v1 = vunpack.c.h.bf16 %v428_v46  ;;  %v456_v2 = vunpack.c.l.bf16 %v429_v47  ;;  %v457_v3 = vunpack.c.h.bf16 %v429_v47 }
  0x50   : > { %v458_v4 = vunpack.c.l.bf16 %v430_v52  ;;  %v459_v6 = vunpack.c.h.bf16 %v430_v52  ;;  %v460_v18 = vunpack.c.l.bf16 %v431_v53  ;;  %v466_v25 = vstv %s3538_s20 }
  0x51   : > { %v461_v26 = vunpack.c.h.bf16 %v431_v53  ;;  %v462_v37 = vunpack.c.l.bf16 %v432_v58  ;;  %v463_v43 = vunpack.c.h.bf16 %v432_v58  ;;  %v464_v36 = vunpack.c.l.bf16 %v433_v59 }
  0x52   : > { %v465_v38 = vunpack.c.h.bf16 %v433_v59  ;;  %v3592_v41 = vrot.slane %v3518_v7, %v3468_v21  ;;  %v3596_v42 = vrot.slane %v3518_v7, %v3471_v22  ;;  %v467_v46 = vsub.f32 %v434_v28, %v466_v25 }
  0x53   : > { %v468_v47 = vsub.f32 %v435_v29, %v466_v25  ;;  %v469_v52 = vsub.f32 %v436_v34, %v466_v25  ;;  %v6342_v53 = vunpack.c.h.bf16 %v3455_v13  ;;  %v6343_v59 = vunpack.c.l.bf16 %v3460_v16 }
  0x54   : > { %6340 = vst [vmem:[#allocation31_spill] sm:$0xff] %v3592_v41  ;;  %6341 = vst [vmem:[#allocation32_spill] sm:$0xff] %v3596_v42  ;;  %v472_v9 = vsub.f32 %v6344_v10, %v466_v25  ;;  %v473_v7 = vsub.f32 %v440_v44, %v466_v25  ;;  %v474_v42 = vsub.f32 %v441_v45, %v466_v25 }
  0x55   : > { %v470_v58 = vsub.f32 %v6342_v53, %v466_v25  ;;  %v471_v5 = vsub.f32 %v6343_v59, %v466_v25  ;;  %v475_v41 = vsub.f32 %v442_v48, %v466_v25  ;;  %v476_v40 = vsub.f32 %v443_v49, %v466_v25 }
  0x56   : > { %v477_v28 = vsub.f32 %v444_v50, %v466_v25  ;;  %v478_v39 = vsub.f32 %v445_v51, %v466_v25  ;;  %v479_v12 = vsub.f32 %v446_v56, %v466_v25  ;;  %v480_v29 = vsub.f32 %v447_v54, %v466_v25 }
  0x57   : > { %v481_v33 = vsub.f32 %v448_v57, %v466_v25  ;;  %v482_v32 = vsub.f32 %v449_v55, %v466_v25  ;;  %v483_v34 = vsub.f32 %v450_v60, %v466_v25  ;;  %v484_v31 = vsub.f32 %v451_v61, %v466_v25 }
  0x58   : > { %v485_v13 = vsub.f32 %v452_v62, %v466_v25  ;;  %v486_v53 = vsub.f32 %v453_v63, %v466_v25  ;;  %v487_v30 = vsub.f32 %v454_v0, %v466_v25  ;;  %v488_v24 = vsub.f32 %v455_v1, %v466_v25 }
  0x59   : > { %v489_v59 = vsub.f32 %v456_v2, %v466_v25  ;;  %v490_v23 = vsub.f32 %v457_v3, %v466_v25  ;;  %v491_v16 = vsub.f32 %v458_v4, %v466_v25  ;;  %v492_v10 = vsub.f32 %v459_v6, %v466_v25 }
  0x5a   : > { %v493_v44 = vsub.f32 %v460_v18, %v466_v25  ;;  %v494_v45 = vsub.f32 %v461_v26, %v466_v25  ;;  %v495_v48 = vsub.f32 %v462_v37, %v466_v25  ;;  %v496_v49 = vsub.f32 %v463_v43, %v466_v25 }
  0x5b   : > { %v497_v50 = vsub.f32 %v464_v36, %v466_v25  ;;  %v498_v51 = vsub.f32 %v465_v38, %v466_v25  ;;  %v3611_v56 = vmul.f32 %v3588_v35, %v467_v46  ;;  %v3614_v54 = vmul.f32 %v3588_v35, %v468_v47 }
  0x5c   : > { %v3617_v57 = vmul.f32 %v3588_v35, %v469_v52  ;;  %v3620_v55 = vmul.f32 %v3588_v35, %v470_v58  ;;  %v3623_v60 = vmul.f32 %v3588_v35, %v471_v5  ;;  %v3626_v61 = vmul.f32 %v3588_v35, %v472_v9 }
  0x5d   : > { %v3629_v36 = vmul.f32 %v3588_v35, %v473_v7  ;;  %v3632_v43 = vmul.f32 %v3588_v35, %v474_v42  ;;  %v3635_v62 = vmul.f32 %v3588_v35, %v475_v41  ;;  %v3638_v63 = vmul.f32 %v3588_v35, %v476_v40 }
  0x5e   : > { %v3641_v0 = vmul.f32 %v3588_v35, %v477_v28  ;;  %v3644_v5 = vmul.f32 %v3588_v35, %v478_v39  ;;  %v3647_v9 = vmul.f32 %v3588_v35, %v479_v12  ;;  %v3650_v7 = vmul.f32 %v3588_v35, %v480_v29 }
  0x5f   : > { %v3653_v1 = vmul.f32 %v3588_v35, %v481_v33  ;;  %v3656_v2 = vmul.f32 %v3588_v35, %v482_v32  ;;  %v3659_v40 = vmul.f32 %v3588_v35, %v483_v34  ;;  %v3662_v3 = vmul.f32 %v3588_v35, %v484_v31 }
  0x60   : > { %v3665_v39 = vmul.f32 %v3588_v35, %v485_v13  ;;  %v3668_v4 = vmul.f32 %v3588_v35, %v486_v53  ;;  %v3671_v6 = vmul.f32 %v3588_v35, %v487_v30  ;;  %v3674_v33 = vmul.f32 %v3588_v35, %v488_v24 }
  0x61   : > { %v3677_v32 = vmul.f32 %v3588_v35, %v489_v59  ;;  %v3680_v18 = vmul.f32 %v3588_v35, %v490_v23  ;;  %v3683_v31 = vmul.f32 %v3588_v35, %v491_v16  ;;  %v3686_v25 = vmul.f32 %v3588_v35, %v492_v10 }
  0x62   : > { %v3689_v26 = vmul.f32 %v3588_v35, %v493_v44  ;;  %v3692_v30 = vmul.f32 %v3588_v35, %v494_v45  ;;  %v3695_v24 = vmul.f32 %v3588_v35, %v495_v48  ;;  %v3698_v37 = vmul.f32 %v3588_v35, %v496_v49 }
  0x63   : > { %6345 = vst [vmem:[#allocation33_spill] sm:$0xff] %v3683_v31  ;;  %6346 = vst [vmem:[#allocation34_spill] sm:$0xff] %v3686_v25  ;;  %v3701_v23 = vmul.f32 %v3588_v35, %v497_v50  ;;  %v3704_v38 = vmul.f32 %v3588_v35, %v498_v51  ;;  %vm532_vm0 = vcmp.gt.f32.partialorder %v3611_v56, 0.0  ;;  %vm533_vm1 = vcmp.gt.f32.partialorder %v3614_v54, 0.0 }
  0x64   : > { %6347 = vst [vmem:[#allocation35_spill] sm:$0xff] %v3692_v30  ;;  %6348 = vst [vmem:[#allocation36_spill] sm:$0xff] %v3695_v24  ;;  %vm534_vm2 = vcmp.gt.f32.partialorder %v3617_v57, 0.0  ;;  %vm535_vm3 = vcmp.gt.f32.partialorder %v3620_v55, 0.0  ;;  %vm536_vm4 = vcmp.gt.f32.partialorder %v3623_v60, 0.0  ;;  %vm537_vm5 = vcmp.gt.f32.partialorder %v3626_v61, 0.0 }
  0x65   : > { %6349 = vst [vmem:[#allocation37_spill] sm:$0xff] %v3698_v37  ;;  %vm538_vm6 = vcmp.gt.f32.partialorder %v3629_v36, 0.0  ;;  %vm539_vm7 = vcmp.gt.f32.partialorder %v3632_v43, 0.0  ;;  %vm540_vm8 = vcmp.gt.f32.partialorder %v3635_v62, 0.0  ;;  %vm541_vm9 = vcmp.gt.f32.partialorder %v3638_v63, 0.0 }
  0x66   : > { %vm542_vm10 = vcmp.gt.f32.partialorder %v3641_v0, 0.0  ;;  %vm543_vm11 = vcmp.gt.f32.partialorder %v3644_v5, 0.0  ;;  %v564_v35 = vmul.f32 %v3611_v56, %v3478_v27  ;;  %v565_v41 = vmul.f32 %v3614_v54, %v3478_v27 }
  0x67   : > { %v566_v42 = vmul.f32 %v3617_v57, %v3478_v27  ;;  %v567_v46 = vmul.f32 %v3620_v55, %v3478_v27  ;;  %v568_v47 = vmul.f32 %v3623_v60, %v3478_v27  ;;  %v569_v52 = vmul.f32 %v3626_v61, %v3478_v27 }
  0x68   : > { %v570_v58 = vmul.f32 %v3629_v36, %v3478_v27  ;;  %v571_v28 = vmul.f32 %v3632_v43, %v3478_v27  ;;  %v572_v12 = vmul.f32 %v3635_v62, %v3478_v27  ;;  %v573_v29 = vmul.f32 %v3638_v63, %v3478_v27 }
  0x69   : > { %v574_v34 = vmul.f32 %v3641_v0, %v3478_v27  ;;  %v575_v13 = vmul.f32 %v3644_v5, %v3478_v27  ;;  %v576_v53 = vmul.f32 %v3647_v9, %v3478_v27  ;;  %v577_v59 = vmul.f32 %v3650_v7, %v3478_v27 }
  0x6a   : > { %v578_v16 = vmul.f32 %v3653_v1, %v3478_v27  ;;  %v579_v10 = vmul.f32 %v3656_v2, %v3478_v27  ;;  %vm560_vm12 = vcmp.gt.f32.partialorder %v3695_v24, 0.0  ;;  %vm561_vm13 = vcmp.gt.f32.partialorder %v3698_v37, 0.0 }
  0x6b   : > { %vm562_vm14 = vcmp.gt.f32.partialorder %v3701_v23, 0.0  ;;  %vm563_vm15 = vcmp.gt.f32.partialorder %v3704_v38, 0.0  ;;  %v580_v44 = vmul.f32 %v3659_v40, %v3478_v27  ;;  %v581_v45 = vmul.f32 %v3662_v3, %v3478_v27 }
  0x6c   : > { %v582_v48 = vmul.f32 %v3665_v39, %v3478_v27  ;;  %v583_v49 = vmul.f32 %v3668_v4, %v3478_v27  ;;  %v584_v50 = vmul.f32 %v3671_v6, %v3478_v27  ;;  %v585_v51 = vmul.f32 %v3674_v33, %v3478_v27 }
  0x6d   : > { %v586_v20 = vmul.f32 %v3677_v32, %v3478_v27  ;;  %v587_v19 = vmul.f32 %v3680_v18, %v3478_v27  ;;  %v588_v17 = vmul.f32 %v3683_v31, %v3478_v27  ;;  %v589_v15 = vmul.f32 %v3686_v25, %v3478_v27 }
  0x6e   : > { %v590_v14 = vmul.f32 %v3689_v26, %v3478_v27  ;;  %v591_v11 = vmul.f32 %v3692_v30, %v3478_v27  ;;  %v592_v22 = vmul.f32 %v3695_v24, %v3478_v27  ;;  %v593_v8 = vmul.f32 %v3698_v37, %v3478_v27 }
  0x6f   : > { %v594_v21 = vmul.f32 %v3701_v23, %v3478_v27  ;;  %v595_v31 = vmul.f32 %v3704_v38, %v3478_v27  ;;  %v596_v25 = vsel %vm532_vm0, %v3611_v56, %v564_v35  ;;  %v597_v30 = vsel %vm533_vm1, %v3614_v54, %v565_v41  ;;  %v6362_v35 = vld [vmem:[#allocation33_spill] sm:$0xff]  ;;  %v6364_v41 = vld [vmem:[#allocation34_spill] sm:$0xff] }
  0x70   : > { %v598_v24 = vsel %vm534_vm2, %v3617_v57, %v566_v42  ;;  %v599_v37 = vsel %vm535_vm3, %v3620_v55, %v567_v46  ;;  %v600_v27 = vsel %vm536_vm4, %v3623_v60, %v568_v47  ;;  %v601_v56 = vsel %vm537_vm5, %v3626_v61, %v569_v52  ;;  %v6367_v42 = vld [vmem:[#allocation35_spill] sm:$0xff]  ;;  %v6372_v46 = vld [vmem:[#allocation16_spill] sm:$0xff] }
  0x71   : > { %v602_v54 = vsel %vm538_vm6, %v3629_v36, %v570_v58  ;;  %v603_v57 = vsel %vm539_vm7, %v3632_v43, %v571_v28  ;;  %v604_v55 = vsel %vm540_vm8, %v3635_v62, %v572_v12  ;;  %v605_v60 = vsel %vm541_vm9, %v3638_v63, %v573_v29  ;;  %v6385_v29 = vld [vmem:[#allocation20_spill] sm:$0xff] }
  0x72   : > { %v606_v61 = vsel %vm542_vm10, %v3641_v0, %v574_v34  ;;  %v607_v36 = vsel %vm543_vm11, %v3644_v5, %v575_v13  ;;  %vm6350_vm0 = vcmp.gt.f32.partialorder %v3647_v9, 0.0  ;;  %vm6351_vm1 = vcmp.gt.f32.partialorder %v3650_v7, 0.0 }
  0x73   : > { %v608_v43 = vsel %vm6350_vm0, %v3647_v9, %v576_v53  ;;  %v609_v62 = vsel %vm6351_vm1, %v3650_v7, %v577_v59  ;;  %vm6352_vm2 = vcmp.gt.f32.partialorder %v3653_v1, 0.0  ;;  %vm6353_vm3 = vcmp.gt.f32.partialorder %v3656_v2, 0.0  ;;  %v6388_v53 = vld [vmem:[#allocation21_spill] sm:$0xff] }
  0x74   : > { %v610_v63 = vsel %vm6352_vm2, %v3653_v1, %v578_v16  ;;  %v611_v0 = vsel %vm6353_vm3, %v3656_v2, %v579_v10  ;;  %vm6354_vm4 = vcmp.gt.f32.partialorder %v3659_v40, 0.0  ;;  %vm6355_vm5 = vcmp.gt.f32.partialorder %v3662_v3, 0.0  ;;  %v6391_v10 = vld [vmem:[#allocation22_spill] sm:$0xff] }
  0x75   : > { %v612_v5 = vsel %vm6354_vm4, %v3659_v40, %v580_v44  ;;  %v613_v9 = vsel %vm6355_vm5, %v3662_v3, %v581_v45  ;;  %vm6356_vm6 = vcmp.gt.f32.partialorder %v3665_v39, 0.0  ;;  %vm6357_vm7 = vcmp.gt.f32.partialorder %v3668_v4, 0.0 }
  0x76   : > { %v614_v7 = vsel %vm6356_vm6, %v3665_v39, %v582_v48  ;;  %v615_v1 = vsel %vm6357_vm7, %v3668_v4, %v583_v49  ;;  %vm6358_vm8 = vcmp.gt.f32.partialorder %v3671_v6, 0.0  ;;  %vm6359_vm9 = vcmp.gt.f32.partialorder %v3674_v33, 0.0  ;;  %v6394_v48 = vld [vmem:[#allocation23_spill] sm:$0xff] }
  0x77   : > { %v616_v2 = vsel %vm6358_vm8, %v3671_v6, %v584_v50  ;;  %v617_v40 = vsel %vm6359_vm9, %v3674_v33, %v585_v51  ;;  %vm6360_vm10 = vcmp.gt.f32.partialorder %v3677_v32, 0.0  ;;  %vm6361_vm11 = vcmp.gt.f32.partialorder %v3680_v18, 0.0  ;;  %v6397_v51 = vld [vmem:[#allocation24_spill] sm:$0xff] }
  0x78   : > { %v618_v3 = vsel %vm6360_vm10, %v3677_v32, %v586_v20  ;;  %v619_v39 = vsel %vm6361_vm11, %v3680_v18, %v587_v19  ;;  %vm6363_vm0 = vcmp.gt.f32.partialorder %v6362_v35, 0.0  ;;  %vm6365_vm1 = vcmp.gt.f32.partialorder %v6364_v41, 0.0  ;;  %v6369_v32 = vld [vmem:[#allocation36_spill] sm:$0xff]  ;;  %v6370_v18 = vld [vmem:[#allocation37_spill] sm:$0xff] }
  0x79   : > { %v620_v4 = vsel %vm6363_vm0, %v6362_v35, %v588_v17  ;;  %v621_v6 = vsel %vm6365_vm1, %v6364_v41, %v589_v15  ;;  %vm6366_vm2 = vcmp.gt.f32.partialorder %v3689_v26, 0.0  ;;  %vm6368_vm3 = vcmp.gt.f32.partialorder %v6367_v42, 0.0 }
  0x7a   : > { %v622_v33 = vsel %vm6366_vm2, %v3689_v26, %v590_v14  ;;  %v623_v20 = vsel %vm6368_vm3, %v6367_v42, %v591_v11  ;;  %v624_v19 = vsel %vm560_vm12, %v6369_v32, %v592_v22  ;;  %v625_v17 = vsel %vm561_vm13, %v6370_v18, %v593_v8  ;;  %v6371_v26 = vld [vmem:[#allocation12_spill] sm:$0xff]  ;;  %v6374_v11 = vld [vmem:[#allocation13_spill] sm:$0xff] }
  0x7b   : > { %v626_v15 = vsel %vm562_vm14, %v3701_v23, %v594_v21  ;;  %v627_v14 = vsel %vm563_vm15, %v3704_v38, %v595_v31  ;;  %v3900_v47 = vrot.slane %v6372_v46, %v6371_v26  ;;  %v3904_v52 = vrot.slane %v6372_v46, %v6374_v11  ;;  %v6376_v22 = vld [vmem:[#allocation17_spill] sm:$0xff]  ;;  %v6379_v21 = vld [vmem:[#allocation18_spill] sm:$0xff]  ;;  %v6382_v38 = vld [vmem:[#allocation19_spill] sm:$0xff] }
  0x7c   : > { %v3908_v58 = vrot.slane %v6376_v22, %v6371_v26  ;;  %v3912_v8 = vrot.slane %v6376_v22, %v6374_v11  ;;  %v3916_v23 = vrot.slane %v6379_v21, %v6371_v26  ;;  %v3920_v31 = vrot.slane %v6379_v21, %v6374_v11  ;;  %v6400_v42 = vld [vmem:[#allocation25_spill] sm:$0xff]  ;;  %v6409_v21 = vld [vmem:[#allocation28_spill] sm:$0xff] }
  0x7d   : > { %6373 = vst [vmem:[#allocation33_spill] sm:$0xff] %v3900_v47  ;;  %6375 = vst [vmem:[#allocation34_spill] sm:$0xff] %v3904_v52  ;;  %v3924_v28 = vrot.slane %v6382_v38, %v6371_v26  ;;  %v3928_v12 = vrot.slane %v6382_v38, %v6374_v11  ;;  %v3932_v34 = vrot.slane %v6385_v29, %v6371_v26  ;;  %v6412_v46 = vld [vmem:[#allocation29_spill] sm:$0xff]  ;;  %vm6241_vm12 = vcmask 1041409  }
  0x7e   : > { %6377 = vst [vmem:[#allocation35_spill] sm:$0xff] %v3908_v58  ;;  %6378 = vst [vmem:[#allocation36_spill] sm:$0xff] %v3912_v8  ;;  %v3936_v13 = vrot.slane %v6385_v29, %v6374_v11  ;;  %v3940_v59 = vrot.slane %v6388_v53, %v6371_v26  ;;  %v3944_v16 = vrot.slane %v6388_v53, %v6374_v11  ;;  %v6406_v29 = vld [vmem:[#allocation27_spill] sm:$0xff]  ;;  %vm6240_vm13 = vcmask 1042434  }
  0x7f   : > { %6380 = vst [vmem:[#allocation37_spill] sm:$0xff] %v3916_v23  ;;  %6381 = vst [vmem:[#allocation12_spill] sm:$0xff] %v3920_v31  ;;  %v3948_v44 = vrot.slane %v6391_v10, %v6371_v26  ;;  %v3952_v45 = vrot.slane %v6391_v10, %v6374_v11  ;;  %v3956_v49 = vrot.slane %v6394_v48, %v6371_v26  ;;  %v6403_v10 = vld [vmem:[#allocation26_spill] sm:$0xff]  ;;  %vm6239_vm14 = vcmask 1043459  }
  0x80   : > { %6383 = vst [vmem:[#allocation13_spill] sm:$0xff] %v3924_v28  ;;  %6384 = vst [vmem:[#allocation38_spill] sm:$0xff] %v3928_v12  ;;  %v3960_v50 = vrot.slane %v6394_v48, %v6374_v11  ;;  %v3964_v35 = vrot.slane %v6397_v51, %v6371_v26  ;;  %v3968_v41 = vrot.slane %v6397_v51, %v6374_v11  ;;  %vm6238_vm15 = vcmask 1044484  }
  0x81   : > { %6386 = vst [vmem:[#allocation39_spill] sm:$0xff] %v3932_v34  ;;  %6387 = vst [vmem:[#allocation40_spill] sm:$0xff] %v3936_v13  ;;  %v3972_v32 = vrot.slane %v6400_v42, %v6371_v26  ;;  %v3976_v18 = vrot.slane %v6400_v42, %v6374_v11  ;;  %v3980_v48 = vrot.slane %v6403_v10, %v6371_v26  ;;  %vm6237_vm4 = vcmask 1045509  }
  0x82   : > { %6389 = vst [vmem:[#allocation41_spill] sm:$0xff] %v3940_v59  ;;  %6390 = vst [vmem:[#allocation42_spill] sm:$0xff] %v3944_v16  ;;  %v3984_v53 = vrot.slane %v6403_v10, %v6374_v11  ;;  %v3988_v51 = vrot.slane %v6406_v29, %v6371_v26  ;;  %v3992_v38 = vrot.slane %v6406_v29, %v6374_v11  ;;  %vm6236_vm5 = vcmask 1046534  }
  0x83   : > { %6392 = vst [vmem:[#allocation43_spill] sm:$0xff] %v3948_v44  ;;  %6393 = vst [vmem:[#allocation44_spill] sm:$0xff] %v3952_v45  ;;  %v3996_v42 = vrot.slane %v6409_v21, %v6371_v26  ;;  %v4000_v22 = vrot.slane %v6409_v21, %v6374_v11  ;;  %v4004_v10 = vrot.slane %v6412_v46, %v6371_v26  ;;  %v6419_v21 = vld [vmem:[#allocation32_spill] sm:$0xff]  ;;  %vm6235_vm6 = vcmask 1047559  }
  0x84   : > { %6395 = vst [vmem:[#allocation45_spill] sm:$0xff] %v3956_v49  ;;  %6396 = vst [vmem:[#allocation46_spill] sm:$0xff] %v3960_v50 }
  0x85   : > { %6398 = vst [vmem:[#allocation47_spill] sm:$0xff] %v3964_v35  ;;  %6399 = vst [vmem:[#allocation48_spill] sm:$0xff] %v3968_v41 }
  0x86   : > { %6401 = vst [vmem:[#allocation49_spill] sm:$0xff] %v3972_v32  ;;  %6402 = vst [vmem:[#allocation50_spill] sm:$0xff] %v3976_v18 }
  0x87   : > { %6404 = vst [vmem:[#allocation51_spill] sm:$0xff] %v3980_v48  ;;  %6405 = vst [vmem:[#allocation52_spill] sm:$0xff] %v3984_v53  ;;  %v4008_v53 = vrot.slane %v6412_v46, %v6374_v11  ;;  %v4028_v46 = vadd.f32 %v3904_v52, %v599_v37  ;;  %v4049_v37 = vadd.f32 %v3932_v34, %v606_v61 }
  0x88   : > { %6407 = vst [vmem:[#allocation53_spill] sm:$0xff] %v3988_v51  ;;  %6408 = vst [vmem:[#allocation54_spill] sm:$0xff] %v3992_v38  ;;  %v6415_v51 = vld [vmem:[#allocation30_spill] sm:$0xff]  ;;  %v4070_v61 = vadd.f32 %v3960_v50, %v613_v9 }
  0x89   : > { %6410 = vst [vmem:[#allocation55_spill] sm:$0xff] %v3996_v42  ;;  %6411 = vst [vmem:[#allocation56_spill] sm:$0xff] %v4000_v22  ;;  %v4012_v29 = vrot.slane %v6415_v51, %v6371_v26  ;;  %v4016_v38 = vrot.slane %v6415_v51, %v6374_v11  ;;  %v6418_v42 = vld [vmem:[#allocation31_spill] sm:$0xff]  ;;  %v4022_v22 = vadd.f32 %v6419_v21, %v597_v30 }
  0x8a   : > { %6413 = vst [vmem:[#allocation57_spill] sm:$0xff] %v4004_v10  ;;  %6414 = vst [vmem:[#allocation58_spill] sm:$0xff] %v4008_v53  ;;  %v4019_v48 = vadd.f32 %v6418_v42, %v596_v25  ;;  %v4025_v10 = vadd.f32 %v3900_v47, %v598_v24  ;;  %v4031_v53 = vadd.f32 %v3908_v58, %v600_v27 }
  0x8b   : > { %6416 = vst [vmem:[#allocation59_spill] sm:$0xff] %v4012_v29  ;;  %6417 = vst [vmem:[#allocation60_spill] sm:$0xff] %v4016_v38  ;;  %v4034_v26 = vadd.f32 %v3912_v8, %v601_v56  ;;  %v4037_v11 = vadd.f32 %v3916_v23, %v602_v54  ;;  %v4040_v25 = vadd.f32 %v3920_v31, %v603_v57 }
  0x8c   : > { %v4043_v30 = vadd.f32 %v3924_v28, %v604_v55  ;;  %v4046_v24 = vadd.f32 %v3928_v12, %v605_v60  ;;  %v4052_v27 = vadd.f32 %v3936_v13, %v607_v36  ;;  %v4055_v56 = vadd.f32 %v3940_v59, %v608_v43 }
  0x8d   : > { %v4058_v54 = vadd.f32 %v3944_v16, %v609_v62  ;;  %v4061_v57 = vadd.f32 %v3948_v44, %v610_v63  ;;  %v4064_v55 = vadd.f32 %v3952_v45, %v611_v0  ;;  %v4067_v60 = vadd.f32 %v3956_v49, %v612_v5 }
  0x8e   : > { %v4073_v36 = vadd.f32 %v3964_v35, %v614_v7  ;;  %v4076_v43 = vadd.f32 %v3968_v41, %v615_v1  ;;  %v4079_v62 = vadd.f32 %v3972_v32, %v616_v2  ;;  %v4082_v63 = vadd.f32 %v3976_v18, %v617_v40  ;;  %v6420_v0 = vld [vmem:[#allocation51_spill] sm:$0xff]  ;;  %v6421_v5 = vld [vmem:[#allocation52_spill] sm:$0xff] }
  0x8f   : > { %v4085_v45 = vadd.f32 %v6420_v0, %v618_v3  ;;  %v4088_v49 = vadd.f32 %v6421_v5, %v619_v39  ;;  %v6422_v9 = vld [vmem:[#allocation53_spill] sm:$0xff]  ;;  %v6423_v7 = vld [vmem:[#allocation54_spill] sm:$0xff]  ;;  %v4109_v39 = vadd.f32 %v4012_v29, %v626_v15 }
  0x90   : > { %v4091_v50 = vadd.f32 %v6422_v9, %v620_v4  ;;  %v4094_v35 = vadd.f32 %v6423_v7, %v621_v6  ;;  %v6424_v1 = vld [vmem:[#allocation55_spill] sm:$0xff]  ;;  %v6425_v2 = vld [vmem:[#allocation56_spill] sm:$0xff]  ;;  %v4112_v4 = vadd.f32 %v4016_v38, %v627_v14  ;;  %v6428_v6 = vld [vmem:[#allocation10_spill] sm:$0xff] }
  0x91   : > { %v4097_v41 = vadd.f32 %v6424_v1, %v622_v33  ;;  %v4100_v32 = vadd.f32 %v6425_v2, %v623_v20  ;;  %v6426_v40 = vld [vmem:[#allocation57_spill] sm:$0xff]  ;;  %v6427_v3 = vld [vmem:[#allocation58_spill] sm:$0xff]  ;;  %v967_v7 = vrot.slane %v4019_v48, %v6428_v6  ;;  %v6429_v33 = vld [vmem:[#allocation11_spill] sm:$0xff]  ;;  %v975_v20 = vrot.slane %v4022_v22, %v6428_v6 }
  0x92   : > { %v4103_v18 = vadd.f32 %v6426_v40, %v624_v19  ;;  %v4106_v0 = vadd.f32 %v6427_v3, %v625_v17  ;;  %v971_v1 = vrot.slane %v4019_v48, %v6429_v33  ;;  %v979_v19 = vrot.slane %v4025_v10, %v6428_v6 }
  0x93   : > { %v983_v17 = vrot.slane %v4025_v10, %v6429_v33  ;;  %v987_v15 = vrot.slane %v4028_v46, %v6428_v6  ;;  %v991_v14 = vrot.slane %v4031_v53, %v6428_v6  ;;  %v995_v48 = vrot.slane %v4031_v53, %v6429_v33 }
  0x94   : > { %v999_v38 = vrot.slane %v4034_v26, %v6428_v6  ;;  %v1003_v22 = vrot.slane %v4037_v11, %v6428_v6  ;;  %v1007_v10 = vrot.slane %v4037_v11, %v6429_v33  ;;  %v1011_v46 = vrot.slane %v4040_v25, %v6428_v6 }
  0x95   : > { %v1015_v29 = vrot.slane %v4043_v30, %v6428_v6  ;;  %v1019_v3 = vrot.slane %v4043_v30, %v6429_v33  ;;  %v1023_v53 = vrot.slane %v4046_v24, %v6428_v6  ;;  %v1027_v26 = vrot.slane %v4049_v37, %v6428_v6 }
  0x96   : > { %v1031_v40 = vrot.slane %v4049_v37, %v6429_v33  ;;  %v1035_v11 = vrot.slane %v4052_v27, %v6428_v6  ;;  %v1039_v25 = vrot.slane %v4055_v56, %v6428_v6  ;;  %v1043_v30 = vrot.slane %v4055_v56, %v6429_v33 }
  0x97   : > { %v1047_v2 = vrot.slane %v4058_v54, %v6428_v6  ;;  %v1051_v24 = vrot.slane %v4061_v57, %v6428_v6  ;;  %v1055_v37 = vrot.slane %v4061_v57, %v6429_v33  ;;  %v1059_v27 = vrot.slane %v4064_v55, %v6428_v6 }
  0x98   : > { %v1063_v9 = vrot.slane %v4067_v60, %v6428_v6  ;;  %v1067_v5 = vrot.slane %v4067_v60, %v6429_v33  ;;  %v1071_v56 = vrot.slane %v4070_v61, %v6428_v6  ;;  %v1075_v54 = vrot.slane %v4073_v36, %v6428_v6 }
  0x99   : > { %v1079_v57 = vrot.slane %v4073_v36, %v6429_v33  ;;  %v1083_v55 = vrot.slane %v4076_v43, %v6428_v6  ;;  %v1087_v44 = vrot.slane %v4079_v62, %v6428_v6  ;;  %v1091_v60 = vrot.slane %v4079_v62, %v6429_v33 }
  0x9a   : > { %v1095_v16 = vrot.slane %v4082_v63, %v6428_v6  ;;  %v1099_v61 = vrot.slane %v4085_v45, %v6428_v6  ;;  %v1103_v59 = vrot.slane %v4085_v45, %v6429_v33  ;;  %v1107_v36 = vrot.slane %v4088_v49, %v6428_v6 }
  0x9b   : > { %v1111_v43 = vrot.slane %v4091_v50, %v6428_v6  ;;  %v1115_v13 = vrot.slane %v4091_v50, %v6429_v33  ;;  %v1119_v62 = vrot.slane %v4094_v35, %v6428_v6  ;;  %v1123_v63 = vrot.slane %v4097_v41, %v6428_v6 }
  0x9c   : > { %v1127_v34 = vrot.slane %v4097_v41, %v6429_v33  ;;  %v1131_v45 = vrot.slane %v4100_v32, %v6428_v6  ;;  %v1135_v49 = vrot.slane %v4103_v18, %v6428_v6  ;;  %v1147_v12 = vrot.slane %v4109_v39, %v6428_v6 }
  0x9d   : > { %v1157_v50 = vsel %vm6241_vm12, %v979_v19, %v967_v7  ;;  %v1170_v35 = vsel %vm6241_vm12, %v983_v17, %v971_v1  ;;  %v1177_v41 = vsel %vm6241_vm12, %v987_v15, %v975_v20  ;;  %v1184_v23 = vsel %vm6241_vm12, %v1075_v54, %v1063_v9  ;;  %v1227_v54 = vld [vmem:[%s3439_s24 + $0x2a] sm:$0x15] }
  0x9e   : > { %v1159_v28 = vsel %vm6240_vm13, %v991_v14, %v1157_v50  ;;  %v1171_v31 = vsel %vm6240_vm13, %v995_v48, %v1170_v35  ;;  %v1178_v58 = vsel %vm6240_vm13, %v999_v38, %v1177_v41  ;;  %v1185_v52 = vsel %vm6240_vm13, %v1087_v44, %v1184_v23  ;;  %v1231_v35 = vld [vmem:[%s3439_s24 + $0x42] sm:$0x15]  ;;  %v1232_v41 = vld [vmem:[%s3439_s24 + $0x48] sm:$0x15] }
  0x9f   : > { %v1161_v32 = vsel %vm6239_vm14, %v1003_v22, %v1159_v28  ;;  %v1172_v8 = vsel %vm6239_vm14, %v1007_v10, %v1171_v31  ;;  %v1179_v19 = vsel %vm6239_vm14, %v1011_v46, %v1178_v58  ;;  %v1186_v17 = vsel %vm6239_vm14, %v1099_v61, %v1185_v52 }
  0xa0   : > { %v1163_v7 = vsel %vm6238_vm15, %v1015_v29, %v1161_v32  ;;  %v1173_v1 = vsel %vm6238_vm15, %v1019_v3, %v1172_v8  ;;  %v1180_v23 = vsel %vm6238_vm15, %v1023_v53, %v1179_v19  ;;  %v1187_v38 = vsel %vm6238_vm15, %v1111_v43, %v1186_v17  ;;  %v1229_v43 = vld [vmem:[%s3439_s24 + $0x36] sm:$0x15]  ;;  %v1233_v17 = vld [vmem:[%s3439_s24 + $0x4e] sm:$0x15] }
  0xa1   : > { %v1165_v28 = vsel %vm6237_vm4, %v1027_v26, %v1163_v7  ;;  %v1174_v31 = vsel %vm6237_vm4, %v1031_v40, %v1173_v1  ;;  %v1181_v52 = vsel %vm6237_vm4, %v1035_v11, %v1180_v23  ;;  %v1188_v29 = vsel %vm6237_vm4, %v1123_v63, %v1187_v38  ;;  %v1222_v11 = vld [vmem:[%s3439_s24 + $0xc] sm:$0x15] }
  0xa2   : > { %v1167_v8 = vsel %vm6236_vm5, %v1039_v25, %v1165_v28  ;;  %v1175_v58 = vsel %vm6236_vm5, %v1043_v30, %v1174_v31  ;;  %v1182_v40 = vsel %vm6236_vm5, %v1047_v2, %v1181_v52  ;;  %v1189_v3 = vsel %vm6236_vm5, %v1135_v49, %v1188_v29  ;;  %v1223_v25 = vld [vmem:[%s3439_s24 + $0x12] sm:$0x15]  ;;  %v1224_v30 = vld [vmem:[%s3439_s24 + $0x18] sm:$0x15] }
  0xa3   : > { %v1169_v44 = vsel %vm6235_vm6, %v1051_v24, %v1167_v8  ;;  %v1176_v9 = vsel %vm6235_vm6, %v1055_v37, %v1175_v58  ;;  %v1183_v20 = vsel %vm6235_vm6, %v1059_v27, %v1182_v40  ;;  %v1190_v15 = vsel %vm6235_vm6, %v1147_v12, %v1189_v3  ;;  %v1225_v24 = vld [vmem:[%s3439_s24 + $0x1e] sm:$0x15]  ;;  %v1226_v37 = vld [vmem:[%s3439_s24 + $0x24] sm:$0x15]  ;;  %v1234_v28 = vld [vmem:[%s3439_s24 + $0x54] sm:$0x15] }
  0xa4   : > { %v1191_v14 = vsel %vm6241_vm12, %v1079_v57, %v1067_v5  ;;  %v1198_v48 = vsel %vm6241_vm12, %v1083_v55, %v1071_v56  ;;  %1211 = vst [vmem:[%s4220_s30] sm:$0xff] %v1169_v44  ;;  %1212 = vst [vmem:[%s4220_s30 + $0x8] sm:$0xff] %v1176_v9  ;;  %v1139_v22 = vrot.slane %v4103_v18, %v6429_v33  ;;  %v1228_v57 = vld [vmem:[%s3439_s24 + $0x30] sm:$0x15]  ;;  %v1240_v61 = vunpack.c.l.bf16 %v1222_v11  ;;  %v1235_v58 = vld [vmem:[%s3439_s24 + $0x5a] sm:$0x15] }
  0xa5   : > { %v1143_v10 = vrot.slane %v4106_v0, %v6428_v6  ;;  %v1192_v2 = vsel %vm6240_vm13, %v1091_v60, %v1191_v14  ;;  %v1199_v46 = vsel %vm6240_vm13, %v1095_v16, %v1198_v48  ;;  %1213 = vst [vmem:[%s4220_s30 + $0x10] sm:$0xff] %v1183_v20  ;;  %1214 = vst [vmem:[%s4220_s30 + $0x18] sm:$0xff] %v1190_v15  ;;  %v1242_v63 = vunpack.c.l.bf16 %v1223_v25 }
  0xa6   : > { %v1151_v12 = vrot.slane %v4109_v39, %v6429_v33  ;;  %v1155_v5 = vrot.slane %v4112_v4, %v6428_v6  ;;  %v1193_v18 = vsel %vm6239_vm14, %v1103_v59, %v1192_v2  ;;  %v1200_v0 = vsel %vm6239_vm14, %v1107_v36, %v1199_v46 }
  0xa7   : > { %v1194_v16 = vsel %vm6238_vm15, %v1115_v13, %v1193_v18  ;;  %v1201_v53 = vsel %vm6238_vm15, %v1119_v62, %v1200_v0  ;;  %v1220_v13 = vld [vmem:[%s3439_s24] sm:$0x15]  ;;  %v1241_v36 = vunpack.c.h.bf16 %v1222_v11  ;;  %v1244_v49 = vunpack.c.l.bf16 %v1224_v30 }
  0xa8   : > { %v1195_v26 = vsel %vm6237_vm4, %v1127_v34, %v1194_v16  ;;  %v1202_v39 = vsel %vm6237_vm4, %v1131_v45, %v1201_v53  ;;  %v1221_v34 = vld [vmem:[%s3439_s24 + $0x6] sm:$0x15]  ;;  %v1236_v27 = vunpack.c.l.bf16 %v1220_v13  ;;  %v1237_v56 = vunpack.c.h.bf16 %v1220_v13  ;;  %v1230_v62 = vld [vmem:[%s3439_s24 + $0x3c] sm:$0x15] }
  0xa9   : > { %v1196_v4 = vsel %vm6236_vm5, %v1139_v22, %v1195_v26  ;;  %v1203_v6 = vsel %vm6236_vm5, %v1143_v10, %v1202_v39  ;;  %v1238_v55 = vunpack.c.l.bf16 %v1221_v34  ;;  %v1239_v60 = vunpack.c.h.bf16 %v1221_v34 }
  0xaa   : > { %v1197_v59 = vsel %vm6235_vm6, %v1151_v12, %v1196_v4  ;;  %v1204_v33 = vsel %vm6235_vm6, %v1155_v5, %v1203_v6  ;;  %v1243_v45 = vunpack.c.h.bf16 %v1223_v25  ;;  %v1245_v50 = vunpack.c.h.bf16 %v1224_v30 }
  0xab   : > { %1215 = vst [vmem:[%s4220_s30 + $0x20] sm:$0xff] %v1197_v59  ;;  %1216 = vst [vmem:[%s4220_s30 + $0x28] sm:$0xff] %v1204_v33  ;;  %v1246_v32 = vunpack.c.l.bf16 %v1225_v24  ;;  %v1247_v7 = vunpack.c.h.bf16 %v1225_v24  ;;  %v1248_v1 = vunpack.c.l.bf16 %v1226_v37  ;;  %v1249_v19 = vunpack.c.h.bf16 %v1226_v37 }
  0xac   : > { %v1250_v31 = vunpack.c.l.bf16 %v1227_v54  ;;  %v1251_v23 = vunpack.c.h.bf16 %v1227_v54  ;;  %v1252_v38 = vunpack.c.l.bf16 %v1228_v57  ;;  %v1253_v8 = vunpack.c.h.bf16 %v1228_v57 }
  0xad   : > { %v1254_v52 = vunpack.c.l.bf16 %v1229_v43  ;;  %v1255_v29 = vunpack.c.h.bf16 %v1229_v43  ;;  %v1256_v44 = vunpack.c.l.bf16 %v1230_v62  ;;  %v1257_v9 = vunpack.c.h.bf16 %v1230_v62 }
  0xae   : > { %v1258_v40 = vunpack.c.l.bf16 %v1231_v35  ;;  %v1259_v3 = vunpack.c.h.bf16 %v1231_v35  ;;  %v1260_v20 = vunpack.c.l.bf16 %v1232_v41  ;;  %v1268_v15 = vstv %s4266_s7 }
  0xaf   : > { %v1261_v14 = vunpack.c.h.bf16 %v1232_v41  ;;  %v1262_v48 = vunpack.c.l.bf16 %v1233_v17  ;;  %v1263_v22 = vunpack.c.h.bf16 %v1233_v17  ;;  %v1264_v10 = vunpack.c.l.bf16 %v1234_v28 }
  0xb0   : > { %v1265_v2 = vunpack.c.h.bf16 %v1234_v28  ;;  %v1266_v46 = vunpack.c.l.bf16 %v1235_v58  ;;  %v1267_v12 = vunpack.c.h.bf16 %v1235_v58  ;;  %v4287_v5 = vstv %s4272_s8 }
  0xb1   : > { %v1269_v18 = vsub.f32 %v1236_v27, %v1268_v15  ;;  %v1270_v0 = vsub.f32 %v1237_v56, %v1268_v15  ;;  %v1271_v16 = vsub.f32 %v1238_v55, %v1268_v15  ;;  %v1272_v53 = vsub.f32 %v1239_v60, %v1268_v15 }
  0xb2   : > { %v1273_v26 = vsub.f32 %v1240_v61, %v1268_v15  ;;  %v1274_v39 = vsub.f32 %v1241_v36, %v1268_v15  ;;  %v1275_v4 = vsub.f32 %v1242_v63, %v1268_v15  ;;  %v1276_v6 = vsub.f32 %v1243_v45, %v1268_v15 }
  0xb3   : > { %v1277_v59 = vsub.f32 %v1244_v49, %v1268_v15  ;;  %v1278_v33 = vsub.f32 %v1245_v50, %v1268_v15  ;;  %v1279_v13 = vsub.f32 %v1246_v32, %v1268_v15  ;;  %v1280_v34 = vsub.f32 %v1247_v7, %v1268_v15 }
  0xb4   : > { %v1281_v11 = vsub.f32 %v1248_v1, %v1268_v15  ;;  %v1282_v25 = vsub.f32 %v1249_v19, %v1268_v15  ;;  %v1283_v30 = vsub.f32 %v1250_v31, %v1268_v15  ;;  %v1284_v24 = vsub.f32 %v1251_v23, %v1268_v15 }
  0xb5   : > { %v1285_v37 = vsub.f32 %v1252_v38, %v1268_v15  ;;  %v1286_v54 = vsub.f32 %v1253_v8, %v1268_v15  ;;  %v1287_v57 = vsub.f32 %v1254_v52, %v1268_v15  ;;  %v1288_v43 = vsub.f32 %v1255_v29, %v1268_v15 }
  0xb6   : > { %v1289_v27 = vsub.f32 %v1256_v44, %v1268_v15  ;;  %v1290_v56 = vsub.f32 %v1257_v9, %v1268_v15  ;;  %v1291_v55 = vsub.f32 %v1258_v40, %v1268_v15  ;;  %v1292_v60 = vsub.f32 %v1259_v3, %v1268_v15 }
  0xb7   : > { %v1293_v61 = vsub.f32 %v1260_v20, %v1268_v15  ;;  %v1294_v36 = vsub.f32 %v1261_v14, %v1268_v15  ;;  %v1295_v62 = vsub.f32 %v1262_v48, %v1268_v15  ;;  %v1296_v63 = vsub.f32 %v1263_v22, %v1268_v15 }
  0xb8   : > { %v1297_v45 = vsub.f32 %v1264_v10, %v1268_v15  ;;  %v1298_v49 = vsub.f32 %v1265_v2, %v1268_v15  ;;  %v1299_v50 = vsub.f32 %v1266_v46, %v1268_v15  ;;  %v1300_v35 = vsub.f32 %v1267_v12, %v1268_v15 }
  0xb9   : > { %v4290_v41 = vmul.f32 %v4287_v5, %v1269_v18  ;;  %v4293_v32 = vmul.f32 %v4287_v5, %v1270_v0  ;;  %v4296_v7 = vmul.f32 %v4287_v5, %v1271_v16  ;;  %v4299_v1 = vmul.f32 %v4287_v5, %v1272_v53 }
  0xba   : > { %v4302_v19 = vmul.f32 %v4287_v5, %v1273_v26  ;;  %v4305_v17 = vmul.f32 %v4287_v5, %v1274_v39  ;;  %v4308_v28 = vmul.f32 %v4287_v5, %v1275_v4  ;;  %v4311_v31 = vmul.f32 %v4287_v5, %v1276_v6 }
  0xbb   : > { %v4314_v23 = vmul.f32 %v4287_v5, %v1277_v59  ;;  %v4317_v38 = vmul.f32 %v4287_v5, %v1278_v33  ;;  %v4320_v8 = vmul.f32 %v4287_v5, %v1279_v13  ;;  %v4323_v58 = vmul.f32 %v4287_v5, %v1280_v34 }
  0xbc   : > { %v4326_v52 = vmul.f32 %v4287_v5, %v1281_v11  ;;  %v4329_v29 = vmul.f32 %v4287_v5, %v1282_v25  ;;  %v4332_v44 = vmul.f32 %v4287_v5, %v1283_v30  ;;  %v4335_v9 = vmul.f32 %v4287_v5, %v1284_v24 }
  0xbd   : > { %v4338_v40 = vmul.f32 %v4287_v5, %v1285_v37  ;;  %v4341_v3 = vmul.f32 %v4287_v5, %v1286_v54  ;;  %v4344_v20 = vmul.f32 %v4287_v5, %v1287_v57  ;;  %v4347_v15 = vmul.f32 %v4287_v5, %v1288_v43 }
  0xbe   : > { %v4350_v14 = vmul.f32 %v4287_v5, %v1289_v27  ;;  %v4353_v48 = vmul.f32 %v4287_v5, %v1290_v56  ;;  %v4356_v22 = vmul.f32 %v4287_v5, %v1291_v55  ;;  %v4359_v10 = vmul.f32 %v4287_v5, %v1292_v60 }
  0xbf   : > { %v4362_v2 = vmul.f32 %v4287_v5, %v1293_v61  ;;  %v4365_v46 = vmul.f32 %v4287_v5, %v1294_v36  ;;  %v4368_v12 = vmul.f32 %v4287_v5, %v1295_v62  ;;  %v4371_v18 = vmul.f32 %v4287_v5, %v1296_v63 }
  0xc0   : > { %v4374_v0 = vmul.f32 %v4287_v5, %v1297_v45  ;;  %v4377_v16 = vmul.f32 %v4287_v5, %v1298_v49  ;;  %v4380_v53 = vmul.f32 %v4287_v5, %v1299_v50  ;;  %v4383_v26 = vmul.f32 %v4287_v5, %v1300_v35  ;;  %v6435_v5 = vld [vmem:[#allocation14_spill] sm:$0xff] }
  0xc1   : > { %6430 = vst [vmem:[#allocation10_spill] sm:$0xff] %v4362_v2  ;;  %6431 = vst [vmem:[#allocation11_spill] sm:$0xff] %v4365_v46  ;;  %vm1334_vm7 = vcmp.gt.f32.partialorder %v4290_v41, 0.0  ;;  %vm1335_vm8 = vcmp.gt.f32.partialorder %v4293_v32, 0.0  ;;  %vm1336_vm9 = vcmp.gt.f32.partialorder %v4296_v7, 0.0  ;;  %vm1337_vm10 = vcmp.gt.f32.partialorder %v4299_v1, 0.0 }
  0xc2   : > { %6432 = vst [vmem:[#allocation61_spill] sm:$0xff] %v4371_v18  ;;  %6433 = vst [vmem:[#allocation62_spill] sm:$0xff] %v4377_v16  ;;  %vm1338_vm11 = vcmp.gt.f32.partialorder %v4302_v19, 0.0  ;;  %vm1339_vm0 = vcmp.gt.f32.partialorder %v4305_v17, 0.0  ;;  %vm1340_vm1 = vcmp.gt.f32.partialorder %v4308_v28, 0.0  ;;  %vm1341_vm2 = vcmp.gt.f32.partialorder %v4311_v31, 0.0 }
  0xc3   : > { %6434 = vst [vmem:[#allocation63_spill] sm:$0xff] %v4380_v53  ;;  %vm1342_vm3 = vcmp.gt.f32.partialorder %v4314_v23, 0.0  ;;  %vm1343_vm6 = vcmp.gt.f32.partialorder %v4317_v38, 0.0  ;;  %vm1344_vm5 = vcmp.gt.f32.partialorder %v4320_v8, 0.0  ;;  %vm1345_vm4 = vcmp.gt.f32.partialorder %v4323_v58, 0.0 }
  0xc4   : > { %v1366_v39 = vmul.f32 %v4290_v41, %v6435_v5  ;;  %v1367_v4 = vmul.f32 %v4293_v32, %v6435_v5  ;;  %v1368_v6 = vmul.f32 %v4296_v7, %v6435_v5  ;;  %v1369_v59 = vmul.f32 %v4299_v1, %v6435_v5 }
  0xc5   : > { %v1370_v33 = vmul.f32 %v4302_v19, %v6435_v5  ;;  %v1371_v13 = vmul.f32 %v4305_v17, %v6435_v5  ;;  %v1372_v34 = vmul.f32 %v4308_v28, %v6435_v5  ;;  %v1373_v11 = vmul.f32 %v4311_v31, %v6435_v5 }
  0xc6   : > { %v1374_v25 = vmul.f32 %v4314_v23, %v6435_v5  ;;  %v1375_v30 = vmul.f32 %v4317_v38, %v6435_v5  ;;  %v1376_v24 = vmul.f32 %v4320_v8, %v6435_v5  ;;  %v1377_v37 = vmul.f32 %v4323_v58, %v6435_v5 }
  0xc7   : > { %v1378_v54 = vmul.f32 %v4326_v52, %v6435_v5  ;;  %v1379_v57 = vmul.f32 %v4329_v29, %v6435_v5  ;;  %v1380_v43 = vmul.f32 %v4332_v44, %v6435_v5  ;;  %v1381_v27 = vmul.f32 %v4335_v9, %v6435_v5 }
  0xc8   : > { %v1382_v56 = vmul.f32 %v4338_v40, %v6435_v5  ;;  %v1383_v55 = vmul.f32 %v4341_v3, %v6435_v5  ;;  %v1384_v60 = vmul.f32 %v4344_v20, %v6435_v5  ;;  %v1385_v61 = vmul.f32 %v4347_v15, %v6435_v5 }
  0xc9   : > { %v1386_v36 = vmul.f32 %v4350_v14, %v6435_v5  ;;  %v1387_v62 = vmul.f32 %v4353_v48, %v6435_v5  ;;  %vm1362_vm14 = vcmp.gt.f32.partialorder %v4374_v0, 0.0  ;;  %vm1363_vm15 = vcmp.gt.f32.partialorder %v4377_v16, 0.0 }
  0xca   : > { %vm1364_vm12 = vcmp.gt.f32.partialorder %v4380_v53, 0.0  ;;  %vm1365_vm13 = vcmp.gt.f32.partialorder %v4383_v26, 0.0  ;;  %v1388_v63 = vmul.f32 %v4356_v22, %v6435_v5  ;;  %v1389_v45 = vmul.f32 %v4359_v10, %v6435_v5 }
  0xcb   : > { %v1390_v49 = vmul.f32 %v4362_v2, %v6435_v5  ;;  %v1391_v50 = vmul.f32 %v4365_v46, %v6435_v5  ;;  %v1392_v35 = vmul.f32 %v4368_v12, %v6435_v5  ;;  %v1393_v47 = vmul.f32 %v4371_v18, %v6435_v5 }
  0xcc   : > { %v1394_v21 = vmul.f32 %v4374_v0, %v6435_v5  ;;  %v1395_v42 = vmul.f32 %v4377_v16, %v6435_v5  ;;  %v1396_v51 = vmul.f32 %v4380_v53, %v6435_v5  ;;  %v1397_v2 = vmul.f32 %v4383_v26, %v6435_v5 }
  0xcd   : > { %v4484_v46 = vsel %vm1334_vm7, %v4290_v41, %v1366_v39  ;;  %v4489_v18 = vsel %vm1335_vm8, %v4293_v32, %v1367_v4  ;;  %v4494_v16 = vsel %vm1336_vm9, %v4296_v7, %v1368_v6  ;;  %v4499_v53 = vsel %vm1337_vm10, %v4299_v1, %v1369_v59 }
  0xce   : > { %v4504_v41 = vsel %vm1338_vm11, %v4302_v19, %v1370_v33  ;;  %v4509_v32 = vsel %vm1339_vm0, %v4305_v17, %v1371_v13  ;;  %v4514_v7 = vsel %vm1340_vm1, %v4308_v28, %v1372_v34  ;;  %v4519_v1 = vsel %vm1341_vm2, %v4311_v31, %v1373_v11  ;;  %v6448_v34 = vld [vmem:[#allocation9_spill] sm:$0xff] }
  0xcf   : > { %v4524_v19 = vsel %vm1342_vm3, %v4314_v23, %v1374_v25  ;;  %v4529_v17 = vsel %vm1343_vm6, %v4317_v38, %v1375_v30  ;;  %v4534_v28 = vsel %vm1344_vm5, %v4320_v8, %v1376_v24  ;;  %v4539_v31 = vsel %vm1345_vm4, %v4323_v58, %v1377_v37  ;;  %v6449_v25 = vld [vmem:[#allocation10_spill] sm:$0xff] }
  0xd0   : > { %v3331_v39 = vmov 858984721   ;;  %v3332_v6 = vmov 2004309333   ;;  %vm6436_vm7 = vcmp.gt.f32.partialorder %v4326_v52, 0.0  ;;  %vm6437_vm6 = vcmp.gt.f32.partialorder %v4329_v29, 0.0 }
  0xd1   : > { %v1431_v4 = vunpack.c.l.s4 %v3331_v39  ;;  %v1438_v23 = vunpack.c.l.s4 %v3332_v6  ;;  %v4544_v59 = vsel %vm6436_vm7, %v4326_v52, %v1378_v54  ;;  %v4549_v38 = vsel %vm6437_vm6, %v4329_v29, %v1379_v57  ;;  %v6459_v57 = vld [vmem:[#allocation62_spill] sm:$0xff]  ;;  %v6481_v39 = vld [vmem:[#allocation20_spill] sm:$0xff] }
  0xd2   : > { %vm6438_vm5 = vcmp.gt.f32.partialorder %v4332_v44, 0.0  ;;  %vm6439_vm4 = vcmp.gt.f32.partialorder %v4335_v9, 0.0  ;;  %vm6440_vm8 = vcmp.gt.f32.partialorder %v4338_v40, 0.0  ;;  %vm6441_vm9 = vcmp.gt.f32.partialorder %v4341_v3, 0.0 }
  0xd3   : > { %v4554_v8 = vsel %vm6438_vm5, %v4332_v44, %v1380_v43  ;;  %v4559_v58 = vsel %vm6439_vm4, %v4335_v9, %v1381_v27  ;;  %v4564_v52 = vsel %vm6440_vm8, %v4338_v40, %v1382_v56  ;;  %v4569_v29 = vsel %vm6441_vm9, %v4341_v3, %v1383_v55  ;;  %v6461_v27 = vld [vmem:[#allocation63_spill] sm:$0xff] }
  0xd4   : > { %v1432_v33 = vunpack.c.0.s8 %v1431_v4  ;;  %v1439_v13 = vunpack.c.0.s8 %v1438_v23  ;;  %vm6442_vm10 = vcmp.gt.f32.partialorder %v4344_v20, 0.0  ;;  %vm6443_vm11 = vcmp.gt.f32.partialorder %v4347_v15, 0.0  ;;  %v6464_v56 = vld [vmem:[#allocation15_spill] sm:$0xff]  ;;  %v6484_v23 = vld [vmem:[#allocation21_spill] sm:$0xff] }
  0xd5   : > { %v4574_v44 = vsel %vm6442_vm10, %v4344_v20, %v1384_v60  ;;  %v4579_v9 = vsel %vm6443_vm11, %v4347_v15, %v1385_v61  ;;  %vm6444_vm0 = vcmp.gt.f32.partialorder %v4350_v14, 0.0  ;;  %vm6445_vm1 = vcmp.gt.f32.partialorder %v4353_v48, 0.0  ;;  %v6469_v60 = vld [vmem:[#allocation16_spill] sm:$0xff] }
  0xd6   : > { %v4584_v40 = vsel %vm6444_vm0, %v4350_v14, %v1386_v36  ;;  %v4589_v3 = vsel %vm6445_vm1, %v4353_v48, %v1387_v62  ;;  %vm6446_vm2 = vcmp.gt.f32.partialorder %v4356_v22, 0.0  ;;  %vm6447_vm3 = vcmp.gt.f32.partialorder %v4359_v10, 0.0  ;;  %v6451_v48 = vld [vmem:[#allocation11_spill] sm:$0xff]  ;;  %v6475_v62 = vld [vmem:[#allocation18_spill] sm:$0xff] }
  0xd7   : > { %v4594_v20 = vsel %vm6446_vm2, %v4356_v22, %v1388_v63  ;;  %v4599_v15 = vsel %vm6447_vm3, %v4359_v10, %v1389_v45  ;;  %v1435_v11 = vsub.s32 %v1432_v33, %v6448_v34  ;;  %v1442_v14 = vsub.s32 %v1439_v13, %v6448_v34  ;;  %v6455_v10 = vld [vmem:[#allocation61_spill] sm:$0xff] }
  0xd8   : > { %vm6450_vm7 = vcmp.gt.f32.partialorder %v6449_v25, 0.0  ;;  %vm6452_vm6 = vcmp.gt.f32.partialorder %v6451_v48, 0.0  ;;  %vm6453_vm5 = vcmp.gt.f32.partialorder %v4368_v12, 0.0  ;;  %vm6456_vm4 = vcmp.gt.f32.partialorder %v6455_v10, 0.0 }
  0xd9   : > { %v4606_v30 = vsel %vm6450_vm7, %v6449_v25, %v1390_v49  ;;  %v4611_v24 = vsel %vm6452_vm6, %v6451_v48, %v1391_v50  ;;  %v4616_v22 = vsel %vm6453_vm5, %v4368_v12, %v1392_v35  ;;  %v4621_v37 = vsel %vm6456_vm4, %v6455_v10, %v1393_v47  ;;  %v6478_v49 = vld [vmem:[#allocation19_spill] sm:$0xff]  ;;  %v6487_v25 = vld [vmem:[#allocation22_spill] sm:$0xff] }
  0xda   : > { %6454 = vst [vmem:[#allocation10_spill] sm:$0xff] %v4616_v22  ;;  %6457 = vst [vmem:[#allocation11_spill] sm:$0xff] %v4621_v37  ;;  %v4626_v54 = vsel %vm1362_vm14, %v4374_v0, %v1394_v21  ;;  %v4631_v43 = vsel %vm1363_vm15, %v6459_v57, %v1395_v42  ;;  %v4636_v12 = vsel %vm1364_vm12, %v6461_v27, %v1396_v51  ;;  %v4650_v0 = vsub.s32 1, %v6448_v34  ;;  %v6490_v57 = vld [vmem:[#allocation23_spill] sm:$0xff] }
  0xdb   : > { %6458 = vst [vmem:[#allocation61_spill] sm:$0xff] %v4626_v54  ;;  %6460 = vst [vmem:[#allocation62_spill] sm:$0xff] %v4631_v43  ;;  %v4641_v47 = vsel %vm1365_vm13, %v4383_v26, %v1397_v2  ;;  %v4644_v55 = vrot.slane %v6464_v56, %v1435_v11  ;;  %v4647_v21 = vrot.slane %v6464_v56, %v1442_v14  ;;  %v4653_v42 = vsub.s32 5, %v6448_v34  ;;  %v6472_v2 = vld [vmem:[#allocation17_spill] sm:$0xff] }
  0xdc   : > { %6462 = vst [vmem:[#allocation63_spill] sm:$0xff] %v4636_v12  ;;  %6463 = vst [vmem:[#allocation64_spill] sm:$0xff] %v4641_v47  ;;  %v4656_v51 = vrot.slane %v6469_v60, %v1435_v11  ;;  %v4659_v61 = vrot.slane %v6469_v60, %v1442_v14  ;;  %v4662_v26 = vrot.slane %v6472_v2, %v1435_v11  ;;  %v6493_v60 = vld [vmem:[#allocation24_spill] sm:$0xff]  ;;  %vm6523_vm12 = vcmask 1041409  }
  0xdd   : > { %6465 = vst [vmem:[#allocation15_spill] sm:$0xff] %v4644_v55  ;;  %6466 = vst [vmem:[#allocation65_spill] sm:$0xff] %v4647_v21  ;;  %v4665_v36 = vrot.slane %v6472_v2, %v1442_v14  ;;  %v4668_v63 = vrot.slane %v6475_v62, %v1435_v11  ;;  %v4671_v45 = vrot.slane %v6475_v62, %v1442_v14  ;;  %vm6527_vm8 = vcmask 1042434  }
  0xde   : > { %6467 = vst [vmem:[#allocation66_spill] sm:$0xff] %v4650_v0  ;;  %6468 = vst [vmem:[#allocation67_spill] sm:$0xff] %v4653_v42  ;;  %v4674_v50 = vrot.slane %v6478_v49, %v1435_v11  ;;  %v4677_v35 = vrot.slane %v6478_v49, %v1442_v14  ;;  %v4680_v4 = vrot.slane %v6481_v39, %v1435_v11  ;;  %v6496_v49 = vld [vmem:[#allocation25_spill] sm:$0xff]  ;;  %vm6531_vm0 = vcmask 1043459  }
  0xdf   : > { %6470 = vst [vmem:[#allocation16_spill] sm:$0xff] %v4656_v51  ;;  %6471 = vst [vmem:[#allocation68_spill] sm:$0xff] %v4659_v61  ;;  %v4683_v6 = vrot.slane %v6481_v39, %v1442_v14  ;;  %v4686_v33 = vrot.slane %v6484_v23, %v1435_v11  ;;  %v4689_v13 = vrot.slane %v6484_v23, %v1442_v14  ;;  %vm6535_vm7 = vcmask 1044484  }
  0xe0   : > { %6473 = vst [vmem:[#allocation17_spill] sm:$0xff] %v4662_v26  ;;  %6474 = vst [vmem:[#allocation69_spill] sm:$0xff] %v4665_v36  ;;  %v4692_v48 = vrot.slane %v6487_v25, %v1435_v11  ;;  %v4695_v10 = vrot.slane %v6487_v25, %v1442_v14  ;;  %v4698_v27 = vrot.slane %v6490_v57, %v1435_v11  ;;  %v6499_v25 = vld [vmem:[#allocation26_spill] sm:$0xff] }
  0xe1   : > { %6476 = vst [vmem:[#allocation18_spill] sm:$0xff] %v4668_v63  ;;  %6477 = vst [vmem:[#allocation70_spill] sm:$0xff] %v4671_v45  ;;  %v4701_v56 = vrot.slane %v6490_v57, %v1442_v14  ;;  %v4704_v2 = vrot.slane %v6493_v60, %v1435_v11  ;;  %v4707_v62 = vrot.slane %v6493_v60, %v1442_v14  ;;  %v6502_v57 = vld [vmem:[#allocation27_spill] sm:$0xff]  ;;  %v6505_v60 = vld [vmem:[#allocation28_spill] sm:$0xff] }
  0xe2   : > { %6479 = vst [vmem:[#allocation19_spill] sm:$0xff] %v4674_v50  ;;  %6480 = vst [vmem:[#allocation71_spill] sm:$0xff] %v4677_v35  ;;  %v4710_v39 = vrot.slane %v6496_v49, %v1435_v11  ;;  %v4713_v23 = vrot.slane %v6496_v49, %v1442_v14  ;;  %v4716_v34 = vrot.slane %v6499_v25, %v1435_v11  ;;  %v6508_v49 = vld [vmem:[#allocation29_spill] sm:$0xff] }
  0xe3   : > { %6482 = vst [vmem:[#allocation20_spill] sm:$0xff] %v4680_v4  ;;  %6483 = vst [vmem:[#allocation72_spill] sm:$0xff] %v4683_v6  ;;  %v4719_v5 = vrot.slane %v6499_v25, %v1442_v14  ;;  %v4722_v42 = vrot.slane %v6502_v57, %v1435_v11  ;;  %v4725_v0 = vrot.slane %v6502_v57, %v1442_v14  ;;  %v6511_v25 = vld [vmem:[#allocation30_spill] sm:$0xff] }
  0xe4   : > { %6485 = vst [vmem:[#allocation21_spill] sm:$0xff] %v4686_v33  ;;  %6486 = vst [vmem:[#allocation73_spill] sm:$0xff] %v4689_v13  ;;  %v4728_v47 = vrot.slane %v6505_v60, %v1435_v11  ;;  %v4731_v12 = vrot.slane %v6505_v60, %v1442_v14  ;;  %v4734_v43 = vrot.slane %v6508_v49, %v1435_v11 }
  0xe5   : > { %6488 = vst [vmem:[#allocation22_spill] sm:$0xff] %v4692_v48  ;;  %6489 = vst [vmem:[#allocation74_spill] sm:$0xff] %v4695_v10  ;;  %v4737_v54 = vrot.slane %v6508_v49, %v1442_v14  ;;  %v4740_v37 = vrot.slane %v6511_v25, %v1435_v11  ;;  %v4743_v22 = vrot.slane %v6511_v25, %v1442_v14  ;;  %v6514_v14 = vld [vmem:[#allocation10_spill] sm:$0xff]  ;;  %v6515_v25 = vld [vmem:[#allocation11_spill] sm:$0xff] }
  0xe6   : > { %6491 = vst [vmem:[#allocation23_spill] sm:$0xff] %v4698_v27  ;;  %6492 = vst [vmem:[#allocation75_spill] sm:$0xff] %v4701_v56  ;;  %v4747_v57 = vadd.f32 %v4644_v55, %v4484_v46  ;;  %v4751_v60 = vadd.f32 %v4647_v21, %v4489_v18  ;;  %v4759_v49 = vadd.f32 %v4659_v61, %v4499_v53 }
  0xe7   : > { %6494 = vst [vmem:[#allocation24_spill] sm:$0xff] %v4704_v2  ;;  %6495 = vst [vmem:[#allocation76_spill] sm:$0xff] %v4707_v62  ;;  %v4763_v11 = vadd.f32 %v4662_v26, %v4504_v41  ;;  %v4767_v46 = vadd.f32 %v4665_v36, %v4509_v32  ;;  %v4771_v18 = vadd.f32 %v4668_v63, %v4514_v7 }
  0xe8   : > { %6497 = vst [vmem:[#allocation25_spill] sm:$0xff] %v4710_v39  ;;  %6498 = vst [vmem:[#allocation77_spill] sm:$0xff] %v4713_v23  ;;  %v4779_v53 = vadd.f32 %v4674_v50, %v4524_v19  ;;  %v4783_v41 = vadd.f32 %v4677_v35, %v4529_v17  ;;  %v4787_v32 = vadd.f32 %v4680_v4, %v4534_v28 }
  0xe9   : > { %6500 = vst [vmem:[#allocation26_spill] sm:$0xff] %v4716_v34  ;;  %6501 = vst [vmem:[#allocation78_spill] sm:$0xff] %v4719_v5  ;;  %v4791_v7 = vadd.f32 %v4683_v6, %v4539_v31  ;;  %v4799_v19 = vadd.f32 %v4689_v13, %v4549_v38  ;;  %v4803_v17 = vadd.f32 %v4692_v48, %v4554_v8 }
  0xea   : > { %6503 = vst [vmem:[#allocation27_spill] sm:$0xff] %v4722_v42  ;;  %6504 = vst [vmem:[#allocation79_spill] sm:$0xff] %v4725_v0  ;;  %v4807_v28 = vadd.f32 %v4695_v10, %v4559_v58  ;;  %v4811_v31 = vadd.f32 %v4698_v27, %v4564_v52  ;;  %v4819_v38 = vadd.f32 %v4704_v2, %v4574_v44 }
  0xeb   : > { %6506 = vst [vmem:[#allocation28_spill] sm:$0xff] %v4728_v47  ;;  %6507 = vst [vmem:[#allocation80_spill] sm:$0xff] %v4731_v12  ;;  %v4823_v8 = vadd.f32 %v4707_v62, %v4579_v9  ;;  %v4827_v58 = vadd.f32 %v4710_v39, %v4584_v40  ;;  %v4831_v52 = vadd.f32 %v4713_v23, %v4589_v3 }
  0xec   : > { %6509 = vst [vmem:[#allocation29_spill] sm:$0xff] %v4734_v43  ;;  %6510 = vst [vmem:[#allocation81_spill] sm:$0xff] %v4737_v54  ;;  %v4755_v43 = vadd.f32 %v4656_v51, %v4494_v16  ;;  %v4775_v16 = vadd.f32 %v4671_v45, %v4519_v1  ;;  %v4795_v1 = vadd.f32 %v4686_v33, %v4544_v59 }
  0xed   : > { %6512 = vst [vmem:[#allocation30_spill] sm:$0xff] %v4740_v37  ;;  %6513 = vst [vmem:[#allocation82_spill] sm:$0xff] %v4743_v22  ;;  %v4815_v59 = vadd.f32 %v4701_v56, %v4569_v29  ;;  %v4835_v29 = vadd.f32 %v4716_v34, %v4594_v20  ;;  %v4839_v44 = vadd.f32 %v4719_v5, %v4599_v15  ;;  %v6516_v34 = vld [vmem:[#allocation61_spill] sm:$0xff]  ;;  %v6518_v5 = vld [vmem:[#allocation62_spill] sm:$0xff] }
  0xee   : > { %v4843_v9 = vadd.f32 %v4722_v42, %v4606_v30  ;;  %v4847_v40 = vadd.f32 %v4725_v0, %v4611_v24  ;;  %v4851_v3 = vadd.f32 %v4728_v47, %v6514_v14  ;;  %v4855_v20 = vadd.f32 %v4731_v12, %v6515_v25  ;;  %v6519_v42 = vld [vmem:[#allocation63_spill] sm:$0xff]  ;;  %v6520_v0 = vld [vmem:[#allocation64_spill] sm:$0xff]  ;;  %v6521_v47 = vld [vmem:[#allocation66_spill] sm:$0xff] }
  0xef   : > { %v4863_v30 = vadd.f32 %v4737_v54, %v6518_v5  ;;  %v4867_v24 = vadd.f32 %v4740_v37, %v6519_v42  ;;  %v4871_v14 = vadd.f32 %v4743_v22, %v6520_v0  ;;  %v1753_v25 = vrot.slane %v4747_v57, %v6521_v47  ;;  %v6522_v12 = vld [vmem:[#allocation67_spill] sm:$0xff]  ;;  %vm6524_vm13 = vmmov %vm6523_vm12 }
  0xf0   : > { %v1757_v39 = vrot.slane %v4747_v57, %v6522_v12  ;;  %v1765_v5 = vrot.slane %v4755_v43, %v6521_v47  ;;  %v1769_v42 = vrot.slane %v4755_v43, %v6522_v12  ;;  %v1773_v37 = vrot.slane %v4759_v49, %v6521_v47  ;;  %vm6525_vm14 = vmmov %vm6523_vm12 }
  0xf1   : > { %v1777_v0 = vrot.slane %v4763_v11, %v6521_v47  ;;  %v1781_v22 = vrot.slane %v4763_v11, %v6522_v12  ;;  %v1785_v57 = vrot.slane %v4767_v46, %v6521_v47  ;;  %v1793_v54 = vrot.slane %v4771_v18, %v6522_v12  ;;  %vm6526_vm15 = vmmov %vm6523_vm12 }
  0xf2   : > { %v1797_v43 = vrot.slane %v4775_v16, %v6521_v47  ;;  %v1801_v49 = vrot.slane %v4779_v53, %v6521_v47  ;;  %v1809_v11 = vrot.slane %v4783_v41, %v6521_v47  ;;  %v1813_v46 = vrot.slane %v4787_v32, %v6521_v47  ;;  %vm6528_vm9 = vmmov %vm6527_vm8 }
  0xf3   : > { %v6517_v23 = vld [vmem:[#allocation29_spill] sm:$0xff]  ;;  %v1817_v62 = vrot.slane %v4787_v32, %v6522_v12  ;;  %v1825_v16 = vrot.slane %v4795_v1, %v6521_v47  ;;  %v1829_v2 = vrot.slane %v4795_v1, %v6522_v12  ;;  %v1837_v41 = vrot.slane %v4803_v17, %v6521_v47  ;;  %vm6529_vm10 = vmmov %vm6527_vm8 }
  0xf4   : > { %v4859_v15 = vadd.f32 %v6517_v23, %v6516_v34  ;;  %v1761_v34 = vrot.slane %v4751_v60, %v6521_v47  ;;  %v1789_v60 = vrot.slane %v4771_v18, %v6521_v47  ;;  %v1805_v23 = vrot.slane %v4779_v53, %v6522_v12  ;;  %vm6530_vm11 = vmmov %vm6527_vm8 }
  0xf5   : > { %v1821_v18 = vrot.slane %v4791_v7, %v6521_v47  ;;  %v1833_v53 = vrot.slane %v4799_v19, %v6521_v47  ;;  %v1841_v56 = vrot.slane %v4803_v17, %v6522_v12  ;;  %v1845_v32 = vrot.slane %v4807_v28, %v6521_v47  ;;  %vm6532_vm1 = vmmov %vm6531_vm0 }
  0xf6   : > { %v1849_v7 = vrot.slane %v4811_v31, %v6521_v47  ;;  %v1853_v27 = vrot.slane %v4811_v31, %v6522_v12  ;;  %v1857_v1 = vrot.slane %v4815_v59, %v6521_v47  ;;  %v1861_v19 = vrot.slane %v4819_v38, %v6521_v47  ;;  %vm6533_vm2 = vmmov %vm6531_vm0 }
  0xf7   : > { %v1865_v10 = vrot.slane %v4819_v38, %v6522_v12  ;;  %v1869_v17 = vrot.slane %v4823_v8, %v6521_v47  ;;  %v1873_v28 = vrot.slane %v4827_v58, %v6521_v47  ;;  %v1877_v48 = vrot.slane %v4827_v58, %v6522_v12  ;;  %vm6534_vm3 = vmmov %vm6531_vm0 }
  0xf8   : > { %v1881_v31 = vrot.slane %v4831_v52, %v6521_v47  ;;  %v1885_v59 = vrot.slane %v4835_v29, %v6521_v47  ;;  %v1889_v13 = vrot.slane %v4835_v29, %v6522_v12  ;;  %v1893_v38 = vrot.slane %v4839_v44, %v6521_v47  ;;  %vm6536_vm6 = vmmov %vm6535_vm7 }
  0xf9   : > { %v1897_v8 = vrot.slane %v4843_v9, %v6521_v47  ;;  %v1901_v33 = vrot.slane %v4843_v9, %v6522_v12  ;;  %v1905_v58 = vrot.slane %v4847_v40, %v6521_v47  ;;  %v1909_v52 = vrot.slane %v4851_v3, %v6521_v47  ;;  %vm6537_vm5 = vmmov %vm6536_vm6 }
  0xfa   : > { %v1921_v6 = vrot.slane %v4859_v15, %v6521_v47  ;;  %v1933_v29 = vrot.slane %v4867_v24, %v6521_v47  ;;  %v1942_v44 = vsel %vm6523_vm12, %v1765_v5, %v1753_v25  ;;  %v1949_v4 = vsel %vm6524_vm13, %v1769_v42, %v1757_v39  ;;  %vm6538_vm4 = vmmov %vm6537_vm5 }
  0xfb   : > { %v1956_v35 = vsel %vm6525_vm14, %v1773_v37, %v1761_v34  ;;  %v1963_v9 = vsel %vm6526_vm15, %v1861_v19, %v1849_v7  ;;  %v1943_v50 = vsel %vm6527_vm8, %v1777_v0, %v1942_v44  ;;  %v1950_v40 = vsel %vm6528_vm9, %v1781_v22, %v1949_v4  ;;  %v2007_v19 = vld [vmem:[%s3439_s24 + $0x2a] sm:$0x2a] }
  0xfc   : > { %v1957_v45 = vsel %vm6529_vm10, %v1785_v57, %v1956_v35  ;;  %v1964_v63 = vsel %vm6530_vm11, %v1873_v28, %v1963_v9  ;;  %v1944_v36 = vsel %vm6531_vm0, %v1789_v60, %v1943_v50  ;;  %v1951_v26 = vsel %vm6532_vm1, %v1793_v54, %v1950_v40  ;;  %v2011_v40 = vld [vmem:[%s3439_s24 + $0x42] sm:$0x2a] }
  0xfd   : > { %v1958_v25 = vsel %vm6533_vm2, %v1797_v43, %v1957_v45  ;;  %v1965_v39 = vsel %vm6534_vm3, %v1885_v59, %v1964_v63  ;;  %v1945_v37 = vsel %vm6535_vm7, %v1801_v49, %v1944_v36  ;;  %v1952_v34 = vsel %vm6536_vm6, %v1805_v23, %v1951_v26 }
  0xfe   : > { %v1959_v5 = vsel %vm6537_vm5, %v1809_v11, %v1958_v25  ;;  %v1966_v22 = vsel %vm6538_vm4, %v1897_v8, %v1965_v39  ;;  %vm6539_vm12 = vcmask 1045509   ;;  %vm6543_vm8 = vcmask 1046534   ;;  %v2009_v8 = vld [vmem:[%s3439_s24 + $0x36] sm:$0x2a]  ;;  %v2012_v25 = vld [vmem:[%s3439_s24 + $0x48] sm:$0x2a] }
  0xff   : > { %v1946_v35 = vsel %vm6539_vm12, %v1813_v46, %v1945_v37  ;;  %vm6540_vm13 = vmmov %vm6539_vm12  ;;  %vm6547_vm0 = vcmask 1047559   ;;  %v1913_v57 = vrot.slane %v4851_v3, %v6522_v12  ;;  %v1917_v60 = vrot.slane %v4855_v20, %v6521_v47  ;;  %v2002_v46 = vld [vmem:[%s3439_s24 + $0xc] sm:$0x2a] }
 0x100   : > { %v1953_v4 = vsel %vm6540_vm13, %v1817_v62, %v1952_v34  ;;  %vm6541_vm14 = vmmov %vm6539_vm12  ;;  %v1947_v36 = vsel %vm6543_vm8, %v1825_v16, %v1946_v35  ;;  %vm6551_vm7 = vcmask 1041409   ;;  %vm6553_vm5 = vcmask 1042434   ;;  %v2003_v16 = vld [vmem:[%s3439_s24 + $0x12] sm:$0x2a] }
 0x101   : > { %v1960_v54 = vsel %vm6541_vm14, %v1821_v18, %v1959_v5  ;;  %vm6542_vm15 = vmmov %vm6539_vm12  ;;  %v1948_v23 = vsel %vm6547_vm0, %v1837_v41, %v1947_v36  ;;  %vm6555_vm12 = vcmask 1043459   ;;  %vm6557_vm14 = vcmask 1044484   ;;  %v2005_v41 = vld [vmem:[%s3439_s24 + $0x1e] sm:$0x2a]  ;;  %v2014_v35 = vld [vmem:[%s3439_s24 + $0x54] sm:$0x2a] }
 0x102   : > { %v1967_v45 = vsel %vm6542_vm15, %v1909_v52, %v1966_v22  ;;  %vm6544_vm9 = vmmov %vm6543_vm8  ;;  %3193 = vst [vmem:[%s4220_s30 + $0x30] sm:$0xff] %v1948_v23  ;;  %v2020_v59 = vunpack.c.l.bf16 %v2002_v46  ;;  %v2022_v52 = vunpack.c.l.bf16 %v2003_v16  ;;  %v2026_v39 = vunpack.c.l.bf16 %v2005_v41  ;;  %v2013_v22 = vld [vmem:[%s3439_s24 + $0x4e] sm:$0x2a] }
 0x103   : > { %v1954_v26 = vsel %vm6544_vm9, %v1829_v2, %v1953_v4  ;;  %vm6545_vm10 = vmmov %vm6543_vm8  ;;  %v1970_v2 = vsel %vm6551_vm7, %v1865_v10, %v1853_v27  ;;  %v1937_v10 = vrot.slane %v4867_v24, %v6522_v12  ;;  %v1941_v27 = vrot.slane %v4871_v14, %v6521_v47  ;;  %v2001_v14 = vld [vmem:[%s3439_s24 + $0x6] sm:$0x2a] }
 0x104   : > { %v1961_v63 = vsel %vm6545_vm10, %v1833_v53, %v1960_v54  ;;  %vm6546_vm11 = vmmov %vm6543_vm8  ;;  %v1971_v3 = vsel %vm6553_vm5, %v1877_v48, %v1970_v2  ;;  %vm6559_vm8 = vcmask 1045509   ;;  %v2004_v53 = vld [vmem:[%s3439_s24 + $0x18] sm:$0x2a]  ;;  %v2018_v28 = vunpack.c.l.bf16 %v2001_v14 }
 0x105   : > { %v1968_v50 = vsel %vm6546_vm11, %v1921_v6, %v1967_v45  ;;  %vm6548_vm1 = vmmov %vm6547_vm0  ;;  %v1925_v6 = vrot.slane %v4859_v15, %v6522_v12  ;;  %v1972_v49 = vsel %vm6555_vm12, %v1889_v13, %v1971_v3  ;;  %v2024_v44 = vunpack.c.l.bf16 %v2004_v53 }
 0x106   : > { %v1955_v42 = vsel %vm6548_vm1, %v1841_v56, %v1954_v26  ;;  %vm6549_vm2 = vmmov %vm6547_vm0  ;;  %v1929_v56 = vrot.slane %v4863_v30, %v6521_v47  ;;  %v1973_v48 = vsel %vm6557_vm14, %v1901_v33, %v1972_v49  ;;  %v2000_v47 = vld [vmem:[%s3439_s24] sm:$0x2a]  ;;  %v2025_v9 = vunpack.c.h.bf16 %v2004_v53  ;;  %v2015_v26 = vld [vmem:[%s3439_s24 + $0x5a] sm:$0x2a] }
 0x107   : > { %v1962_v62 = vsel %vm6549_vm2, %v1845_v32, %v1961_v63  ;;  %vm6550_vm3 = vmmov %vm6547_vm0  ;;  %3194 = vst [vmem:[%s4220_s30 + $0x38] sm:$0xff] %v1955_v42  ;;  %v1974_v11 = vsel %vm6559_vm8, %v1913_v57, %v1973_v48  ;;  %v2006_v32 = vld [vmem:[%s3439_s24 + $0x24] sm:$0x2a]  ;;  %v2016_v7 = vunpack.c.l.bf16 %v2000_v47  ;;  %v2027_v37 = vunpack.c.h.bf16 %v2005_v41 }
 0x108   : > { %v1969_v0 = vsel %vm6550_vm3, %v1933_v29, %v1968_v50  ;;  %vm6552_vm6 = vmmov %vm6551_vm7  ;;  %3195 = vst [vmem:[%s4220_s30 + $0x40] sm:$0xff] %v1962_v62  ;;  %v1975_v24 = vsel %vm6545_vm10, %v1925_v6, %v1974_v11  ;;  %v2023_v29 = vunpack.c.h.bf16 %v2003_v16  ;;  %v2028_v34 = vunpack.c.l.bf16 %v2006_v32 }
 0x109   : > { %v1977_v43 = vsel %vm6552_vm6, %v1869_v17, %v1857_v1  ;;  %3196 = vst [vmem:[%s4220_s30 + $0x48] sm:$0xff] %v1969_v0  ;;  %vm6554_vm4 = vmmov %vm6553_vm5  ;;  %v1976_v33 = vsel %vm6547_vm0, %v1937_v10, %v1975_v24  ;;  %v2017_v1 = vunpack.c.h.bf16 %v2000_v47  ;;  %v2008_v17 = vld [vmem:[%s3439_s24 + $0x30] sm:$0x2a]  ;;  %v2029_v5 = vunpack.c.h.bf16 %v2006_v32 }
 0x10a   : > { %v1978_v20 = vsel %vm6554_vm4, %v1881_v31, %v1977_v43  ;;  %vm6556_vm13 = vmmov %vm6555_vm12  ;;  %3197 = vst [vmem:[%s4220_s30 + $0x50] sm:$0xff] %v1976_v33  ;;  %v2019_v31 = vunpack.c.h.bf16 %v2001_v14  ;;  %v2030_v4 = vunpack.c.l.bf16 %v2007_v19  ;;  %v2031_v54 = vunpack.c.h.bf16 %v2007_v19 }
 0x10b   : > { %v1979_v15 = vsel %vm6556_vm13, %v1893_v38, %v1978_v20  ;;  %vm6558_vm15 = vmmov %vm6557_vm14  ;;  %v2021_v38 = vunpack.c.h.bf16 %v2002_v46  ;;  %v2032_v45 = vunpack.c.l.bf16 %v2008_v17  ;;  %v2033_v36 = vunpack.c.h.bf16 %v2008_v17 }
 0x10c   : > { %v1980_v30 = vsel %vm6558_vm15, %v1905_v58, %v1979_v15  ;;  %vm6560_vm9 = vmmov %vm6559_vm8  ;;  %v2010_v58 = vld [vmem:[%s3439_s24 + $0x3c] sm:$0x2a]  ;;  %v2034_v63 = vunpack.c.l.bf16 %v2009_v8  ;;  %v2035_v50 = vunpack.c.h.bf16 %v2009_v8  ;;  %v2038_v62 = vunpack.c.l.bf16 %v2011_v40 }
 0x10d   : > { %v1981_v12 = vsel %vm6560_vm9, %v1917_v60, %v1980_v30  ;;  %vm6561_vm11 = vmmov %vm6545_vm10  ;;  %v2036_v23 = vunpack.c.l.bf16 %v2010_v58  ;;  %v2037_v42 = vunpack.c.h.bf16 %v2010_v58  ;;  %v2039_v0 = vunpack.c.h.bf16 %v2011_v40 }
 0x10e   : > { %v1982_v13 = vsel %vm6561_vm11, %v1929_v56, %v1981_v12  ;;  %vm6562_vm1 = vmmov %vm6547_vm0  ;;  %v2040_v57 = vunpack.c.l.bf16 %v2012_v25  ;;  %v2048_v60 = vstv %s5015_s10  ;;  %v2041_v2 = vunpack.c.h.bf16 %v2012_v25 }
 0x10f   : > { %v1983_v18 = vsel %vm6562_vm1, %v1941_v27, %v1982_v13  ;;  %v2042_v43 = vunpack.c.l.bf16 %v2013_v22  ;;  %v2043_v6 = vunpack.c.h.bf16 %v2013_v22  ;;  %v2044_v56 = vunpack.c.l.bf16 %v2014_v35 }
 0x110   : > { %3198 = vst [vmem:[%s4220_s30 + $0x58] sm:$0xff] %v1983_v18  ;;  %v2045_v3 = vunpack.c.h.bf16 %v2014_v35  ;;  %v2046_v20 = vunpack.c.l.bf16 %v2015_v26  ;;  %v2047_v10 = vunpack.c.h.bf16 %v2015_v26  ;;  %v5040_v27 = vstv %s5025_s11 }
 0x111   : > { %v2049_v49 = vsub.f32 %v2016_v7, %v2048_v60  ;;  %v2050_v15 = vsub.f32 %v2017_v1, %v2048_v60  ;;  %v2051_v48 = vsub.f32 %v2018_v28, %v2048_v60  ;;  %v2052_v30 = vsub.f32 %v2019_v31, %v2048_v60 }
 0x112   : > { %v2053_v11 = vsub.f32 %v2020_v59, %v2048_v60  ;;  %v2054_v12 = vsub.f32 %v2021_v38, %v2048_v60  ;;  %v2055_v47 = vsub.f32 %v2022_v52, %v2048_v60  ;;  %v2056_v24 = vsub.f32 %v2023_v29, %v2048_v60 }
 0x113   : > { %v2057_v13 = vsub.f32 %v2024_v44, %v2048_v60  ;;  %v2058_v14 = vsub.f32 %v2025_v9, %v2048_v60  ;;  %v2059_v46 = vsub.f32 %v2026_v39, %v2048_v60  ;;  %v2060_v33 = vsub.f32 %v2027_v37, %v2048_v60 }
 0x114   : > { %v2061_v18 = vsub.f32 %v2028_v34, %v2048_v60  ;;  %v2062_v16 = vsub.f32 %v2029_v5, %v2048_v60  ;;  %v2063_v53 = vsub.f32 %v2030_v4, %v2048_v60  ;;  %v2064_v41 = vsub.f32 %v2031_v54, %v2048_v60 }
 0x115   : > { %v2065_v32 = vsub.f32 %v2032_v45, %v2048_v60  ;;  %v2066_v19 = vsub.f32 %v2033_v36, %v2048_v60  ;;  %v2067_v17 = vsub.f32 %v2034_v63, %v2048_v60  ;;  %v2068_v8 = vsub.f32 %v2035_v50, %v2048_v60 }
 0x116   : > { %v2069_v7 = vsub.f32 %v2036_v23, %v2048_v60  ;;  %v2070_v1 = vsub.f32 %v2037_v42, %v2048_v60  ;;  %v2071_v28 = vsub.f32 %v2038_v62, %v2048_v60  ;;  %v2072_v31 = vsub.f32 %v2039_v0, %v2048_v60 }
 0x117   : > { %v2073_v59 = vsub.f32 %v2040_v57, %v2048_v60  ;;  %v2074_v38 = vsub.f32 %v2041_v2, %v2048_v60  ;;  %v2075_v58 = vsub.f32 %v2042_v43, %v2048_v60  ;;  %v2076_v52 = vsub.f32 %v2043_v6, %v2048_v60 }
 0x118   : > { %v2077_v29 = vsub.f32 %v2044_v56, %v2048_v60  ;;  %v2078_v44 = vsub.f32 %v2045_v3, %v2048_v60  ;;  %v2079_v9 = vsub.f32 %v2046_v20, %v2048_v60  ;;  %v2080_v40 = vsub.f32 %v2047_v10, %v2048_v60 }
 0x119   : > { %v5043_v25 = vmul.f32 %v5040_v27, %v2049_v49  ;;  %v5046_v39 = vmul.f32 %v5040_v27, %v2050_v15  ;;  %v5049_v37 = vmul.f32 %v5040_v27, %v2051_v48  ;;  %v5052_v34 = vmul.f32 %v5040_v27, %v2052_v30 }
 0x11a   : > { %v5055_v5 = vmul.f32 %v5040_v27, %v2053_v11  ;;  %v5058_v22 = vmul.f32 %v5040_v27, %v2054_v12  ;;  %v5061_v35 = vmul.f32 %v5040_v27, %v2055_v47  ;;  %v5064_v4 = vmul.f32 %v5040_v27, %v2056_v24 }
 0x11b   : > { %v5067_v54 = vmul.f32 %v5040_v27, %v2057_v13  ;;  %v5070_v45 = vmul.f32 %v5040_v27, %v2058_v14  ;;  %v5073_v36 = vmul.f32 %v5040_v27, %v2059_v46  ;;  %v5076_v26 = vmul.f32 %v5040_v27, %v2060_v33 }
 0x11c   : > { %v5079_v63 = vmul.f32 %v5040_v27, %v2061_v18  ;;  %v5082_v50 = vmul.f32 %v5040_v27, %v2062_v16  ;;  %v5085_v23 = vmul.f32 %v5040_v27, %v2063_v53  ;;  %v5088_v42 = vmul.f32 %v5040_v27, %v2064_v41 }
 0x11d   : > { %v5091_v62 = vmul.f32 %v5040_v27, %v2065_v32  ;;  %v5094_v0 = vmul.f32 %v5040_v27, %v2066_v19  ;;  %v5097_v57 = vmul.f32 %v5040_v27, %v2067_v17  ;;  %v5100_v60 = vmul.f32 %v5040_v27, %v2068_v8 }
 0x11e   : > { %v5103_v2 = vmul.f32 %v5040_v27, %v2069_v7  ;;  %v5106_v43 = vmul.f32 %v5040_v27, %v2070_v1  ;;  %v5109_v6 = vmul.f32 %v5040_v27, %v2071_v28  ;;  %v5112_v56 = vmul.f32 %v5040_v27, %v2072_v31 }
 0x11f   : > { %v5115_v3 = vmul.f32 %v5040_v27, %v2073_v59  ;;  %v5118_v20 = vmul.f32 %v5040_v27, %v2074_v38  ;;  %v5121_v10 = vmul.f32 %v5040_v27, %v2075_v58  ;;  %v5124_v49 = vmul.f32 %v5040_v27, %v2076_v52 }
 0x120   : > { %v5127_v15 = vmul.f32 %v5040_v27, %v2077_v29  ;;  %v5130_v48 = vmul.f32 %v5040_v27, %v2078_v44  ;;  %v5133_v30 = vmul.f32 %v5040_v27, %v2079_v9  ;;  %v5136_v11 = vmul.f32 %v5040_v27, %v2080_v40  ;;  %v6568_v27 = vld [vmem:[#allocation14_spill] sm:$0xff] }
 0x121   : > { %6563 = vst [vmem:[#allocation10_spill] sm:$0xff] %v5115_v3  ;;  %6564 = vst [vmem:[#allocation11_spill] sm:$0xff] %v5118_v20  ;;  %vm2114_vm2 = vcmp.gt.f32.partialorder %v5043_v25, 0.0  ;;  %vm2115_vm3 = vcmp.gt.f32.partialorder %v5046_v39, 0.0  ;;  %vm2116_vm7 = vcmp.gt.f32.partialorder %v5049_v37, 0.0  ;;  %vm2117_vm6 = vcmp.gt.f32.partialorder %v5052_v34, 0.0 }
 0x122   : > { %6565 = vst [vmem:[#allocation61_spill] sm:$0xff] %v5124_v49  ;;  %6566 = vst [vmem:[#allocation62_spill] sm:$0xff] %v5127_v15  ;;  %vm2118_vm5 = vcmp.gt.f32.partialorder %v5055_v5, 0.0  ;;  %vm2119_vm4 = vcmp.gt.f32.partialorder %v5058_v22, 0.0  ;;  %vm2120_vm12 = vcmp.gt.f32.partialorder %v5061_v35, 0.0  ;;  %vm2121_vm13 = vcmp.gt.f32.partialorder %v5064_v4, 0.0 }
 0x123   : > { %6567 = vst [vmem:[#allocation63_spill] sm:$0xff] %v5130_v48  ;;  %vm2122_vm14 = vcmp.gt.f32.partialorder %v5067_v54, 0.0  ;;  %vm2123_vm15 = vcmp.gt.f32.partialorder %v5070_v45, 0.0  ;;  %vm2124_vm8 = vcmp.gt.f32.partialorder %v5073_v36, 0.0  ;;  %vm2125_vm9 = vcmp.gt.f32.partialorder %v5076_v26, 0.0 }
 0x124   : > { %v2146_v12 = vmul.f32 %v5043_v25, %v6568_v27  ;;  %v2147_v47 = vmul.f32 %v5046_v39, %v6568_v27  ;;  %v2148_v24 = vmul.f32 %v5049_v37, %v6568_v27  ;;  %v2149_v13 = vmul.f32 %v5052_v34, %v6568_v27 }
 0x125   : > { %v2150_v14 = vmul.f32 %v5055_v5, %v6568_v27  ;;  %v2151_v46 = vmul.f32 %v5058_v22, %v6568_v27  ;;  %v2152_v33 = vmul.f32 %v5061_v35, %v6568_v27  ;;  %v2153_v18 = vmul.f32 %v5064_v4, %v6568_v27 }
 0x126   : > { %v2154_v16 = vmul.f32 %v5067_v54, %v6568_v27  ;;  %v2155_v53 = vmul.f32 %v5070_v45, %v6568_v27  ;;  %v2156_v41 = vmul.f32 %v5073_v36, %v6568_v27  ;;  %v2157_v32 = vmul.f32 %v5076_v26, %v6568_v27 }
 0x127   : > { %v2158_v19 = vmul.f32 %v5079_v63, %v6568_v27  ;;  %v2159_v17 = vmul.f32 %v5082_v50, %v6568_v27  ;;  %v2160_v8 = vmul.f32 %v5085_v23, %v6568_v27  ;;  %v2161_v7 = vmul.f32 %v5088_v42, %v6568_v27 }
 0x128   : > { %vm2142_vm10 = vcmp.gt.f32.partialorder %v5127_v15, 0.0  ;;  %vm2143_vm11 = vcmp.gt.f32.partialorder %v5130_v48, 0.0  ;;  %vm2144_vm0 = vcmp.gt.f32.partialorder %v5133_v30, 0.0  ;;  %vm2145_vm1 = vcmp.gt.f32.partialorder %v5136_v11, 0.0 }
 0x129   : > { %v2162_v1 = vmul.f32 %v5091_v62, %v6568_v27  ;;  %v2163_v28 = vmul.f32 %v5094_v0, %v6568_v27  ;;  %v2164_v31 = vmul.f32 %v5097_v57, %v6568_v27  ;;  %v2165_v59 = vmul.f32 %v5100_v60, %v6568_v27 }
 0x12a   : > { %v2166_v38 = vmul.f32 %v5103_v2, %v6568_v27  ;;  %v2167_v58 = vmul.f32 %v5106_v43, %v6568_v27  ;;  %v2168_v52 = vmul.f32 %v5109_v6, %v6568_v27  ;;  %v2169_v29 = vmul.f32 %v5112_v56, %v6568_v27 }
 0x12b   : > { %v2170_v44 = vmul.f32 %v5115_v3, %v6568_v27  ;;  %v2171_v9 = vmul.f32 %v5118_v20, %v6568_v27  ;;  %v2172_v40 = vmul.f32 %v5121_v10, %v6568_v27  ;;  %v2173_v61 = vmul.f32 %v5124_v49, %v6568_v27 }
 0x12c   : > { %v2174_v51 = vmul.f32 %v5127_v15, %v6568_v27  ;;  %v2175_v21 = vmul.f32 %v5130_v48, %v6568_v27  ;;  %v2176_v55 = vmul.f32 %v5133_v30, %v6568_v27  ;;  %v2177_v3 = vmul.f32 %v5136_v11, %v6568_v27 }
 0x12d   : > { %v2178_v20 = vsel %vm2114_vm2, %v5043_v25, %v2146_v12  ;;  %v2179_v49 = vsel %vm2115_vm3, %v5046_v39, %v2147_v47  ;;  %v2180_v15 = vsel %vm2116_vm7, %v5049_v37, %v2148_v24  ;;  %v2181_v48 = vsel %vm2117_vm6, %v5052_v34, %v2149_v13  ;;  %v6581_v12 = vld [vmem:[#allocation10_spill] sm:$0xff]  ;;  %v6583_v47 = vld [vmem:[#allocation11_spill] sm:$0xff]  ;;  %v6586_v24 = vld [vmem:[#allocation61_spill] sm:$0xff] }
 0x12e   : > { %v2182_v27 = vsel %vm2118_vm5, %v5055_v5, %v2150_v14  ;;  %v2183_v25 = vsel %vm2119_vm4, %v5058_v22, %v2151_v46  ;;  %v2184_v39 = vsel %vm2120_vm12, %v5061_v35, %v2152_v33  ;;  %v2185_v37 = vsel %vm2121_vm13, %v5064_v4, %v2153_v18  ;;  %v6588_v13 = vld [vmem:[#allocation62_spill] sm:$0xff]  ;;  %v6589_v14 = vld [vmem:[#allocation63_spill] sm:$0xff] }
 0x12f   : > { %v2186_v34 = vsel %vm2122_vm14, %v5067_v54, %v2154_v16  ;;  %v2187_v5 = vsel %vm2123_vm15, %v5070_v45, %v2155_v53  ;;  %v2188_v22 = vsel %vm2124_vm8, %v5073_v36, %v2156_v41  ;;  %v2189_v35 = vsel %vm2125_vm9, %v5076_v26, %v2157_v32  ;;  %v6590_v18 = vld [vmem:[#allocation31_spill] sm:$0xff]  ;;  %v6592_v41 = vld [vmem:[#allocation33_spill] sm:$0xff]  ;;  %v6593_v32 = vld [vmem:[#allocation34_spill] sm:$0xff] }
 0x130   : > { %vm6569_vm2 = vcmp.gt.f32.partialorder %v5079_v63, 0.0  ;;  %vm6570_vm3 = vcmp.gt.f32.partialorder %v5082_v50, 0.0  ;;  %vm6571_vm7 = vcmp.gt.f32.partialorder %v5085_v23, 0.0  ;;  %vm6572_vm6 = vcmp.gt.f32.partialorder %v5088_v42, 0.0 }
 0x131   : > { %v2190_v4 = vsel %vm6569_vm2, %v5079_v63, %v2158_v19  ;;  %v2191_v54 = vsel %vm6570_vm3, %v5082_v50, %v2159_v17  ;;  %v2192_v45 = vsel %vm6571_vm7, %v5085_v23, %v2160_v8  ;;  %v2193_v36 = vsel %vm6572_vm6, %v5088_v42, %v2161_v7  ;;  %v6596_v8 = vld [vmem:[#allocation37_spill] sm:$0xff] }
 0x132   : > { %vm6573_vm5 = vcmp.gt.f32.partialorder %v5091_v62, 0.0  ;;  %vm6574_vm4 = vcmp.gt.f32.partialorder %v5094_v0, 0.0  ;;  %vm6575_vm12 = vcmp.gt.f32.partialorder %v5097_v57, 0.0  ;;  %vm6576_vm13 = vcmp.gt.f32.partialorder %v5100_v60, 0.0 }
 0x133   : > { %v2194_v26 = vsel %vm6573_vm5, %v5091_v62, %v2162_v1  ;;  %v2195_v63 = vsel %vm6574_vm4, %v5094_v0, %v2163_v28  ;;  %v2196_v50 = vsel %vm6575_vm12, %v5097_v57, %v2164_v31  ;;  %v2197_v23 = vsel %vm6576_vm13, %v5100_v60, %v2165_v59  ;;  %v6602_v59 = vld [vmem:[#allocation41_spill] sm:$0xff] }
 0x134   : > { %vm6577_vm14 = vcmp.gt.f32.partialorder %v5103_v2, 0.0  ;;  %vm6578_vm15 = vcmp.gt.f32.partialorder %v5106_v43, 0.0  ;;  %vm6579_vm8 = vcmp.gt.f32.partialorder %v5109_v6, 0.0  ;;  %vm6580_vm9 = vcmp.gt.f32.partialorder %v5112_v56, 0.0 }
 0x135   : > { %v2198_v42 = vsel %vm6577_vm14, %v5103_v2, %v2166_v38  ;;  %v2199_v62 = vsel %vm6578_vm15, %v5106_v43, %v2167_v58  ;;  %v2200_v0 = vsel %vm6579_vm8, %v5109_v6, %v2168_v52  ;;  %v2201_v57 = vsel %vm6580_vm9, %v5112_v56, %v2169_v29  ;;  %v6603_v58 = vld [vmem:[#allocation42_spill] sm:$0xff]  ;;  %v6604_v29 = vld [vmem:[#allocation43_spill] sm:$0xff] }
 0x136   : > { %vm6582_vm2 = vcmp.gt.f32.partialorder %v6581_v12, 0.0  ;;  %vm6584_vm3 = vcmp.gt.f32.partialorder %v6583_v47, 0.0  ;;  %vm6585_vm7 = vcmp.gt.f32.partialorder %v5121_v10, 0.0  ;;  %vm6587_vm6 = vcmp.gt.f32.partialorder %v6586_v24, 0.0 }
 0x137   : > { %v2202_v60 = vsel %vm6582_vm2, %v6581_v12, %v2170_v44  ;;  %v2203_v2 = vsel %vm6584_vm3, %v6583_v47, %v2171_v9  ;;  %v2204_v43 = vsel %vm6585_vm7, %v5121_v10, %v2172_v40  ;;  %v2205_v6 = vsel %vm6587_vm6, %v6586_v24, %v2173_v61  ;;  %v6591_v61 = vld [vmem:[#allocation32_spill] sm:$0xff] }
 0x138   : > { %v2206_v56 = vsel %vm2142_vm10, %v6588_v13, %v2174_v51  ;;  %v2207_v46 = vsel %vm2143_vm11, %v6589_v14, %v2175_v21  ;;  %v2208_v33 = vsel %vm2144_vm0, %v5133_v30, %v2176_v55  ;;  %v2209_v10 = vsel %vm2145_vm1, %v5136_v11, %v2177_v3  ;;  %v6594_v21 = vld [vmem:[#allocation35_spill] sm:$0xff]  ;;  %v6595_v55 = vld [vmem:[#allocation36_spill] sm:$0xff] }
 0x139   : > { %v5331_v16 = vadd.f32 %v2178_v20, %v6590_v18  ;;  %v5334_v53 = vadd.f32 %v2179_v49, %v6591_v61  ;;  %v5337_v51 = vadd.f32 %v2180_v15, %v6592_v41  ;;  %v5340_v19 = vadd.f32 %v2181_v48, %v6593_v32  ;;  %v6597_v20 = vld [vmem:[#allocation12_spill] sm:$0xff]  ;;  %v6598_v49 = vld [vmem:[#allocation13_spill] sm:$0xff]  ;;  %v6599_v15 = vld [vmem:[#allocation38_spill] sm:$0xff] }
 0x13a   : > { %v5343_v17 = vadd.f32 %v2182_v27, %v6594_v21  ;;  %v5346_v30 = vadd.f32 %v2183_v25, %v6595_v55  ;;  %v5349_v3 = vadd.f32 %v2184_v39, %v6596_v8  ;;  %v5352_v11 = vadd.f32 %v2185_v37, %v6597_v20  ;;  %v6600_v48 = vld [vmem:[#allocation39_spill] sm:$0xff]  ;;  %v6601_v27 = vld [vmem:[#allocation40_spill] sm:$0xff]  ;;  %v6606_v25 = vld [vmem:[#allocation45_spill] sm:$0xff] }
 0x13b   : > { %v5355_v7 = vadd.f32 %v2186_v34, %v6598_v49  ;;  %v5358_v1 = vadd.f32 %v2187_v5, %v6599_v15  ;;  %v5361_v28 = vadd.f32 %v2188_v22, %v6600_v48  ;;  %v5364_v31 = vadd.f32 %v2189_v35, %v6601_v27  ;;  %v6605_v9 = vld [vmem:[#allocation44_spill] sm:$0xff]  ;;  %v6607_v37 = vld [vmem:[#allocation46_spill] sm:$0xff]  ;;  %v6608_v5 = vld [vmem:[#allocation47_spill] sm:$0xff] }
 0x13c   : > { %v5367_v38 = vadd.f32 %v2190_v4, %v6602_v59  ;;  %v5370_v52 = vadd.f32 %v2191_v54, %v6603_v58  ;;  %v5373_v44 = vadd.f32 %v2192_v45, %v6604_v29  ;;  %v5376_v40 = vadd.f32 %v2193_v36, %v6605_v9  ;;  %v6609_v35 = vld [vmem:[#allocation48_spill] sm:$0xff]  ;;  %v6610_v54 = vld [vmem:[#allocation49_spill] sm:$0xff]  ;;  %v6611_v45 = vld [vmem:[#allocation50_spill] sm:$0xff] }
 0x13d   : > { %v5379_v39 = vadd.f32 %v2194_v26, %v6606_v25  ;;  %v5382_v34 = vadd.f32 %v2195_v63, %v6607_v37  ;;  %v5385_v22 = vadd.f32 %v2196_v50, %v6608_v5  ;;  %v5388_v4 = vadd.f32 %v2197_v23, %v6609_v35  ;;  %v6612_v36 = vld [vmem:[#allocation9_spill] sm:$0xff]  ;;  %v6613_v63 = vld [vmem:[#allocation51_spill] sm:$0xff]  ;;  %v6614_v50 = vld [vmem:[#allocation52_spill] sm:$0xff] }
 0x13e   : > { %v5391_v12 = vadd.f32 %v2198_v42, %v6610_v54  ;;  %v5394_v47 = vadd.f32 %v2199_v62, %v6611_v45  ;;  %v5397_v24 = vsub.s32 2, %v6612_v36  ;;  %v5400_v26 = vsub.s32 6, %v6612_v36  ;;  %v6615_v23 = vld [vmem:[#allocation53_spill] sm:$0xff]  ;;  %v6616_v42 = vld [vmem:[#allocation54_spill] sm:$0xff]  ;;  %v6617_v62 = vld [vmem:[#allocation55_spill] sm:$0xff] }
 0x13f   : > { %v5403_v13 = vadd.f32 %v2200_v0, %v6613_v63  ;;  %v5406_v14 = vadd.f32 %v2201_v57, %v6614_v50  ;;  %v5409_v18 = vadd.f32 %v2202_v60, %v6615_v23  ;;  %v5412_v61 = vadd.f32 %v2203_v2, %v6616_v42  ;;  %v6618_v32 = vld [vmem:[#allocation56_spill] sm:$0xff]  ;;  %v6619_v55 = vld [vmem:[#allocation57_spill] sm:$0xff]  ;;  %v6620_v0 = vld [vmem:[#allocation58_spill] sm:$0xff] }
 0x140   : > { %v5415_v41 = vadd.f32 %v2204_v43, %v6617_v62  ;;  %v5418_v21 = vadd.f32 %v2205_v6, %v6618_v32  ;;  %v5421_v8 = vadd.f32 %v2206_v56, %v6619_v55  ;;  %v5424_v20 = vadd.f32 %v2207_v46, %v6620_v0  ;;  %v6621_v57 = vld [vmem:[#allocation59_spill] sm:$0xff]  ;;  %v6622_v60 = vld [vmem:[#allocation60_spill] sm:$0xff] }
 0x141   : > { %v5427_v49 = vadd.f32 %v2208_v33, %v6621_v57  ;;  %v5430_v15 = vadd.f32 %v2209_v10, %v6622_v60  ;;  %v2277_v2 = vrot.slane %v5331_v16, %v5397_v24  ;;  %v2281_v43 = vrot.slane %v5331_v16, %v5400_v26 }
 0x142   : > { %v2285_v6 = vrot.slane %v5334_v53, %v5397_v24  ;;  %v2289_v56 = vrot.slane %v5337_v51, %v5397_v24  ;;  %v2293_v46 = vrot.slane %v5337_v51, %v5400_v26  ;;  %v2297_v33 = vrot.slane %v5340_v19, %v5397_v24 }
 0x143   : > { %v2301_v10 = vrot.slane %v5343_v17, %v5397_v24  ;;  %v2305_v48 = vrot.slane %v5343_v17, %v5400_v26  ;;  %v2309_v16 = vrot.slane %v5346_v30, %v5397_v24  ;;  %v2313_v53 = vrot.slane %v5349_v3, %v5397_v24 }
 0x144   : > { %v2317_v27 = vrot.slane %v5349_v3, %v5400_v26  ;;  %v2321_v51 = vrot.slane %v5352_v11, %v5397_v24  ;;  %v2325_v19 = vrot.slane %v5355_v7, %v5397_v24  ;;  %v2329_v59 = vrot.slane %v5355_v7, %v5400_v26 }
 0x145   : > { %v2333_v17 = vrot.slane %v5358_v1, %v5397_v24  ;;  %v2337_v30 = vrot.slane %v5361_v28, %v5397_v24  ;;  %v2341_v58 = vrot.slane %v5361_v28, %v5400_v26  ;;  %v2345_v3 = vrot.slane %v5364_v31, %v5397_v24 }
 0x146   : > { %v2349_v11 = vrot.slane %v5367_v38, %v5397_v24  ;;  %v2353_v29 = vrot.slane %v5367_v38, %v5400_v26  ;;  %v2357_v7 = vrot.slane %v5370_v52, %v5397_v24  ;;  %v2361_v1 = vrot.slane %v5373_v44, %v5397_v24 }
 0x147   : > { %v2365_v9 = vrot.slane %v5373_v44, %v5400_v26  ;;  %v2369_v28 = vrot.slane %v5376_v40, %v5397_v24  ;;  %v2373_v31 = vrot.slane %v5379_v39, %v5397_v24  ;;  %v2377_v25 = vrot.slane %v5379_v39, %v5400_v26 }
 0x148   : > { %v2381_v38 = vrot.slane %v5382_v34, %v5397_v24  ;;  %v2385_v52 = vrot.slane %v5385_v22, %v5397_v24  ;;  %v2389_v37 = vrot.slane %v5385_v22, %v5400_v26  ;;  %v2393_v44 = vrot.slane %v5388_v4, %v5397_v24 }
 0x149   : > { %v2397_v40 = vrot.slane %v5391_v12, %v5397_v24  ;;  %v2401_v5 = vrot.slane %v5391_v12, %v5400_v26  ;;  %v2405_v39 = vrot.slane %v5394_v47, %v5397_v24  ;;  %v2409_v34 = vrot.slane %v5403_v13, %v5397_v24 }
 0x14a   : > { %v2413_v35 = vrot.slane %v5403_v13, %v5400_v26  ;;  %v2417_v22 = vrot.slane %v5406_v14, %v5397_v24  ;;  %v2421_v4 = vrot.slane %v5409_v18, %v5397_v24  ;;  %v2425_v54 = vrot.slane %v5409_v18, %v5400_v26 }
 0x14b   : > { %v2429_v12 = vrot.slane %v5412_v61, %v5397_v24  ;;  %v2433_v45 = vrot.slane %v5415_v41, %v5397_v24  ;;  %v2445_v47 = vrot.slane %v5421_v8, %v5397_v24  ;;  %v2457_v63 = vrot.slane %v5427_v49, %v5397_v24 }
 0x14c   : > { %vm6623_vm10 = vcmask 1041409   ;;  %vm6627_vm5 = vcmask 1042434   ;;  %vm6631_vm14 = vcmask 1043459   ;;  %vm6635_vm2 = vcmask 1044484  }
 0x14d   : > { %v2466_v13 = vsel %vm6623_vm10, %v2289_v56, %v2277_v2  ;;  %vm6624_vm11 = vmmov %vm6623_vm10 }
 0x14e   : > { %v2473_v50 = vsel %vm6624_vm11, %v2293_v46, %v2281_v43  ;;  %vm6625_vm0 = vmmov %vm6623_vm10  ;;  %v2467_v18 = vsel %vm6627_vm5, %v2301_v10, %v2466_v13  ;;  %vm6639_vm10 = vcmask 1045509   ;;  %v2533_v13 = vld [vmem:[%s3439_s24 + $0x36] sm:$0x2a] }
 0x14f   : > { %v2480_v14 = vsel %vm6625_vm0, %v2297_v33, %v2285_v6  ;;  %vm6626_vm1 = vmmov %vm6625_vm0  ;;  %v2468_v32 = vsel %vm6631_vm14, %v2313_v53, %v2467_v18 }
 0x150   : > { %v2487_v23 = vsel %vm6626_vm1, %v2385_v52, %v2373_v31  ;;  %vm6628_vm4 = vmmov %vm6627_vm5  ;;  %v2469_v60 = vsel %vm6635_vm2, %v2325_v19, %v2468_v32  ;;  %vm6643_vm5 = vcmask 1046534  }
 0x151   : > { %v2474_v42 = vsel %vm6628_vm4, %v2305_v48, %v2473_v50  ;;  %vm6629_vm12 = vmmov %vm6628_vm4  ;;  %v2470_v56 = vsel %vm6639_vm10, %v2337_v30, %v2469_v60  ;;  %v2437_v30 = vrot.slane %v5415_v41, %v5400_v26  ;;  %v2534_v50 = vld [vmem:[%s3439_s24 + $0x3c] sm:$0x2a]  ;;  %v2537_v60 = vld [vmem:[%s3439_s24 + $0x4e] sm:$0x2a] }
 0x152   : > { %v2481_v61 = vsel %vm6629_vm12, %v2309_v16, %v2480_v14  ;;  %vm6630_vm13 = vmmov %vm6628_vm4  ;;  %v2471_v48 = vsel %vm6643_vm5, %v2349_v11, %v2470_v56 }
 0x153   : > { %v2488_v62 = vsel %vm6630_vm13, %v2397_v40, %v2487_v23  ;;  %vm6632_vm15 = vmmov %vm6631_vm14  ;;  %v2527_v40 = vld [vmem:[%s3439_s24 + $0x12] sm:$0x2a] }
 0x154   : > { %v2475_v55 = vsel %vm6632_vm15, %v2317_v27, %v2474_v42  ;;  %vm6633_vm8 = vmmov %vm6631_vm14  ;;  %vm6647_vm14 = vcmask 1047559   ;;  %v2546_v14 = vunpack.c.l.bf16 %v2527_v40  ;;  %v2547_v23 = vunpack.c.h.bf16 %v2527_v40 }
 0x155   : > { %v2482_v0 = vsel %vm6633_vm8, %v2321_v51, %v2481_v61  ;;  %vm6634_vm9 = vmmov %vm6633_vm8  ;;  %v2472_v51 = vsel %vm6647_vm14, %v2361_v1, %v2471_v48  ;;  %v2461_v1 = vrot.slane %v5427_v49, %v5400_v26  ;;  %v2535_v61 = vld [vmem:[%s3439_s24 + $0x42] sm:$0x2a]  ;;  %v2559_v48 = vunpack.c.h.bf16 %v2533_v13 }
 0x156   : > { %v2489_v57 = vsel %vm6634_vm9, %v2409_v34, %v2488_v62  ;;  %vm6636_vm3 = vmmov %vm6635_vm2  ;;  %3199 = vst [vmem:[%s4220_s30 + $0x60] sm:$0xff] %v2472_v51  ;;  %v2530_v34 = vld [vmem:[%s3439_s24 + $0x24] sm:$0x2a]  ;;  %v2563_v51 = vunpack.c.h.bf16 %v2535_v61 }
 0x157   : > { %v2476_v2 = vsel %vm6636_vm3, %v2329_v59, %v2475_v55  ;;  %vm6637_vm7 = vmmov %vm6635_vm2  ;;  %v2536_v62 = vld [vmem:[%s3439_s24 + $0x48] sm:$0x2a] }
 0x158   : > { %v2483_v43 = vsel %vm6637_vm7, %v2333_v17, %v2482_v0  ;;  %vm6638_vm6 = vmmov %vm6635_vm2  ;;  %vm6651_vm2 = vcmask 1041409   ;;  %vm6653_vm7 = vcmask 1042434   ;;  %v2552_v0 = vunpack.c.l.bf16 %v2530_v34 }
 0x159   : > { %v2490_v6 = vsel %vm6638_vm6, %v2421_v4, %v2489_v57  ;;  %vm6640_vm11 = vmmov %vm6639_vm10  ;;  %v2531_v4 = vld [vmem:[%s3439_s24 + $0x2a] sm:$0x2a]  ;;  %v2553_v57 = vunpack.c.h.bf16 %v2530_v34 }
 0x15a   : > { %v2477_v46 = vsel %vm6640_vm11, %v2341_v58, %v2476_v2  ;;  %vm6641_vm0 = vmmov %vm6639_vm10  ;;  %v2441_v58 = vrot.slane %v5418_v21, %v5397_v24  ;;  %vm6655_vm10 = vcmask 1043459   ;;  %v2538_v2 = vld [vmem:[%s3439_s24 + $0x54] sm:$0x2a] }
 0x15b   : > { %v2484_v33 = vsel %vm6641_vm0, %v2345_v3, %v2483_v43  ;;  %vm6642_vm1 = vmmov %vm6641_vm0  ;;  %v2494_v3 = vsel %vm6651_vm2, %v2389_v37, %v2377_v25  ;;  %vm6657_vm0 = vcmask 1044484   ;;  %v2524_v25 = vld [vmem:[%s3439_s24] sm:$0x2a]  ;;  %v2525_v37 = vld [vmem:[%s3439_s24 + $0x6] sm:$0x2a]  ;;  %v2554_v43 = vunpack.c.l.bf16 %v2531_v4 }
 0x15c   : > { %v2491_v10 = vsel %vm6642_vm1, %v2433_v45, %v2490_v6  ;;  %vm6644_vm4 = vmmov %vm6643_vm5  ;;  %v2495_v41 = vsel %vm6653_vm7, %v2401_v5, %v2494_v3  ;;  %vm6659_vm5 = vcmask 1045509   ;;  %v2528_v5 = vld [vmem:[%s3439_s24 + $0x18] sm:$0x2a]  ;;  %v2543_v45 = vunpack.c.h.bf16 %v2525_v37 }
 0x15d   : > { %v2478_v16 = vsel %vm6644_vm4, %v2353_v29, %v2477_v46  ;;  %vm6645_vm12 = vmmov %vm6644_vm4  ;;  %v2449_v29 = vrot.slane %v5421_v8, %v5400_v26  ;;  %v2548_v18 = vunpack.c.l.bf16 %v2528_v5  ;;  %v2549_v42 = vunpack.c.h.bf16 %v2528_v5 }
 0x15e   : > { %v2485_v53 = vsel %vm6645_vm12, %v2357_v7, %v2484_v33  ;;  %vm6646_vm13 = vmmov %vm6644_vm4  ;;  %v2453_v7 = vrot.slane %v5424_v20, %v5397_v24  ;;  %v2555_v6 = vunpack.c.h.bf16 %v2531_v4  ;;  %v2539_v33 = vld [vmem:[%s3439_s24 + $0x5a] sm:$0x2a]  ;;  %v2568_v3 = vunpack.c.l.bf16 %v2538_v2 }
 0x15f   : > { %v2492_v27 = vsel %vm6646_vm13, %v2445_v47, %v2491_v10  ;;  %vm6648_vm15 = vmmov %vm6647_vm14  ;;  %v2558_v10 = vunpack.c.l.bf16 %v2533_v13 }
 0x160   : > { %v2479_v19 = vsel %vm6648_vm15, %v2365_v9, %v2478_v16  ;;  %vm6649_vm8 = vmmov %vm6647_vm14  ;;  %v2465_v9 = vrot.slane %v5430_v15, %v5397_v24  ;;  %v2560_v16 = vunpack.c.l.bf16 %v2534_v50 }
 0x161   : > { %v2486_v59 = vsel %vm6649_vm8, %v2369_v28, %v2485_v53  ;;  %vm6650_vm9 = vmmov %vm6649_vm8  ;;  %3200 = vst [vmem:[%s4220_s30 + $0x68] sm:$0xff] %v2479_v19  ;;  %v2496_v28 = vsel %vm6655_vm10, %v2413_v35, %v2495_v41  ;;  %v2540_v35 = vunpack.c.l.bf16 %v2524_v25  ;;  %v2561_v53 = vunpack.c.h.bf16 %v2534_v50 }
 0x162   : > { %v2493_v17 = vsel %vm6650_vm9, %v2457_v63, %v2492_v27  ;;  %vm6652_vm3 = vmmov %vm6651_vm2  ;;  %3201 = vst [vmem:[%s4220_s30 + $0x70] sm:$0xff] %v2486_v59  ;;  %v2497_v20 = vsel %vm6657_vm0, %v2425_v54, %v2496_v28  ;;  %v2532_v54 = vld [vmem:[%s3439_s24 + $0x30] sm:$0x2a]  ;;  %v2562_v27 = vunpack.c.l.bf16 %v2535_v61  ;;  %v2564_v19 = vunpack.c.l.bf16 %v2536_v62 }
 0x163   : > { %v2501_v11 = vsel %vm6652_vm3, %v2393_v44, %v2381_v38  ;;  %3202 = vst [vmem:[%s4220_s30 + $0x78] sm:$0xff] %v2493_v17  ;;  %vm6654_vm6 = vmmov %vm6653_vm7  ;;  %v2498_v26 = vsel %vm6659_vm5, %v2437_v30, %v2497_v20  ;;  %v2526_v44 = vld [vmem:[%s3439_s24 + $0xc] sm:$0x2a]  ;;  %v2556_v56 = vunpack.c.l.bf16 %v2532_v54  ;;  %v2557_v46 = vunpack.c.h.bf16 %v2532_v54 }
 0x164   : > { %v2502_v21 = vsel %vm6654_vm6, %v2405_v39, %v2501_v11  ;;  %vm6656_vm11 = vmmov %vm6655_vm10  ;;  %v2499_v24 = vsel %vm6645_vm12, %v2449_v29, %v2498_v26  ;;  %v2529_v39 = vld [vmem:[%s3439_s24 + $0x1e] sm:$0x2a]  ;;  %v2544_v47 = vunpack.c.l.bf16 %v2526_v44  ;;  %v2545_v63 = vunpack.c.h.bf16 %v2526_v44 }
 0x165   : > { %v2503_v8 = vsel %vm6656_vm11, %v2417_v22, %v2502_v21  ;;  %vm6658_vm1 = vmmov %vm6657_vm0  ;;  %v2541_v22 = vunpack.c.h.bf16 %v2524_v25  ;;  %v2550_v32 = vunpack.c.l.bf16 %v2529_v39  ;;  %v2551_v55 = vunpack.c.h.bf16 %v2529_v39 }
 0x166   : > { %v2504_v31 = vsel %vm6658_vm1, %v2429_v12, %v2503_v8  ;;  %vm6660_vm4 = vmmov %vm6659_vm5  ;;  %v2542_v12 = vunpack.c.l.bf16 %v2525_v37  ;;  %v2572_v59 = vstv %s5576_s13  ;;  %v2565_v17 = vunpack.c.h.bf16 %v2536_v62 }
 0x167   : > { %v2505_v49 = vsel %vm6660_vm4, %v2441_v58, %v2504_v31  ;;  %vm6661_vm13 = vmmov %vm6645_vm12  ;;  %v2566_v30 = vunpack.c.l.bf16 %v2537_v60  ;;  %v2567_v58 = vunpack.c.h.bf16 %v2537_v60  ;;  %v2569_v11 = vunpack.c.h.bf16 %v2538_v2 }
 0x168   : > { %v2506_v15 = vsel %vm6661_vm13, %v2453_v7, %v2505_v49  ;;  %vm6662_vm14 = vmmov %vm6649_vm8  ;;  %v2570_v29 = vunpack.c.l.bf16 %v2539_v33  ;;  %v2571_v7 = vunpack.c.h.bf16 %v2539_v33  ;;  %v5599_v41 = vstv %s5584_s14 }
 0x169   : > { %v2500_v38 = vsel %vm6662_vm14, %v2461_v1, %v2499_v24  ;;  %vm6663_vm15 = vmmov %vm6649_vm8  ;;  %v2573_v21 = vsub.f32 %v2540_v35, %v2572_v59  ;;  %v2574_v1 = vsub.f32 %v2541_v22, %v2572_v59  ;;  %v5605_v28 = vsub.s32 7, %v6612_v36 }
 0x16a   : > { %v2507_v52 = vsel %vm6663_vm15, %v2465_v9, %v2506_v15  ;;  %3203 = vst [vmem:[%s4220_s30 + $0x80] sm:$0xff] %v2500_v38  ;;  %v5602_v9 = vsub.s32 3, %v6612_v36  ;;  %v2575_v8 = vsub.f32 %v2542_v12, %v2572_v59  ;;  %v2576_v20 = vsub.f32 %v2543_v45, %v2572_v59 }
 0x16b   : > { %3204 = vst [vmem:[%s4220_s30 + $0x88] sm:$0xff] %v2507_v52  ;;  %6665 = vst [vmem:[#allocation66_spill] sm:$0xff] %v5605_v28  ;;  %v2577_v31 = vsub.f32 %v2544_v47, %v2572_v59  ;;  %v2578_v26 = vsub.f32 %v2545_v63, %v2572_v59  ;;  %v2579_v49 = vsub.f32 %v2546_v14, %v2572_v59 }
 0x16c   : > { %6664 = vst [vmem:[#allocation64_spill] sm:$0xff] %v5602_v9  ;;  %v2580_v24 = vsub.f32 %v2547_v23, %v2572_v59  ;;  %v2581_v15 = vsub.f32 %v2548_v18, %v2572_v59  ;;  %v2582_v25 = vsub.f32 %v2549_v42, %v2572_v59  ;;  %v2583_v38 = vsub.f32 %v2550_v32, %v2572_v59 }
 0x16d   : > { %v2584_v52 = vsub.f32 %v2551_v55, %v2572_v59  ;;  %v2585_v37 = vsub.f32 %v2552_v0, %v2572_v59  ;;  %v2586_v44 = vsub.f32 %v2553_v57, %v2572_v59  ;;  %v2587_v40 = vsub.f32 %v2554_v43, %v2572_v59 }
 0x16e   : > { %v2588_v5 = vsub.f32 %v2555_v6, %v2572_v59  ;;  %v2589_v39 = vsub.f32 %v2556_v56, %v2572_v59  ;;  %v2590_v34 = vsub.f32 %v2557_v46, %v2572_v59  ;;  %v2591_v35 = vsub.f32 %v2558_v10, %v2572_v59 }
 0x16f   : > { %v2592_v22 = vsub.f32 %v2559_v48, %v2572_v59  ;;  %v2593_v36 = vsub.f32 %v2560_v16, %v2572_v59  ;;  %v2594_v4 = vsub.f32 %v2561_v53, %v2572_v59  ;;  %v2595_v54 = vsub.f32 %v2562_v27, %v2572_v59 }
 0x170   : > { %v2596_v12 = vsub.f32 %v2563_v51, %v2572_v59  ;;  %v2597_v45 = vsub.f32 %v2564_v19, %v2572_v59  ;;  %v2598_v47 = vsub.f32 %v2565_v17, %v2572_v59  ;;  %v2599_v63 = vsub.f32 %v2566_v30, %v2572_v59 }
 0x171   : > { %v2600_v13 = vsub.f32 %v2567_v58, %v2572_v59  ;;  %v2601_v50 = vsub.f32 %v2568_v3, %v2572_v59  ;;  %v2602_v14 = vsub.f32 %v2569_v11, %v2572_v59  ;;  %v2603_v23 = vsub.f32 %v2570_v29, %v2572_v59 }
 0x172   : > { %v2604_v18 = vsub.f32 %v2571_v7, %v2572_v59  ;;  %v5608_v42 = vmul.f32 %v5599_v41, %v2573_v21  ;;  %v5611_v61 = vmul.f32 %v5599_v41, %v2574_v1  ;;  %v5614_v62 = vmul.f32 %v5599_v41, %v2575_v8 }
 0x173   : > { %v5617_v32 = vmul.f32 %v5599_v41, %v2576_v20  ;;  %v5620_v55 = vmul.f32 %v5599_v41, %v2577_v31  ;;  %v5623_v0 = vmul.f32 %v5599_v41, %v2578_v26  ;;  %v5626_v57 = vmul.f32 %v5599_v41, %v2579_v49 }
 0x174   : > { %v5629_v60 = vmul.f32 %v5599_v41, %v2580_v24  ;;  %v5632_v2 = vmul.f32 %v5599_v41, %v2581_v15  ;;  %v5635_v43 = vmul.f32 %v5599_v41, %v2582_v25  ;;  %v5638_v6 = vmul.f32 %v5599_v41, %v2583_v38 }
 0x175   : > { %v5641_v56 = vmul.f32 %v5599_v41, %v2584_v52  ;;  %v5644_v46 = vmul.f32 %v5599_v41, %v2585_v37  ;;  %v5647_v33 = vmul.f32 %v5599_v41, %v2586_v44  ;;  %v5650_v10 = vmul.f32 %v5599_v41, %v2587_v40 }
 0x176   : > { %v5653_v48 = vmul.f32 %v5599_v41, %v2588_v5  ;;  %v5656_v16 = vmul.f32 %v5599_v41, %v2589_v39  ;;  %v5659_v53 = vmul.f32 %v5599_v41, %v2590_v34  ;;  %v5662_v27 = vmul.f32 %v5599_v41, %v2591_v35 }
 0x177   : > { %v5665_v51 = vmul.f32 %v5599_v41, %v2592_v22  ;;  %v5668_v19 = vmul.f32 %v5599_v41, %v2593_v36  ;;  %v5671_v59 = vmul.f32 %v5599_v41, %v2594_v4  ;;  %v5674_v17 = vmul.f32 %v5599_v41, %v2595_v54 }
 0x178   : > { %v5677_v30 = vmul.f32 %v5599_v41, %v2596_v12  ;;  %v5680_v58 = vmul.f32 %v5599_v41, %v2597_v45  ;;  %v5683_v3 = vmul.f32 %v5599_v41, %v2598_v47  ;;  %v5686_v11 = vmul.f32 %v5599_v41, %v2599_v63 }
 0x179   : > { %v5689_v29 = vmul.f32 %v5599_v41, %v2600_v13  ;;  %v5692_v7 = vmul.f32 %v5599_v41, %v2601_v50  ;;  %v5695_v21 = vmul.f32 %v5599_v41, %v2602_v14  ;;  %v5698_v1 = vmul.f32 %v5599_v41, %v2603_v23 }
 0x17a   : > { %6666 = vst [vmem:[#allocation67_spill] sm:$0xff] %v5680_v58  ;;  %6667 = vst [vmem:[#allocation10_spill] sm:$0xff] %v5683_v3  ;;  %v5701_v8 = vmul.f32 %v5599_v41, %v2604_v18  ;;  %vm2638_vm8 = vcmp.gt.f32.partialorder %v5608_v42, 0.0  ;;  %vm2639_vm9 = vcmp.gt.f32.partialorder %v5611_v61, 0.0  ;;  %vm2640_vm2 = vcmp.gt.f32.partialorder %v5614_v62, 0.0  ;;  %v6671_v41 = vld [vmem:[#allocation14_spill] sm:$0xff] }
 0x17b   : > { %6668 = vst [vmem:[#allocation11_spill] sm:$0xff] %v5689_v29  ;;  %6669 = vst [vmem:[#allocation61_spill] sm:$0xff] %v5692_v7  ;;  %vm2641_vm3 = vcmp.gt.f32.partialorder %v5617_v32, 0.0  ;;  %vm2642_vm7 = vcmp.gt.f32.partialorder %v5620_v55, 0.0  ;;  %vm2643_vm6 = vcmp.gt.f32.partialorder %v5623_v0, 0.0  ;;  %vm2644_vm10 = vcmp.gt.f32.partialorder %v5626_v57, 0.0 }
 0x17c   : > { %6670 = vst [vmem:[#allocation62_spill] sm:$0xff] %v5695_v21  ;;  %vm2645_vm11 = vcmp.gt.f32.partialorder %v5629_v60, 0.0  ;;  %vm2646_vm0 = vcmp.gt.f32.partialorder %v5632_v2, 0.0  ;;  %vm2649_vm4 = vcmp.gt.f32.partialorder %v5641_v56, 0.0  ;;  %vm2650_vm12 = vcmp.gt.f32.partialorder %v5644_v46, 0.0 }
 0x17d   : > { %vm2651_vm13 = vcmp.gt.f32.partialorder %v5647_v33, 0.0  ;;  %v2670_v20 = vmul.f32 %v5608_v42, %v6671_v41  ;;  %v2671_v31 = vmul.f32 %v5611_v61, %v6671_v41  ;;  %v2672_v26 = vmul.f32 %v5614_v62, %v6671_v41 }
 0x17e   : > { %v2673_v49 = vmul.f32 %v5617_v32, %v6671_v41  ;;  %v2674_v24 = vmul.f32 %v5620_v55, %v6671_v41  ;;  %v2675_v15 = vmul.f32 %v5623_v0, %v6671_v41  ;;  %v2676_v25 = vmul.f32 %v5626_v57, %v6671_v41 }
 0x17f   : > { %v2677_v38 = vmul.f32 %v5629_v60, %v6671_v41  ;;  %v2678_v52 = vmul.f32 %v5632_v2, %v6671_v41  ;;  %v2679_v37 = vmul.f32 %v5635_v43, %v6671_v41  ;;  %v2680_v44 = vmul.f32 %v5638_v6, %v6671_v41 }
 0x180   : > { %v2681_v40 = vmul.f32 %v5641_v56, %v6671_v41  ;;  %v2682_v5 = vmul.f32 %v5644_v46, %v6671_v41  ;;  %v2683_v39 = vmul.f32 %v5647_v33, %v6671_v41  ;;  %vm2666_vm1 = vcmp.gt.f32.partialorder %v5692_v7, 0.0 }
 0x181   : > { %vm2667_vm5 = vcmp.gt.f32.partialorder %v5695_v21, 0.0  ;;  %v2684_v34 = vmul.f32 %v5650_v10, %v6671_v41  ;;  %v2685_v35 = vmul.f32 %v5653_v48, %v6671_v41  ;;  %v2686_v22 = vmul.f32 %v5656_v16, %v6671_v41 }
 0x182   : > { %v2687_v36 = vmul.f32 %v5659_v53, %v6671_v41  ;;  %vm2668_vm14 = vcmp.gt.f32.partialorder %v5698_v1, 0.0  ;;  %vm2669_vm15 = vcmp.gt.f32.partialorder %v5701_v8, 0.0  ;;  %v2688_v4 = vmul.f32 %v5662_v27, %v6671_v41 }
 0x183   : > { %v2689_v54 = vmul.f32 %v5665_v51, %v6671_v41  ;;  %v2690_v12 = vmul.f32 %v5668_v19, %v6671_v41  ;;  %v2691_v45 = vmul.f32 %v5671_v59, %v6671_v41  ;;  %v2692_v47 = vmul.f32 %v5674_v17, %v6671_v41 }
 0x184   : > { %v2693_v63 = vmul.f32 %v5677_v30, %v6671_v41  ;;  %v2694_v13 = vmul.f32 %v5680_v58, %v6671_v41  ;;  %v2695_v50 = vmul.f32 %v5683_v3, %v6671_v41  ;;  %v2696_v14 = vmul.f32 %v5686_v11, %v6671_v41 }
 0x185   : > { %v2697_v23 = vmul.f32 %v5689_v29, %v6671_v41  ;;  %v2698_v18 = vmul.f32 %v5692_v7, %v6671_v41  ;;  %v2699_v28 = vmul.f32 %v5695_v21, %v6671_v41  ;;  %v2700_v9 = vmul.f32 %v5698_v1, %v6671_v41 }
 0x186   : > { %v2701_v58 = vmul.f32 %v5701_v8, %v6671_v41  ;;  %v2702_v3 = vsel %vm2638_vm8, %v5608_v42, %v2670_v20  ;;  %v2703_v29 = vsel %vm2639_vm9, %v5611_v61, %v2671_v31  ;;  %v2704_v7 = vsel %vm2640_vm2, %v5614_v62, %v2672_v26  ;;  %v6684_v20 = vld [vmem:[#allocation67_spill] sm:$0xff]  ;;  %v6686_v31 = vld [vmem:[#allocation10_spill] sm:$0xff] }
 0x187   : > { %v2705_v21 = vsel %vm2641_vm3, %v5617_v32, %v2673_v49  ;;  %v2706_v41 = vsel %vm2642_vm7, %v5620_v55, %v2674_v24  ;;  %v2707_v42 = vsel %vm2643_vm6, %v5623_v0, %v2675_v15  ;;  %v2708_v61 = vsel %vm2644_vm10, %v5626_v57, %v2676_v25  ;;  %v6689_v26 = vld [vmem:[#allocation11_spill] sm:$0xff]  ;;  %v6691_v49 = vld [vmem:[#allocation61_spill] sm:$0xff]  ;;  %v6692_v24 = vld [vmem:[#allocation62_spill] sm:$0xff] }
 0x188   : > { %v2709_v62 = vsel %vm2645_vm11, %v5629_v60, %v2677_v38  ;;  %v2710_v32 = vsel %vm2646_vm0, %v5632_v2, %v2678_v52  ;;  %vm6672_vm8 = vcmp.gt.f32.partialorder %v5635_v43, 0.0  ;;  %vm6673_vm9 = vcmp.gt.f32.partialorder %v5638_v6, 0.0  ;;  %v6693_v38 = vld [vmem:[#allocation15_spill] sm:$0xff] }
 0x189   : > { %v2711_v55 = vsel %vm6672_vm8, %v5635_v43, %v2679_v37  ;;  %v2712_v0 = vsel %vm6673_vm9, %v5638_v6, %v2680_v44  ;;  %v2713_v57 = vsel %vm2649_vm4, %v5641_v56, %v2681_v40  ;;  %v2714_v60 = vsel %vm2650_vm12, %v5644_v46, %v2682_v5  ;;  %v6694_v37 = vld [vmem:[#allocation65_spill] sm:$0xff]  ;;  %v6695_v40 = vld [vmem:[#allocation16_spill] sm:$0xff] }
 0x18a   : > { %v2715_v2 = vsel %vm2651_vm13, %v5647_v33, %v2683_v39  ;;  %vm6674_vm2 = vcmp.gt.f32.partialorder %v5650_v10, 0.0  ;;  %vm6675_vm3 = vcmp.gt.f32.partialorder %v5653_v48, 0.0  ;;  %vm6676_vm7 = vcmp.gt.f32.partialorder %v5656_v16, 0.0  ;;  %v6696_v39 = vld [vmem:[#allocation68_spill] sm:$0xff] }
 0x18b   : > { %v2716_v43 = vsel %vm6674_vm2, %v5650_v10, %v2684_v34  ;;  %v2717_v6 = vsel %vm6675_vm3, %v5653_v48, %v2685_v35  ;;  %v2718_v56 = vsel %vm6676_vm7, %v5656_v16, %v2686_v22  ;;  %vm6677_vm6 = vcmp.gt.f32.partialorder %v5659_v53, 0.0  ;;  %v6699_v22 = vld [vmem:[#allocation18_spill] sm:$0xff] }
 0x18c   : > { %v2719_v46 = vsel %vm6677_vm6, %v5659_v53, %v2687_v36  ;;  %vm6678_vm10 = vcmp.gt.f32.partialorder %v5662_v27, 0.0  ;;  %vm6679_vm11 = vcmp.gt.f32.partialorder %v5665_v51, 0.0  ;;  %vm6680_vm0 = vcmp.gt.f32.partialorder %v5668_v19, 0.0 }
 0x18d   : > { %v2720_v33 = vsel %vm6678_vm10, %v5662_v27, %v2688_v4  ;;  %v2721_v10 = vsel %vm6679_vm11, %v5665_v51, %v2689_v54  ;;  %v2722_v48 = vsel %vm6680_vm0, %v5668_v19, %v2690_v12  ;;  %vm6681_vm4 = vcmp.gt.f32.partialorder %v5671_v59, 0.0  ;;  %v6704_v12 = vld [vmem:[#allocation72_spill] sm:$0xff] }
 0x18e   : > { %v2723_v16 = vsel %vm6681_vm4, %v5671_v59, %v2691_v45  ;;  %vm6682_vm12 = vcmp.gt.f32.partialorder %v5674_v17, 0.0  ;;  %vm6683_vm13 = vcmp.gt.f32.partialorder %v5677_v30, 0.0  ;;  %vm6685_vm8 = vcmp.gt.f32.partialorder %v6684_v20, 0.0 }
 0x18f   : > { %v2724_v53 = vsel %vm6682_vm12, %v5674_v17, %v2692_v47  ;;  %v2725_v27 = vsel %vm6683_vm13, %v5677_v30, %v2693_v63  ;;  %v2726_v51 = vsel %vm6685_vm8, %v6684_v20, %v2694_v13  ;;  %vm6687_vm9 = vcmp.gt.f32.partialorder %v6686_v31, 0.0  ;;  %v6705_v47 = vld [vmem:[#allocation21_spill] sm:$0xff] }
 0x190   : > { %v2727_v19 = vsel %vm6687_vm9, %v6686_v31, %v2695_v50  ;;  %vm6688_vm2 = vcmp.gt.f32.partialorder %v5686_v11, 0.0  ;;  %vm6690_vm3 = vcmp.gt.f32.partialorder %v6689_v26, 0.0  ;;  %v2730_v30 = vsel %vm2666_vm1, %v6691_v49, %v2698_v18  ;;  %v6706_v13 = vld [vmem:[#allocation73_spill] sm:$0xff]  ;;  %v6708_v18 = vld [vmem:[#allocation74_spill] sm:$0xff] }
 0x191   : > { %v2728_v59 = vsel %vm6688_vm2, %v5686_v11, %v2696_v14  ;;  %v2729_v17 = vsel %vm6690_vm3, %v6689_v26, %v2697_v23  ;;  %v2731_v15 = vsel %vm2667_vm5, %v6692_v24, %v2699_v28  ;;  %v2732_v25 = vsel %vm2668_vm14, %v5698_v1, %v2700_v9  ;;  %v6697_v28 = vld [vmem:[#allocation17_spill] sm:$0xff]  ;;  %v6707_v14 = vld [vmem:[#allocation22_spill] sm:$0xff] }
 0x192   : > { %v2733_v11 = vsel %vm2669_vm15, %v5701_v8, %v2701_v58  ;;  %v5896_v52 = vadd.f32 %v2702_v3, %v6693_v38  ;;  %v5899_v44 = vadd.f32 %v2703_v29, %v6694_v37  ;;  %v5902_v5 = vadd.f32 %v2704_v7, %v6695_v40  ;;  %v6698_v9 = vld [vmem:[#allocation69_spill] sm:$0xff]  ;;  %v6700_v3 = vld [vmem:[#allocation70_spill] sm:$0xff]  ;;  %v6701_v29 = vld [vmem:[#allocation19_spill] sm:$0xff] }
 0x193   : > { %v5905_v34 = vadd.f32 %v2705_v21, %v6696_v39  ;;  %v5908_v35 = vadd.f32 %v2706_v41, %v6697_v28  ;;  %v5911_v1 = vadd.f32 %v2707_v42, %v6698_v9  ;;  %v5914_v58 = vadd.f32 %v2708_v61, %v6699_v22  ;;  %v6702_v7 = vld [vmem:[#allocation71_spill] sm:$0xff]  ;;  %v6703_v21 = vld [vmem:[#allocation20_spill] sm:$0xff] }
 0x194   : > { %v5917_v8 = vadd.f32 %v2709_v62, %v6700_v3  ;;  %v5920_v36 = vadd.f32 %v2710_v32, %v6701_v29  ;;  %v5923_v4 = vadd.f32 %v2711_v55, %v6702_v7  ;;  %v5926_v54 = vadd.f32 %v2712_v0, %v6703_v21  ;;  %v6709_v42 = vld [vmem:[#allocation23_spill] sm:$0xff]  ;;  %v6711_v55 = vld [vmem:[#allocation24_spill] sm:$0xff] }
 0x195   : > { %v5929_v45 = vadd.f32 %v2713_v57, %v6704_v12  ;;  %v5932_v63 = vadd.f32 %v2714_v60, %v6705_v47  ;;  %v5935_v50 = vadd.f32 %v2715_v2, %v6706_v13  ;;  %v5938_v23 = vadd.f32 %v2716_v43, %v6707_v14  ;;  %v6710_v62 = vld [vmem:[#allocation75_spill] sm:$0xff]  ;;  %v6712_v57 = vld [vmem:[#allocation76_spill] sm:$0xff]  ;;  %v6713_v2 = vld [vmem:[#allocation25_spill] sm:$0xff] }
 0x196   : > { %v5941_v41 = vadd.f32 %v2717_v6, %v6708_v18  ;;  %v5944_v61 = vadd.f32 %v2718_v56, %v6709_v42  ;;  %v5947_v32 = vadd.f32 %v2719_v46, %v6710_v62  ;;  %v5950_v0 = vadd.f32 %v2720_v33, %v6711_v55  ;;  %v6714_v43 = vld [vmem:[#allocation77_spill] sm:$0xff]  ;;  %v6715_v6 = vld [vmem:[#allocation26_spill] sm:$0xff]  ;;  %v6717_v46 = vld [vmem:[#allocation27_spill] sm:$0xff] }
 0x197   : > { %v5953_v60 = vadd.f32 %v2721_v10, %v6712_v57  ;;  %v5956_v20 = vadd.f32 %v2722_v48, %v6713_v2  ;;  %v5959_v31 = vadd.f32 %v2723_v16, %v6714_v43  ;;  %v5962_v26 = vadd.f32 %v2724_v53, %v6715_v6  ;;  %v6716_v56 = vld [vmem:[#allocation78_spill] sm:$0xff]  ;;  %v6718_v33 = vld [vmem:[#allocation79_spill] sm:$0xff]  ;;  %v6719_v10 = vld [vmem:[#allocation28_spill] sm:$0xff] }
 0x198   : > { %v5965_v49 = vadd.f32 %v2725_v27, %v6716_v56  ;;  %v5968_v24 = vadd.f32 %v2726_v51, %v6717_v46  ;;  %v5971_v38 = vadd.f32 %v2727_v19, %v6718_v33  ;;  %v5974_v37 = vadd.f32 %v2728_v59, %v6719_v10  ;;  %v6720_v48 = vld [vmem:[#allocation80_spill] sm:$0xff]  ;;  %v6721_v16 = vld [vmem:[#allocation29_spill] sm:$0xff]  ;;  %v6723_v27 = vld [vmem:[#allocation30_spill] sm:$0xff] }
 0x199   : > { %v5977_v40 = vadd.f32 %v2729_v17, %v6720_v48  ;;  %v5980_v39 = vadd.f32 %v2730_v30, %v6721_v16  ;;  %v6722_v53 = vld [vmem:[#allocation81_spill] sm:$0xff]  ;;  %v5986_v9 = vadd.f32 %v2732_v25, %v6723_v27  ;;  %v6724_v51 = vld [vmem:[#allocation82_spill] sm:$0xff]  ;;  %v6725_v19 = vld [vmem:[#allocation64_spill] sm:$0xff]  ;;  %vm6727_vm1 = vcmask 1041409  }
 0x19a   : > { %v5983_v28 = vadd.f32 %v2731_v15, %v6722_v53  ;;  %v5989_v22 = vadd.f32 %v2733_v11, %v6724_v51  ;;  %v2801_v3 = vrot.slane %v5896_v52, %v6725_v19  ;;  %v6726_v59 = vld [vmem:[#allocation66_spill] sm:$0xff]  ;;  %v2809_v17 = vrot.slane %v5899_v44, %v6725_v19  ;;  %vm6728_vm5 = vmmov %vm6727_vm1 }
 0x19b   : > { %v2805_v29 = vrot.slane %v5896_v52, %v6726_v59  ;;  %v2813_v30 = vrot.slane %v5902_v5, %v6725_v19  ;;  %v2817_v15 = vrot.slane %v5902_v5, %v6726_v59  ;;  %v2821_v25 = vrot.slane %v5905_v34, %v6725_v19  ;;  %vm6729_vm14 = vmmov %vm6727_vm1 }
 0x19c   : > { %v2825_v11 = vrot.slane %v5908_v35, %v6725_v19  ;;  %v2829_v7 = vrot.slane %v5908_v35, %v6726_v59  ;;  %v2833_v52 = vrot.slane %v5911_v1, %v6725_v19  ;;  %v2837_v44 = vrot.slane %v5914_v58, %v6725_v19  ;;  %vm6730_vm15 = vmmov %vm6727_vm1 }
 0x19d   : > { %v2841_v21 = vrot.slane %v5914_v58, %v6726_v59  ;;  %v2845_v5 = vrot.slane %v5917_v8, %v6725_v19  ;;  %v2849_v34 = vrot.slane %v5920_v36, %v6725_v19  ;;  %v2853_v12 = vrot.slane %v5920_v36, %v6726_v59 }
 0x19e   : > { %v2857_v35 = vrot.slane %v5923_v4, %v6725_v19  ;;  %v2861_v1 = vrot.slane %v5926_v54, %v6725_v19  ;;  %v2865_v47 = vrot.slane %v5926_v54, %v6726_v59  ;;  %v2869_v58 = vrot.slane %v5929_v45, %v6725_v19 }
 0x19f   : > { %v2873_v8 = vrot.slane %v5932_v63, %v6725_v19  ;;  %v2877_v13 = vrot.slane %v5932_v63, %v6726_v59  ;;  %v2881_v36 = vrot.slane %v5935_v50, %v6725_v19  ;;  %v2885_v4 = vrot.slane %v5938_v23, %v6725_v19 }
 0x1a0   : > { %v2889_v14 = vrot.slane %v5938_v23, %v6726_v59  ;;  %v2893_v54 = vrot.slane %v5941_v41, %v6725_v19  ;;  %v2897_v45 = vrot.slane %v5944_v61, %v6725_v19  ;;  %v2901_v18 = vrot.slane %v5944_v61, %v6726_v59 }
 0x1a1   : > { %v2905_v63 = vrot.slane %v5947_v32, %v6725_v19  ;;  %v2909_v50 = vrot.slane %v5950_v0, %v6725_v19  ;;  %v2913_v42 = vrot.slane %v5950_v0, %v6726_v59  ;;  %v2917_v23 = vrot.slane %v5953_v60, %v6725_v19 }
 0x1a2   : > { %v2921_v41 = vrot.slane %v5956_v20, %v6725_v19  ;;  %v2925_v62 = vrot.slane %v5956_v20, %v6726_v59  ;;  %v2929_v61 = vrot.slane %v5959_v31, %v6725_v19  ;;  %v2933_v32 = vrot.slane %v5962_v26, %v6725_v19 }
 0x1a3   : > { %v2937_v55 = vrot.slane %v5962_v26, %v6726_v59  ;;  %v2941_v0 = vrot.slane %v5965_v49, %v6725_v19  ;;  %v2945_v57 = vrot.slane %v5968_v24, %v6725_v19  ;;  %v2949_v60 = vrot.slane %v5968_v24, %v6726_v59 }
 0x1a4   : > { %v2953_v2 = vrot.slane %v5971_v38, %v6725_v19  ;;  %v2957_v20 = vrot.slane %v5974_v37, %v6725_v19  ;;  %v2969_v43 = vrot.slane %v5980_v39, %v6725_v19  ;;  %v2981_v31 = vrot.slane %v5986_v9, %v6725_v19 }
 0x1a5   : > { %v2990_v6 = vsel %vm6727_vm1, %v2813_v30, %v2801_v3  ;;  %v2997_v26 = vsel %vm6728_vm5, %v2817_v15, %v2805_v29  ;;  %v3004_v56 = vsel %vm6729_vm14, %v2821_v25, %v2809_v17  ;;  %v3011_v49 = vsel %vm6730_vm15, %v2909_v50, %v2897_v45 }
 0x1a6   : > { %vm6731_vm7 = vcmask 1042434   ;;  %vm6735_vm0 = vcmask 1043459   ;;  %vm6739_vm8 = vcmask 1044484   ;;  %vm6743_vm1 = vcmask 1045509  }
 0x1a7   : > { %v2991_v46 = vsel %vm6731_vm7, %v2825_v11, %v2990_v6  ;;  %vm6732_vm6 = vmmov %vm6731_vm7  ;;  %vm6747_vm7 = vcmask 1046534  }
 0x1a8   : > { %v2998_v24 = vsel %vm6732_vm6, %v2829_v7, %v2997_v26  ;;  %vm6733_vm10 = vmmov %vm6732_vm6  ;;  %v2992_v10 = vsel %vm6735_vm0, %v2837_v44, %v2991_v46 }
 0x1a9   : > { %v3005_v33 = vsel %vm6733_vm10, %v2833_v52, %v3004_v56  ;;  %vm6734_vm11 = vmmov %vm6732_vm6  ;;  %v2993_v27 = vsel %vm6739_vm8, %v2849_v34, %v2992_v10 }
 0x1aa   : > { %v3012_v38 = vsel %vm6734_vm11, %v2921_v41, %v3011_v49  ;;  %vm6736_vm4 = vmmov %vm6735_vm0  ;;  %v2994_v17 = vsel %vm6743_vm1, %v2861_v1, %v2993_v27  ;;  %v2965_v1 = vrot.slane %v5977_v40, %v6725_v19 }
 0x1ab   : > { %v2999_v48 = vsel %vm6736_vm4, %v2841_v21, %v2998_v24  ;;  %vm6737_vm12 = vmmov %vm6735_vm0  ;;  %v2995_v11 = vsel %vm6747_vm7, %v2873_v8, %v2994_v17  ;;  %v2973_v8 = vrot.slane %v5980_v39, %v6726_v59 }
 0x1ac   : > { %v3006_v16 = vsel %vm6737_vm12, %v2845_v5, %v3005_v33  ;;  %vm6738_vm13 = vmmov %vm6735_vm0  ;;  %vm6751_vm0 = vcmask 1047559  }
 0x1ad   : > { %v3013_v53 = vsel %vm6738_vm13, %v2933_v32, %v3012_v38  ;;  %vm6740_vm9 = vmmov %vm6739_vm8  ;;  %v2996_v21 = vsel %vm6751_vm0, %v2885_v4, %v2995_v11  ;;  %v2989_v4 = vrot.slane %v5989_v22, %v6725_v19 }
 0x1ae   : > { %v3000_v51 = vsel %vm6740_vm9, %v2853_v12, %v2999_v48  ;;  %vm6741_vm2 = vmmov %vm6739_vm8  ;;  %vm6755_vm8 = vcmask 1041409   ;;  %3205 = vst [vmem:[%s4220_s30 + $0x90] sm:$0xff] %v2996_v21 }
 0x1af   : > { %v3007_v3 = vsel %vm6741_vm2, %v2857_v35, %v3006_v16  ;;  %vm6742_vm3 = vmmov %vm6741_vm2  ;;  %v2961_v35 = vrot.slane %v5974_v37, %v6726_v59  ;;  %vm6757_vm2 = vcmask 1042434  }
 0x1b0   : > { %v3014_v29 = vsel %vm6742_vm3, %v2945_v57, %v3013_v53  ;;  %vm6744_vm5 = vmmov %vm6743_vm1 }
 0x1b1   : > { %v3001_v30 = vsel %vm6744_vm5, %v2865_v47, %v3000_v51  ;;  %vm6745_vm14 = vmmov %vm6743_vm1  ;;  %v3018_v47 = vsel %vm6755_vm8, %v2913_v42, %v2901_v18 }
 0x1b2   : > { %v3008_v15 = vsel %vm6745_vm14, %v2869_v58, %v3007_v3  ;;  %vm6746_vm15 = vmmov %vm6743_vm1  ;;  %v3019_v37 = vsel %vm6757_vm2, %v2925_v62, %v3018_v47  ;;  %vm6759_vm1 = vcmask 1043459   ;;  %vm6761_vm14 = vcmask 1044484  }
 0x1b3   : > { %v3015_v25 = vsel %vm6746_vm15, %v2957_v20, %v3014_v29  ;;  %vm6748_vm6 = vmmov %vm6747_vm7  ;;  %vm6763_vm7 = vcmask 1045509  }
 0x1b4   : > { %v3002_v7 = vsel %vm6748_vm6, %v2877_v13, %v3001_v30  ;;  %vm6749_vm10 = vmmov %vm6748_vm6  ;;  %v2977_v13 = vrot.slane %v5983_v28, %v6725_v19 }
 0x1b5   : > { %v3009_v52 = vsel %vm6749_vm10, %v2881_v36, %v3008_v15  ;;  %vm6750_vm11 = vmmov %vm6748_vm6  ;;  %v2985_v36 = vrot.slane %v5986_v9, %v6726_v59 }
 0x1b6   : > { %v3016_v44 = vsel %vm6750_vm11, %v2969_v43, %v3015_v25  ;;  %vm6752_vm4 = vmmov %vm6751_vm0 }
 0x1b7   : > { %v3003_v5 = vsel %vm6752_vm4, %v2889_v14, %v3002_v7  ;;  %vm6753_vm12 = vmmov %vm6751_vm0  ;;  %v3020_v14 = vsel %vm6759_vm1, %v2937_v55, %v3019_v37 }
 0x1b8   : > { %v3010_v34 = vsel %vm6753_vm12, %v2893_v54, %v3009_v52  ;;  %vm6754_vm13 = vmmov %vm6751_vm0  ;;  %3206 = vst [vmem:[%s4220_s30 + $0x98] sm:$0xff] %v3003_v5  ;;  %v3021_v39 = vsel %vm6761_vm14, %v2949_v60, %v3020_v14 }
 0x1b9   : > { %v3017_v12 = vsel %vm6754_vm13, %v2981_v31, %v3016_v44  ;;  %vm6756_vm9 = vmmov %vm6755_vm8  ;;  %3207 = vst [vmem:[%s4220_s30 + $0xa0] sm:$0xff] %v3010_v34  ;;  %v3022_v28 = vsel %vm6763_vm7, %v2961_v35, %v3021_v39 }
 0x1ba   : > { %v3025_v58 = vsel %vm6756_vm9, %v2917_v23, %v2905_v63  ;;  %3208 = vst [vmem:[%s4220_s30 + $0xa8] sm:$0xff] %v3017_v12  ;;  %vm6758_vm3 = vmmov %vm6757_vm2  ;;  %v3023_v63 = vsel %vm6749_vm10, %v2973_v8, %v3022_v28 }
 0x1bb   : > { %v3026_v40 = vsel %vm6758_vm3, %v2929_v61, %v3025_v58  ;;  %vm6760_vm5 = vmmov %vm6759_vm1  ;;  %v3024_v9 = vsel %vm6751_vm0, %v2985_v36, %v3023_v63 }
 0x1bc   : > { %v3027_v54 = vsel %vm6760_vm5, %v2941_v0, %v3026_v40  ;;  %vm6762_vm15 = vmmov %vm6761_vm14  ;;  %3209 = vst [vmem:[%s4220_s30 + $0xb0] sm:$0xff] %v3024_v9 }
 0x1bd   : > { %v3028_v45 = vsel %vm6762_vm15, %v2953_v2, %v3027_v54  ;;  %vm6764_vm6 = vmmov %vm6763_vm7 }
 0x1be   : > { %v3029_v18 = vsel %vm6764_vm6, %v2965_v1, %v3028_v45  ;;  %vm6765_vm11 = vmmov %vm6749_vm10 }
 0x1bf   : > { %v3030_v50 = vsel %vm6765_vm11, %v2977_v13, %v3029_v18  ;;  %vm6766_vm4 = vmmov %vm6751_vm0 }
 0x1c0   : > { %v3031_v22 = vsel %vm6766_vm4, %v2989_v4, %v3030_v50 }
 0x1c1   : > { %3210 = vst [vmem:[%s4220_s30 + $0xb8] sm:$0xff] %v3031_v22 }
 0x1c2 PF: > { %s18_s22 = sadd.s32 1, %s3325_s22   ;;  %s6767_s20 = smov %s3321_s21 }
 0x1c3   : > { %p15_p4 = scmp.ge.s32.totalorder %s18_s22, 4   ;;  %s6768_s21 = smov %s6770_s23 }
 0x1c5   :  { %17 = sbr.rel (!%p15_p4) target bundleno = 5 (0x5), region = 85 }
 0x1ca   :  { %3077 = vsyncpa [#allocation4], 1 }
 0x1cb   :  { %3079 = vsyncpa [#allocation4 + $0x1], 1 }
 0x1cc   :  { %3080 = vsyncpa [#allocation6], 1 }

// kernel: first_conv_block.2
= control target key start
LH: loop header
LB: loop body
LE: loop exit
PB: predicated region body
PF: predicated region fallthrough
CT: control target
= control target key end

     0   :  { %s3770_s18 = smov 0   ;;  %s3772_s19 = smov 0   ;;  %s7585_s0 = inlined_call_operand.vmem [shape: bf16[4,12,2,512], index: 0, kind: input, shape index: {}]   ;;  %s7586_s1 = inlined_call_operand.vmem [shape: bf16[4,256], index: 1, kind: input, shape index: {}]   ;;  %s7587_s2 = inlined_call_operand.vmem [shape: f32[4,1], index: 2, kind: input, shape index: {}]   ;;  %s7588_s3 = inlined_call_operand.vmem [shape: bf16[2,16,4,384], index: 3, kind: output, shape index: {0}]   ;;  %s7589_s4 = inlined_call_operand.vmem [shape: bf16[2,16,2,384], index: 4, kind: output, shape index: {1}]   ;;  %s7590_s5 = inlined_call_operand.vmem [shape: f32[2,2,4,2], index: 5, kind: output, shape index: {2}]  }
   0x1   :  { %s3774_s20 = smov 0   ;;  %s3776_s21 = smov 0  }
   0x2   :  { %s3778_s22 = smov 0   ;;  %s3780_s23 = smov 0  }
   0x3   :  { %s3782_s24 = smov 0  }
   0x4 LB: > { %s28_s25 = sadd.s32 1, %s3675_s21  ;;  %s31_s26 = sadd.s32 1, %s3679_s22  ;;  %s3687_s24 = sphi %s3782_s24, %s16_s24   ;;  %s3683_s23 = sphi %s3780_s23, %s9062_s23   ;;  %s3679_s22 = sphi %s3778_s22, %s9061_s22   ;;  %s3675_s21 = sphi %s3776_s21, %s9060_s21   ;;  %s3671_s20 = sphi %s3774_s20, %s9059_s20   ;;  %s3667_s19 = sphi %s3772_s19, %s9058_s19   ;;  %s3663_s18 = sphi %s3770_s18, %s9057_s18  }
   0x5   : > { %p29_p0 = scmp.ge.s32.totalorder %s28_s25, 8  ;;  %p3462_p1 = scmp.ge.s32.totalorder %s3687_s24, 1 }
   0x6   : > { %p224_p2 = scmp.lt.s32.totalorder %s3687_s24, 33  ;;  %s35_s27 = sadd.s32 1, %s3683_s23 }
   0x7   : > { %s9064_s25 = smov (%p29_p0, %s28_s25), 0  ;;  %s9066_s26 = smov (!%p29_p0, %s31_s26), %s3679_s22 }
   0x8   : > { %p225_p3 = pnand %p3462_p1, %p224_p2  ;;  %p33_p4 = scmp.ge.s32.totalorder %s9066_s26, 2 }
   0xa   : > { %s9068_s26 = smov (%p33_p4, %s9066_s26), 0  ;;  %s9070_s27 = smov (!%p33_p4, %s35_s27), %s3683_s23 }
   0xb   : > { %p37_p5 = scmp.ge.s32.totalorder %s9070_s27, 2  ;;  %228 = sbr.rel (%p225_p3) target bundleno = 1638 (0x666), region = 32 }
   0xd   : > { %s9072_s27 = smov (%p37_p5, %s9070_s27), 0 }
  0x10   : > { %s3463_s28 = sshll.u32 %s3671_s20, 1  ;;  %v7609_v0 = vlaneseq  ;;  %v3689_v1 = vmov 1966171168   ;;  %s3469_s6 = sshll.u32 %s3663_s18, 2  ;;  %vm7905_vm0 = vcmask 490496   ;;  %vm7903_vm1 = vcmask 482304  }
  0x11   : > { %s276_s29 = sadd.s32 %s3667_s19, %s3463_s28  ;;  %v334_v2 = vunpack.c.l.s4 %v3689_v1  ;;  %s7619_s11 = smov 126   ;;  %vm7950_vm2 = vcmask 1040384   ;;  %vm7895_vm3 = vcmask 474112   ;;  %vm596_vm4 = vcmask 1041408  }
  0x12   : > { %p277_p6 = scmp.lt.s32.totalorder %s276_s29, 3  ;;  %v3821_v4 = vshrl.u32 %v7609_v0, 7  ;;  %s7713_s12 = smov 127   ;;  %vm7914_vm5 = vcmask 1042432   ;;  %vm610_vm6 = vcmask 1043456   ;;  %vm7894_vm7 = vcmask 465920  }
  0x13   : > { %v335_v3 = vunpack.c.0.s8 %v334_v2  ;;  %s7601_s13 = smov 125   ;;  %s7591_s14 = smov 124   ;;  %vm7872_vm8 = vcmask 1044480   ;;  %vm7871_vm9 = vcmask 1039360   ;;  %vm7867_vm10 = vcmask 1022976  }
  0x14   : > { %7952 = vst [vmem:[#allocation2_spill] sm:$0xff] %v3821_v4  ;;  %s9074_s29 = smov (!%p277_p6, %s276_s29), 3  ;;  %s3694_s15 = smov 108   ;;  %vm7869_vm11 = vcmask 1031168   ;;  %vm7868_vm12 = vcmask 891904   ;;  %vm7870_vm13 = vcmask 883712  }
  0x15   : > { %s3511_s30 = smul.u32 48, %s9074_s29  ;;  %v3825_v5 = vsub.s32 %v335_v3, %v3821_v4  ;;  %s7624_s16 = smov 107   ;;  %vm7915_vm14 = vcmask 875520   ;;  %vm7881_vm15 = vcmask 867328  }
  0x16   : > { %s7638_s17 = smov 106   ;;  %s7599_s28 = smov 105  }
  0x17   : > { %s280_s9 = scalar_lea.vmem %s7585_s0, %s3511_s30  ;;  %s7597_s29 = smov 104  }
  0x18   : > { %s3830_s10 = scalar_lea.vmem %s280_s9, %s3469_s6  ;;  %s3699_s30 = smov 88  }
  0x19   : > { %v315_v6 = vld [vmem:[%s3830_s10] sm:$0xf]  ;;  %s7708_s6 = smov 87   ;;  %s7648_s7 = smov 86   ;;  %v3471_v32 = vld [vmem:[%s3830_s10 + $0x4] sm:$0xf] }
  0x1a   : > { %v339_v7 = vrot.slane %v315_v6, %v3825_v5  ;;  %v356_v8 = vcombine.low %v315_v6, %v315_v6  ;;  %s7595_s8 = smov 85   ;;  %s7593_s9 = smov 84   ;;  %v702_v33 = vcombine.low %v3471_v32, %v3471_v32  ;;  %v716_v39 = vrot.slane %v3471_v32, %v3825_v5 }
  0x1b   : > { %p284_p7 = scmp.lt.s32.totalorder %s3671_s20, 1  ;;  %p306_p9 = scmp.lt.s32.totalorder %s3667_s19, 1 }
  0x1c   : > { %v3835_v9 = vrot.slane %v339_v7, %v3825_v5  ;;  %v363_v10 = vrot.slane %v356_v8, %v3825_v5  ;;  %v393_v11 = vcombine.low %v339_v7, %v339_v7  ;;  %v340_v20 = vcombine.high %v339_v7, %v339_v7  ;;  %p3482_p10 = scmp.ne.s32.totalorder %s3663_s18, 0 }
  0x1d   : > { %v709_v35 = vrot.slane %v702_v33, %v3825_v5  ;;  %v749_v43 = vcombine.low %v716_v39, %v716_v39  ;;  %v4042_v55 = vrot.slane %v716_v39, %v3825_v5  ;;  %v792_v63 = vcombine.high %v716_v39, %v716_v39  ;;  %s9076_s20 = smov (!%p284_p7, %s3671_s20), 1 }
  0x1e   : > { %404 = vrot.lane.b32.xlu1 %v3835_v9, %s7619_s11  ;;  %v3842_v12 = vcombine.high %v3835_v9, %v3835_v9  ;;  %v3845_v13 = vrot.slane %v363_v10, %v3825_v5  ;;  %v3850_v14 = vrot.slane %v393_v11, %v3825_v5  ;;  %v364_v15 = vcombine.high %v363_v10, %v363_v10 }
  0x1f   : > { %v414_v19 = vcombine.low %v363_v10, %v363_v10  ;;  %v3876_v23 = vrot.slane %v340_v20, %v3825_v5  ;;  %v3890_v26 = vcombine.low %v3835_v9, %v3835_v9  ;;  %v717_v38 = vcombine.high %v709_v35, %v709_v35  ;;  %7957 = vst [vmem:[#allocation7_spill] sm:$0xff] %v4042_v55 }
  0x20   : > { %381 = vrot.lane.b32.xlu0 %v3845_v13, %s7713_s12  ;;  %v3857_v16 = vrot.slane %v364_v15, %v3825_v5  ;;  %v379_v17 = vcombine.high %v3845_v13, %v3845_v13  ;;  %v401_v18 = vcombine.high %v3850_v14, %v3850_v14  ;;  %v449_v28 = vcombine.low %v3845_v13, %v3845_v13 }
  0x21   : > { %v3870_v21 = vrot.slane %v414_v19, %v3825_v5  ;;  %v3885_v25 = vcombine.low %v3876_v23, %v3876_v23  ;;  %v463_v29 = vcombine.low %v3850_v14, %v3850_v14  ;;  %v3931_v31 = vcombine.high %v3876_v23, %v3876_v23 }
  0x22   : > { %408 = vrot.lane.b32.xlu1 %v3842_v12, %s7619_s11  ;;  %v380_v22 = vcombine.high %v3857_v16, %v3857_v16  ;;  %v450_v27 = vcombine.low %v3857_v16, %v3857_v16  ;;  %v4005_v42 = vrot.slane %v717_v38, %v3825_v5  ;;  %v4014_v46 = vrot.slane %v709_v35, %v3825_v5 }
  0x23   : > { %v422_v24 = vcombine.high %v3870_v21, %v3870_v21  ;;  %v476_v30 = vcombine.low %v3870_v21, %v3870_v21  ;;  %7953 = vst [vmem:[#allocation3_spill] sm:$0xff] %v3931_v31  ;;  %v4019_v47 = vrot.slane %v749_v43, %v3825_v5  ;;  %v771_v52 = vcombine.low %v709_v35, %v709_v35 }
  0x24   : > { %402 = vrot.lane.b32.xlu0 %v3850_v14, %s7619_s11  ;;  %v4029_v50 = vcombine.high %v4014_v46, %v4014_v46  ;;  %v4059_v59 = vcombine.high %v4042_v55, %v4042_v55  ;;  %v4077_v1 = vcombine.low %v4042_v55, %v4042_v55  ;;  %v4086_v6 = vrot.slane %v792_v63, %v3825_v5 }
  0x25   : > { %v4035_v51 = vcombine.high %v4019_v47, %v4019_v47  ;;  %v4049_v56 = vrot.slane %v771_v52, %v3825_v5  ;;  %v4104_v11 = vcombine.low %v4014_v46, %v4014_v46  ;;  %v4190_v39 = vcombine.high %v4005_v42, %v4005_v42 }
  0x26   : > { %425 = vrot.lane.b32.xlu1 %v3845_v13, %s7601_s13  ;;  %7959 = vst [vmem:[#allocation9_spill] sm:$0xff] %v4059_v59  ;;  %7963 = vst [vmem:[#allocation13_spill] sm:$0xff] %v4086_v6  ;;  %v4098_v10 = vcombine.low %v4086_v6, %v4086_v6 }
  0x27   : > { %v4065_v60 = vcombine.high %v4049_v56, %v4049_v56 }
  0x28   : > { %383 = vrot.lane.b32.xlu0 %v3857_v16, %s7713_s12 }
  0x2a   : > { %385 = vrot.lane.b32.xlu1 %v379_v17, %s7713_s12 }
  0x2c   : > { %406 = vrot.lane.b32.xlu0 %v401_v18, %s7619_s11 }
  0x2e   : > { %429 = vrot.lane.b32.xlu1 %v379_v17, %s7601_s13 }
  0x30   : > { %423 = vrot.lane.b32.xlu0 %v3870_v21, %s7601_s13 }
  0x32   : > { %387 = vrot.lane.b32.xlu1 %v380_v22, %s7713_s12 }
  0x34   : > { %427 = vrot.lane.b32.xlu0 %v422_v24, %s7601_s13  ;;  %s7607_s13 = smov 58  }
  0x36   : > { %439 = vrot.lane.b32.xlu1 %v3885_v25, %s7591_s14 }
  0x38   : > { %437 = vrot.lane.b32.xlu0 %v3890_v26, %s7591_s14 }
  0x3a   : > { %443 = vrot.lane.b32.xlu1 %v3876_v23, %s7591_s14 }
  0x3c   : > { %441 = vrot.lane.b32.xlu0 %v3835_v9, %s7591_s14  ;;  %s7664_s14 = smov 68  }
  0x3e   : > { %453 = vrot.lane.b32.xlu1 %v450_v27, %s3694_s15 }
  0x40   : > { %451 = vrot.lane.b32.xlu0 %v449_v28, %s3694_s15 }
  0x42   : > { %457 = vrot.lane.b32.xlu1 %v3857_v16, %s3694_s15 }
  0x44   : > { %455 = vrot.lane.b32.xlu0 %v3845_v13, %s3694_s15 }
  0x46   : > { %466 = vrot.lane.b32.xlu1 %v3890_v26, %s7624_s16 }
  0x48   : > { %464 = vrot.lane.b32.xlu0 %v463_v29, %s7624_s16 }
  0x4a   : > { %470 = vrot.lane.b32.xlu1 %v3835_v9, %s7624_s16 }
  0x4c   : > { %468 = vrot.lane.b32.xlu0 %v3850_v14, %s7624_s16 }
  0x4e   : > { %479 = vrot.lane.b32.xlu1 %v449_v28, %s7638_s17 }
  0x50   : > { %477 = vrot.lane.b32.xlu0 %v476_v30, %s7638_s17 }
  0x52   : > { %483 = vrot.lane.b32.xlu1 %v3845_v13, %s7638_s17 }
  0x54   : > { %481 = vrot.lane.b32.xlu0 %v3870_v21, %s7638_s17 }
  0x56   : > { %492 = vrot.lane.b32.xlu1 %v3876_v23, %s7599_s28 }
  0x58   : > { %490 = vrot.lane.b32.xlu0 %v3835_v9, %s7599_s28 }
  0x5a   : > { %496 = vrot.lane.b32.xlu1 %v3931_v31, %s7599_s28 }
  0x5c   : > { %494 = vrot.lane.b32.xlu0 %v3842_v12, %s7599_s28  ;;  %s7605_s28 = smov 59  }
  0x5e   : > { %504 = vrot.lane.b32.xlu1 %v3857_v16, %s7597_s29 }
  0x60   : > { %502 = vrot.lane.b32.xlu0 %v3845_v13, %s7597_s29 }
  0x62   : > { %508 = vrot.lane.b32.xlu1 %v380_v22, %s7597_s29 }
  0x64   : > { %506 = vrot.lane.b32.xlu0 %v379_v17, %s7597_s29  ;;  %s7603_s29 = smov 60  }
  0x66   : > { %516 = vrot.lane.b32.xlu1 %v3835_v9, %s3699_s30 }
  0x68   : > { %514 = vrot.lane.b32.xlu0 %v3850_v14, %s3699_s30 }
  0x6a   : > { %520 = vrot.lane.b32.xlu1 %v3842_v12, %s3699_s30 }
  0x6c   : > { %518 = vrot.lane.b32.xlu0 %v401_v18, %s3699_s30  ;;  %v4128_v18 = vcombine.low %v4019_v47, %v4019_v47 }
  0x6e   : > { %528 = vrot.lane.b32.xlu1 %v3845_v13, %s7708_s6 }
  0x70   : > { %526 = vrot.lane.b32.xlu0 %v3870_v21, %s7708_s6 }
  0x72   : > { %532 = vrot.lane.b32.xlu1 %v379_v17, %s7708_s6  ;;  %v4122_v17 = vcombine.low %v4005_v42, %v4005_v42 }
  0x74   : > { %530 = vrot.lane.b32.xlu0 %v422_v24, %s7708_s6  ;;  %v4148_v24 = vcombine.low %v4049_v56, %v4049_v56 }
  0x76   : > { %540 = vrot.lane.b32.xlu1 %v3885_v25, %s7648_s7 }
  0x78   : > { %538 = vrot.lane.b32.xlu0 %v3890_v26, %s7648_s7 }
  0x7a   : > { %544 = vrot.lane.b32.xlu1 %v3876_v23, %s7648_s7 }
  0x7c   : > { %542 = vrot.lane.b32.xlu0 %v3835_v9, %s7648_s7 }
  0x7e   : > { %552 = vrot.lane.b32.xlu1 %v450_v27, %s7595_s8 }
  0x80   : > { %550 = vrot.lane.b32.xlu0 %v449_v28, %s7595_s8 }
  0x82   : > { %556 = vrot.lane.b32.xlu1 %v3857_v16, %s7595_s8 }
  0x84   : > { %554 = vrot.lane.b32.xlu0 %v3845_v13, %s7595_s8  ;;  %s7697_s8 = smov 61  }
  0x86   : > { %564 = vrot.lane.b32.xlu1 %v3890_v26, %s7593_s9 }
  0x88   : > { %562 = vrot.lane.b32.xlu0 %v463_v29, %s7593_s9 }
  0x8a   : > { %568 = vrot.lane.b32.xlu1 %v3835_v9, %s7593_s9 }
  0x8c   : > { %566 = vrot.lane.b32.xlu0 %v3850_v14, %s7593_s9  ;;  %s3705_s9 = smov 109  }
  0x8e   : > { %576 = vrot.lane.b32.xlu1 %v449_v28, %s7664_s14 }
  0x90   : > { %v3981_v34 = vpop.permute.xlu1 %404  ;;  %574 = vrot.lane.b32.xlu0 %v476_v30, %s7664_s14 }
  0x92   : > { %580 = vrot.lane.b32.xlu1 %v3845_v13, %s7664_s14  ;;  %v3987_v36 = vpop.permute.xlu0 %381 }
  0x94   : > { %v3989_v37 = vpop.permute.xlu1 %408  ;;  %578 = vrot.lane.b32.xlu0 %v3870_v21, %s7664_s14 }
  0x95   : > { %7954 = vst [vmem:[#allocation4_spill] sm:$0xff] %v3989_v37 }
  0x96   : > { %691 = vrot.lane.b32.xlu1 %v3885_v25, %s3705_s9  ;;  %v3996_v40 = vpop.permute.xlu0 %402 }
  0x98   : > { %v3998_v41 = vpop.permute.xlu1 %425  ;;  %689 = vrot.lane.b32.xlu0 %v3890_v26, %s3705_s9 }
  0x9a   : > { %695 = vrot.lane.b32.xlu1 %v3876_v23, %s3705_s9  ;;  %v4007_v44 = vpop.permute.xlu0 %383 }
  0x9c   : > { %v4009_v45 = vpop.permute.xlu1 %385  ;;  %693 = vrot.lane.b32.xlu0 %v3835_v9, %s3705_s9 }
  0x9e   : > { %742 = vrot.lane.b32.xlu1 %v4005_v42, %s7697_s8  ;;  %v4021_v48 = vpop.permute.xlu0 %406 }
  0xa0   : > { %v4023_v49 = vpop.permute.xlu1 %429  ;;  %740 = vrot.lane.b32.xlu0 %v4014_v46, %s7697_s8 }
  0xa1   : > { %7955 = vst [vmem:[#allocation5_spill] sm:$0xff] %v4023_v49 }
  0xa2   : > { %759 = vrot.lane.b32.xlu1 %v4019_v47, %s7603_s29  ;;  %v4037_v53 = vpop.permute.xlu0 %423 }
  0xa4   : > { %v4039_v54 = vpop.permute.xlu1 %387  ;;  %744 = vrot.lane.b32.xlu0 %v4029_v50, %s7697_s8 }
  0xa5   : > { %7956 = vst [vmem:[#allocation6_spill] sm:$0xff] %v4039_v54 }
  0xa6   : > { %763 = vrot.lane.b32.xlu1 %v4035_v51, %s7603_s29  ;;  %v4051_v57 = vpop.permute.xlu0 %427 }
  0xa8   : > { %v4053_v58 = vpop.permute.xlu1 %439  ;;  %761 = vrot.lane.b32.xlu0 %v4042_v55, %s7603_s29 }
  0xa9   : > { %7958 = vst [vmem:[#allocation8_spill] sm:$0xff] %v4053_v58 }
  0xaa   : > { %780 = vrot.lane.b32.xlu1 %v4049_v56, %s7605_s28  ;;  %v4067_v61 = vpop.permute.xlu0 %437 }
  0xab   : > { %7960 = vst [vmem:[#allocation10_spill] sm:$0xff] %v4067_v61 }
  0xac   : > { %v4069_v62 = vpop.permute.xlu1 %443  ;;  %765 = vrot.lane.b32.xlu0 %v4059_v59, %s7603_s29  ;;  %s7610_s29 = smov 57  }
  0xad   : > { %7961 = vst [vmem:[#allocation11_spill] sm:$0xff] %v4069_v62 }
  0xae   : > { %784 = vrot.lane.b32.xlu1 %v4065_v60, %s7605_s28  ;;  %v4079_v2 = vpop.permute.xlu0 %441 }
  0xaf   : > { %7962 = vst [vmem:[#allocation12_spill] sm:$0xff] %v4079_v2 }
  0xb0   : > { %v4081_v3 = vpop.permute.xlu1 %453  ;;  %782 = vrot.lane.b32.xlu0 %v4014_v46, %s7605_s28 }
  0xb2   : > { %802 = vrot.lane.b32.xlu1 %v4077_v1, %s7607_s13  ;;  %v4090_v7 = vpop.permute.xlu0 %451 }
  0xb4   : > { %v4092_v8 = vpop.permute.xlu1 %457  ;;  %786 = vrot.lane.b32.xlu0 %v4029_v50, %s7605_s28  ;;  %s3711_s28 = smov 41  }
  0xb5   : > { %7964 = vst [vmem:[#allocation14_spill] sm:$0xff] %v4092_v8 }
  0xb6   : > { %806 = vrot.lane.b32.xlu1 %v4042_v55, %s7607_s13  ;;  %v4106_v13 = vpop.permute.xlu0 %455 }
  0xb8   : > { %v4108_v14 = vpop.permute.xlu1 %466  ;;  %804 = vrot.lane.b32.xlu0 %v4098_v10, %s7607_s13 }
  0xba   : > { %816 = vrot.lane.b32.xlu1 %v4104_v11, %s7610_s29  ;;  %v4114_v15 = vpop.permute.xlu0 %464 }
  0xbc   : > { %v4116_v16 = vpop.permute.xlu1 %470  ;;  %808 = vrot.lane.b32.xlu0 %v4086_v6, %s7607_s13  ;;  %s3712_s13 = smov 40  }
  0xbd   : > { %7965 = vst [vmem:[#allocation15_spill] sm:$0xff] %v4116_v16 }
  0xbe   : > { %820 = vrot.lane.b32.xlu1 %v4014_v46, %s7610_s29  ;;  %v4130_v19 = vpop.permute.xlu0 %468 }
  0xc0   : > { %v4132_v20 = vpop.permute.xlu1 %479  ;;  %818 = vrot.lane.b32.xlu0 %v4122_v17, %s7610_s29 }
  0xc2   : > { %829 = vrot.lane.b32.xlu1 %v4128_v18, %s3711_s28  ;;  %v4138_v21 = vpop.permute.xlu0 %477 }
  0xc4   : > { %v4140_v22 = vpop.permute.xlu1 %483  ;;  %822 = vrot.lane.b32.xlu0 %v4005_v42, %s7610_s29  ;;  %s3713_s29 = smov 110  }
  0xc5   : > { %7966 = vst [vmem:[#allocation16_spill] sm:$0xff] %v4140_v22 }
  0xc6   : > { %833 = vrot.lane.b32.xlu1 %v4019_v47, %s3711_s28  ;;  %v4150_v25 = vpop.permute.xlu0 %481 }
  0xc7   : > { %7967 = vst [vmem:[#allocation17_spill] sm:$0xff] %v4150_v25 }
  0xc8   : > { %v4152_v26 = vpop.permute.xlu1 %492  ;;  %831 = vrot.lane.b32.xlu0 %v4077_v1, %s3711_s28 }
  0xc9   : > { %7968 = vst [vmem:[#allocation18_spill] sm:$0xff] %v4152_v26 }
  0xca   : > { %842 = vrot.lane.b32.xlu1 %v4148_v24, %s3712_s13  ;;  %v4158_v27 = vpop.permute.xlu0 %490 }
  0xcb   : > { %7969 = vst [vmem:[#allocation19_spill] sm:$0xff] %v4158_v27 }
  0xcc   : > { %v4160_v28 = vpop.permute.xlu1 %496  ;;  %835 = vrot.lane.b32.xlu0 %v4042_v55, %s3711_s28 }
  0xcd   : > { %7970 = vst [vmem:[#allocation20_spill] sm:$0xff] %v4160_v28 }
  0xce   : > { %846 = vrot.lane.b32.xlu1 %v4049_v56, %s3712_s13  ;;  %v4166_v29 = vpop.permute.xlu0 %494 }
  0xcf   : > { %7971 = vst [vmem:[#allocation21_spill] sm:$0xff] %v4166_v29 }
  0xd0   : > { %v4168_v30 = vpop.permute.xlu1 %504  ;;  %844 = vrot.lane.b32.xlu0 %v4104_v11, %s3712_s13 }
  0xd1   : > { %7972 = vst [vmem:[#allocation22_spill] sm:$0xff] %v4168_v30 }
  0xd2   : > { %943 = vrot.lane.b32.xlu1 %v4014_v46, %s7713_s12  ;;  %v4174_v32 = vpop.permute.xlu0 %502 }
  0xd3   : > { %7973 = vst [vmem:[#allocation23_spill] sm:$0xff] %v4174_v32 }
  0xd4   : > { %v4176_v33 = vpop.permute.xlu1 %508  ;;  %848 = vrot.lane.b32.xlu0 %v4014_v46, %s3712_s13 }
  0xd5   : > { %7974 = vst [vmem:[#allocation24_spill] sm:$0xff] %v4176_v33 }
  0xd6   : > { %947 = vrot.lane.b32.xlu1 %v4029_v50, %s7713_s12  ;;  %v4182_v35 = vpop.permute.xlu0 %506 }
  0xd7   : > { %7975 = vst [vmem:[#allocation25_spill] sm:$0xff] %v4182_v35 }
  0xd8   : > { %v4184_v38 = vpop.permute.xlu1 %516  ;;  %945 = vrot.lane.b32.xlu0 %v4005_v42, %s7713_s12 }
  0xd9   : > { %7976 = vst [vmem:[#allocation26_spill] sm:$0xff] %v4184_v38 }
  0xda   : > { %954 = vrot.lane.b32.xlu1 %v4019_v47, %s7619_s11  ;;  %v4194_v43 = vpop.permute.xlu0 %514 }
  0xdb   : > { %7977 = vst [vmem:[#allocation27_spill] sm:$0xff] %v4194_v43 }
  0xdc   : > { %v4196_v52 = vpop.permute.xlu1 %520  ;;  %949 = vrot.lane.b32.xlu0 %v4190_v39, %s7713_s12  ;;  %s3728_s12 = smov 111  }
  0xdd   : > { %7978 = vst [vmem:[#allocation28_spill] sm:$0xff] %v4196_v52 }
  0xde   : > { %958 = vrot.lane.b32.xlu1 %v4035_v51, %s7619_s11  ;;  %v4202_v63 = vpop.permute.xlu0 %518 }
  0xdf   : > { %7979 = vst [vmem:[#allocation29_spill] sm:$0xff] %v4202_v63 }
  0xe0   : > { %v4204_v0 = vpop.permute.xlu1 %528  ;;  %956 = vrot.lane.b32.xlu0 %v4042_v55, %s7619_s11 }
  0xe1   : > { %7980 = vst [vmem:[#allocation30_spill] sm:$0xff] %v4204_v0 }
  0xe2   : > { %965 = vrot.lane.b32.xlu1 %v4049_v56, %s3713_s29  ;;  %v4210_v4 = vpop.permute.xlu0 %526 }
  0xe3   : > { %7981 = vst [vmem:[#allocation31_spill] sm:$0xff] %v4210_v4 }
  0xe4   : > { %v4212_v62 = vpop.permute.xlu1 %532  ;;  %960 = vrot.lane.b32.xlu0 %v4059_v59, %s7619_s11  ;;  %s3714_s11 = smov 90  }
  0xe5   : > { %7982 = vst [vmem:[#allocation32_spill] sm:$0xff] %v4212_v62 }
  0xe6   : > { %969 = vrot.lane.b32.xlu1 %v4065_v60, %s3713_s29  ;;  %v4218_v52 = vpop.permute.xlu0 %530 }
  0xe7   : > { %7983 = vst [vmem:[#allocation33_spill] sm:$0xff] %v4218_v52 }
  0xe8   : > { %v4220_v33 = vpop.permute.xlu1 %540  ;;  %967 = vrot.lane.b32.xlu0 %v4014_v46, %s3713_s29 }
  0xe9   : > { %7984 = vst [vmem:[#allocation34_spill] sm:$0xff] %v4220_v33  ;;  %v4306_v33 = vcombine.high %v4086_v6, %v4086_v6 }
  0xea   : > { %977 = vrot.lane.b32.xlu1 %v4077_v1, %s3705_s9  ;;  %v4226_v61 = vpop.permute.xlu0 %538 }
  0xeb   : > { %7985 = vst [vmem:[#allocation35_spill] sm:$0xff] %v4226_v61  ;;  %8002 = vst [vmem:[#allocation52_spill] sm:$0xff] %v4306_v33 }
  0xec   : > { %v4228_v4 = vpop.permute.xlu1 %544  ;;  %971 = vrot.lane.b32.xlu0 %v4029_v50, %s3713_s29 }
  0xed   : > { %7986 = vst [vmem:[#allocation36_spill] sm:$0xff] %v4228_v4 }
  0xee   : > { %981 = vrot.lane.b32.xlu1 %v4042_v55, %s3705_s9  ;;  %v4234_v62 = vpop.permute.xlu0 %542 }
  0xef   : > { %7987 = vst [vmem:[#allocation37_spill] sm:$0xff] %v4234_v62 }
  0xf0   : > { %v4236_v58 = vpop.permute.xlu1 %552  ;;  %979 = vrot.lane.b32.xlu0 %v4098_v10, %s3705_s9 }
  0xf1   : > { %7988 = vst [vmem:[#allocation38_spill] sm:$0xff] %v4236_v58 }
  0xf2   : > { %988 = vrot.lane.b32.xlu1 %v4104_v11, %s3694_s15  ;;  %v4242_v2 = vpop.permute.xlu0 %550 }
  0xf3   : > { %7989 = vst [vmem:[#allocation39_spill] sm:$0xff] %v4242_v2 }
  0xf4   : > { %v4244_v61 = vpop.permute.xlu1 %556  ;;  %983 = vrot.lane.b32.xlu0 %v4086_v6, %s3705_s9 }
  0xf5   : > { %7990 = vst [vmem:[#allocation40_spill] sm:$0xff] %v4244_v61 }
  0xf6   : > { %992 = vrot.lane.b32.xlu1 %v4014_v46, %s3694_s15  ;;  %v4250_v4 = vpop.permute.xlu0 %554 }
  0xf7   : > { %7991 = vst [vmem:[#allocation41_spill] sm:$0xff] %v4250_v4 }
  0xf8   : > { %v4252_v43 = vpop.permute.xlu1 %564  ;;  %990 = vrot.lane.b32.xlu0 %v4122_v17, %s3694_s15 }
  0xf9   : > { %7992 = vst [vmem:[#allocation42_spill] sm:$0xff] %v4252_v43 }
  0xfa   : > { %999 = vrot.lane.b32.xlu1 %v4128_v18, %s7624_s16  ;;  %v4258_v58 = vpop.permute.xlu0 %562 }
  0xfb   : > { %7993 = vst [vmem:[#allocation43_spill] sm:$0xff] %v4258_v58 }
  0xfc   : > { %v4260_v2 = vpop.permute.xlu1 %568  ;;  %994 = vrot.lane.b32.xlu0 %v4005_v42, %s3694_s15 }
  0xfd   : > { %7994 = vst [vmem:[#allocation44_spill] sm:$0xff] %v4260_v2 }
  0xfe   : > { %1003 = vrot.lane.b32.xlu1 %v4019_v47, %s7624_s16  ;;  %v4266_v61 = vpop.permute.xlu0 %566 }
  0xff   : > { %7995 = vst [vmem:[#allocation45_spill] sm:$0xff] %v4266_v61 }
 0x100   : > { %v4268_v4 = vpop.permute.xlu1 %576  ;;  %1001 = vrot.lane.b32.xlu0 %v4077_v1, %s7624_s16 }
 0x101   : > { %7996 = vst [vmem:[#allocation46_spill] sm:$0xff] %v4268_v4 }
 0x102   : > { %1010 = vrot.lane.b32.xlu1 %v4148_v24, %s7638_s17  ;;  %v4274_v43 = vpop.permute.xlu0 %574 }
 0x103   : > { %7997 = vst [vmem:[#allocation47_spill] sm:$0xff] %v4274_v43 }
 0x104   : > { %v4276_v58 = vpop.permute.xlu1 %580  ;;  %1005 = vrot.lane.b32.xlu0 %v4042_v55, %s7624_s16  ;;  %s3715_s16 = smov 89  }
 0x105   : > { %7998 = vst [vmem:[#allocation48_spill] sm:$0xff] %v4276_v58 }
 0x106   : > { %1014 = vrot.lane.b32.xlu1 %v4049_v56, %s7638_s17  ;;  %v4282_v2 = vpop.permute.xlu0 %578 }
 0x107   : > { %7999 = vst [vmem:[#allocation49_spill] sm:$0xff] %v4282_v2 }
 0x108   : > { %v4284_v61 = vpop.permute.xlu1 %691  ;;  %1012 = vrot.lane.b32.xlu0 %v4104_v11, %s7638_s17 }
 0x10a   : > { %1021 = vrot.lane.b32.xlu1 %v4042_v55, %s3714_s11  ;;  %v4290_v43 = vpop.permute.xlu0 %689 }
 0x10c   : > { %v4292_v58 = vpop.permute.xlu1 %695  ;;  %1016 = vrot.lane.b32.xlu0 %v4014_v46, %s7638_s17  ;;  %s3716_s17 = smov 70  }
 0x10d   : > { %8000 = vst [vmem:[#allocation50_spill] sm:$0xff] %v4292_v58 }
 0x10e   : > { %1025 = vrot.lane.b32.xlu1 %v4059_v59, %s3714_s11  ;;  %v4298_v4 = vpop.permute.xlu0 %693 }
 0x110   : > { %v4300_v2 = vpop.permute.xlu1 %742  ;;  %1023 = vrot.lane.b32.xlu0 %v4086_v6, %s3714_s11 }
 0x111   : > { %8001 = vst [vmem:[#allocation51_spill] sm:$0xff] %v4300_v2 }
 0x112   : > { %1033 = vrot.lane.b32.xlu1 %v4014_v46, %s3715_s16  ;;  %v4310_v62 = vpop.permute.xlu0 %740 }
 0x113   : > { %8003 = vst [vmem:[#allocation53_spill] sm:$0xff] %v4310_v62 }
 0x114   : > { %v4312_v32 = vpop.permute.xlu1 %759  ;;  %1027 = vrot.lane.b32.xlu0 %v4306_v33, %s3714_s11 }
 0x115   : > { %8004 = vst [vmem:[#allocation54_spill] sm:$0xff] %v4312_v32 }
 0x116   : > { %1037 = vrot.lane.b32.xlu1 %v4029_v50, %s3715_s16  ;;  %v4318_v0 = vpop.permute.xlu0 %744 }
 0x117   : > { %8005 = vst [vmem:[#allocation55_spill] sm:$0xff] %v4318_v0 }
 0x118   : > { %v4320_v52 = vpop.permute.xlu1 %763  ;;  %1035 = vrot.lane.b32.xlu0 %v4005_v42, %s3715_s16 }
 0x119   : > { %8006 = vst [vmem:[#allocation56_spill] sm:$0xff] %v4320_v52 }
 0x11a   : > { %1045 = vrot.lane.b32.xlu1 %v4019_v47, %s3699_s30  ;;  %v4326_v38 = vpop.permute.xlu0 %761 }
 0x11b   : > { %8007 = vst [vmem:[#allocation57_spill] sm:$0xff] %v4326_v38 }
 0x11c   : > { %v4328_v63 = vpop.permute.xlu1 %780  ;;  %1039 = vrot.lane.b32.xlu0 %v4190_v39, %s3715_s16 }
 0x11d   : > { %8008 = vst [vmem:[#allocation58_spill] sm:$0xff] %v4328_v63 }
 0x11e   : > { %1049 = vrot.lane.b32.xlu1 %v4035_v51, %s3699_s30  ;;  %v766_v30 = vpop.permute.xlu0 %765 }
 0x120   : > { %v4334_v35 = vpop.permute.xlu1 %784  ;;  %1047 = vrot.lane.b32.xlu0 %v4042_v55, %s3699_s30 }
 0x121   : > { %8009 = vst [vmem:[#allocation59_spill] sm:$0xff] %v4334_v35 }
 0x122   : > { %1056 = vrot.lane.b32.xlu1 %v4049_v56, %s7708_s6  ;;  %v4340_v31 = vpop.permute.xlu0 %782 }
 0x123   : > { %8010 = vst [vmem:[#allocation60_spill] sm:$0xff] %v4340_v31 }
 0x124   : > { %v4342_v33 = vpop.permute.xlu1 %802  ;;  %1051 = vrot.lane.b32.xlu0 %v4059_v59, %s3699_s30 }
 0x125   : > { %8011 = vst [vmem:[#allocation61_spill] sm:$0xff] %v4342_v33 }
 0x126   : > { %1060 = vrot.lane.b32.xlu1 %v4065_v60, %s7708_s6  ;;  %v787_v51 = vpop.permute.xlu0 %786 }
 0x128   : > { %v4348_v39 = vpop.permute.xlu1 %806  ;;  %1058 = vrot.lane.b32.xlu0 %v4014_v46, %s7708_s6 }
 0x129   : > { %8012 = vst [vmem:[#allocation62_spill] sm:$0xff] %v4348_v39 }
 0x12a   : > { %1067 = vrot.lane.b32.xlu1 %v4077_v1, %s7648_s7  ;;  %v4354_v63 = vpop.permute.xlu0 %804 }
 0x12b   : > { %8013 = vst [vmem:[#allocation63_spill] sm:$0xff] %v4354_v63 }
 0x12c   : > { %v4356_v31 = vpop.permute.xlu1 %816  ;;  %1062 = vrot.lane.b32.xlu0 %v4029_v50, %s7708_s6  ;;  %v791_v50 = vsel %vm7903_vm1, %v4334_v35, %v787_v51  ;;  %s3727_s6 = smov 112  }
 0x12d   : > { %8014 = vst [vmem:[#allocation64_spill] sm:$0xff] %v4356_v31  ;;  %v770_v31 = vsel %vm7905_vm0, %v4320_v52, %v766_v30 }
 0x12e   : > { %1071 = vrot.lane.b32.xlu1 %v4042_v55, %s7648_s7  ;;  %v809_v60 = vpop.permute.xlu0 %808 }
 0x12f   : > { %v813_v32 = vsel %vm7895_vm3, %v4348_v39, %v809_v60 }
 0x130   : > { %v4362_v59 = vpop.permute.xlu1 %820  ;;  %1069 = vrot.lane.b32.xlu0 %v4098_v10, %s7648_s7  ;;  %v892_v10 = vsel %vm7950_vm2, %v4160_v28, %v4318_v0 }
 0x131   : > { %8015 = vst [vmem:[#allocation65_spill] sm:$0xff] %v4362_v59  ;;  %v900_v30 = vsel %vm596_vm4, %v892_v10, %v770_v31 }
 0x132   : > { %1078 = vrot.lane.b32.xlu1 %v4104_v11, %s3716_s17  ;;  %v4370_v33 = vpop.permute.xlu0 %818  ;;  %v908_v51 = vsel %vm7914_vm5, %v900_v30, %v791_v50  ;;  %v4401_v50 = vld [vmem:[%s3830_s10 + $0x8] sm:$0xf] }
 0x133   : > { %8016 = vst [vmem:[#allocation66_spill] sm:$0xff] %v4370_v33  ;;  %v916_v33 = vsel %vm610_vm6, %v908_v51, %v813_v32  ;;  %8021 = vst [vmem:[#allocation71_spill] sm:$0xff] %v4401_v50  ;;  %v1240_v32 = vrot.slane %v4401_v50, %v3825_v5 }
 0x134   : > { %v4374_v63 = vpop.permute.xlu1 %829  ;;  %1073 = vrot.lane.b32.xlu0 %v4086_v6, %s7648_s7  ;;  %s3717_s7 = smov 69  }
 0x135   : > { %8017 = vst [vmem:[#allocation67_spill] sm:$0xff] %v4374_v63 }
 0x136   : > { %1082 = vrot.lane.b32.xlu1 %v4014_v46, %s3716_s17  ;;  %v823_v63 = vpop.permute.xlu0 %822 }
 0x137   : > { %v827_v60 = vsel %vm7894_vm7, %v4362_v59, %v823_v63 }
 0x138   : > { %v4390_v39 = vpop.permute.xlu1 %833  ;;  %v4393_v6 = vsel %vm7872_vm8, %v916_v33, %v827_v60  ;;  %1080 = vrot.lane.b32.xlu0 %v4122_v17, %s3716_s17 }
 0x139   : > { %8018 = vst [vmem:[#allocation68_spill] sm:$0xff] %v4390_v39  ;;  %8019 = vst [vmem:[#allocation69_spill] sm:$0xff] %v4393_v6  ;;  %v1303_v6 = vcombine.high %v1240_v32, %v1240_v32 }
 0x13a   : > { %1090 = vrot.lane.b32.xlu1 %v4128_v18, %s3717_s7  ;;  %v4398_v31 = vpop.permute.xlu0 %831  ;;  %v1241_v18 = vcombine.low %v1240_v32, %v1240_v32 }
 0x13b   : > { %8020 = vst [vmem:[#allocation70_spill] sm:$0xff] %v4398_v31 }
 0x13c   : > { %v4403_v10 = vpop.permute.xlu1 %842  ;;  %1084 = vrot.lane.b32.xlu0 %v4005_v42, %s3716_s17  ;;  %v1266_v42 = vcombine.low %v4401_v50, %v4401_v50  ;;  %s3718_s17 = smov 83   ;;  %v4446_v50 = vrot.slane %v1240_v32, %v3825_v5 }
 0x13d   : > { %8022 = vst [vmem:[#allocation72_spill] sm:$0xff] %v4403_v10 }
 0x13e   : > { %1094 = vrot.lane.b32.xlu1 %v4019_v47, %s3717_s7  ;;  %v4410_v33 = vpop.permute.xlu0 %835  ;;  %v4427_v47 = vrot.slane %v1241_v18, %v3825_v5  ;;  %8031 = vst [vmem:[#allocation81_spill] sm:$0xff] %v4446_v50 }
 0x13f   : > { %8023 = vst [vmem:[#allocation73_spill] sm:$0xff] %v4410_v33 }
 0x140   : > { %v4412_v17 = vpop.permute.xlu1 %846  ;;  %1092 = vrot.lane.b32.xlu0 %v4077_v1, %s3717_s7  ;;  %v4439_v60 = vcombine.high %v4427_v47, %v4427_v47  ;;  %v4538_v10 = vcombine.low %v4427_v47, %v4427_v47 }
 0x141   : > { %8024 = vst [vmem:[#allocation74_spill] sm:$0xff] %v4412_v17 }
 0x142   : > { %1102 = vrot.lane.b32.xlu1 %v4148_v24, %s7664_s14  ;;  %v4417_v63 = vpop.permute.xlu0 %844  ;;  %v1273_v24 = vrot.slane %v1266_v42, %v3825_v5 }
 0x143   : > { %8025 = vst [vmem:[#allocation75_spill] sm:$0xff] %v4417_v63 }
 0x144   : > { %v4419_v30 = vpop.permute.xlu1 %943  ;;  %1096 = vrot.lane.b32.xlu0 %v4042_v55, %s3717_s7  ;;  %v4451_v42 = vrot.slane %v1273_v24, %v3825_v5  ;;  %s3719_s7 = smov 82  }
 0x145   : > { %8026 = vst [vmem:[#allocation76_spill] sm:$0xff] %v4419_v30 }
 0x146   : > { %1106 = vrot.lane.b32.xlu1 %v4049_v56, %s7664_s14  ;;  %v4429_v1 = vpop.permute.xlu0 %848 }
 0x147   : > { %8027 = vst [vmem:[#allocation77_spill] sm:$0xff] %v4429_v1 }
 0x148   : > { %v4431_v51 = vpop.permute.xlu1 %947  ;;  %1104 = vrot.lane.b32.xlu0 %v4104_v11, %s7664_s14  ;;  %v1274_v11 = vcombine.low %v1273_v24, %v1273_v24 }
 0x149   : > { %8028 = vst [vmem:[#allocation78_spill] sm:$0xff] %v4431_v51  ;;  %v1325_v51 = vcombine.high %v1273_v24, %v1273_v24 }
 0x14a   : > { %1257 = vrot.lane.b32.xlu1 %v4427_v47, %s3718_s17  ;;  %v4441_v56 = vpop.permute.xlu0 %945  ;;  %v4460_v55 = vrot.slane %v1274_v11, %v3825_v5 }
 0x14b   : > { %8029 = vst [vmem:[#allocation79_spill] sm:$0xff] %v4441_v56 }
 0x14c   : > { %v4443_v18 = vpop.permute.xlu1 %954  ;;  %1108 = vrot.lane.b32.xlu0 %v4014_v46, %s7664_s14  ;;  %v4465_v46 = vcombine.high %v4451_v42, %v4451_v42  ;;  %v4477_v11 = vcombine.high %v4460_v55, %v4460_v55  ;;  %s7675_s14 = smov 79   ;;  %v4558_v63 = vcombine.low %v4460_v55, %v4460_v55 }
 0x14d   : > { %8030 = vst [vmem:[#allocation80_spill] sm:$0xff] %v4443_v18  ;;  %v4468_v18 = vrot.slane %v1303_v6, %v3825_v5 }
 0x14e   : > { %1261 = vrot.lane.b32.xlu1 %v4439_v60, %s3718_s17  ;;  %v4454_v1 = vpop.permute.xlu0 %949 }
 0x14f   : > { %8032 = vst [vmem:[#allocation82_spill] sm:$0xff] %v4454_v1  ;;  %8034 = vst [vmem:[#allocation84_spill] sm:$0xff] %v4468_v18  ;;  %v4575_v31 = vcombine.high %v4468_v18, %v4468_v18 }
 0x150   : > { %v4456_v33 = vpop.permute.xlu1 %958  ;;  %1259 = vrot.lane.b32.xlu0 %v4446_v50, %s3718_s17  ;;  %s7692_s17 = smov 81  }
 0x151   : > { %8033 = vst [vmem:[#allocation83_spill] sm:$0xff] %v4456_v33  ;;  %v4482_v33 = vcombine.low %v4468_v18, %v4468_v18  ;;  %8055 = vst [vmem:[#allocation105_spill] sm:$0xff] %v4575_v31 }
 0x152   : > { %1293 = vrot.lane.b32.xlu1 %v4451_v42, %s3719_s7  ;;  %v4470_v32 = vpop.permute.xlu0 %956 }
 0x153   : > { %8035 = vst [vmem:[#allocation85_spill] sm:$0xff] %v4470_v32  ;;  %v4496_v32 = vrot.slane %v1325_v51, %v3825_v5  ;;  %v4518_v51 = vcombine.low %v4451_v42, %v4451_v42 }
 0x154   : > { %v4472_v1 = vpop.permute.xlu1 %965  ;;  %1291 = vrot.lane.b32.xlu0 %v4460_v55, %s3719_s7 }
 0x155   : > { %8036 = vst [vmem:[#allocation86_spill] sm:$0xff] %v4472_v1  ;;  %v4491_v1 = vcombine.low %v4446_v50, %v4446_v50 }
 0x156   : > { %1297 = vrot.lane.b32.xlu1 %v4465_v46, %s3719_s7  ;;  %v4484_v30 = vpop.permute.xlu0 %960 }
 0x157   : > { %8037 = vst [vmem:[#allocation87_spill] sm:$0xff] %v4484_v30 }
 0x158   : > { %v4486_v6 = vpop.permute.xlu1 %969  ;;  %1295 = vrot.lane.b32.xlu0 %v4477_v11, %s3719_s7  ;;  %s7670_s7 = smov 80  }
 0x159   : > { %8038 = vst [vmem:[#allocation88_spill] sm:$0xff] %v4486_v6  ;;  %v4508_v6 = vcombine.low %v4496_v32, %v4496_v32 }
 0x15a   : > { %1315 = vrot.lane.b32.xlu1 %v4482_v33, %s7692_s17  ;;  %v4498_v56 = vpop.permute.xlu0 %967 }
 0x15b   : > { %8039 = vst [vmem:[#allocation89_spill] sm:$0xff] %v4498_v56 }
 0x15c   : > { %v4500_v24 = vpop.permute.xlu1 %977  ;;  %1313 = vrot.lane.b32.xlu0 %v4491_v1, %s7692_s17 }
 0x15d   : > { %8040 = vst [vmem:[#allocation90_spill] sm:$0xff] %v4500_v24 }
 0x15e   : > { %1319 = vrot.lane.b32.xlu1 %v4468_v18, %s7692_s17  ;;  %v4510_v30 = vpop.permute.xlu0 %971 }
 0x15f   : > { %8041 = vst [vmem:[#allocation91_spill] sm:$0xff] %v4510_v30 }
 0x160   : > { %v4512_v17 = vpop.permute.xlu1 %981  ;;  %1317 = vrot.lane.b32.xlu0 %v4446_v50, %s7692_s17  ;;  %s3725_s17 = smov 43  }
 0x161   : > { %8042 = vst [vmem:[#allocation92_spill] sm:$0xff] %v4512_v17 }
 0x162   : > { %1337 = vrot.lane.b32.xlu1 %v4508_v6, %s7670_s7  ;;  %v4522_v24 = vpop.permute.xlu0 %979 }
 0x163   : > { %8043 = vst [vmem:[#allocation93_spill] sm:$0xff] %v4522_v24 }
 0x164   : > { %v4524_v56 = vpop.permute.xlu1 %988  ;;  %1335 = vrot.lane.b32.xlu0 %v4518_v51, %s7670_s7 }
 0x165   : > { %8044 = vst [vmem:[#allocation94_spill] sm:$0xff] %v4524_v56 }
 0x166   : > { %1341 = vrot.lane.b32.xlu1 %v4496_v32, %s7670_s7  ;;  %v4530_v17 = vpop.permute.xlu0 %983 }
 0x167   : > { %8045 = vst [vmem:[#allocation95_spill] sm:$0xff] %v4530_v17 }
 0x168   : > { %v4532_v30 = vpop.permute.xlu1 %992  ;;  %1339 = vrot.lane.b32.xlu0 %v4451_v42, %s7670_s7  ;;  %s3723_s7 = smov 63  }
 0x169   : > { %8046 = vst [vmem:[#allocation96_spill] sm:$0xff] %v4532_v30 }
 0x16a   : > { %1350 = vrot.lane.b32.xlu1 %v4491_v1, %s7675_s14  ;;  %v4542_v56 = vpop.permute.xlu0 %990 }
 0x16b   : > { %8047 = vst [vmem:[#allocation97_spill] sm:$0xff] %v4542_v56 }
 0x16c   : > { %v4544_v24 = vpop.permute.xlu1 %999  ;;  %1348 = vrot.lane.b32.xlu0 %v4538_v10, %s7675_s14 }
 0x16d   : > { %8048 = vst [vmem:[#allocation98_spill] sm:$0xff] %v4544_v24 }
 0x16e   : > { %1354 = vrot.lane.b32.xlu1 %v4446_v50, %s7675_s14  ;;  %v4550_v30 = vpop.permute.xlu0 %994 }
 0x16f   : > { %8049 = vst [vmem:[#allocation99_spill] sm:$0xff] %v4550_v30 }
 0x170   : > { %v4552_v17 = vpop.permute.xlu1 %1003  ;;  %1352 = vrot.lane.b32.xlu0 %v4427_v47, %s7675_s14  ;;  %s3724_s14 = smov 62  }
 0x171   : > { %8050 = vst [vmem:[#allocation100_spill] sm:$0xff] %v4552_v17 }
 0x172   : > { %1363 = vrot.lane.b32.xlu1 %v4518_v51, %s3723_s7  ;;  %v4561_v24 = vpop.permute.xlu0 %1001 }
 0x173   : > { %8051 = vst [vmem:[#allocation101_spill] sm:$0xff] %v4561_v24 }
 0x174   : > { %v4563_v56 = vpop.permute.xlu1 %1010  ;;  %1361 = vrot.lane.b32.xlu0 %v4558_v63, %s3723_s7 }
 0x175   : > { %8052 = vst [vmem:[#allocation102_spill] sm:$0xff] %v4563_v56 }
 0x176   : > { %1367 = vrot.lane.b32.xlu1 %v4451_v42, %s3723_s7  ;;  %v4567_v30 = vpop.permute.xlu0 %1005 }
 0x177   : > { %8053 = vst [vmem:[#allocation103_spill] sm:$0xff] %v4567_v30  ;;  %v4584_v30 = vcombine.high %v4446_v50, %v4446_v50 }
 0x178   : > { %v4569_v17 = vpop.permute.xlu1 %1014  ;;  %1365 = vrot.lane.b32.xlu0 %v4460_v55, %s3723_s7  ;;  %s8070_s7 = smov 59  }
 0x179   : > { %8054 = vst [vmem:[#allocation104_spill] sm:$0xff] %v4569_v17  ;;  %8058 = vst [vmem:[#allocation108_spill] sm:$0xff] %v4584_v30 }
 0x17a   : > { %1377 = vrot.lane.b32.xlu1 %v4468_v18, %s3724_s14  ;;  %v4577_v24 = vpop.permute.xlu0 %1012 }
 0x17b   : > { %8056 = vst [vmem:[#allocation106_spill] sm:$0xff] %v4577_v24 }
 0x17c   : > { %v4579_v56 = vpop.permute.xlu1 %1021  ;;  %1375 = vrot.lane.b32.xlu0 %v4446_v50, %s3724_s14 }
 0x17d   : > { %8057 = vst [vmem:[#allocation107_spill] sm:$0xff] %v4579_v56  ;;  %v4596_v56 = vcombine.high %v4496_v32, %v4496_v32 }
 0x17e   : > { %1381 = vrot.lane.b32.xlu1 %v4575_v31, %s3724_s14  ;;  %v4587_v17 = vpop.permute.xlu0 %1016 }
 0x17f   : > { %8059 = vst [vmem:[#allocation109_spill] sm:$0xff] %v4587_v17 }
 0x180   : > { %v4589_v39 = vpop.permute.xlu1 %1025  ;;  %1379 = vrot.lane.b32.xlu0 %v4584_v30, %s3724_s14  ;;  %s8065_s14 = smov 60  }
 0x181   : > { %8060 = vst [vmem:[#allocation110_spill] sm:$0xff] %v4589_v39 }
 0x182   : > { %1390 = vrot.lane.b32.xlu1 %v4496_v32, %s7697_s8  ;;  %v4598_v24 = vpop.permute.xlu0 %1023 }
 0x183   : > { %8061 = vst [vmem:[#allocation111_spill] sm:$0xff] %v4598_v24 }
 0x184   : > { %v4600_v59 = vpop.permute.xlu1 %1033  ;;  %1388 = vrot.lane.b32.xlu0 %v4451_v42, %s7697_s8 }
 0x185   : > { %8062 = vst [vmem:[#allocation112_spill] sm:$0xff] %v4600_v59 }
 0x186   : > { %1394 = vrot.lane.b32.xlu1 %v4596_v56, %s7697_s8  ;;  %v4606_v39 = vpop.permute.xlu0 %1027 }
 0x187   : > { %8063 = vst [vmem:[#allocation113_spill] sm:$0xff] %v4606_v39 }
 0x188   : > { %v4608_v17 = vpop.permute.xlu1 %1037  ;;  %1392 = vrot.lane.b32.xlu0 %v4465_v46, %s7697_s8  ;;  %s3726_s8 = smov 42  }
 0x189   : > { %8064 = vst [vmem:[#allocation114_spill] sm:$0xff] %v4608_v17 }
 0x18a   : > { %1401 = vrot.lane.b32.xlu1 %v4446_v50, %s8065_s14  ;;  %v4614_v35 = vpop.permute.xlu0 %1035 }
 0x18b   : > { %8066 = vst [vmem:[#allocation115_spill] sm:$0xff] %v4614_v35 }
 0x18c   : > { %v4616_v24 = vpop.permute.xlu1 %1045  ;;  %1399 = vrot.lane.b32.xlu0 %v4427_v47, %s8065_s14 }
 0x18d   : > { %8067 = vst [vmem:[#allocation116_spill] sm:$0xff] %v4616_v24 }
 0x18e   : > { %1405 = vrot.lane.b32.xlu1 %v4584_v30, %s8065_s14  ;;  %v4622_v59 = vpop.permute.xlu0 %1039 }
 0x18f   : > { %8068 = vst [vmem:[#allocation117_spill] sm:$0xff] %v4622_v59 }
 0x190   : > { %v4624_v39 = vpop.permute.xlu1 %1049  ;;  %1403 = vrot.lane.b32.xlu0 %v4439_v60, %s8065_s14 }
 0x191   : > { %8069 = vst [vmem:[#allocation118_spill] sm:$0xff] %v4624_v39 }
 0x192   : > { %1412 = vrot.lane.b32.xlu1 %v4451_v42, %s8070_s7  ;;  %v4630_v17 = vpop.permute.xlu0 %1047 }
 0x193   : > { %8071 = vst [vmem:[#allocation119_spill] sm:$0xff] %v4630_v17 }
 0x194   : > { %v4632_v35 = vpop.permute.xlu1 %1056  ;;  %1410 = vrot.lane.b32.xlu0 %v4460_v55, %s8070_s7 }
 0x195   : > { %8072 = vst [vmem:[#allocation120_spill] sm:$0xff] %v4632_v35 }
 0x196   : > { %1416 = vrot.lane.b32.xlu1 %v4465_v46, %s8070_s7  ;;  %v4638_v24 = vpop.permute.xlu0 %1051 }
 0x197   : > { %8073 = vst [vmem:[#allocation121_spill] sm:$0xff] %v4638_v24 }
 0x198   : > { %v4640_v59 = vpop.permute.xlu1 %1060  ;;  %1414 = vrot.lane.b32.xlu0 %v4477_v11, %s8070_s7 }
 0x199   : > { %8074 = vst [vmem:[#allocation122_spill] sm:$0xff] %v4640_v59 }
 0x19a   : > { %1423 = vrot.lane.b32.xlu1 %v4482_v33, %s3725_s17  ;;  %v4646_v17 = vpop.permute.xlu0 %1058 }
 0x19b   : > { %8075 = vst [vmem:[#allocation123_spill] sm:$0xff] %v4646_v17 }
 0x19c   : > { %v4648_v35 = vpop.permute.xlu1 %1067  ;;  %1421 = vrot.lane.b32.xlu0 %v4491_v1, %s3725_s17 }
 0x19d   : > { %8076 = vst [vmem:[#allocation124_spill] sm:$0xff] %v4648_v35 }
 0x19e   : > { %1427 = vrot.lane.b32.xlu1 %v4468_v18, %s3725_s17  ;;  %v4654_v24 = vpop.permute.xlu0 %1062 }
 0x19f   : > { %8077 = vst [vmem:[#allocation125_spill] sm:$0xff] %v4654_v24 }
 0x1a0   : > { %v4656_v59 = vpop.permute.xlu1 %1071  ;;  %1425 = vrot.lane.b32.xlu0 %v4446_v50, %s3725_s17 }
 0x1a1   : > { %8078 = vst [vmem:[#allocation126_spill] sm:$0xff] %v4656_v59 }
 0x1a2   : > { %1435 = vrot.lane.b32.xlu1 %v4508_v6, %s3726_s8  ;;  %v4662_v17 = vpop.permute.xlu0 %1069 }
 0x1a3   : > { %8079 = vst [vmem:[#allocation127_spill] sm:$0xff] %v4662_v17 }
 0x1a4   : > { %v4664_v35 = vpop.permute.xlu1 %1078  ;;  %1433 = vrot.lane.b32.xlu0 %v4518_v51, %s3726_s8 }
 0x1a5   : > { %8080 = vst [vmem:[#allocation128_spill] sm:$0xff] %v4664_v35 }
 0x1a6   : > { %1439 = vrot.lane.b32.xlu1 %v4496_v32, %s3726_s8  ;;  %v4670_v24 = vpop.permute.xlu0 %1073 }
 0x1a7   : > { %8081 = vst [vmem:[#allocation129_spill] sm:$0xff] %v4670_v24 }
 0x1a8   : > { %v4672_v59 = vpop.permute.xlu1 %1082  ;;  %1437 = vrot.lane.b32.xlu0 %v4451_v42, %s3726_s8 }
 0x1a9   : > { %8082 = vst [vmem:[#allocation130_spill] sm:$0xff] %v4672_v59 }
 0x1aa   : > { %1447 = vrot.lane.b32.xlu1 %v4491_v1, %s3711_s28  ;;  %v4678_v39 = vpop.permute.xlu0 %1080 }
 0x1ab   : > { %8083 = vst [vmem:[#allocation131_spill] sm:$0xff] %v4678_v39 }
 0x1ac   : > { %v4680_v17 = vpop.permute.xlu1 %1090  ;;  %1445 = vrot.lane.b32.xlu0 %v4538_v10, %s3711_s28 }
 0x1ad   : > { %8084 = vst [vmem:[#allocation132_spill] sm:$0xff] %v4680_v17 }
 0x1ae   : > { %1451 = vrot.lane.b32.xlu1 %v4446_v50, %s3711_s28  ;;  %v4686_v35 = vpop.permute.xlu0 %1084 }
 0x1af   : > { %8085 = vst [vmem:[#allocation133_spill] sm:$0xff] %v4686_v35 }
 0x1b0   : > { %v4688_v24 = vpop.permute.xlu1 %1094  ;;  %1449 = vrot.lane.b32.xlu0 %v4427_v47, %s3711_s28 }
 0x1b1   : > { %8086 = vst [vmem:[#allocation134_spill] sm:$0xff] %v4688_v24 }
 0x1b2   : > { %1458 = vrot.lane.b32.xlu1 %v4518_v51, %s3712_s13  ;;  %v4694_v59 = vpop.permute.xlu0 %1092 }
 0x1b3   : > { %8087 = vst [vmem:[#allocation135_spill] sm:$0xff] %v4694_v59 }
 0x1b4   : > { %v4696_v39 = vpop.permute.xlu1 %1102  ;;  %1456 = vrot.lane.b32.xlu0 %v4558_v63, %s3712_s13 }
 0x1b5   : > { %8088 = vst [vmem:[#allocation136_spill] sm:$0xff] %v4696_v39 }
 0x1b6   : > { %1462 = vrot.lane.b32.xlu1 %v4451_v42, %s3712_s13  ;;  %v4702_v17 = vpop.permute.xlu0 %1096 }
 0x1b7   : > { %8089 = vst [vmem:[#allocation137_spill] sm:$0xff] %v4702_v17 }
 0x1b8   : > { %v4704_v35 = vpop.permute.xlu1 %1106  ;;  %1460 = vrot.lane.b32.xlu0 %v4460_v55, %s3712_s13 }
 0x1b9   : > { %8090 = vst [vmem:[#allocation138_spill] sm:$0xff] %v4704_v35 }
 0x1ba   : > { %1577 = vrot.lane.b32.xlu1 %v4496_v32, %s3727_s6  ;;  %v4709_v24 = vpop.permute.xlu0 %1104 }
 0x1bb   : > { %8091 = vst [vmem:[#allocation139_spill] sm:$0xff] %v4709_v24 }
 0x1bc   : > { %v4711_v59 = vpop.permute.xlu1 %1257  ;;  %1575 = vrot.lane.b32.xlu0 %v4451_v42, %s3727_s6 }
 0x1bd   : > { %8092 = vst [vmem:[#allocation140_spill] sm:$0xff] %v4711_v59 }
 0x1be   : > { %1581 = vrot.lane.b32.xlu1 %v4596_v56, %s3727_s6  ;;  %v4715_v39 = vpop.permute.xlu0 %1108 }
 0x1bf   : > { %8093 = vst [vmem:[#allocation141_spill] sm:$0xff] %v4715_v39 }
 0x1c0   : > { %v4717_v52 = vpop.permute.xlu1 %1261  ;;  %1579 = vrot.lane.b32.xlu0 %v4465_v46, %s3727_s6  ;;  %s3730_s6 = smov 91  }
 0x1c1   : > { %8094 = vst [vmem:[#allocation142_spill] sm:$0xff] %v4717_v52 }
 0x1c2   : > { %1589 = vrot.lane.b32.xlu1 %v4446_v50, %s3728_s12  ;;  %v4721_v35 = vpop.permute.xlu0 %1259 }
 0x1c3   : > { %8095 = vst [vmem:[#allocation143_spill] sm:$0xff] %v4721_v35 }
 0x1c4   : > { %v4723_v17 = vpop.permute.xlu1 %1293  ;;  %1587 = vrot.lane.b32.xlu0 %v4427_v47, %s3728_s12 }
 0x1c5   : > { %8096 = vst [vmem:[#allocation144_spill] sm:$0xff] %v4723_v17 }
 0x1c6   : > { %1593 = vrot.lane.b32.xlu1 %v4584_v30, %s3728_s12  ;;  %v4727_v24 = vpop.permute.xlu0 %1291 }
 0x1c7   : > { %8097 = vst [vmem:[#allocation145_spill] sm:$0xff] %v4727_v24 }
 0x1c8   : > { %v4729_v59 = vpop.permute.xlu1 %1297  ;;  %1591 = vrot.lane.b32.xlu0 %v4439_v60, %s3728_s12  ;;  %s3729_s12 = smov 92  }
 0x1c9   : > { %8098 = vst [vmem:[#allocation146_spill] sm:$0xff] %v4729_v59 }
 0x1ca   : > { %1601 = vrot.lane.b32.xlu1 %v4451_v42, %s3713_s29  ;;  %v4734_v39 = vpop.permute.xlu0 %1295 }
 0x1cb   : > { %8099 = vst [vmem:[#allocation147_spill] sm:$0xff] %v4734_v39 }
 0x1cc   : > { %v4736_v52 = vpop.permute.xlu1 %1315  ;;  %1599 = vrot.lane.b32.xlu0 %v4460_v55, %s3713_s29 }
 0x1cd   : > { %8100 = vst [vmem:[#allocation148_spill] sm:$0xff] %v4736_v52 }
 0x1ce   : > { %1605 = vrot.lane.b32.xlu1 %v4465_v46, %s3713_s29  ;;  %v4742_v17 = vpop.permute.xlu0 %1313 }
 0x1cf   : > { %8101 = vst [vmem:[#allocation149_spill] sm:$0xff] %v4742_v17 }
 0x1d0   : > { %v4744_v24 = vpop.permute.xlu1 %1319  ;;  %1603 = vrot.lane.b32.xlu0 %v4477_v11, %s3713_s29 }
 0x1d1   : > { %8102 = vst [vmem:[#allocation150_spill] sm:$0xff] %v4744_v24 }
 0x1d2   : > { %1612 = vrot.lane.b32.xlu1 %v4482_v33, %s3705_s9  ;;  %v4750_v59 = vpop.permute.xlu0 %1317 }
 0x1d3   : > { %8103 = vst [vmem:[#allocation151_spill] sm:$0xff] %v4750_v59 }
 0x1d4   : > { %v4752_v39 = vpop.permute.xlu1 %1337  ;;  %1610 = vrot.lane.b32.xlu0 %v4491_v1, %s3705_s9 }
 0x1d5   : > { %8104 = vst [vmem:[#allocation152_spill] sm:$0xff] %v4752_v39 }
 0x1d6   : > { %1616 = vrot.lane.b32.xlu1 %v4468_v18, %s3705_s9  ;;  %v4758_v52 = vpop.permute.xlu0 %1335 }
 0x1d7   : > { %8105 = vst [vmem:[#allocation153_spill] sm:$0xff] %v4758_v52 }
 0x1d8   : > { %v4760_v17 = vpop.permute.xlu1 %1341  ;;  %1614 = vrot.lane.b32.xlu0 %v4446_v50, %s3705_s9 }
 0x1d9   : > { %8106 = vst [vmem:[#allocation154_spill] sm:$0xff] %v4760_v17 }
 0x1da   : > { %1623 = vrot.lane.b32.xlu1 %v4508_v6, %s3694_s15  ;;  %v4766_v33 = vpop.permute.xlu0 %1339 }
 0x1db   : > { %8107 = vst [vmem:[#allocation155_spill] sm:$0xff] %v4766_v33 }
 0x1dc   : > { %v4768_v11 = vpop.permute.xlu1 %1350  ;;  %1621 = vrot.lane.b32.xlu0 %v4518_v51, %s3694_s15 }
 0x1dd   : > { %8108 = vst [vmem:[#allocation156_spill] sm:$0xff] %v4768_v11 }
 0x1de   : > { %1627 = vrot.lane.b32.xlu1 %v4496_v32, %s3694_s15  ;;  %v4774_v24 = vpop.permute.xlu0 %1348 }
 0x1df   : > { %8109 = vst [vmem:[#allocation157_spill] sm:$0xff] %v4774_v24 }
 0x1e0   : > { %v4776_v59 = vpop.permute.xlu1 %1354  ;;  %1625 = vrot.lane.b32.xlu0 %v4451_v42, %s3694_s15 }
 0x1e1   : > { %8110 = vst [vmem:[#allocation158_spill] sm:$0xff] %v4776_v59 }
 0x1e2   : > { %1634 = vrot.lane.b32.xlu1 %v4491_v1, %s3729_s12  ;;  %v4781_v6 = vpop.permute.xlu0 %1352 }
 0x1e3   : > { %8111 = vst [vmem:[#allocation159_spill] sm:$0xff] %v4781_v6 }
 0x1e4   : > { %v4783_v17 = vpop.permute.xlu1 %1363  ;;  %1632 = vrot.lane.b32.xlu0 %v4538_v10, %s3729_s12 }
 0x1e5   : > { %8112 = vst [vmem:[#allocation160_spill] sm:$0xff] %v4783_v17 }
 0x1e6   : > { %1638 = vrot.lane.b32.xlu1 %v4446_v50, %s3729_s12  ;;  %v4787_v33 = vpop.permute.xlu0 %1361 }
 0x1e7   : > { %8113 = vst [vmem:[#allocation161_spill] sm:$0xff] %v4787_v33 }
 0x1e8   : > { %v4789_v11 = vpop.permute.xlu1 %1367  ;;  %1636 = vrot.lane.b32.xlu0 %v4427_v47, %s3729_s12  ;;  %s3731_s12 = smov 44  }
 0x1e9   : > { %8114 = vst [vmem:[#allocation162_spill] sm:$0xff] %v4789_v11 }
 0x1ea   : > { %1646 = vrot.lane.b32.xlu1 %v4518_v51, %s3730_s6  ;;  %v4793_v59 = vpop.permute.xlu0 %1365 }
 0x1eb   : > { %8115 = vst [vmem:[#allocation163_spill] sm:$0xff] %v4793_v59 }
 0x1ec   : > { %v4795_v1 = vpop.permute.xlu1 %1377  ;;  %1644 = vrot.lane.b32.xlu0 %v4558_v63, %s3730_s6 }
 0x1ed   : > { %8116 = vst [vmem:[#allocation164_spill] sm:$0xff] %v4795_v1 }
 0x1ee   : > { %1650 = vrot.lane.b32.xlu1 %v4451_v42, %s3730_s6  ;;  %v4799_v10 = vpop.permute.xlu0 %1375 }
 0x1ef   : > { %8117 = vst [vmem:[#allocation165_spill] sm:$0xff] %v4799_v10 }
 0x1f0   : > { %v4801_v6 = vpop.permute.xlu1 %1381  ;;  %1648 = vrot.lane.b32.xlu0 %v4460_v55, %s3730_s6  ;;  %v3475_v55 = vld [vmem:[%s3830_s10 + $0xc] sm:$0xf]  ;;  %s8233_s6 = smov 58  }
 0x1f1   : > { %8118 = vst [vmem:[#allocation166_spill] sm:$0xff] %v4801_v6  ;;  %v1690_v33 = vcombine.low %v3475_v55, %v3475_v55 }
 0x1f2   : > { %1658 = vrot.lane.b32.xlu1 %v4468_v18, %s3714_s11  ;;  %v4806_v11 = vpop.permute.xlu0 %1379 }
 0x1f3   : > { %8119 = vst [vmem:[#allocation167_spill] sm:$0xff] %v4806_v11  ;;  %v1697_v17 = vrot.slane %v1690_v33, %v3825_v5 }
 0x1f4   : > { %v4808_v51 = vpop.permute.xlu1 %1390  ;;  %1656 = vrot.lane.b32.xlu0 %v4446_v50, %s3714_s11 }
 0x1f5   : > { %8120 = vst [vmem:[#allocation168_spill] sm:$0xff] %v4808_v51 }
 0x1f6   : > { %1662 = vrot.lane.b32.xlu1 %v4575_v31, %s3714_s11  ;;  %v4814_v63 = vpop.permute.xlu0 %1388 }
 0x1f7   : > { %8121 = vst [vmem:[#allocation169_spill] sm:$0xff] %v4814_v63 }
 0x1f8   : > { %v4816_v59 = vpop.permute.xlu1 %1394  ;;  %1660 = vrot.lane.b32.xlu0 %v4584_v30, %s3714_s11 }
 0x1f9   : > { %8122 = vst [vmem:[#allocation170_spill] sm:$0xff] %v4816_v59 }
 0x1fa   : > { %1669 = vrot.lane.b32.xlu1 %v4496_v32, %s3715_s16  ;;  %v4823_v18 = vpop.permute.xlu0 %1392  ;;  %v1704_v32 = vrot.slane %v3475_v55, %v3825_v5 }
 0x1fb   : > { %8123 = vst [vmem:[#allocation171_spill] sm:$0xff] %v4823_v18 }
 0x1fc   : > { %v4825_v6 = vpop.permute.xlu1 %1401  ;;  %1667 = vrot.lane.b32.xlu0 %v4451_v42, %s3715_s16 }
 0x1fd   : > { %8124 = vst [vmem:[#allocation172_spill] sm:$0xff] %v4825_v6 }
 0x1fe   : > { %1673 = vrot.lane.b32.xlu1 %v4596_v56, %s3715_s16  ;;  %v4831_v31 = vpop.permute.xlu0 %1399  ;;  %v1705_v56 = vcombine.low %v1697_v17, %v1697_v17 }
 0x1ff   : > { %8125 = vst [vmem:[#allocation173_spill] sm:$0xff] %v4831_v31  ;;  %v1758_v31 = vcombine.high %v1697_v17, %v1697_v17 }
 0x200   : > { %v4833_v59 = vpop.permute.xlu1 %1405  ;;  %1671 = vrot.lane.b32.xlu0 %v4465_v46, %s3715_s16  ;;  %v4853_v46 = vrot.slane %v1697_v17, %v3825_v5 }
 0x201   : > { %8126 = vst [vmem:[#allocation174_spill] sm:$0xff] %v4833_v59  ;;  %v4848_v59 = vrot.slane %v1704_v32, %v3825_v5 }
 0x202   : > { %1680 = vrot.lane.b32.xlu1 %v4446_v50, %s3699_s30  ;;  %v4841_v24 = vpop.permute.xlu0 %1403  ;;  %v4862_v50 = vrot.slane %v1705_v56, %v3825_v5 }
 0x203   : > { %8127 = vst [vmem:[#allocation175_spill] sm:$0xff] %v4841_v24  ;;  %8129 = vst [vmem:[#allocation177_spill] sm:$0xff] %v4848_v59 }
 0x204   : > { %v4843_v42 = vpop.permute.xlu1 %1412  ;;  %1678 = vrot.lane.b32.xlu0 %v4427_v47, %s3699_s30  ;;  %v1737_v47 = vcombine.high %v1704_v32, %v1704_v32 }
 0x205   : > { %8128 = vst [vmem:[#allocation176_spill] sm:$0xff] %v4843_v42 }
 0x206   : > { %1684 = vrot.lane.b32.xlu1 %v4584_v30, %s3699_s30  ;;  %v4855_v33 = vpop.permute.xlu0 %1410  ;;  %v4867_v30 = vcombine.low %v4848_v59, %v4848_v59  ;;  %v4879_v56 = vrot.slane %v1737_v47, %v3825_v5  ;;  %v4896_v47 = vcombine.low %v4853_v46, %v4853_v46 }
 0x207   : > { %8130 = vst [vmem:[#allocation178_spill] sm:$0xff] %v4855_v33 }
 0x208   : > { %v4857_v55 = vpop.permute.xlu1 %1416  ;;  %1682 = vrot.lane.b32.xlu0 %v4439_v60, %s3699_s30  ;;  %v4876_v60 = vcombine.high %v4862_v50, %v4862_v50  ;;  %8134 = vst [vmem:[#allocation182_spill] sm:$0xff] %v4879_v56  ;;  %v4890_v10 = vcombine.low %v4879_v56, %v4879_v56 }
 0x209   : > { %8131 = vst [vmem:[#allocation179_spill] sm:$0xff] %v4857_v55 }
 0x20a   : > { %1730 = vrot.lane.b32.xlu1 %v4853_v46, %s3731_s12  ;;  %v4869_v52 = vpop.permute.xlu0 %1414 }
 0x20b   : > { %8132 = vst [vmem:[#allocation180_spill] sm:$0xff] %v4869_v52 }
 0x20c   : > { %v4871_v39 = vpop.permute.xlu1 %1423  ;;  %1728 = vrot.lane.b32.xlu0 %v4862_v50, %s3731_s12 }
 0x20d   : > { %8133 = vst [vmem:[#allocation181_spill] sm:$0xff] %v4871_v39  ;;  %v1779_v39 = vcombine.low %v1704_v32, %v1704_v32 }
 0x20e   : > { %1747 = vrot.lane.b32.xlu1 %v4867_v30, %s3725_s17  ;;  %v4883_v55 = vpop.permute.xlu0 %1421 }
 0x20f   : > { %8135 = vst [vmem:[#allocation183_spill] sm:$0xff] %v4883_v55  ;;  %v4910_v17 = vrot.slane %v1779_v39, %v3825_v5 }
 0x210   : > { %v4885_v33 = vpop.permute.xlu1 %1427  ;;  %1732 = vrot.lane.b32.xlu0 %v4876_v60, %s3731_s12  ;;  %s8250_s12 = smov 125  }
 0x211   : > { %8136 = vst [vmem:[#allocation184_spill] sm:$0xff] %v4885_v33  ;;  %v4905_v33 = vrot.slane %v1758_v31, %v3825_v5  ;;  %v4926_v31 = vcombine.low %v4910_v17, %v4910_v17 }
 0x212   : > { %1751 = vrot.lane.b32.xlu1 %v4848_v59, %s3725_s17  ;;  %v4898_v63 = vpop.permute.xlu0 %1425 }
 0x213   : > { %8137 = vst [vmem:[#allocation185_spill] sm:$0xff] %v4898_v63  ;;  %v4920_v32 = vcombine.low %v4905_v33, %v4905_v33 }
 0x214   : > { %v4900_v55 = vpop.permute.xlu1 %1435  ;;  %1749 = vrot.lane.b32.xlu0 %v4890_v10, %s3725_s17 }
 0x215   : > { %8138 = vst [vmem:[#allocation186_spill] sm:$0xff] %v4900_v55 }
 0x216   : > { %1768 = vrot.lane.b32.xlu1 %v4896_v47, %s3726_s8  ;;  %v4912_v42 = vpop.permute.xlu0 %1433 }
 0x217   : > { %8139 = vst [vmem:[#allocation187_spill] sm:$0xff] %v4912_v42 }
 0x218   : > { %v4914_v52 = vpop.permute.xlu1 %1439  ;;  %1753 = vrot.lane.b32.xlu0 %v4879_v56, %s3725_s17  ;;  %s3732_s17 = smov 77  }
 0x219   : > { %8140 = vst [vmem:[#allocation188_spill] sm:$0xff] %v4914_v52 }
 0x21a   : > { %1772 = vrot.lane.b32.xlu1 %v4853_v46, %s3726_s8  ;;  %v4928_v39 = vpop.permute.xlu0 %1437 }
 0x21b   : > { %8141 = vst [vmem:[#allocation189_spill] sm:$0xff] %v4928_v39 }
 0x21c   : > { %v4930_v55 = vpop.permute.xlu1 %1447  ;;  %1770 = vrot.lane.b32.xlu0 %v4920_v32, %s3726_s8 }
 0x21d   : > { %8142 = vst [vmem:[#allocation190_spill] sm:$0xff] %v4930_v55  ;;  %v4946_v55 = vcombine.low %v4862_v50, %v4862_v50 }
 0x21e   : > { %1788 = vrot.lane.b32.xlu1 %v4926_v31, %s3711_s28  ;;  %v4936_v52 = vpop.permute.xlu0 %1445 }
 0x21f   : > { %8143 = vst [vmem:[#allocation191_spill] sm:$0xff] %v4936_v52  ;;  %8145 = vst [vmem:[#allocation193_spill] sm:$0xff] %v4946_v55 }
 0x220   : > { %v4938_v42 = vpop.permute.xlu1 %1451  ;;  %1774 = vrot.lane.b32.xlu0 %v4905_v33, %s3726_s8  ;;  %s8152_s8 = smov 127  }
 0x221   : > { %8144 = vst [vmem:[#allocation192_spill] sm:$0xff] %v4938_v42 }
 0x222   : > { %1792 = vrot.lane.b32.xlu1 %v4910_v17, %s3711_s28  ;;  %v4948_v39 = vpop.permute.xlu0 %1449 }
 0x223   : > { %8146 = vst [vmem:[#allocation194_spill] sm:$0xff] %v4948_v39 }
 0x224   : > { %v4950_v63 = vpop.permute.xlu1 %1458  ;;  %1790 = vrot.lane.b32.xlu0 %v4867_v30, %s3711_s28 }
 0x225   : > { %8147 = vst [vmem:[#allocation195_spill] sm:$0xff] %v4950_v63 }
 0x226   : > { %1800 = vrot.lane.b32.xlu1 %v4946_v55, %s3712_s13  ;;  %v4956_v42 = vpop.permute.xlu0 %1456 }
 0x227   : > { %8148 = vst [vmem:[#allocation196_spill] sm:$0xff] %v4956_v42  ;;  %v4974_v42 = vcombine.high %v4853_v46, %v4853_v46 }
 0x228   : > { %v4958_v52 = vpop.permute.xlu1 %1462  ;;  %1794 = vrot.lane.b32.xlu0 %v4848_v59, %s3711_s28 }
 0x229   : > { %8149 = vst [vmem:[#allocation197_spill] sm:$0xff] %v4958_v52  ;;  %v3477_v52 = vld [vmem:[%s3830_s10 + $0x10] sm:$0xf]  ;;  %s8158_s10 = smov 126  }
 0x22a   : > { %1804 = vrot.lane.b32.xlu1 %v4862_v50, %s3712_s13  ;;  %v4964_v1 = vpop.permute.xlu0 %1460 }
 0x22b   : > { %8150 = vst [vmem:[#allocation198_spill] sm:$0xff] %v4964_v1  ;;  %v2254_v1 = vcombine.low %v3477_v52, %v3477_v52 }
 0x22c   : > { %v4966_v39 = vpop.permute.xlu1 %1577  ;;  %1802 = vrot.lane.b32.xlu0 %v4896_v47, %s3712_s13 }
 0x22d   : > { %8151 = vst [vmem:[#allocation199_spill] sm:$0xff] %v4966_v39  ;;  %v2228_v39 = vrot.slane %v3477_v52, %v3825_v5  ;;  %v5003_v52 = vcombine.high %v4910_v17, %v4910_v17 }
 0x22e   : > { %1935 = vrot.lane.b32.xlu1 %v4853_v46, %s8152_s8  ;;  %v4977_v63 = vpop.permute.xlu0 %1575 }
 0x22f   : > { %8153 = vst [vmem:[#allocation200_spill] sm:$0xff] %v4977_v63  ;;  %v4994_v63 = vcombine.high %v4905_v33, %v4905_v33  ;;  %v2229_v18 = vcombine.high %v2228_v39, %v2228_v39 }
 0x230   : > { %v4979_v11 = vpop.permute.xlu1 %1581  ;;  %1806 = vrot.lane.b32.xlu0 %v4853_v46, %s3712_s13 }
 0x231   : > { %8154 = vst [vmem:[#allocation201_spill] sm:$0xff] %v4979_v11  ;;  %v4997_v11 = vrot.slane %v2228_v39, %v3825_v5 }
 0x232   : > { %1939 = vrot.lane.b32.xlu1 %v4974_v42, %s8152_s8  ;;  %v4986_v6 = vpop.permute.xlu0 %1579 }
 0x233   : > { %8155 = vst [vmem:[#allocation202_spill] sm:$0xff] %v4986_v6  ;;  %8157 = vst [vmem:[#allocation204_spill] sm:$0xff] %v4997_v11  ;;  %v2261_v6 = vrot.slane %v2254_v1, %v3825_v5  ;;  %v5016_v35 = vcombine.high %v4997_v11, %v4997_v11  ;;  %v5025_v1 = vrot.slane %v2229_v18, %v3825_v5 }
 0x234   : > { %v4988_v24 = vpop.permute.xlu1 %1589  ;;  %1937 = vrot.lane.b32.xlu0 %v4905_v33, %s8152_s8 }
 0x235   : > { %8156 = vst [vmem:[#allocation203_spill] sm:$0xff] %v4988_v24  ;;  %8161 = vst [vmem:[#allocation207_spill] sm:$0xff] %v5016_v35  ;;  %v2262_v55 = vcombine.high %v2261_v6, %v2261_v6  ;;  %v5043_v18 = vcombine.high %v5025_v1, %v5025_v1 }
 0x236   : > { %1947 = vrot.lane.b32.xlu1 %v4910_v17, %s8158_s10  ;;  %v5006_v24 = vpop.permute.xlu0 %1587  ;;  %8164 = vst [vmem:[#allocation210_spill] sm:$0xff] %v5025_v1 }
 0x237   : > { %8159 = vst [vmem:[#allocation205_spill] sm:$0xff] %v5006_v24  ;;  %8167 = vst [vmem:[#allocation213_spill] sm:$0xff] %v5043_v18 }
 0x238   : > { %v5008_v51 = vpop.permute.xlu1 %1593  ;;  %1941 = vrot.lane.b32.xlu0 %v4994_v63, %s8152_s8 }
 0x239   : > { %8160 = vst [vmem:[#allocation206_spill] sm:$0xff] %v5008_v51  ;;  %v5030_v51 = vrot.slane %v2262_v55, %v3825_v5 }
 0x23a   : > { %1951 = vrot.lane.b32.xlu1 %v5003_v52, %s8158_s10  ;;  %v5018_v38 = vpop.permute.xlu0 %1591 }
 0x23b   : > { %8162 = vst [vmem:[#allocation208_spill] sm:$0xff] %v5018_v38  ;;  %v5049_v55 = vcombine.high %v5030_v51, %v5030_v51 }
 0x23c   : > { %v5020_v0 = vpop.permute.xlu1 %1601  ;;  %1949 = vrot.lane.b32.xlu0 %v4848_v59, %s8158_s10 }
 0x23d   : > { %8163 = vst [vmem:[#allocation209_spill] sm:$0xff] %v5020_v0  ;;  %v5039_v0 = vrot.slane %v2261_v6, %v3825_v5 }
 0x23e   : > { %2599 = vrot.lane.b32.xlu1 %v5016_v35, %s3714_s11  ;;  %v5032_v24 = vpop.permute.xlu0 %1599 }
 0x23f   : > { %8165 = vst [vmem:[#allocation211_spill] sm:$0xff] %v5032_v24  ;;  %v2290_v24 = vcombine.low %v2228_v39, %v2228_v39  ;;  %v5059_v62 = vcombine.high %v5039_v0, %v5039_v0 }
 0x240   : > { %v5034_v28 = vpop.permute.xlu1 %1605  ;;  %2597 = vrot.lane.b32.xlu0 %v5025_v1, %s3714_s11 }
 0x241   : > { %8166 = vst [vmem:[#allocation212_spill] sm:$0xff] %v5034_v28  ;;  %v5064_v2 = vrot.slane %v2290_v24, %v3825_v5 }
 0x242   : > { %2608 = vrot.lane.b32.xlu1 %v5030_v51, %s3715_s16  ;;  %v5051_v38 = vpop.permute.xlu0 %1603 }
 0x243   : > { %8168 = vst [vmem:[#allocation214_spill] sm:$0xff] %v5051_v38 }
 0x244   : > { %v5053_v28 = vpop.permute.xlu1 %1612  ;;  %2601 = vrot.lane.b32.xlu0 %v5043_v18, %s3714_s11 }
 0x245   : > { %8169 = vst [vmem:[#allocation215_spill] sm:$0xff] %v5053_v28  ;;  %v5076_v28 = vcombine.high %v5064_v2, %v5064_v2 }
 0x246   : > { %2612 = vrot.lane.b32.xlu1 %v5049_v55, %s3715_s16  ;;  %v5066_v29 = vpop.permute.xlu0 %1610 }
 0x247   : > { %8170 = vst [vmem:[#allocation216_spill] sm:$0xff] %v5066_v29 }
 0x248   : > { %v5068_v39 = vpop.permute.xlu1 %1616  ;;  %2610 = vrot.lane.b32.xlu0 %v5059_v62, %s3715_s16 }
 0x249   : > { %8171 = vst [vmem:[#allocation217_spill] sm:$0xff] %v5068_v39 }
 0x24a   : > { %2606 = vrot.lane.b32.xlu1 %v5039_v0, %s3715_s16  ;;  %v5078_v38 = vpop.permute.xlu0 %1614  ;;  %s8189_s16 = smov 86  }
 0x24b   : > { %8172 = vst [vmem:[#allocation218_spill] sm:$0xff] %v5078_v38 }
 0x24c   : > { %v5080_v22 = vpop.permute.xlu1 %1623  ;;  %2595 = vrot.lane.b32.xlu0 %v4997_v11, %s3714_s11  ;;  %s8180_s11 = smov 87  }
 0x24d   : > { %8173 = vst [vmem:[#allocation219_spill] sm:$0xff] %v5080_v22  ;;  %v2310_v22 = vcombine.low %v2261_v6, %v2261_v6 }
 0x24e   : > { %2621 = vrot.lane.b32.xlu1 %v5076_v28, %s3699_s30  ;;  %v5086_v24 = vpop.permute.xlu0 %1621 }
 0x24f   : > { %8174 = vst [vmem:[#allocation220_spill] sm:$0xff] %v5086_v24  ;;  %v5109_v27 = vrot.slane %v2310_v22, %v3825_v5 }
 0x250   : > { %v5088_v29 = vpop.permute.xlu1 %1627  ;;  %2619 = vrot.lane.b32.xlu0 %v4997_v11, %s3699_s30 }
 0x251   : > { %8175 = vst [vmem:[#allocation221_spill] sm:$0xff] %v5088_v29  ;;  %v5121_v6 = vcombine.high %v5109_v27, %v5109_v27 }
 0x252   : > { %2520 = vrot.lane.b32.xlu1 %v5030_v51, %s8152_s8  ;;  %v5094_v39 = vpop.permute.xlu0 %1625 }
 0x253   : > { %8176 = vst [vmem:[#allocation222_spill] sm:$0xff] %v5094_v39 }
 0x254   : > { %v5096_v38 = vpop.permute.xlu1 %1634  ;;  %2623 = vrot.lane.b32.xlu0 %v5016_v35, %s3699_s30 }
 0x255   : > { %8177 = vst [vmem:[#allocation223_spill] sm:$0xff] %v5096_v38 }
 0x256   : > { %2524 = vrot.lane.b32.xlu1 %v5049_v55, %s8152_s8  ;;  %v5102_v24 = vpop.permute.xlu0 %1632 }
 0x257   : > { %8178 = vst [vmem:[#allocation224_spill] sm:$0xff] %v5102_v24 }
 0x258   : > { %v5104_v29 = vpop.permute.xlu1 %1638  ;;  %2522 = vrot.lane.b32.xlu0 %v5059_v62, %s8152_s8 }
 0x259   : > { %8179 = vst [vmem:[#allocation225_spill] sm:$0xff] %v5104_v29 }
 0x25a   : > { %2630 = vrot.lane.b32.xlu1 %v5039_v0, %s8180_s11  ;;  %v5113_v38 = vpop.permute.xlu0 %1636 }
 0x25b   : > { %8181 = vst [vmem:[#allocation226_spill] sm:$0xff] %v5113_v38 }
 0x25c   : > { %v5115_v39 = vpop.permute.xlu1 %1646  ;;  %2617 = vrot.lane.b32.xlu0 %v5064_v2, %s3699_s30 }
 0x25d   : > { %8182 = vst [vmem:[#allocation227_spill] sm:$0xff] %v5115_v39 }
 0x25e   : > { %2634 = vrot.lane.b32.xlu1 %v5059_v62, %s8180_s11  ;;  %v5125_v24 = vpop.permute.xlu0 %1644 }
 0x25f   : > { %8183 = vst [vmem:[#allocation228_spill] sm:$0xff] %v5125_v24  ;;  %v5143_v24 = vcombine.low %v5025_v1, %v5025_v1 }
 0x260   : > { %v5127_v5 = vpop.permute.xlu1 %1650  ;;  %2632 = vrot.lane.b32.xlu0 %v5121_v6, %s8180_s11 }
 0x261   : > { %8184 = vst [vmem:[#allocation229_spill] sm:$0xff] %v5127_v5 }
 0x262   : > { %2531 = vrot.lane.b32.xlu1 %v4997_v11, %s8158_s10  ;;  %v5133_v22 = vpop.permute.xlu0 %1648 }
 0x263   : > { %8185 = vst [vmem:[#allocation230_spill] sm:$0xff] %v5133_v22 }
 0x264   : > { %v5135_v39 = vpop.permute.xlu1 %1658  ;;  %2518 = vrot.lane.b32.xlu0 %v5039_v0, %s8152_s8  ;;  %s8267_s8 = smov 104  }
 0x265   : > { %8186 = vst [vmem:[#allocation231_spill] sm:$0xff] %v5135_v39 }
 0x266   : > { %2535 = vrot.lane.b32.xlu1 %v5016_v35, %s8158_s10  ;;  %v5145_v5 = vpop.permute.xlu0 %1656 }
 0x267   : > { %8187 = vst [vmem:[#allocation232_spill] sm:$0xff] %v5145_v5 }
 0x268   : > { %v5147_v29 = vpop.permute.xlu1 %1662  ;;  %2533 = vrot.lane.b32.xlu0 %v5076_v28, %s8158_s10 }
 0x269   : > { %8188 = vst [vmem:[#allocation233_spill] sm:$0xff] %v5147_v29 }
 0x26a   : > { %2641 = vrot.lane.b32.xlu1 %v5143_v24, %s8189_s16  ;;  %v5153_v22 = vpop.permute.xlu0 %1660 }
 0x26b   : > { %8190 = vst [vmem:[#allocation234_spill] sm:$0xff] %v5153_v22 }
 0x26c   : > { %v5155_v38 = vpop.permute.xlu1 %1669  ;;  %2628 = vrot.lane.b32.xlu0 %v5109_v27, %s8180_s11 }
 0x26d   : > { %8191 = vst [vmem:[#allocation235_spill] sm:$0xff] %v5155_v38 }
 0x26e   : > { %2645 = vrot.lane.b32.xlu1 %v5025_v1, %s8189_s16  ;;  %v5161_v39 = vpop.permute.xlu0 %1667 }
 0x26f   : > { %8192 = vst [vmem:[#allocation236_spill] sm:$0xff] %v5161_v39 }
 0x270   : > { %v5163_v5 = vpop.permute.xlu1 %1673  ;;  %2643 = vrot.lane.b32.xlu0 %v4997_v11, %s8189_s16 }
 0x271   : > { %8193 = vst [vmem:[#allocation237_spill] sm:$0xff] %v5163_v5  ;;  %v5185_v5 = vcombine.low %v4997_v11, %v4997_v11 }
 0x272   : > { %2542 = vrot.lane.b32.xlu1 %v5039_v0, %s3713_s29  ;;  %v5169_v29 = vpop.permute.xlu0 %1671 }
 0x273   : > { %8194 = vst [vmem:[#allocation238_spill] sm:$0xff] %v5169_v29 }
 0x274   : > { %v5171_v22 = vpop.permute.xlu1 %1680  ;;  %2529 = vrot.lane.b32.xlu0 %v5064_v2, %s8158_s10 }
 0x275   : > { %8195 = vst [vmem:[#allocation239_spill] sm:$0xff] %v5171_v22 }
 0x276   : > { %2546 = vrot.lane.b32.xlu1 %v5059_v62, %s3713_s29  ;;  %v5177_v38 = vpop.permute.xlu0 %1678 }
 0x277   : > { %8196 = vst [vmem:[#allocation240_spill] sm:$0xff] %v5177_v38 }
 0x278   : > { %v5179_v39 = vpop.permute.xlu1 %1684  ;;  %2544 = vrot.lane.b32.xlu0 %v5121_v6, %s3713_s29 }
 0x279   : > { %8197 = vst [vmem:[#allocation241_spill] sm:$0xff] %v5179_v39 }
 0x27a   : > { %2540 = vrot.lane.b32.xlu1 %v5109_v27, %s3713_s29  ;;  %v5189_v22 = vpop.permute.xlu0 %1682  ;;  %s8206_s29 = smov 61  }
 0x27b   : > { %8198 = vst [vmem:[#allocation242_spill] sm:$0xff] %v5189_v22 }
 0x27c   : > { %v5191_v29 = vpop.permute.xlu1 %1730  ;;  %2639 = vrot.lane.b32.xlu0 %v5185_v5, %s8189_s16 }
 0x27d   : > { %8199 = vst [vmem:[#allocation243_spill] sm:$0xff] %v5191_v29 }
 0x27e   : > { %2555 = vrot.lane.b32.xlu1 %v4997_v11, %s3705_s9  ;;  %v5197_v39 = vpop.permute.xlu0 %1728 }
 0x27f   : > { %8200 = vst [vmem:[#allocation244_spill] sm:$0xff] %v5197_v39 }
 0x280   : > { %v5199_v38 = vpop.permute.xlu1 %1747  ;;  %2553 = vrot.lane.b32.xlu0 %v5143_v24, %s3705_s9 }
 0x281   : > { %8201 = vst [vmem:[#allocation245_spill] sm:$0xff] %v5199_v38 }
 0x282   : > { %2333 = vrot.lane.b32.xlu1 %v4997_v11, %s3732_s17  ;;  %v5204_v26 = vpop.permute.xlu0 %1732 }
 0x283   : > { %8202 = vst [vmem:[#allocation246_spill] sm:$0xff] %v5204_v26 }
 0x284   : > { %v5206_v22 = vpop.permute.xlu1 %1751  ;;  %2557 = vrot.lane.b32.xlu0 %v5025_v1, %s3705_s9 }
 0x285   : > { %8203 = vst [vmem:[#allocation247_spill] sm:$0xff] %v5206_v22 }
 0x286   : > { %2337 = vrot.lane.b32.xlu1 %v5016_v35, %s3732_s17  ;;  %v5211_v29 = vpop.permute.xlu0 %1749 }
 0x287   : > { %8204 = vst [vmem:[#allocation248_spill] sm:$0xff] %v5211_v29 }
 0x288   : > { %v5213_v39 = vpop.permute.xlu1 %1768  ;;  %2335 = vrot.lane.b32.xlu0 %v5025_v1, %s3732_s17 }
 0x289   : > { %8205 = vst [vmem:[#allocation249_spill] sm:$0xff] %v5213_v39 }
 0x28a   : > { %2347 = vrot.lane.b32.xlu1 %v5039_v0, %s8206_s29  ;;  %v5218_v38 = vpop.permute.xlu0 %1753 }
 0x28b   : > { %8207 = vst [vmem:[#allocation250_spill] sm:$0xff] %v5218_v38 }
 0x28c   : > { %v5220_v25 = vpop.permute.xlu1 %1772  ;;  %2339 = vrot.lane.b32.xlu0 %v5043_v18, %s3732_s17  ;;  %s8282_s17 = smov 79  }
 0x28d   : > { %8208 = vst [vmem:[#allocation251_spill] sm:$0xff] %v5220_v25  ;;  %v5241_v25 = vcombine.low %v5030_v51, %v5030_v51 }
 0x28e   : > { %2351 = vrot.lane.b32.xlu1 %v5059_v62, %s8206_s29  ;;  %v5225_v22 = vpop.permute.xlu0 %1770 }
 0x28f   : > { %8209 = vst [vmem:[#allocation252_spill] sm:$0xff] %v5225_v22 }
 0x290   : > { %v5227_v26 = vpop.permute.xlu1 %1788  ;;  %2349 = vrot.lane.b32.xlu0 %v5030_v51, %s8206_s29 }
 0x291   : > { %8210 = vst [vmem:[#allocation253_spill] sm:$0xff] %v5227_v26 }
 0x292   : > { %2551 = vrot.lane.b32.xlu1 %v5185_v5, %s3705_s9  ;;  %v5233_v39 = vpop.permute.xlu0 %1774  ;;  %s8221_s9 = smov 107  }
 0x293   : > { %8211 = vst [vmem:[#allocation254_spill] sm:$0xff] %v5233_v39 }
 0x294   : > { %v5235_v38 = vpop.permute.xlu1 %1792  ;;  %2353 = vrot.lane.b32.xlu0 %v5049_v55, %s8206_s29  ;;  %s3733_s29 = smov 78  }
 0x295   : > { %8212 = vst [vmem:[#allocation255_spill] sm:$0xff] %v5235_v38  ;;  %v5263_v38 = vcombine.low %v5039_v0, %v5039_v0 }
 0x296   : > { %2566 = vrot.lane.b32.xlu1 %v5039_v0, %s3694_s15  ;;  %v5245_v26 = vpop.permute.xlu0 %1790 }
 0x297   : > { %8213 = vst [vmem:[#allocation256_spill] sm:$0xff] %v5245_v26 }
 0x298   : > { %v5247_v22 = vpop.permute.xlu1 %1800  ;;  %2564 = vrot.lane.b32.xlu0 %v5241_v25, %s3694_s15 }
 0x299   : > { %8214 = vst [vmem:[#allocation257_spill] sm:$0xff] %v5247_v22 }
 0x29a   : > { %2359 = vrot.lane.b32.xlu1 %v5064_v2, %s8065_s14  ;;  %v5253_v39 = vpop.permute.xlu0 %1794 }
 0x29b   : > { %8215 = vst [vmem:[#allocation258_spill] sm:$0xff] %v5253_v39 }
 0x29c   : > { %v5255_v55 = vpop.permute.xlu1 %1804  ;;  %2568 = vrot.lane.b32.xlu0 %v5030_v51, %s3694_s15 }
 0x29d   : > { %8216 = vst [vmem:[#allocation259_spill] sm:$0xff] %v5255_v55 }
 0x29e   : > { %2363 = vrot.lane.b32.xlu1 %v5076_v28, %s8065_s14  ;;  %v5265_v22 = vpop.permute.xlu0 %1802 }
 0x29f   : > { %8217 = vst [vmem:[#allocation260_spill] sm:$0xff] %v5265_v22 }
 0x2a0   : > { %v5267_v26 = vpop.permute.xlu1 %1935  ;;  %2361 = vrot.lane.b32.xlu0 %v4997_v11, %s8065_s14 }
 0x2a1   : > { %8218 = vst [vmem:[#allocation261_spill] sm:$0xff] %v5267_v26  ;;  %v8503_v26 = vld [vmem:[#allocation161_spill] sm:$0xff] }
 0x2a2   : > { %2562 = vrot.lane.b32.xlu1 %v5263_v38, %s3694_s15  ;;  %v5273_v39 = vpop.permute.xlu0 %1806 }
 0x2a3   : > { %8219 = vst [vmem:[#allocation262_spill] sm:$0xff] %v5273_v39 }
 0x2a4   : > { %v5275_v55 = vpop.permute.xlu1 %1939  ;;  %2365 = vrot.lane.b32.xlu0 %v5016_v35, %s8065_s14  ;;  %v5299_v35 = vcombine.low %v5064_v2, %v5064_v2  ;;  %s8230_s14 = smov 106  }
 0x2a5   : > { %8220 = vst [vmem:[#allocation263_spill] sm:$0xff] %v5275_v55 }
 0x2a6   : > { %2577 = vrot.lane.b32.xlu1 %v5064_v2, %s8221_s9  ;;  %v5281_v28 = vpop.permute.xlu0 %1937 }
 0x2a7   : > { %8222 = vst [vmem:[#allocation264_spill] sm:$0xff] %v5281_v28 }
 0x2a8   : > { %v5283_v22 = vpop.permute.xlu1 %1947  ;;  %2575 = vrot.lane.b32.xlu0 %v5185_v5, %s8221_s9 }
 0x2a9   : > { %8223 = vst [vmem:[#allocation265_spill] sm:$0xff] %v5283_v22 }
 0x2aa   : > { %2371 = vrot.lane.b32.xlu1 %v5109_v27, %s8070_s7  ;;  %v5289_v29 = vpop.permute.xlu0 %1941 }
 0x2ab   : > { %8224 = vst [vmem:[#allocation266_spill] sm:$0xff] %v5289_v29 }
 0x2ac   : > { %v5291_v39 = vpop.permute.xlu1 %1951  ;;  %2579 = vrot.lane.b32.xlu0 %v4997_v11, %s8221_s9 }
 0x2ad   : > { %8225 = vst [vmem:[#allocation267_spill] sm:$0xff] %v5291_v39 }
 0x2ae   : > { %2375 = vrot.lane.b32.xlu1 %v5121_v6, %s8070_s7  ;;  %v5301_v18 = vpop.permute.xlu0 %1949 }
 0x2af   : > { %8226 = vst [vmem:[#allocation268_spill] sm:$0xff] %v5301_v18 }
 0x2b0   : > { %v5303_v22 = vpop.permute.xlu1 %2599  ;;  %2373 = vrot.lane.b32.xlu0 %v5039_v0, %s8070_s7 }
 0x2b1   : > { %8227 = vst [vmem:[#allocation269_spill] sm:$0xff] %v5303_v22 }
 0x2b2   : > { %2573 = vrot.lane.b32.xlu1 %v5299_v35, %s8221_s9  ;;  %v5309_v39 = vpop.permute.xlu0 %2597 }
 0x2b3   : > { %8228 = vst [vmem:[#allocation270_spill] sm:$0xff] %v5309_v39 }
 0x2b4   : > { %v5311_v29 = vpop.permute.xlu1 %2608  ;;  %2377 = vrot.lane.b32.xlu0 %v5059_v62, %s8070_s7  ;;  %v5335_v62 = vcombine.low %v5109_v27, %v5109_v27  ;;  %s8240_s7 = smov 57  }
 0x2b5   : > { %8229 = vst [vmem:[#allocation271_spill] sm:$0xff] %v5311_v29 }
 0x2b6   : > { %2588 = vrot.lane.b32.xlu1 %v5109_v27, %s8230_s14  ;;  %v5317_v6 = vpop.permute.xlu0 %2601 }
 0x2b7   : > { %8231 = vst [vmem:[#allocation272_spill] sm:$0xff] %v5317_v6 }
 0x2b8   : > { %v5319_v18 = vpop.permute.xlu1 %2612  ;;  %2586 = vrot.lane.b32.xlu0 %v5263_v38, %s8230_s14 }
 0x2b9   : > { %8232 = vst [vmem:[#allocation273_spill] sm:$0xff] %v5319_v18 }
 0x2ba   : > { %2382 = vrot.lane.b32.xlu1 %v5185_v5, %s8233_s6  ;;  %v5325_v22 = vpop.permute.xlu0 %2610 }
 0x2bb   : > { %8234 = vst [vmem:[#allocation274_spill] sm:$0xff] %v5325_v22 }
 0x2bc   : > { %v5327_v39 = vpop.permute.xlu1 %2606  ;;  %2590 = vrot.lane.b32.xlu0 %v5039_v0, %s8230_s14 }
 0x2bd   : > { %8235 = vst [vmem:[#allocation275_spill] sm:$0xff] %v5327_v39 }
 0x2be   : > { %2386 = vrot.lane.b32.xlu1 %v4997_v11, %s8233_s6  ;;  %v5337_v6 = vpop.permute.xlu0 %2595 }
 0x2bf   : > { %8236 = vst [vmem:[#allocation276_spill] sm:$0xff] %v5337_v6 }
 0x2c0   : > { %v5339_v18 = vpop.permute.xlu1 %2621  ;;  %2384 = vrot.lane.b32.xlu0 %v5143_v24, %s8233_s6 }
 0x2c1   : > { %8237 = vst [vmem:[#allocation277_spill] sm:$0xff] %v5339_v18 }
 0x2c2   : > { %2584 = vrot.lane.b32.xlu1 %v5335_v62, %s8230_s14  ;;  %v5345_v39 = vpop.permute.xlu0 %2619 }
 0x2c3   : > { %8238 = vst [vmem:[#allocation278_spill] sm:$0xff] %v5345_v39 }
 0x2c4   : > { %v5347_v29 = vpop.permute.xlu1 %2520  ;;  %2388 = vrot.lane.b32.xlu0 %v5025_v1, %s8233_s6  ;;  %v5371_v1 = vcombine.high %v4848_v59, %v4848_v59  ;;  %s8317_s6 = smov 68  }
 0x2c5   : > { %8239 = vst [vmem:[#allocation279_spill] sm:$0xff] %v5347_v29 }
 0x2c6   : > { %2395 = vrot.lane.b32.xlu1 %v5241_v25, %s8240_s7  ;;  %v5353_v22 = vpop.permute.xlu0 %2623  ;;  %8245 = vst [vmem:[#allocation284_spill] sm:$0xff] %v5371_v1 }
 0x2c7   : > { %8241 = vst [vmem:[#allocation280_spill] sm:$0xff] %v5353_v22 }
 0x2c8   : > { %v5355_v6 = vpop.permute.xlu1 %2524  ;;  %2393 = vrot.lane.b32.xlu0 %v5263_v38, %s8240_s7 }
 0x2c9   : > { %8242 = vst [vmem:[#allocation281_spill] sm:$0xff] %v5355_v6 }
 0x2ca   : > { %2399 = vrot.lane.b32.xlu1 %v5030_v51, %s8240_s7  ;;  %v5361_v18 = vpop.permute.xlu0 %2522 }
 0x2cb   : > { %8243 = vst [vmem:[#allocation282_spill] sm:$0xff] %v5361_v18 }
 0x2cc   : > { %v5363_v39 = vpop.permute.xlu1 %2630  ;;  %2397 = vrot.lane.b32.xlu0 %v5039_v0, %s8240_s7  ;;  %s8329_s7 = smov 124  }
 0x2cd   : > { %8244 = vst [vmem:[#allocation283_spill] sm:$0xff] %v5363_v39 }
 0x2ce   : > { %2404 = vrot.lane.b32.xlu1 %v5299_v35, %s3711_s28  ;;  %v5373_v6 = vpop.permute.xlu0 %2617 }
 0x2cf   : > { %8246 = vst [vmem:[#allocation285_spill] sm:$0xff] %v5373_v6 }
 0x2d0   : > { %v5375_v29 = vpop.permute.xlu1 %2634  ;;  %1953 = vrot.lane.b32.xlu0 %v5371_v1, %s8158_s10  ;;  %s8273_s10 = smov 80  }
 0x2d1   : > { %8247 = vst [vmem:[#allocation286_spill] sm:$0xff] %v5375_v29 }
 0x2d2   : > { %2408 = vrot.lane.b32.xlu1 %v5064_v2, %s3711_s28  ;;  %v5381_v39 = vpop.permute.xlu0 %2632 }
 0x2d3   : > { %8248 = vst [vmem:[#allocation287_spill] sm:$0xff] %v5381_v39 }
 0x2d4   : > { %v5383_v18 = vpop.permute.xlu1 %2531  ;;  %2406 = vrot.lane.b32.xlu0 %v5185_v5, %s3711_s28 }
 0x2d5   : > { %8249 = vst [vmem:[#allocation288_spill] sm:$0xff] %v5383_v18 }
 0x2d6   : > { %1960 = vrot.lane.b32.xlu1 %v4853_v46, %s8250_s12  ;;  %v5389_v22 = vpop.permute.xlu0 %2518 }
 0x2d7   : > { %8251 = vst [vmem:[#allocation289_spill] sm:$0xff] %v5389_v22 }
 0x2d8   : > { %v5391_v6 = vpop.permute.xlu1 %2535  ;;  %2410 = vrot.lane.b32.xlu0 %v4997_v11, %s3711_s28  ;;  %s8259_s28 = smov 81  }
 0x2d9   : > { %8252 = vst [vmem:[#allocation290_spill] sm:$0xff] %v5391_v6 }
 0x2da   : > { %1964 = vrot.lane.b32.xlu1 %v4974_v42, %s8250_s12  ;;  %v5397_v29 = vpop.permute.xlu0 %2533 }
 0x2db   : > { %8253 = vst [vmem:[#allocation291_spill] sm:$0xff] %v5397_v29 }
 0x2dc   : > { %v5399_v39 = vpop.permute.xlu1 %2641  ;;  %1962 = vrot.lane.b32.xlu0 %v4876_v60, %s8250_s12 }
 0x2dd   : > { %8254 = vst [vmem:[#allocation292_spill] sm:$0xff] %v5399_v39 }
 0x2de   : > { %2417 = vrot.lane.b32.xlu1 %v5263_v38, %s3712_s13  ;;  %v5405_v18 = vpop.permute.xlu0 %2628 }
 0x2df   : > { %8255 = vst [vmem:[#allocation293_spill] sm:$0xff] %v5405_v18 }
 0x2e0   : > { %v5407_v22 = vpop.permute.xlu1 %2645  ;;  %2415 = vrot.lane.b32.xlu0 %v5335_v62, %s3712_s13 }
 0x2e1   : > { %8256 = vst [vmem:[#allocation294_spill] sm:$0xff] %v5407_v22 }
 0x2e2   : > { %2421 = vrot.lane.b32.xlu1 %v5039_v0, %s3712_s13  ;;  %v5413_v6 = vpop.permute.xlu0 %2643 }
 0x2e3   : > { %8257 = vst [vmem:[#allocation295_spill] sm:$0xff] %v5413_v6 }
 0x2e4   : > { %v5415_v29 = vpop.permute.xlu1 %2542  ;;  %2419 = vrot.lane.b32.xlu0 %v5109_v27, %s3712_s13  ;;  %s8264_s13 = smov 105  }
 0x2e5   : > { %8258 = vst [vmem:[#allocation296_spill] sm:$0xff] %v5415_v29 }
 0x2e6   : > { %2246 = vrot.lane.b32.xlu1 %v5185_v5, %s8259_s28  ;;  %v5421_v39 = vpop.permute.xlu0 %2529 }
 0x2e7   : > { %8260 = vst [vmem:[#allocation297_spill] sm:$0xff] %v5421_v39 }
 0x2e8   : > { %v5423_v18 = vpop.permute.xlu1 %2546  ;;  %1958 = vrot.lane.b32.xlu0 %v4862_v50, %s8250_s12  ;;  %s3464_s12 = sshll.u32 %s3667_s19, 3  ;;  %s9080_s19 = smov (!%p306_p9, %s3667_s19), 1 }
 0x2e9   : > { %8261 = vst [vmem:[#allocation298_spill] sm:$0xff] %v5423_v18  ;;  %v5447_v18 = vcombine.high %v4879_v56, %v4879_v56  ;;  %p286_p8 = scmp.lt.s32.totalorder %s3464_s12, 15 }
 0x2ea   : > { %2250 = vrot.lane.b32.xlu1 %v4997_v11, %s8259_s28  ;;  %v5429_v22 = vpop.permute.xlu0 %2544 }
 0x2eb   : > { %8262 = vst [vmem:[#allocation299_spill] sm:$0xff] %v5429_v22  ;;  %8268 = vst [vmem:[#allocation303_spill] sm:$0xff] %v5447_v18  ;;  %s9078_s12 = smov (!%p286_p8, %s3464_s12), 15 }
 0x2ec   : > { %v5431_v6 = vpop.permute.xlu1 %2540  ;;  %2248 = vrot.lane.b32.xlu0 %v5143_v24, %s8259_s28  ;;  %s3512_s28 = smul.u32 3, %s9078_s12 }
 0x2ed   : > { %8263 = vst [vmem:[#allocation300_spill] sm:$0xff] %v5431_v6 }
 0x2ee   : > { %2017 = vrot.lane.b32.xlu1 %v5371_v1, %s8264_s13  ;;  %v5437_v29 = vpop.permute.xlu0 %2639 }
 0x2ef   : > { %8265 = vst [vmem:[#allocation301_spill] sm:$0xff] %v5437_v29 }
 0x2f0   : > { %v5439_v39 = vpop.permute.xlu1 %2555  ;;  %2015 = vrot.lane.b32.xlu0 %v4879_v56, %s8264_s13 }
 0x2f1   : > { %8266 = vst [vmem:[#allocation302_spill] sm:$0xff] %v5439_v39 }
 0x2f2   : > { %2026 = vrot.lane.b32.xlu1 %v4905_v33, %s8267_s8  ;;  %v5449_v6 = vpop.permute.xlu0 %2553 }
 0x2f3   : > { %8269 = vst [vmem:[#allocation304_spill] sm:$0xff] %v5449_v6 }
 0x2f4   : > { %v5451_v24 = vpop.permute.xlu1 %2333  ;;  %2019 = vrot.lane.b32.xlu0 %v5447_v18, %s8264_s13  ;;  %v8485_v18 = vld [vmem:[#allocation195_spill] sm:$0xff] }
 0x2f5   : > { %8270 = vst [vmem:[#allocation305_spill] sm:$0xff] %v5451_v24 }
 0x2f6   : > { %2030 = vrot.lane.b32.xlu1 %v4994_v63, %s8267_s8  ;;  %v5457_v39 = vpop.permute.xlu0 %2557 }
 0x2f7   : > { %8271 = vst [vmem:[#allocation306_spill] sm:$0xff] %v5457_v39 }
 0x2f8   : > { %v5459_v22 = vpop.permute.xlu1 %2337  ;;  %2028 = vrot.lane.b32.xlu0 %v4974_v42, %s8267_s8 }
 0x2f9   : > { %8272 = vst [vmem:[#allocation307_spill] sm:$0xff] %v5459_v22 }
 0x2fa   : > { %2281 = vrot.lane.b32.xlu1 %v5241_v25, %s8273_s10  ;;  %v5465_v29 = vpop.permute.xlu0 %2335 }
 0x2fb   : > { %8274 = vst [vmem:[#allocation308_spill] sm:$0xff] %v5465_v29 }
 0x2fc   : > { %v5467_v6 = vpop.permute.xlu1 %2347  ;;  %2279 = vrot.lane.b32.xlu0 %v5263_v38, %s8273_s10 }
 0x2fd   : > { %8275 = vst [vmem:[#allocation309_spill] sm:$0xff] %v5467_v6  ;;  %v8463_v6 = vld [vmem:[#allocation180_spill] sm:$0xff] }
 0x2fe   : > { %2285 = vrot.lane.b32.xlu1 %v5030_v51, %s8273_s10  ;;  %v5473_v63 = vpop.permute.xlu0 %2339 }
 0x2ff   : > { %8276 = vst [vmem:[#allocation310_spill] sm:$0xff] %v5473_v63 }
 0x300   : > { %v5475_v24 = vpop.permute.xlu1 %2351  ;;  %2283 = vrot.lane.b32.xlu0 %v5039_v0, %s8273_s10  ;;  %s3735_s10 = smov 67  }
 0x301   : > { %8277 = vst [vmem:[#allocation311_spill] sm:$0xff] %v5475_v24 }
 0x302   : > { %2024 = vrot.lane.b32.xlu1 %v4853_v46, %s8267_s8  ;;  %v5481_v25 = vpop.permute.xlu0 %2349 }
 0x303   : > { %8278 = vst [vmem:[#allocation312_spill] sm:$0xff] %v5481_v25  ;;  %v8464_v25 = vld [vmem:[#allocation176_spill] sm:$0xff] }
 0x304   : > { %v5483_v22 = vpop.permute.xlu1 %2551  ;;  %2013 = vrot.lane.b32.xlu0 %v4848_v59, %s8264_s13  ;;  %s3467_s13 = sshll.u32 %s9076_s20, 1 }
 0x305   : > { %8279 = vst [vmem:[#allocation313_spill] sm:$0xff] %v5483_v22  ;;  %s309_s12 = sadd.s32 %s3467_s13, %s9080_s19  ;;  %s3734_s19 = smov 45  }
 0x306   : > { %2039 = vrot.lane.b32.xlu1 %v5003_v52, %s3699_s30  ;;  %v5489_v51 = vpop.permute.xlu0 %2353 }
 0x307   : > { %8280 = vst [vmem:[#allocation314_spill] sm:$0xff] %v5489_v51 }
 0x308   : > { %v5491_v63 = vpop.permute.xlu1 %2566  ;;  %2037 = vrot.lane.b32.xlu0 %v4848_v59, %s3699_s30 }
 0x309   : > { %8281 = vst [vmem:[#allocation315_spill] sm:$0xff] %v5491_v63 }
 0x30a   : > { %2299 = vrot.lane.b32.xlu1 %v5299_v35, %s8282_s17  ;;  %v5497_v29 = vpop.permute.xlu0 %2564 }
 0x30b   : > { %8283 = vst [vmem:[#allocation316_spill] sm:$0xff] %v5497_v29 }
 0x30c   : > { %v5499_v24 = vpop.permute.xlu1 %2359  ;;  %2041 = vrot.lane.b32.xlu0 %v5371_v1, %s3699_s30 }
 0x30d   : > { %8284 = vst [vmem:[#allocation317_spill] sm:$0xff] %v5499_v24 }
 0x30e   : > { %2303 = vrot.lane.b32.xlu1 %v5064_v2, %s8282_s17  ;;  %v5505_v52 = vpop.permute.xlu0 %2568 }
 0x30f   : > { %8285 = vst [vmem:[#allocation318_spill] sm:$0xff] %v5505_v52 }
 0x310   : > { %v5507_v51 = vpop.permute.xlu1 %2363  ;;  %2301 = vrot.lane.b32.xlu0 %v5185_v5, %s8282_s17 }
 0x311   : > { %8286 = vst [vmem:[#allocation319_spill] sm:$0xff] %v5507_v51 }
 0x312   : > { %2035 = vrot.lane.b32.xlu1 %v4910_v17, %s3699_s30  ;;  %v5513_v35 = vpop.permute.xlu0 %2361  ;;  %s8301_s30 = smov 85  }
 0x313   : > { %8287 = vst [vmem:[#allocation320_spill] sm:$0xff] %v5513_v35 }
 0x314   : > { %v5515_v22 = vpop.permute.xlu1 %2562  ;;  %2305 = vrot.lane.b32.xlu0 %v4997_v11, %s8282_s17  ;;  %v8474_v11 = vld [vmem:[#allocation186_spill] sm:$0xff] }
 0x315   : > { %8288 = vst [vmem:[#allocation321_spill] sm:$0xff] %v5515_v22  ;;  %v8462_v22 = vld [vmem:[#allocation164_spill] sm:$0xff] }
 0x316   : > { %2050 = vrot.lane.b32.xlu1 %v4876_v60, %s8180_s11  ;;  %v5521_v2 = vpop.permute.xlu0 %2365 }
 0x317   : > { %8289 = vst [vmem:[#allocation322_spill] sm:$0xff] %v5521_v2 }
 0x318   : > { %v5523_v24 = vpop.permute.xlu1 %2577  ;;  %2048 = vrot.lane.b32.xlu0 %v4853_v46, %s8180_s11 }
 0x319   : > { %8290 = vst [vmem:[#allocation323_spill] sm:$0xff] %v5523_v24  ;;  %v8469_v24 = vld [vmem:[#allocation181_spill] sm:$0xff] }
 0x31a   : > { %2319 = vrot.lane.b32.xlu1 %v5335_v62, %s3733_s29  ;;  %v5528_v5 = vpop.permute.xlu0 %2575 }
 0x31b   : > { %8291 = vst [vmem:[#allocation324_spill] sm:$0xff] %v5528_v5  ;;  %v8468_v5 = vld [vmem:[#allocation185_spill] sm:$0xff] }
 0x31c   : > { %v5530_v35 = vpop.permute.xlu1 %2371  ;;  %2052 = vrot.lane.b32.xlu0 %v4974_v42, %s8180_s11 }
 0x31d   : > { %8292 = vst [vmem:[#allocation325_spill] sm:$0xff] %v5530_v35 }
 0x31e   : > { %2323 = vrot.lane.b32.xlu1 %v5109_v27, %s3733_s29  ;;  %v5535_v60 = vpop.permute.xlu0 %2579 }
 0x31f   : > { %8293 = vst [vmem:[#allocation326_spill] sm:$0xff] %v5535_v60  ;;  %v8461_v60 = vld [vmem:[#allocation167_spill] sm:$0xff] }
 0x320   : > { %v5537_v2 = vpop.permute.xlu1 %2375  ;;  %2321 = vrot.lane.b32.xlu0 %v5263_v38, %s3733_s29 }
 0x321   : > { %8294 = vst [vmem:[#allocation327_spill] sm:$0xff] %v5537_v2  ;;  %v390_v2 = vsel %vm7871_vm9, %v3987_v36, %v4007_v44 }
 0x322   : > { %2046 = vrot.lane.b32.xlu1 %v4862_v50, %s8180_s11  ;;  %v5542_v51 = vpop.permute.xlu0 %2373  ;;  %s8306_s11 = smov 84   ;;  %v589_v36 = vsel %vm7950_vm2, %v3835_v9, %v390_v2  ;;  %v433_v9 = vsel %vm7867_vm10, %v3998_v41, %v4051_v57 }
 0x323   : > { %8295 = vst [vmem:[#allocation328_spill] sm:$0xff] %v5542_v51  ;;  %v392_v51 = vsel %vm7871_vm9, %v4009_v45, %v4039_v54  ;;  %v432_v54 = vsel %vm7867_vm10, %v4037_v53, %v3998_v41  ;;  %v698_v53 = vsel %vm7868_vm12, %v4290_v43, %v4284_v61  ;;  %v699_v41 = vsel %vm7868_vm12, %v4284_v61, %v4298_v4 }
 0x324   : > { %v5544_v62 = vpop.permute.xlu1 %2573  ;;  %2325 = vrot.lane.b32.xlu0 %v5039_v0, %s3733_s29 }
 0x325   : > { %8296 = vst [vmem:[#allocation329_spill] sm:$0xff] %v5544_v62  ;;  %v595_v62 = vsel %vm7950_vm2, %v3842_v12, %v392_v51  ;;  %v413_v12 = vsel %vm7869_vm11, %v4021_v48, %v3989_v37 }
 0x326   : > { %2061 = vrot.lane.b32.xlu1 %v4848_v59, %s8189_s16  ;;  %v5549_v42 = vpop.permute.xlu0 %2377  ;;  %v602_v2 = vsel %vm596_vm4, %v595_v62, %v413_v12 }
 0x327   : > { %8297 = vst [vmem:[#allocation330_spill] sm:$0xff] %v5549_v42 }
 0x328   : > { %v5551_v27 = vpop.permute.xlu1 %2588  ;;  %2059 = vrot.lane.b32.xlu0 %v4890_v10, %s8189_s16 }
 0x329   : > { %8298 = vst [vmem:[#allocation331_spill] sm:$0xff] %v5551_v27 }
 0x32a   : > { %2057 = vrot.lane.b32.xlu1 %v4867_v30, %s8189_s16  ;;  %v5557_v38 = vpop.permute.xlu0 %2586 }
 0x32b   : > { %8299 = vst [vmem:[#allocation332_spill] sm:$0xff] %v5557_v38 }
 0x32c   : > { %v5559_v35 = vpop.permute.xlu1 %2382  ;;  %2063 = vrot.lane.b32.xlu0 %v4879_v56, %s8189_s16 }
 0x32d   : > { %8300 = vst [vmem:[#allocation333_spill] sm:$0xff] %v5559_v35 }
 0x32e   : > { %2072 = vrot.lane.b32.xlu1 %v4853_v46, %s8301_s30  ;;  %v5565_v0 = vpop.permute.xlu0 %2590 }
 0x32f   : > { %8302 = vst [vmem:[#allocation334_spill] sm:$0xff] %v5565_v0 }
 0x330   : > { %v5567_v42 = vpop.permute.xlu1 %2386  ;;  %2070 = vrot.lane.b32.xlu0 %v4920_v32, %s8301_s30 }
 0x331   : > { %8303 = vst [vmem:[#allocation335_spill] sm:$0xff] %v5567_v42  ;;  %v391_v42 = vsel %vm7871_vm9, %v4007_v44, %v4009_v45  ;;  %v412_v45 = vsel %vm7869_vm11, %v3981_v34, %v4021_v48  ;;  %v411_v48 = vsel %vm7869_vm11, %v3996_v40, %v3981_v34  ;;  %vm7893_vm11 = vcmask 859136  }
 0x332   : > { %2068 = vrot.lane.b32.xlu1 %v4896_v47, %s8301_s30  ;;  %v5576_v35 = vpop.permute.xlu0 %2384  ;;  %v592_v44 = vsel %vm7950_vm2, %v3876_v23, %v391_v42  ;;  %v434_v23 = vsel %vm7867_vm10, %v4051_v57, %v4023_v49  ;;  %v700_v57 = vsel %vm7868_vm12, %v4298_v4, %v4292_v58  ;;  %v598_v12 = vsel %vm596_vm4, %v589_v36, %v411_v48  ;;  %v8355_v58 = vld [vmem:[#allocation64_spill] sm:$0xff] }
 0x333   : > { %8304 = vst [vmem:[#allocation336_spill] sm:$0xff] %v5576_v35  ;;  %v600_v62 = vsel %vm596_vm4, %v592_v44, %v412_v45  ;;  %v5635_v34 = vsel %vm7914_vm5, %v598_v12, %v432_v54  ;;  %v5641_v61 = vsel %vm7914_vm5, %v602_v2, %v434_v23  ;;  %vm624_vm10 = vcmask 1045504   ;;  %v8455_v35 = vld [vmem:[#allocation172_spill] sm:$0xff] }
 0x334   : > { %v5584_v0 = vpop.permute.xlu1 %2584  ;;  %2074 = vrot.lane.b32.xlu0 %v4905_v33, %s8301_s30  ;;  %8309 = vst [vmem:[#allocation340_spill] sm:$0xff] %v5635_v34  ;;  %v5638_v40 = vsel %vm7914_vm5, %v600_v62, %v433_v9  ;;  %8311 = vst [vmem:[#allocation342_spill] sm:$0xff] %v5641_v61  ;;  %v862_v43 = vsel %vm610_vm6, %v5635_v34, %v698_v53  ;;  %v866_v44 = vsel %vm610_vm6, %v5641_v61, %v700_v57  ;;  %vm631_vm12 = vcmask 1046528   ;;  %v8332_v61 = vld [vmem:[#allocation21_spill] sm:$0xff] }
 0x335   : > { %8305 = vst [vmem:[#allocation337_spill] sm:$0xff] %v5584_v0  ;;  %8310 = vst [vmem:[#allocation341_spill] sm:$0xff] %v5638_v40  ;;  %v864_v36 = vsel %vm610_vm6, %v5638_v40, %v699_v41  ;;  %v5658_v45 = vsel %vm7870_vm13, %v4090_v7, %v4081_v3  ;;  %v5663_v9 = vsel %vm7870_vm13, %v4081_v3, %v4106_v13  ;;  %vm7899_vm9 = vcmask 334848   ;;  %v8340_v34 = vld [vmem:[#allocation57_spill] sm:$0xff] }
 0x336   : > { %2083 = vrot.lane.b32.xlu1 %v4910_v17, %s8306_s11  ;;  %v5602_v51 = vpop.permute.xlu0 %2388  ;;  %8314 = vst [vmem:[#allocation345_spill] sm:$0xff] %v5658_v45  ;;  %8315 = vst [vmem:[#allocation346_spill] sm:$0xff] %v5663_v9  ;;  %v5668_v23 = vsel %vm7870_vm13, %v4106_v13, %v4092_v8  ;;  %v869_v2 = vsel %vm7872_vm8, %v862_v43, %v5658_v45  ;;  %v870_v48 = vsel %vm7872_vm8, %v864_v36, %v5663_v9  ;;  %vm7907_vm13 = vcmask 498688   ;;  %v8327_v43 = vld [vmem:[#allocation19_spill] sm:$0xff]  ;;  %v8335_v45 = vld [vmem:[#allocation53_spill] sm:$0xff] }
 0x337   : > { %8307 = vst [vmem:[#allocation338_spill] sm:$0xff] %v5602_v51  ;;  %8316 = vst [vmem:[#allocation347_spill] sm:$0xff] %v5668_v23  ;;  %v871_v3 = vsel %vm7872_vm8, %v866_v44, %v5668_v23  ;;  %v5683_v13 = vsel %vm7915_vm14, %v4114_v15, %v4108_v14  ;;  %v5688_v53 = vsel %vm7915_vm14, %v4108_v14, %v4130_v19  ;;  %v8324_v15 = vld [vmem:[#allocation17_spill] sm:$0xff]  ;;  %vm7897_vm8 = vcmask 326656   ;;  %v8326_v14 = vld [vmem:[#allocation18_spill] sm:$0xff] }
 0x338   : > { %v5614_v42 = vpop.permute.xlu1 %2395  ;;  %2081 = vrot.lane.b32.xlu0 %v4867_v30, %s8306_s11  ;;  %8319 = vst [vmem:[#allocation349_spill] sm:$0xff] %v5683_v13  ;;  %8320 = vst [vmem:[#allocation350_spill] sm:$0xff] %v5688_v53  ;;  %v5695_v57 = vsel %vm7915_vm14, %v4130_v19, %v4116_v16  ;;  %v5700_v62 = vsel %vm7881_vm15, %v4138_v21, %v4132_v20  ;;  %v5705_v12 = vsel %vm7881_vm15, %v4132_v20, %v8324_v15  ;;  %v8330_v44 = vld [vmem:[#allocation16_spill] sm:$0xff]  ;;  %v8354_v8 = vld [vmem:[#allocation66_spill] sm:$0xff] }
 0x339   : > { %8308 = vst [vmem:[#allocation339_spill] sm:$0xff] %v5614_v42  ;;  %8322 = vst [vmem:[#allocation352_spill] sm:$0xff] %v5695_v57  ;;  %v5712_v36 = vsel %vm7893_vm11, %v8327_v43, %v8326_v14  ;;  %v875_v19 = vsel %vm624_vm10, %v870_v48, %v5688_v53  ;;  %v874_v21 = vsel %vm624_vm10, %v869_v2, %v5683_v13  ;;  %v8341_v53 = vld [vmem:[#allocation54_spill] sm:$0xff]  ;;  %v8404_v51 = vld [vmem:[#allocation96_spill] sm:$0xff] }
 0x33a   : > { %2079 = vrot.lane.b32.xlu1 %v4926_v31, %s8306_s11  ;;  %v5643_v4 = vpop.permute.xlu0 %2393  ;;  %8323 = vst [vmem:[#allocation353_spill] sm:$0xff] %v5700_v62  ;;  %8325 = vst [vmem:[#allocation17_spill] sm:$0xff] %v5705_v12  ;;  %v876_v20 = vsel %vm624_vm10, %v871_v3, %v5695_v57  ;;  %v5725_v23 = vsel %vm7881_vm15, %v8324_v15, %v8330_v44  ;;  %v5730_v43 = vsel %vm7893_vm11, %v8326_v14, %v8332_v61  ;;  %v8337_v3 = vld [vmem:[#allocation20_spill] sm:$0xff]  ;;  %v8339_v57 = vld [vmem:[#allocation55_spill] sm:$0xff]  ;;  %vm7904_vm15 = vcmask 900096  }
 0x33b   : > { %8312 = vst [vmem:[#allocation343_spill] sm:$0xff] %v5643_v4  ;;  %8328 = vst [vmem:[#allocation18_spill] sm:$0xff] %v5712_v36  ;;  %v885_v2 = vsel %vm7950_vm2, %v5712_v36, %v8335_v45  ;;  %v5743_v15 = vsel %vm7893_vm11, %v8332_v61, %v8337_v3  ;;  %v768_v9 = vsel %vm7905_vm0, %v8341_v53, %v8340_v34  ;;  %v8343_v44 = vld [vmem:[#allocation56_spill] sm:$0xff]  ;;  %v8348_v36 = vld [vmem:[#allocation58_spill] sm:$0xff]  ;;  %vm8360_vm11 = vcmask 1044480  }
 0x33c   : > { %v5651_v54 = vpop.permute.xlu1 %2399  ;;  %2085 = vrot.lane.b32.xlu0 %v4848_v59, %s8306_s11  ;;  %8331 = vst [vmem:[#allocation19_spill] sm:$0xff] %v5725_v23  ;;  %8333 = vst [vmem:[#allocation21_spill] sm:$0xff] %v5730_v43  ;;  %v5760_v61 = vsel %vm631_vm12, %v875_v19, %v5705_v12  ;;  %v8349_v19 = vld [vmem:[#allocation59_spill] sm:$0xff]  ;;  %v8419_v42 = vld [vmem:[#allocation102_spill] sm:$0xff] }
 0x33d   : > { %8313 = vst [vmem:[#allocation344_spill] sm:$0xff] %v5651_v54  ;;  %8338 = vst [vmem:[#allocation53_spill] sm:$0xff] %v5743_v15  ;;  %v8391_v54 = vld [vmem:[#allocation88_spill] sm:$0xff] }
 0x33e   : > { %2094 = vrot.lane.b32.xlu1 %v4862_v50, %s8317_s6  ;;  %v5674_v7 = vpop.permute.xlu0 %2397  ;;  %8344 = vst [vmem:[#allocation55_spill] sm:$0xff] %v5760_v61  ;;  %v8483_v61 = vld [vmem:[#allocation183_spill] sm:$0xff] }
 0x33f   : > { %8318 = vst [vmem:[#allocation348_spill] sm:$0xff] %v5674_v7  ;;  %v8454_v7 = vld [vmem:[#allocation175_spill] sm:$0xff] }
 0x340   : > { %v5690_v41 = vpop.permute.xlu1 %2404  ;;  %2092 = vrot.lane.b32.xlu0 %v4896_v47, %s8317_s6 }
 0x341   : > { %8321 = vst [vmem:[#allocation351_spill] sm:$0xff] %v5690_v41  ;;  %v8405_v41 = vld [vmem:[#allocation97_spill] sm:$0xff] }
 0x342   : > { %1971 = vrot.lane.b32.xlu1 %v4890_v10, %s8329_s7  ;;  %v8334_v10 = vld [vmem:[#allocation51_spill] sm:$0xff]  ;;  %v5738_v13 = vpop.permute.xlu0 %1953 }
 0x343   : > { %v747_v48 = vsel %vm7907_vm13, %v8335_v45, %v8334_v10  ;;  %8336 = vst [vmem:[#allocation51_spill] sm:$0xff] %v5738_v13  ;;  %v748_v14 = vsel %vm7907_vm13, %v8334_v10, %v8339_v57  ;;  %v769_v45 = vsel %vm7905_vm0, %v8340_v34, %v8343_v44  ;;  %v5764_v57 = vsel %vm631_vm12, %v874_v21, %v5700_v62  ;;  %v8347_v44 = vld [vmem:[#allocation60_spill] sm:$0xff] }
 0x344   : > { %v5751_v40 = vpop.permute.xlu1 %2408  ;;  %2096 = vrot.lane.b32.xlu0 %v4853_v46, %s8317_s6  ;;  %8345 = vst [vmem:[#allocation57_spill] sm:$0xff] %v5764_v57  ;;  %v5768_v10 = vsel %vm631_vm12, %v876_v20, %v5725_v23  ;;  %v887_v3 = vsel %vm7950_vm2, %v5730_v43, %v747_v48  ;;  %v894_v34 = vsel %vm596_vm4, %v885_v2, %v8341_v53  ;;  %v8350_v48 = vld [vmem:[#allocation63_spill] sm:$0xff]  ;;  %v8351_v23 = vld [vmem:[#allocation61_spill] sm:$0xff]  ;;  %v8352_v2 = vld [vmem:[#allocation62_spill] sm:$0xff]  ;;  %vm7938_vm13 = vcmask 670720  }
 0x345   : > { %8342 = vst [vmem:[#allocation20_spill] sm:$0xff] %v5751_v40  ;;  %8346 = vst [vmem:[#allocation54_spill] sm:$0xff] %v5768_v10  ;;  %v789_v16 = vsel %vm7903_vm1, %v8348_v36, %v8347_v44  ;;  %v790_v12 = vsel %vm7903_vm1, %v8347_v44, %v8349_v19  ;;  %v889_v21 = vsel %vm7950_vm2, %v5743_v15, %v748_v14  ;;  %v8377_v13 = vld [vmem:[#allocation80_spill] sm:$0xff]  ;;  %v8415_v40 = vld [vmem:[#allocation103_spill] sm:$0xff] }
 0x346   : > { %1975 = vrot.lane.b32.xlu1 %v4879_v56, %s8329_s7  ;;  %v896_v20 = vsel %vm596_vm4, %v887_v3, %v768_v9  ;;  %v811_v53 = vsel %vm7895_vm3, %v8351_v23, %v8350_v48  ;;  %v812_v62 = vsel %vm7895_vm3, %v8350_v48, %v8352_v2  ;;  %v5791_v43 = vpop.permute.xlu0 %2406  ;;  %v898_v44 = vsel %vm596_vm4, %v889_v21, %v769_v45  ;;  %v8356_v9 = vld [vmem:[#allocation65_spill] sm:$0xff]  ;;  %v8358_v21 = vld [vmem:[#allocation68_spill] sm:$0xff]  ;;  %v8359_v2 = vld [vmem:[#allocation70_spill] sm:$0xff] }
 0x347   : > { %8353 = vst [vmem:[#allocation56_spill] sm:$0xff] %v5791_v43  ;;  %v902_v19 = vsel %vm7914_vm5, %v894_v34, %v8348_v36  ;;  %v825_v14 = vsel %vm7894_vm7, %v8355_v58, %v8354_v8  ;;  %v826_v3 = vsel %vm7894_vm7, %v8354_v8, %v8356_v9  ;;  %v904_v49 = vsel %vm7914_vm5, %v896_v20, %v789_v16  ;;  %v8361_v16 = vld [vmem:[#allocation67_spill] sm:$0xff]  ;;  %vm8362_vm7 = vmmov %vm8360_vm11  ;;  %v8471_v10 = vld [vmem:[#allocation173_spill] sm:$0xff] }
 0x348   : > { %v5802_v15 = vpop.permute.xlu1 %1960  ;;  %v906_v48 = vsel %vm7914_vm5, %v898_v44, %v790_v12  ;;  %v910_v45 = vsel %vm610_vm6, %v902_v19, %v8351_v23  ;;  %v839_v36 = vsel %vm7899_vm9, %v8359_v2, %v8358_v21  ;;  %1973 = vrot.lane.b32.xlu0 %v4848_v59, %s8329_s7  ;;  %v912_v34 = vsel %vm610_vm6, %v904_v49, %v811_v53  ;;  %vm8363_vm3 = vmmov %vm8362_vm7  ;;  %v8364_v44 = vld [vmem:[#allocation75_spill] sm:$0xff]  ;;  %v8365_v19 = vld [vmem:[#allocation72_spill] sm:$0xff] }
 0x349   : > { %8357 = vst [vmem:[#allocation60_spill] sm:$0xff] %v5802_v15  ;;  %v914_v8 = vsel %vm610_vm6, %v906_v48, %v812_v62  ;;  %v918_v9 = vsel %vm8360_vm11, %v910_v45, %v8355_v58  ;;  %v838_v12 = vsel %vm7899_vm9, %v8361_v16, %v8359_v2  ;;  %v920_v23 = vsel %vm8362_vm7, %v912_v34, %v825_v14  ;;  %v8366_v53 = vld [vmem:[#allocation74_spill] sm:$0xff]  ;;  %v8368_v45 = vld [vmem:[#allocation79_spill] sm:$0xff]  ;;  %v8369_v2 = vld [vmem:[#allocation76_spill] sm:$0xff] }
 0x34a   : > { %1969 = vrot.lane.b32.xlu1 %v4867_v30, %s8329_s7  ;;  %v922_v20 = vsel %vm8363_vm3, %v914_v8, %v826_v3  ;;  %v851_v49 = vsel %vm7897_vm8, %v8365_v19, %v8364_v44  ;;  %v852_v62 = vsel %vm7897_vm8, %v8364_v44, %v8366_v53  ;;  %v5830_v58 = vpop.permute.xlu0 %2410  ;;  %v926_v48 = vsel %vm624_vm10, %v918_v9, %v8361_v16  ;;  %v8371_v14 = vld [vmem:[#allocation78_spill] sm:$0xff]  ;;  %v8376_v53 = vld [vmem:[#allocation85_spill] sm:$0xff] }
 0x34b   : > { %8367 = vst [vmem:[#allocation58_spill] sm:$0xff] %v5830_v58  ;;  %vm8370_vm11 = vcmask 1039360   ;;  %vm7918_vm7 = vcmask 728064   ;;  %v930_v8 = vsel %vm624_vm10, %v922_v20, %v839_v36  ;;  %v8374_v21 = vld [vmem:[#allocation82_spill] sm:$0xff]  ;;  %vm8378_vm9 = vcmask 1031168   ;;  %v8379_v16 = vld [vmem:[#allocation193_spill] sm:$0xff] }
 0x34c   : > { %v951_v37 = vsel %vm8370_vm11, %v8369_v2, %v8368_v45  ;;  %vm8372_vm3 = vmmov %vm8370_vm11  ;;  %v5840_v34 = vpop.permute.xlu1 %1964  ;;  %v962_v9 = vsel %vm8378_vm9, %v8377_v13, %v8376_v53  ;;  %2090 = vrot.lane.b32.xlu0 %v8379_v16, %s8317_s6  ;;  %v928_v2 = vsel %vm624_vm10, %v920_v23, %v838_v12  ;;  %v8383_v20 = vld [vmem:[#allocation87_spill] sm:$0xff]  ;;  %v5865_v13 = vsel %vm631_vm12, %v930_v8, %v852_v62  ;;  %v8389_v58 = vld [vmem:[#allocation89_spill] sm:$0xff] }
 0x34d   : > { %v952_v3 = vsel %vm8372_vm3, %v8368_v45, %v8371_v14  ;;  %8373 = vst [vmem:[#allocation59_spill] sm:$0xff] %v5840_v34  ;;  %vm8375_vm8 = vmmov %vm8372_vm3  ;;  %v5854_v45 = vsel %vm631_vm12, %v926_v48, %v8365_v19  ;;  %v8381_v34 = vld [vmem:[#allocation83_spill] sm:$0xff]  ;;  %vm7916_vm3 = vcmask 736256   ;;  %v5868_v12 = vsel %vm631_vm12, %v928_v2, %v851_v49  ;;  %v8388_v48 = vld [vmem:[#allocation13_spill] sm:$0xff] }
 0x34e   : > { %v953_v44 = vsel %vm8375_vm8, %v8371_v14, %v8374_v21  ;;  %8380 = vst [vmem:[#allocation63_spill] sm:$0xff] %v5854_v45  ;;  %vm8382_vm11 = vmmov %vm8378_vm9  ;;  %1984 = vrot.lane.b32.xlu1 %v4853_v46, %s3694_s15  ;;  %v8387_v23 = vld [vmem:[#allocation7_spill] sm:$0xff]  ;;  %v975_v62 = vsel %vm7904_vm15, %v8389_v58, %v8391_v54  ;;  %v5884_v8 = vpop.permute.xlu0 %1962  ;;  %v8393_v49 = vld [vmem:[#allocation9_spill] sm:$0xff] }
 0x34f   : > { %v963_v36 = vsel %vm8382_vm11, %v8376_v53, %v8381_v34  ;;  %vm8384_vm8 = vmmov %vm8378_vm9  ;;  %8385 = vst [vmem:[#allocation61_spill] sm:$0xff] %v5865_v13  ;;  %v5872_v19 = vsel %vm7950_vm2, %v8387_v23, %v951_v37  ;;  %v5876_v53 = vsel %vm7950_vm2, %v8388_v48, %v952_v3  ;;  %vm7917_vm9 = vcmask 719872   ;;  %v8394_v37 = vld [vmem:[#allocation52_spill] sm:$0xff]  ;;  %v8395_v48 = vld [vmem:[#allocation91_spill] sm:$0xff] }
 0x350   : > { %v964_v14 = vsel %vm8384_vm8, %v8381_v34, %v8383_v20  ;;  %8386 = vst [vmem:[#allocation62_spill] sm:$0xff] %v5868_v12  ;;  %v8390_v34 = vld [vmem:[#allocation86_spill] sm:$0xff]  ;;  %8392 = vst [vmem:[#allocation66_spill] sm:$0xff] %v5884_v8  ;;  %v5888_v2 = vsel %vm7950_vm2, %v8393_v49, %v953_v44  ;;  %v5893_v3 = vsel %vm7950_vm2, %v8394_v37, %v8374_v21  ;;  %v8397_v49 = vld [vmem:[#allocation93_spill] sm:$0xff]  ;;  %vm8399_vm11 = vcmask 891904   ;;  %1982 = vrot.lane.b32.xlu0 %v4920_v32, %s3694_s15 }
 0x351   : > { %v974_v20 = vsel %vm7904_vm15, %v8390_v34, %v8389_v58  ;;  %v1126_v23 = vsel %vm596_vm4, %v5872_v19, %v962_v9  ;;  %v976_v34 = vsel %vm7904_vm15, %v8391_v54, %v8395_v48  ;;  %v5900_v58 = vpop.permute.xlu1 %2417  ;;  %v1128_v15 = vsel %vm596_vm4, %v5876_v53, %v963_v36  ;;  %v8398_v8 = vld [vmem:[#allocation90_spill] sm:$0xff]  ;;  %v8400_v37 = vld [vmem:[#allocation92_spill] sm:$0xff]  ;;  %vm8401_vm8 = vmmov %vm8399_vm11 }
 0x352   : > { %8396 = vst [vmem:[#allocation64_spill] sm:$0xff] %v5900_v58  ;;  %v1130_v44 = vsel %vm596_vm4, %v5888_v2, %v964_v14  ;;  %v985_v21 = vsel %vm8399_vm11, %v8398_v8, %v8397_v49  ;;  %v986_v9 = vsel %vm8401_vm8, %v8397_v49, %v8400_v37  ;;  %vm7923_vm15 = vcmask 711680   ;;  %v8402_v48 = vld [vmem:[#allocation95_spill] sm:$0xff]  ;;  %vm8403_vm0 = vmmov %vm8401_vm8  ;;  %1980 = vrot.lane.b32.xlu1 %v4896_v47, %s3694_s15  ;;  %v8407_v32 = vld [vmem:[#allocation94_spill] sm:$0xff]  ;;  %v5934_v4 = vpop.permute.xlu0 %2415 }
 0x353   : > { %v1134_v54 = vsel %vm7914_vm5, %v1126_v23, %v974_v20  ;;  %v1136_v36 = vsel %vm7914_vm5, %v1128_v15, %v975_v62  ;;  %v987_v14 = vsel %vm8403_vm0, %v8400_v37, %v8402_v48  ;;  %vm8406_vm11 = vcmask 883712   ;;  %v8409_v23 = vld [vmem:[#allocation99_spill] sm:$0xff]  ;;  %v8411_v62 = vld [vmem:[#allocation100_spill] sm:$0xff]  ;;  %v8412_v37 = vld [vmem:[#allocation101_spill] sm:$0xff]  ;;  %8413 = vst [vmem:[#allocation65_spill] sm:$0xff] %v5934_v4 }
 0x354   : > { %v997_v8 = vsel %vm8406_vm11, %v8405_v41, %v8404_v51  ;;  %v1138_v49 = vsel %vm7914_vm5, %v1130_v44, %v976_v34  ;;  %vm8408_vm8 = vmmov %vm8406_vm11  ;;  %v1008_v48 = vsel %vm7915_vm14, %v8412_v37, %v8411_v62  ;;  %v1142_v58 = vsel %vm610_vm6, %v1134_v54, %v985_v21  ;;  %v8414_v34 = vld [vmem:[#allocation98_spill] sm:$0xff]  ;;  %1986 = vrot.lane.b32.xlu0 %v4905_v33, %s3694_s15  ;;  %v8493_v13 = vld [vmem:[#allocation153_spill] sm:$0xff] }
 0x355   : > { %v996_v20 = vsel %vm8408_vm8, %v8407_v32, %v8405_v41  ;;  %vm8410_vm1 = vmmov %vm8408_vm8  ;;  %v1144_v43 = vsel %vm610_vm6, %v1136_v36, %v986_v9  ;;  %v1007_v44 = vsel %vm7915_vm14, %v8414_v34, %v8412_v37  ;;  %v1009_v41 = vsel %vm7915_vm14, %v8411_v62, %v8415_v40  ;;  %v5944_v32 = vpop.permute.xlu1 %2421  ;;  %v8418_v4 = vld [vmem:[#allocation106_spill] sm:$0xff]  ;;  %v8421_v9 = vld [vmem:[#allocation104_spill] sm:$0xff] }
 0x356   : > { %v998_v15 = vsel %vm8410_vm1, %v8404_v51, %v8409_v23  ;;  %8416 = vst [vmem:[#allocation70_spill] sm:$0xff] %v5944_v32  ;;  %v1146_v51 = vsel %vm610_vm6, %v1138_v49, %v987_v14  ;;  %vm8417_vm1 = vcmask 1044480   ;;  %vm8420_vm11 = vcmask 867328   ;;  %1995 = vrot.lane.b32.xlu1 %v4910_v17, %s8221_s9  ;;  %v8425_v14 = vld [vmem:[#allocation115_spill] sm:$0xff]  ;;  %v8427_v49 = vld [vmem:[#allocation114_spill] sm:$0xff]  ;;  %v5967_v37 = vpop.permute.xlu0 %2419 }
 0x357   : > { %v1152_v23 = vsel %vm8417_vm1, %v1144_v43, %v997_v8  ;;  %v1018_v21 = vsel %vm8420_vm11, %v8419_v42, %v8418_v4  ;;  %vm8422_vm8 = vmmov %vm8420_vm11  ;;  %vm1383_vm0 = vcmask 506880   ;;  %v8426_v8 = vld [vmem:[#allocation112_spill] sm:$0xff]  ;;  %8428 = vst [vmem:[#allocation67_spill] sm:$0xff] %v5967_v37  ;;  %vm1356_vm11 = vcmask 646144   ;;  %v8451_v32 = vld [vmem:[#allocation123_spill] sm:$0xff] }
 0x358   : > { %v1019_v54 = vsel %vm8422_vm8, %v8418_v4, %v8421_v9  ;;  %vm8423_vm5 = vmmov %vm8417_vm1  ;;  %v1160_v43 = vsel %vm624_vm10, %v1152_v23, %v1008_v48  ;;  %v1042_v42 = vsel %vm7918_vm7, %v8426_v8, %v8425_v14  ;;  %v1043_v4 = vsel %vm7918_vm7, %v8425_v14, %v8427_v49  ;;  %v8431_v48 = vld [vmem:[#allocation117_spill] sm:$0xff]  ;;  %1993 = vrot.lane.b32.xlu0 %v4867_v30, %s8221_s9 }
 0x359   : > { %v1150_v36 = vsel %vm8423_vm5, %v1142_v58, %v996_v20  ;;  %vm8424_vm14 = vmmov %vm8417_vm1  ;;  %v8429_v20 = vld [vmem:[#allocation109_spill] sm:$0xff]  ;;  %v1044_v23 = vsel %vm7918_vm7, %v8427_v49, %v8431_v48  ;;  %v5984_v34 = vsel %vm631_vm12, %v1160_v43, %v1019_v54  ;;  %v8437_v49 = vld [vmem:[#allocation118_spill] sm:$0xff]  ;;  %vm1343_vm1 = vcmask 654336  }
 0x35a   : > { %v1154_v62 = vsel %vm8424_vm14, %v1146_v51, %v998_v15  ;;  %v1158_v33 = vsel %vm624_vm10, %v1150_v36, %v1007_v44  ;;  %vm8430_vm5 = vmmov %vm8422_vm8  ;;  %vm1321_vm14 = vcmask 662528   ;;  %v5981_v15 = vpop.permute.xlu1 %2246  ;;  %v8434_v51 = vld [vmem:[#allocation107_spill] sm:$0xff]  ;;  %v8436_v14 = vld [vmem:[#allocation113_spill] sm:$0xff]  ;;  %vm7943_vm8 = vcmask 351232   ;;  %1991 = vrot.lane.b32.xlu1 %v4926_v31, %s8221_s9 }
 0x35b   : > { %v5971_v58 = vsel %vm624_vm10, %v1154_v62, %v1009_v41  ;;  %v5976_v17 = vsel %vm8430_vm5, %v8421_v9, %v8429_v20  ;;  %8432 = vst [vmem:[#allocation75_spill] sm:$0xff] %v5981_v15  ;;  %v5987_v44 = vsel %vm631_vm12, %v1158_v33, %v1018_v21  ;;  %v8433_v41 = vld [vmem:[#allocation111_spill] sm:$0xff]  ;;  %v8435_v62 = vld [vmem:[#allocation110_spill] sm:$0xff]  ;;  %v8439_v33 = vld [vmem:[#allocation121_spill] sm:$0xff]  ;;  %v6016_v30 = vsel %vm7950_vm2, %v8436_v14, %v8431_v48 }
 0x35c   : > { %v1030_v36 = vsel %vm7916_vm3, %v8434_v51, %v8433_v41  ;;  %v1031_v9 = vsel %vm7916_vm3, %v8433_v41, %v8435_v62  ;;  %v1032_v8 = vsel %vm7916_vm3, %v8435_v62, %v8436_v14  ;;  %v8438_v20 = vld [vmem:[#allocation119_spill] sm:$0xff]  ;;  %v1055_v41 = vsel %vm7917_vm9, %v8437_v49, %v8439_v33  ;;  %v8442_v62 = vld [vmem:[#allocation122_spill] sm:$0xff]  ;;  %v8453_v15 = vld [vmem:[#allocation145_spill] sm:$0xff]  ;;  %1997 = vrot.lane.b32.xlu0 %v4848_v59, %s8221_s9  ;;  %s3513_s9 = smul.u32 48, %s9076_s20 }
 0x35d   : > { %v1054_v54 = vsel %vm7917_vm9, %v8438_v20, %v8437_v49  ;;  %v6004_v21 = vsel %vm7950_vm2, %v1030_v36, %v1042_v42  ;;  %v1178_v43 = vsel %vm7950_vm2, %v1031_v9, %v1043_v4  ;;  %v1181_v51 = vsel %vm7950_vm2, %v1032_v8, %v1044_v23  ;;  %v8440_v42 = vld [vmem:[#allocation116_spill] sm:$0xff]  ;;  %v8441_v36 = vld [vmem:[#allocation125_spill] sm:$0xff]  ;;  %v6026_v49 = vpop.permute.xlu0 %1958  ;;  %v8444_v48 = vld [vmem:[#allocation143_spill] sm:$0xff] }
 0x35e   : > { %v6021_v4 = vsel %vm7917_vm9, %v8440_v42, %v8438_v20  ;;  %v1066_v9 = vsel %vm7923_vm15, %v8442_v62, %v8441_v36  ;;  %vm1369_vm5 = vcmask 515072   ;;  %8443 = vst [vmem:[#allocation72_spill] sm:$0xff] %v6026_v49  ;;  %v6031_v31 = vsel %vm596_vm4, %v1178_v43, %v1054_v54  ;;  %v8445_v23 = vld [vmem:[#allocation140_spill] sm:$0xff]  ;;  %v8447_v8 = vld [vmem:[#allocation171_spill] sm:$0xff]  ;;  %v6039_v40 = vpop.permute.xlu1 %2250  ;;  %2006 = vrot.lane.b32.xlu1 %v4862_v50, %s8230_s14  ;;  %s6123_s20 = sadd.s32 %s3513_s9, %s3512_s28  ;;  %s3468_s9 = sshll.u32 %s309_s12, 2 }
 0x35f   : > { %vm8446_vm3 = vcmask 678912   ;;  %v8448_v20 = vld [vmem:[#allocation168_spill] sm:$0xff]  ;;  %vm8449_vm9 = vcmask 498688   ;;  %vm7949_vm7 = vcmask 343040   ;;  %8450 = vst [vmem:[#allocation79_spill] sm:$0xff] %v6039_v40  ;;  %v1190_v49 = vsel %vm596_vm4, %v1181_v51, %v1055_v41  ;;  %v8458_v51 = vld [vmem:[#allocation129_spill] sm:$0xff]  ;;  %s302_s29 = scalar_lea.vmem %s7589_s4, %s6123_s20 }
 0x360   : > { %v1264_v14 = vsel %vm8446_vm3, %v8445_v23, %v8444_v48  ;;  %v1397_v42 = vsel %vm8449_vm9, %v8448_v20, %v8447_v8  ;;  %v6046_v54 = vsel %vm7923_vm15, %v8451_v32, %v8442_v62  ;;  %v8452_v43 = vld [vmem:[#allocation144_spill] sm:$0xff]  ;;  %vm8456_vm3 = vcmask 490496   ;;  %v8459_v62 = vld [vmem:[#allocation126_spill] sm:$0xff]  ;;  %2004 = vrot.lane.b32.xlu0 %v4896_v47, %s8230_s14  ;;  %s3465_s8 = sshll.u32 %s6123_s20, 1 }
 0x361   : > { %v1300_v37 = vsel %vm7938_vm13, %v8453_v15, %v8452_v43  ;;  %v1408_v0 = vsel %vm8456_vm3, %v8455_v35, %v8454_v7  ;;  %vm8457_vm9 = vcmask 1042432   ;;  %vm8460_vm15 = vcmask 703488   ;;  %v6084_v63 = vpop.permute.xlu0 %2248  ;;  %v8487_v47 = vld [vmem:[#allocation148_spill] sm:$0xff]  ;;  %s6153_s7 = scalar_lea.vmem %s7588_s3, %s3465_s8  ;;  %s6177_s8 = scalar_lea.vmem %s7590_s5, %s3468_s9 }
 0x362   : > { %v6060_v41 = vsel %vm8457_vm9, %v1190_v49, %v1066_v9  ;;  %v6065_v40 = vsel %vm8460_vm15, %v8459_v62, %v8458_v51  ;;  %v1385_v52 = vsel %vm1383_vm0, %v8462_v22, %v8461_v60  ;;  %vm8465_vm3 = vcmask 482304   ;;  %v8466_v49 = vld [vmem:[#allocation169_spill] sm:$0xff]  ;;  %8470 = vst [vmem:[#allocation76_spill] sm:$0xff] %v6084_v63  ;;  %2002 = vrot.lane.b32.xlu1 %v8379_v16, %s8230_s14  ;;  %v8492_v16 = vld [vmem:[#allocation152_spill] sm:$0xff] }
 0x363   : > { %v1419_v38 = vsel %vm8465_vm3, %v8464_v25, %v8463_v6  ;;  %v1470_v9 = vsel %vm596_vm4, %v5876_v53, %v1264_v14  ;;  %vm8467_vm15 = vcmask 498688   ;;  %v1523_v39 = vsel %vm7950_vm2, %v1385_v52, %v1397_v42  ;;  %v6095_v42 = vpop.permute.xlu1 %2017  ;;  %v8476_v63 = vld [vmem:[#allocation165_spill] sm:$0xff] }
 0x364   : > { %v1396_v27 = vsel %vm8467_vm15, %v8466_v49, %v8448_v20  ;;  %v1431_v29 = vsel %vm7943_vm8, %v8469_v24, %v8468_v5  ;;  %v1478_v50 = vsel %vm8457_vm9, %v1470_v9, %v1300_v37  ;;  %vm8472_vm3 = vcmask 490496   ;;  %v8473_v20 = vld [vmem:[#allocation189_spill] sm:$0xff]  ;;  %8475 = vst [vmem:[#allocation78_spill] sm:$0xff] %v6095_v42  ;;  %v8477_v37 = vld [vmem:[#allocation178_spill] sm:$0xff]  ;;  %2008 = vrot.lane.b32.xlu0 %v4853_v46, %s8230_s14 }
 0x365   : > { %v1407_v53 = vsel %vm8472_vm3, %v8471_v10, %v8455_v35  ;;  %v1532_v14 = vsel %vm596_vm4, %v1523_v39, %v1408_v0  ;;  %v1443_v52 = vsel %vm7949_vm7, %v8474_v11, %v8473_v20  ;;  %vm1086_vm15 = vcmask 572416   ;;  %v8480_v39 = vld [vmem:[#allocation194_spill] sm:$0xff]  ;;  %v6133_v1 = vpop.permute.xlu0 %2015 }
 0x366   : > { %v1384_v57 = vsel %vm1383_vm0, %v8476_v63, %v8462_v22  ;;  %vm8478_vm9 = vcmask 482304   ;;  %vm8479_vm3 = vcmask 1042432   ;;  %v8481_v0 = vld [vmem:[#allocation190_spill] sm:$0xff]  ;;  %vm8482_vm13 = vcmask 334848   ;;  %8491 = vst [vmem:[#allocation82_spill] sm:$0xff] %v6133_v1  ;;  %v8499_v1 = vld [vmem:[#allocation157_spill] sm:$0xff] }
 0x367   : > { %v1418_v9 = vsel %vm8478_vm9, %v8477_v37, %v8464_v25  ;;  %v1540_v35 = vsel %vm8479_vm3, %v1532_v14, %v1419_v38  ;;  %v1454_v45 = vsel %vm8482_vm13, %v8481_v0, %v8480_v39  ;;  %v1520_v42 = vsel %vm7950_vm2, %v1384_v57, %v1396_v27  ;;  %v8484_v25 = vld [vmem:[#allocation198_spill] sm:$0xff]  ;;  %v8488_v14 = vld [vmem:[#allocation149_spill] sm:$0xff]  ;;  %v6147_v59 = vpop.permute.xlu1 %2026 }
 0x368   : > { %v1430_v22 = vsel %vm7943_vm8, %v8483_v61, %v8469_v24  ;;  %v1548_v12 = vsel %vm610_vm6, %v1540_v35, %v1431_v29  ;;  %vm8486_vm9 = vcmask 326656   ;;  %v1322_v27 = vsel %vm1321_vm14, %v8488_v14, %v8487_v47  ;;  %v8489_v24 = vld [vmem:[#allocation187_spill] sm:$0xff]  ;;  %8497 = vst [vmem:[#allocation85_spill] sm:$0xff] %v6147_v59  ;;  %v8502_v59 = vld [vmem:[#allocation160_spill] sm:$0xff] }
 0x369   : > { %v1465_v38 = vsel %vm8486_vm9, %v8485_v18, %v8484_v25  ;;  %v1530_v57 = vsel %vm596_vm4, %v1520_v42, %v1407_v53  ;;  %v1442_v29 = vsel %vm7949_vm7, %v8489_v24, %v8474_v11  ;;  %vm8490_vm13 = vcmask 1044480   ;;  %v8495_v42 = vld [vmem:[#allocation191_spill] sm:$0xff] }
 0x36a   : > { %v1556_v35 = vsel %vm8490_vm13, %v1548_v12, %v1443_v52  ;;  %vm1098_vm3 = vcmask 564224   ;;  %v1344_v56 = vsel %vm1343_vm1, %v8493_v13, %v8492_v16  ;;  %vm8494_vm9 = vcmask 1042432   ;;  %v8498_v52 = vld [vmem:[#allocation156_spill] sm:$0xff] }
 0x36b   : > { %v1538_v53 = vsel %vm8494_vm9, %v1530_v57, %v1418_v9  ;;  %vm8496_vm8 = vcmask 334848   ;;  %v1564_v12 = vsel %vm624_vm10, %v1556_v35, %v1454_v45  ;;  %vm7951_vm13 = vcmask 556032   ;;  %v8500_v57 = vld [vmem:[#allocation196_spill] sm:$0xff] }
 0x36c   : > { %v1453_v11 = vsel %vm8496_vm8, %v8495_v42, %v8481_v0  ;;  %v1357_v55 = vsel %vm1356_vm11, %v8499_v1, %v8498_v52  ;;  %v1546_v9 = vsel %vm610_vm6, %v1538_v53, %v1430_v22  ;;  %vm8501_vm8 = vcmask 326656  }
 0x36d   : > { %v1464_v0 = vsel %vm8501_vm8, %v8500_v57, %v8485_v18  ;;  %v1572_v45 = vsel %vm631_vm12, %v1564_v12, %v1465_v38  ;;  %v1486_v35 = vsel %vm610_vm6, %v1478_v50, %v1322_v27  ;;  %v1370_v28 = vsel %vm1369_vm5, %v8503_v26, %v8502_v59  ;;  %v8506_v38 = vld [vmem:[#allocation142_spill] sm:$0xff] }
 0x36e   : > { %v1517_v22 = vsel %vm7950_vm2, %v8476_v63, %v8466_v49  ;;  %vm8504_vm9 = vcmask 1044480   ;;  %2844 = vrot.lane.b32.xlu1 %v1572_v45, %s3734_s19  ;;  %v1468_v46 = vsel %vm596_vm4, %v5872_v19, %v8445_v23  ;;  %v6185_v63 = vpop.permute.xlu0 %2019  ;;  %vm8508_vm7 = vcmask 1042432   ;;  %v8510_v19 = vld [vmem:[#allocation147_spill] sm:$0xff] }
 0x36f   : > { %v1554_v53 = vsel %vm8504_vm9, %v1546_v9, %v1442_v29  ;;  %vm8505_vm8 = vmmov %vm8504_vm9  ;;  %v1528_v50 = vsel %vm596_vm4, %v1517_v22, %v8471_v10  ;;  %vm8507_vm9 = vcmask 678912   ;;  %v6194_v9 = vpop.permute.xlu1 %2030  ;;  %vm8511_vm2 = vcmask 670720   ;;  %v8517_v22 = vld [vmem:[#allocation155_spill] sm:$0xff] }
 0x370   : > { %v1494_v18 = vsel %vm8505_vm8, %v1486_v35, %v1344_v56  ;;  %v1562_v49 = vsel %vm624_vm10, %v1554_v53, %v1453_v11  ;;  %v1265_v27 = vsel %vm8507_vm9, %v8444_v48, %v8506_v38  ;;  %v1536_v29 = vsel %vm8508_vm7, %v1528_v50, %v8477_v37  ;;  %vm8509_vm8 = vmmov %vm8508_vm7  ;;  %v8512_v37 = vld [vmem:[#allocation133_spill] sm:$0xff]  ;;  %v8514_v35 = vld [vmem:[#allocation151_spill] sm:$0xff] }
 0x371   : > { %v1570_v12 = vsel %vm631_vm12, %v1562_v49, %v1464_v0  ;;  %v1502_v56 = vsel %vm624_vm10, %v1494_v18, %v1357_v55  ;;  %v1476_v10 = vsel %vm8509_vm8, %v1468_v46, %v8453_v15  ;;  %v1301_v23 = vsel %vm8511_vm2, %v8452_v43, %v8510_v19  ;;  %v8513_v0 = vld [vmem:[#allocation130_spill] sm:$0xff]  ;;  %vm8518_vm9 = vmmov %vm8509_vm8  ;;  %v8519_v18 = vld [vmem:[#allocation159_spill] sm:$0xff] }
 0x372   : > { %v1544_v11 = vsel %vm610_vm6, %v1536_v29, %v8483_v61  ;;  %2842 = vrot.lane.b32.xlu0 %v1570_v12, %s3734_s19  ;;  %v1510_v48 = vsel %vm631_vm12, %v1502_v56, %v1370_v28  ;;  %v1089_v45 = vsel %vm1086_vm15, %v8513_v0, %v8512_v37  ;;  %v1484_v55 = vsel %vm610_vm6, %v1476_v10, %v8488_v14  ;;  %v6226_v46 = vpop.permute.xlu0 %2028  ;;  %v8521_v49 = vld [vmem:[#allocation134_spill] sm:$0xff]  ;;  %v8522_v29 = vld [vmem:[#allocation163_spill] sm:$0xff]  ;;  %v8525_v10 = vld [vmem:[#allocation141_spill] sm:$0xff] }
 0x373   : > { %v1323_v15 = vsel %vm1321_vm14, %v8487_v47, %v8514_v35  ;;  %vm8515_vm2 = vcmask 1044480   ;;  %2834 = vrot.lane.b32.xlu1 %v1510_v48, %s3734_s19  ;;  %v1472_v61 = vsel %vm596_vm4, %v5888_v2, %v1265_v27  ;;  %v1345_v53 = vsel %vm1343_vm1, %v8492_v16, %v8517_v22  ;;  %v6236_v50 = vpop.permute.xlu1 %2281  ;;  %v8520_v16 = vld [vmem:[#allocation137_spill] sm:$0xff] }
 0x374   : > { %v1552_v43 = vsel %vm8515_vm2, %v1544_v11, %v8489_v24  ;;  %vm8516_vm7 = vmmov %vm8515_vm2  ;;  %v1480_v47 = vsel %vm8518_vm9, %v1472_v61, %v1301_v23  ;;  %v1358_v2 = vsel %vm1356_vm11, %v8498_v52, %v8519_v18  ;;  %v1371_v12 = vsel %vm1369_vm5, %v8502_v59, %v8522_v29  ;;  %v8523_v52 = vld [vmem:[#allocation127_spill] sm:$0xff]  ;;  %v8526_v23 = vld [vmem:[#allocation138_spill] sm:$0xff] }
 0x375   : > { %v1492_v28 = vsel %vm8516_vm7, %v1484_v55, %v8493_v13  ;;  %v1560_v14 = vsel %vm624_vm10, %v1552_v43, %v8495_v42  ;;  %v1101_v42 = vsel %vm1098_vm3, %v8521_v49, %v8520_v16  ;;  %v1488_v27 = vsel %vm610_vm6, %v1480_v47, %v1323_v15  ;;  %v8527_v59 = vld [vmem:[#allocation120_spill] sm:$0xff]  ;;  %v8529_v55 = vld [vmem:[#allocation131_spill] sm:$0xff]  ;;  %vm8530_vm9 = vmmov %vm8515_vm2 }
 0x376   : > { %v1500_v24 = vsel %vm624_vm10, %v1492_v28, %v8499_v1  ;;  %v1568_v13 = vsel %vm631_vm12, %v1560_v14, %v8500_v57  ;;  %vm8524_vm8 = vcmask 703488   ;;  %v1206_v56 = vsel %vm610_vm6, %v6060_v41, %v6065_v40  ;;  %v6266_v43 = vpop.permute.xlu0 %2279  ;;  %v8532_v61 = vld [vmem:[#allocation135_spill] sm:$0xff] }
 0x377   : > { %2840 = vrot.lane.b32.xlu0 %v1568_v13, %s3734_s19  ;;  %v1508_v1 = vsel %vm631_vm12, %v1500_v24, %v8503_v26  ;;  %v1076_v57 = vsel %vm8524_vm8, %v8523_v52, %v8459_v62  ;;  %v1112_v11 = vsel %vm7951_vm13, %v8526_v23, %v8525_v10  ;;  %v1496_v48 = vsel %vm8515_vm2, %v1488_v27, %v1345_v53  ;;  %v6276_v53 = vpop.permute.xlu1 %2285  ;;  %v8535_v24 = vld [vmem:[#allocation139_spill] sm:$0xff] }
 0x378   : > { %2832 = vrot.lane.b32.xlu1 %v1508_v1, %s3734_s19  ;;  %vm8528_vm7 = vcmask 711680   ;;  %v1088_v62 = vsel %vm1086_vm15, %v8529_v55, %v8513_v0  ;;  %v1214_v15 = vsel %vm8530_vm9, %v1206_v56, %v1089_v45  ;;  %v1504_v40 = vsel %vm624_vm10, %v1496_v48, %v1358_v2  ;;  %v8533_v45 = vld [vmem:[#allocation124_spill] sm:$0xff] }
 0x379   : > { %v1064_v26 = vsel %vm8528_vm7, %v8527_v59, %v8451_v32  ;;  %vm8531_vm8 = vcmask 1042432   ;;  %v1100_v28 = vsel %vm1098_vm3, %v8532_v61, %v8521_v49  ;;  %v1512_v32 = vsel %vm631_vm12, %v1504_v40, %v1371_v12  ;;  %v8536_v49 = vld [vmem:[#allocation128_spill] sm:$0xff]  ;;  %vm8537_vm7 = vmmov %vm8530_vm9  ;;  %v8547_v40 = vld [vmem:[#allocation174_spill] sm:$0xff] }
 0x37a   : > { %v1196_v41 = vsel %vm8531_vm8, %v6031_v31, %v6046_v54  ;;  %v1222_v0 = vsel %vm624_vm10, %v1214_v15, %v1101_v42  ;;  %vm8534_vm2 = vcmask 703488   ;;  %v1111_v31 = vsel %vm7951_vm13, %v8535_v24, %v8526_v23  ;;  %vm8538_vm9 = vmmov %vm8531_vm8  ;;  %v8541_v48 = vld [vmem:[#allocation136_spill] sm:$0xff] }
 0x37b   : > { %v1075_v14 = vsel %vm8534_vm2, %v8533_v45, %v8523_v52  ;;  %v1204_v47 = vsel %vm610_vm6, %v1196_v41, %v1076_v57  ;;  %2836 = vrot.lane.b32.xlu0 %v1512_v32, %s3734_s19  ;;  %v1230_v54 = vsel %vm631_vm12, %v1222_v0, %v1112_v11  ;;  %v1186_v2 = vsel %vm596_vm4, %v6004_v21, %v6021_v4  ;;  %v8539_v52 = vld [vmem:[#allocation132_spill] sm:$0xff]  ;;  %v6305_v4 = vpop.permute.xlu0 %2283  ;;  %v6312_v23 = vpop.permute.xlu1 %2024 }
 0x37c   : > { %v1192_v13 = vsel %vm596_vm4, %v6016_v30, %v8439_v33  ;;  %v1087_v42 = vsel %vm1086_vm15, %v8536_v49, %v8529_v55  ;;  %v1212_v27 = vsel %vm8537_vm7, %v1204_v47, %v1088_v62  ;;  %2808 = vrot.lane.b32.xlu1 %v1230_v54, %s8230_s14  ;;  %v1194_v12 = vsel %vm8538_vm9, %v1186_v2, %v1064_v26  ;;  %vm8540_vm15 = vmmov %vm8537_vm7  ;;  %v8542_v26 = vld [vmem:[#allocation146_spill] sm:$0xff]  ;;  %v8554_v45 = vld [vmem:[#allocation184_spill] sm:$0xff] }
 0x37d   : > { %v1200_v1 = vsel %vm8531_vm8, %v1192_v13, %v8441_v36  ;;  %v1099_v21 = vsel %vm1098_vm3, %v8539_v52, %v8532_v61  ;;  %v1220_v33 = vsel %vm624_vm10, %v1212_v27, %v1100_v28  ;;  %v1202_v30 = vsel %vm610_vm6, %v1194_v12, %v1075_v14  ;;  %v8544_v62 = vld [vmem:[#allocation170_spill] sm:$0xff]  ;;  %v8550_v28 = vld [vmem:[#allocation179_spill] sm:$0xff]  ;;  %v8562_v27 = vld [vmem:[#allocation192_spill] sm:$0xff] }
 0x37e   : > { %v1208_v57 = vsel %vm610_vm6, %v1200_v1, %v8458_v51  ;;  %v1228_v56 = vsel %vm631_vm12, %v1220_v33, %v1111_v31  ;;  %v1170_v36 = vsel %vm631_vm12, %v5971_v58, %v5976_v17  ;;  %v1210_v11 = vsel %vm8540_vm15, %v1202_v30, %v1087_v42  ;;  %v8546_v58 = vld [vmem:[#allocation150_spill] sm:$0xff]  ;;  %v8557_v31 = vld [vmem:[#allocation188_spill] sm:$0xff]  ;;  %v8564_v12 = vld [vmem:[#allocation197_spill] sm:$0xff] }
 0x37f   : > { %v1110_v59 = vsel %vm7951_vm13, %v8541_v48, %v8535_v24  ;;  %vm8543_vm3 = vcmask 670720   ;;  %vm8545_vm2 = vcmask 498688   ;;  %2806 = vrot.lane.b32.xlu0 %v1228_v56, %s8230_s14  ;;  %v1216_v15 = vsel %vm8537_vm7, %v1208_v57, %v8512_v37  ;;  %v8549_v61 = vld [vmem:[#allocation166_spill] sm:$0xff]  ;;  %v6350_v32 = vpop.permute.xlu0 %2013  ;;  %v6358_v14 = vpop.permute.xlu1 %2039  ;;  %v8567_v52 = vld [vmem:[#allocation261_spill] sm:$0xff]  ;;  %v8575_v48 = vld [vmem:[#allocation268_spill] sm:$0xff] }
 0x380   : > { %v1302_v55 = vsel %vm8543_vm3, %v8510_v19, %v8542_v26  ;;  %v1398_v51 = vsel %vm8545_vm2, %v8447_v8, %v8544_v62  ;;  %v1324_v17 = vsel %vm1321_vm14, %v8514_v35, %v8546_v58  ;;  %vm8548_vm9 = vcmask 490496   ;;  %2798 = vrot.lane.b32.xlu1 %v5984_v34, %s8230_s14  ;;  %v8556_v47 = vld [vmem:[#allocation154_spill] sm:$0xff]  ;;  %v8580_v58 = vld [vmem:[#allocation177_spill] sm:$0xff] }
 0x381   : > { %v1409_v41 = vsel %vm8548_vm9, %v8454_v7, %v8547_v40  ;;  %v1218_v19 = vsel %vm624_vm10, %v1210_v11, %v1099_v21  ;;  %v1224_v8 = vsel %vm624_vm10, %v1216_v15, %v8520_v16  ;;  %v1474_v37 = vsel %vm596_vm4, %v5893_v3, %v8506_v38  ;;  %v8559_v2 = vld [vmem:[#allocation158_spill] sm:$0xff] }
 0x382   : > { %v1386_v35 = vsel %vm1383_vm0, %v8461_v60, %v8549_v61  ;;  %vm8551_vm8 = vcmask 482304   ;;  %vm8552_vm15 = vcmask 1042432   ;;  %vm8553_vm3 = vcmask 1040384   ;;  %v8560_v13 = vld [vmem:[#allocation162_spill] sm:$0xff]  ;;  %v8587_v61 = vld [vmem:[#allocation303_spill] sm:$0xff] }
 0x383   : > { %v1420_v7 = vsel %vm8551_vm8, %v8463_v6, %v8550_v28  ;;  %v1482_v34 = vsel %vm8552_vm15, %v1474_v37, %v1302_v55  ;;  %v1526_v0 = vsel %vm8553_vm3, %v1386_v35, %v1398_v51  ;;  %vm8555_vm2 = vcmask 351232   ;;  %vm8561_vm7 = vmmov %vm8552_vm15  ;;  %v6391_v30 = vpop.permute.xlu0 %2037  ;;  %v8573_v57 = vld [vmem:[#allocation266_spill] sm:$0xff]  ;;  %v6398_v11 = vpop.permute.xlu1 %2299  ;;  %v8578_v55 = vld [vmem:[#allocation267_spill] sm:$0xff] }
 0x384   : > { %v1432_v16 = vsel %vm8555_vm2, %v8468_v5, %v8554_v45  ;;  %v1226_v38 = vsel %vm631_vm12, %v1218_v19, %v1110_v59  ;;  %v1490_v60 = vsel %vm610_vm6, %v1482_v34, %v1324_v17  ;;  %v1346_v6 = vsel %vm1343_vm1, %v8517_v22, %v8556_v47  ;;  %2796 = vrot.lane.b32.xlu1 %v5987_v44, %s8230_s14  ;;  %v8576_v59 = vld [vmem:[#allocation265_spill] sm:$0xff]  ;;  %v8582_v40 = vld [vmem:[#allocation182_spill] sm:$0xff] }
 0x385   : > { %v1534_v24 = vsel %vm596_vm4, %v1526_v0, %v1409_v41  ;;  %vm8558_vm0 = vcmask 343040   ;;  %2804 = vrot.lane.b32.xlu0 %v1226_v38, %s8230_s14  ;;  %v1359_v5 = vsel %vm1356_vm11, %v8519_v18, %v8559_v2  ;;  %v1372_v49 = vsel %vm1369_vm5, %v8522_v29, %v8560_v13  ;;  %v8566_v18 = vld [vmem:[#allocation264_spill] sm:$0xff]  ;;  %v8569_v29 = vld [vmem:[#allocation263_spill] sm:$0xff]  ;;  %v8584_v41 = vld [vmem:[#allocation61_spill] sm:$0xff] }
 0x386   : > { %v1444_v54 = vsel %vm8558_vm0, %v8473_v20, %v8557_v31  ;;  %v1542_v42 = vsel %vm8561_vm7, %v1534_v24, %v1420_v7  ;;  %vm8563_vm9 = vcmask 334848   ;;  %vm8565_vm8 = vcmask 326656   ;;  %v8589_v28 = vld [vmem:[#allocation274_spill] sm:$0xff]  ;;  %v8590_v7 = vld [vmem:[#allocation271_spill] sm:$0xff]  ;;  %v8592_v0 = vld [vmem:[#allocation273_spill] sm:$0xff] }
 0x387   : > { %v1455_v22 = vsel %vm8563_vm9, %v8480_v39, %v8562_v27  ;;  %v1550_v20 = vsel %vm610_vm6, %v1542_v42, %v1432_v16  ;;  %v1466_v1 = vsel %vm8565_vm8, %v8484_v25, %v8564_v12  ;;  %vm8568_vm15 = vcmask 1039360   ;;  %v6440_v16 = vpop.permute.xlu0 %2041  ;;  %v8594_v47 = vld [vmem:[#allocation269_spill] sm:$0xff]  ;;  %v8597_v31 = vld [vmem:[#allocation276_spill] sm:$0xff]  ;;  %v6454_v2 = vpop.permute.xlu1 %2303  ;;  %v8603_v27 = vld [vmem:[#allocation278_spill] sm:$0xff] }
 0x388   : > { %v1943_v21 = vsel %vm8568_vm15, %v8567_v52, %v8566_v18  ;;  %vm8570_vm5 = vmmov %vm8568_vm15  ;;  %vm8571_vm3 = vcmask 1044480   ;;  %v6402_v25 = vsel %vm631_vm12, %v1224_v8, %v8525_v10  ;;  %vm8577_vm7 = vcmask 1031168   ;;  %2771 = vrot.lane.b32.xlu1 %v8584_v41, %s3735_s10  ;;  %v8602_v42 = vld [vmem:[#allocation277_spill] sm:$0xff] }
 0x389   : > { %v1944_v33 = vsel %vm8570_vm5, %v8566_v18, %v8569_v29  ;;  %v1498_v39 = vsel %vm8571_vm3, %v1490_v60, %v1346_v6  ;;  %vm8572_vm2 = vmmov %vm8571_vm3  ;;  %v1955_v26 = vsel %vm8577_vm7, %v8576_v59, %v8575_v48  ;;  %2800 = vrot.lane.b32.xlu0 %v1170_v36, %s8230_s14  ;;  %vm8581_vm8 = vcmask 1040384   ;;  %v8585_v36 = vld [vmem:[#allocation284_spill] sm:$0xff]  ;;  %v8595_v6 = vld [vmem:[#allocation270_spill] sm:$0xff] }
 0x38a   : > { %v1558_v44 = vsel %vm8572_vm2, %v1550_v20, %v1444_v54  ;;  %vm8574_vm0 = vmmov %vm8570_vm5  ;;  %v1506_v15 = vsel %vm624_vm10, %v1498_v39, %v1359_v5  ;;  %v2103_v17 = vsel %vm8581_vm8, %v8580_v58, %v1943_v21  ;;  %vm8591_vm2 = vcmask 728064   ;;  %v8599_v5 = vld [vmem:[#allocation272_spill] sm:$0xff]  ;;  %v8610_v21 = vld [vmem:[#allocation275_spill] sm:$0xff] }
 0x38b   : > { %v1945_v56 = vsel %vm8574_vm0, %v8569_v29, %v8573_v57  ;;  %vm8579_vm9 = vmmov %vm8577_vm7  ;;  %v1566_v51 = vsel %vm624_vm10, %v1558_v44, %v1455_v22  ;;  %v6423_v8 = vsel %vm631_vm12, %v1506_v15, %v1372_v49  ;;  %v2615_v34 = vsel %vm8591_vm2, %v8590_v7, %v8589_v28  ;;  %v8605_v20 = vld [vmem:[#allocation280_spill] sm:$0xff]  ;;  %v8613_v39 = vld [vmem:[#allocation287_spill] sm:$0xff] }
 0x38c   : > { %v1956_v62 = vsel %vm8579_vm9, %v8575_v48, %v8578_v55  ;;  %vm8583_vm15 = vmmov %vm8581_vm8  ;;  %v6420_v19 = vsel %vm631_vm12, %v1566_v51, %v1466_v1  ;;  %v6443_v38 = vsel %vm596_vm4, %v2103_v17, %v1955_v26  ;;  %vm8596_vm7 = vcmask 736256   ;;  %v8607_v1 = vld [vmem:[#allocation62_spill] sm:$0xff]  ;;  %v8618_v59 = vld [vmem:[#allocation279_spill] sm:$0xff] }
 0x38d   : > { %v2106_v10 = vsel %vm8583_vm15, %v8582_v40, %v1944_v33  ;;  %vm8586_vm5 = vmmov %vm8581_vm8  ;;  %v2604_v24 = vsel %vm8596_vm7, %v8595_v6, %v8594_v47  ;;  %2769 = vrot.lane.b32.xlu0 %v8607_v1, %s3735_s10  ;;  %v8612_v33 = vld [vmem:[#allocation286_spill] sm:$0xff]  ;;  %v8623_v58 = vld [vmem:[#allocation295_spill] sm:$0xff]  ;;  %v6490_v40 = vpop.permute.xlu0 %2301 }
 0x38e   : > { %v6427_v37 = vsel %vm8586_vm5, %v8585_v36, %v1945_v56  ;;  %vm8588_vm3 = vmmov %vm8586_vm5  ;;  %v6446_v60 = vsel %vm596_vm4, %v2106_v10, %v1956_v62  ;;  %vm8604_vm5 = vcmask 719872   ;;  %v8617_v48 = vld [vmem:[#allocation282_spill] sm:$0xff]  ;;  %v8620_v62 = vld [vmem:[#allocation281_spill] sm:$0xff] }
 0x38f   : > { %v6432_v35 = vsel %vm8588_vm3, %v8587_v61, %v8573_v57  ;;  %vm8593_vm0 = vmmov %vm8591_vm2  ;;  %v2626_v22 = vsel %vm8604_vm5, %v8603_v27, %v8602_v42  ;;  %v8615_v57 = vld [vmem:[#allocation55_spill] sm:$0xff]  ;;  %v8622_v15 = vld [vmem:[#allocation294_spill] sm:$0xff] }
 0x390   : > { %v2616_v45 = vsel %vm8593_vm0, %v8589_v28, %v8592_v0  ;;  %vm8598_vm9 = vmmov %vm8596_vm7  ;;  %2761 = vrot.lane.b32.xlu1 %v8615_v57, %s3735_s10  ;;  %v8625_v61 = vld [vmem:[#allocation285_spill] sm:$0xff] }
 0x391   : > { %v2603_v54 = vsel %vm8598_vm9, %v8597_v31, %v8595_v6  ;;  %vm8600_vm8 = vmmov %vm8596_vm7  ;;  %vm8611_vm7 = vcmask 728064   ;;  %vm8614_vm9 = vcmask 711680   ;;  %v6532_v57 = vpop.permute.xlu0 %2305 }
 0x392   : > { %v2605_v13 = vsel %vm8600_vm8, %v8594_v47, %v8599_v5  ;;  %vm8601_vm15 = vmmov %vm8588_vm3  ;;  %v2614_v29 = vsel %vm8611_vm7, %v8610_v21, %v8590_v7  ;;  %v2638_v44 = vsel %vm8614_vm9, %v8613_v39, %v8612_v33  ;;  %v6499_v7 = vpop.permute.xlu1 %2035  ;;  %v8642_v21 = vld [vmem:[#allocation288_spill] sm:$0xff] }
 0x393   : > { %v2721_v49 = vsel %vm8601_vm15, %v8599_v5, %v8592_v0  ;;  %vm8606_vm3 = vmmov %vm8604_vm5  ;;  %v8634_v5 = vld [vmem:[#allocation210_spill] sm:$0xff] }
 0x394   : > { %v2627_v12 = vsel %vm8606_vm3, %v8602_v42, %v8605_v20  ;;  %vm8608_vm2 = vmmov %vm8601_vm15  ;;  %vm8619_vm15 = vcmask 1039360   ;;  %vm8624_vm3 = vcmask 703488   ;;  %v2729_v36 = vsel %vm596_vm4, %v2721_v49, %v8605_v20  ;;  %v8636_v49 = vld [vmem:[#allocation207_spill] sm:$0xff]  ;;  %v8639_v20 = vld [vmem:[#allocation57_spill] sm:$0xff] }
 0x395   : > { %v2715_v18 = vsel %vm8608_vm2, %v2604_v24, %v2615_v34  ;;  %vm8609_vm0 = vmmov %vm8608_vm2  ;;  %v2527_v26 = vsel %vm8619_vm15, %v8618_v59, %v8617_v48  ;;  %v2649_v17 = vsel %vm8624_vm3, %v8623_v58, %v8622_v15  ;;  %vm8626_vm2 = vcmask 719872   ;;  %v8627_v34 = vld [vmem:[#allocation213_spill] sm:$0xff]  ;;  %2759 = vrot.lane.b32.xlu1 %v8639_v20, %s3735_s10 }
 0x396   : > { %v2718_v52 = vsel %vm8609_vm0, %v2605_v13, %v2616_v45  ;;  %vm8616_vm8 = vmmov %vm8609_vm0  ;;  %v2725_v10 = vsel %vm596_vm4, %v2715_v18, %v2626_v22  ;;  %v2625_v28 = vsel %vm8626_vm2, %v8625_v61, %v8603_v27  ;;  %v2661_v0 = vsel %vm8609_vm0, %v8627_v34, %v8620_v62  ;;  %v8628_v45 = vld [vmem:[#allocation283_spill] sm:$0xff]  ;;  %v8631_v24 = vld [vmem:[#allocation289_spill] sm:$0xff] }
 0x397   : > { %v2712_v56 = vsel %vm8616_vm8, %v2603_v54, %v2614_v29  ;;  %vm8621_vm5 = vmmov %vm8619_vm15  ;;  %v2727_v41 = vsel %vm596_vm4, %v2718_v52, %v2627_v12  ;;  %v8633_v54 = vld [vmem:[#allocation63_spill] sm:$0xff]  ;;  %v8638_v27 = vld [vmem:[#allocation292_spill] sm:$0xff]  ;;  %vm2341_vm2 = vcmask 629760  }
 0x398   : > { %v2528_v51 = vsel %vm8621_vm5, %v8617_v48, %v8620_v62  ;;  %vm8629_vm7 = vmmov %vm8614_vm9  ;;  %vm8630_vm9 = vcmask 1042432   ;;  %2767 = vrot.lane.b32.xlu0 %v8633_v54, %s3735_s10  ;;  %v2648_v22 = vsel %vm8624_vm3, %v8638_v27, %v8623_v58  ;;  %v2723_v1 = vsel %vm596_vm4, %v2712_v56, %v2625_v28  ;;  %v8641_v52 = vld [vmem:[#allocation291_spill] sm:$0xff]  ;;  %v8649_v56 = vld [vmem:[#allocation293_spill] sm:$0xff] }
 0x399   : > { %v2637_v47 = vsel %vm8629_vm7, %v8628_v45, %v8613_v39  ;;  %v2735_v6 = vsel %vm8630_vm9, %v2727_v41, %v2638_v44  ;;  %vm8632_vm8 = vmmov %vm8621_vm5  ;;  %vm8643_vm7 = vcmask 1031168   ;;  %v8644_v39 = vld [vmem:[#allocation290_spill] sm:$0xff]  ;;  %v8654_v34 = vld [vmem:[#allocation297_spill] sm:$0xff] }
 0x39a   : > { %v2526_v31 = vsel %vm8632_vm8, %v8631_v24, %v8618_v59  ;;  %vm8635_vm15 = vmmov %vm8609_vm0  ;;  %v2743_v12 = vsel %vm610_vm6, %v2735_v6, %v2649_v17  ;;  %v2538_v29 = vsel %vm8643_vm7, %v8642_v21, %v8641_v52  ;;  %v8647_v59 = vld [vmem:[#allocation204_spill] sm:$0xff]  ;;  %v2669_v58 = vsel %vm596_vm4, %v2661_v0, %v8644_v39  ;;  %v8651_v17 = vld [vmem:[#allocation301_spill] sm:$0xff] }
 0x39b   : > { %v2655_v13 = vsel %vm8635_vm15, %v8634_v5, %v2527_v26  ;;  %vm8637_vm5 = vmmov %vm8609_vm0  ;;  %v2647_v41 = vsel %vm8624_vm3, %v8651_v17, %v8638_v27  ;;  %v8655_v0 = vld [vmem:[#allocation299_spill] sm:$0xff]  ;;  %v8660_v5 = vld [vmem:[#allocation302_spill] sm:$0xff] }
 0x39c   : > { %v2658_v42 = vsel %vm8637_vm5, %v8636_v49, %v2528_v51  ;;  %vm8640_vm0 = vmmov %vm8630_vm9  ;;  %v6542_v51 = vpop.permute.xlu1 %2050  ;;  %v2665_v28 = vsel %vm596_vm4, %v2655_v13, %v2538_v29  ;;  %v8661_v13 = vld [vmem:[#allocation304_spill] sm:$0xff] }
 0x39d   : > { %v2737_v18 = vsel %vm8640_vm0, %v2729_v36, %v8612_v33  ;;  %vm8645_vm9 = vmmov %vm8643_vm7 }
 0x39e   : > { %v2539_v44 = vsel %vm8645_vm9, %v8641_v52, %v8644_v39  ;;  %vm8646_vm8 = vmmov %vm8640_vm0  ;;  %v2745_v33 = vsel %vm610_vm6, %v2737_v18, %v8622_v15  ;;  %vm8653_vm0 = vcmask 1044480   ;;  %vm8657_vm9 = vcmask 900096   ;;  %v8666_v18 = vld [vmem:[#allocation315_spill] sm:$0xff] }
 0x39f   : > { %v2733_v48 = vsel %vm8646_vm8, %v2725_v10, %v2637_v47  ;;  %vm8648_vm15 = vmmov %vm8637_vm5  ;;  %vm8650_vm5 = vcmask 711680   ;;  %v8652_v10 = vld [vmem:[#allocation54_spill] sm:$0xff]  ;;  %v2749_v36 = vsel %vm8653_vm0, %v2743_v12, 0  ;;  %v2667_v15 = vsel %vm596_vm4, %v2658_v42, %v2539_v44  ;;  %v8656_v47 = vld [vmem:[#allocation296_spill] sm:$0xff]  ;;  %v6569_v42 = vpop.permute.xlu0 %2048 }
 0x3a0   : > { %v2652_v26 = vsel %vm8648_vm15, %v8647_v59, %v2526_v31  ;;  %v2636_v62 = vsel %vm8650_vm5, %v8649_v56, %v8628_v45  ;;  %2763 = vrot.lane.b32.xlu0 %v8652_v10, %s3735_s10  ;;  %v2741_v61 = vsel %vm610_vm6, %v2733_v48, %v2648_v22  ;;  %v2537_v45 = vsel %vm8643_vm7, %v8654_v34, %v8642_v21  ;;  %v8658_v31 = vld [vmem:[#allocation298_spill] sm:$0xff]  ;;  %vm8659_vm15 = vmmov %vm8657_vm9  ;;  %v8664_v22 = vld [vmem:[#allocation300_spill] sm:$0xff]  ;;  %v6580_v29 = vpop.permute.xlu1 %2319 }
 0x3a1   : > { %v2549_v6 = vsel %vm8657_vm9, %v8656_v47, %v8655_v0  ;;  %2990 = vrot.lane.b32.xlu1 %v2749_v36, %s8189_s16  ;;  %v2731_v24 = vsel %vm8646_vm8, %v2723_v1, %v2636_v62  ;;  %v2550_v54 = vsel %vm8659_vm15, %v8655_v0, %v8658_v31  ;;  %vm8662_vm5 = vcmask 891904   ;;  %vm8663_vm3 = vmmov %vm8653_vm0  ;;  %v8667_v1 = vld [vmem:[#allocation316_spill] sm:$0xff]  ;;  %v8671_v59 = vld [vmem:[#allocation323_spill] sm:$0xff] }
 0x3a2   : > { %v2560_v49 = vsel %vm8662_vm5, %v8661_v13, %v8660_v5  ;;  %v2750_v27 = vsel %vm8663_vm3, %v2745_v33, 0  ;;  %vm8665_vm0 = vmmov %vm8657_vm9  ;;  %v2739_v12 = vsel %vm610_vm6, %v2731_v24, %v2647_v41  ;;  %vm8668_vm7 = vcmask 883712   ;;  %v8672_v56 = vld [vmem:[#allocation324_spill] sm:$0xff]  ;;  %v8675_v41 = vld [vmem:[#allocation306_spill] sm:$0xff] }
 0x3a3   : > { %v2548_v20 = vsel %vm8665_vm0, %v8664_v22, %v8656_v47  ;;  %v2571_v52 = vsel %vm8668_vm7, %v8667_v1, %v8666_v18  ;;  %vm8669_vm9 = vmmov %vm8663_vm3  ;;  %v2663_v39 = vsel %vm596_vm4, %v2652_v26, %v2537_v45  ;;  %v2677_v44 = vsel %vm8646_vm8, %v2669_v58, %v8658_v31  ;;  %v8677_v26 = vld [vmem:[#allocation331_spill] sm:$0xff]  ;;  %v8678_v36 = vld [vmem:[#allocation332_spill] sm:$0xff]  ;;  %v6605_v0 = vpop.permute.xlu0 %2052 }
 0x3a4   : > { %v2748_v21 = vsel %vm8669_vm9, %v2741_v61, 0  ;;  %vm8670_vm15 = vmmov %vm8646_vm8  ;;  %vm8673_vm5 = vcmask 875520   ;;  %vm8676_vm0 = vcmask 891904   ;;  %vm8679_vm7 = vcmask 867328   ;;  %v8682_v34 = vld [vmem:[#allocation309_spill] sm:$0xff]  ;;  %v8686_v24 = vld [vmem:[#allocation311_spill] sm:$0xff] }
 0x3a5   : > { %v2673_v48 = vsel %vm8670_vm15, %v2665_v28, %v2549_v6  ;;  %v2582_v62 = vsel %vm8673_vm5, %v8672_v56, %v8671_v59  ;;  %2988 = vrot.lane.b32.xlu0 %v2748_v21, %s8189_s16  ;;  %vm8674_vm3 = vmmov %vm8646_vm8  ;;  %v2561_v10 = vsel %vm8676_vm0, %v8660_v5, %v8675_v41  ;;  %v2593_v58 = vsel %vm8679_vm7, %v8678_v36, %v8677_v26  ;;  %v8681_v28 = vld [vmem:[#allocation312_spill] sm:$0xff]  ;;  %v6616_v5 = vpop.permute.xlu1 %2323  ;;  %v8691_v21 = vld [vmem:[#allocation314_spill] sm:$0xff] }
 0x3a6   : > { %v2675_v33 = vsel %vm8674_vm3, %v2667_v15, %v2550_v54  ;;  %v2681_v17 = vsel %vm610_vm6, %v2673_v48, %v2560_v49  ;;  %2846 = vrot.lane.b32.xlu1 %v6420_v19, %s3734_s19  ;;  %vm8680_vm9 = vmmov %vm8674_vm3  ;;  %vm8683_vm8 = vcmask 498688   ;;  %vm8684_vm15 = vcmask 1044480   ;;  %v8688_v19 = vld [vmem:[#allocation313_spill] sm:$0xff]  ;;  %v8693_v48 = vld [vmem:[#allocation307_spill] sm:$0xff] }
 0x3a7   : > { %v2671_v61 = vsel %vm8680_vm9, %v2663_v39, %v2548_v20  ;;  %v2355_v45 = vsel %vm8683_vm8, %v8682_v34, %v8681_v28  ;;  %v2689_v15 = vsel %vm8684_vm15, %v2681_v17, %v2571_v52  ;;  %vm8685_vm5 = vmmov %vm8684_vm15  ;;  %v2685_v6 = vsel %vm610_vm6, %v2677_v44, %v8675_v41  ;;  %v8689_v20 = vld [vmem:[#allocation308_spill] sm:$0xff]  ;;  %v8690_v52 = vld [vmem:[#allocation305_spill] sm:$0xff] }
 0x3a8   : > { %v2747_v47 = vsel %vm8685_vm5, %v2739_v12, 0  ;;  %vm8687_vm3 = vmmov %vm8683_vm8  ;;  %v2559_v54 = vsel %vm8676_vm0, %v8688_v19, %v8661_v13  ;;  %v2697_v49 = vsel %vm624_vm10, %v2689_v15, %v2582_v62  ;;  %v2683_v22 = vsel %vm610_vm6, %v2675_v33, %v2561_v10  ;;  %v8695_v33 = vld [vmem:[#allocation310_spill] sm:$0xff]  ;;  %v8702_v19 = vld [vmem:[#allocation321_spill] sm:$0xff] }
 0x3a9   : > { %v2356_v31 = vsel %vm8687_vm3, %v8681_v28, %v8686_v24  ;;  %v2342_v12 = vsel %vm2341_vm2, %v8690_v52, %v8689_v20  ;;  %vm8692_vm7 = vmmov %vm8687_vm3  ;;  %2992 = vrot.lane.b32.xlu0 %v2750_v27, %s8189_s16  ;;  %v2705_v44 = vsel %vm631_vm12, %v2697_v49, %v2593_v58  ;;  %v2343_v13 = vsel %vm2341_vm2, %v8689_v20, %v8693_v48  ;;  %v8698_v58 = vld [vmem:[#allocation318_spill] sm:$0xff]  ;;  %v8708_v20 = vld [vmem:[#allocation320_spill] sm:$0xff] }
 0x3aa   : > { %v2357_v39 = vsel %vm8692_vm7, %v8686_v24, %v8691_v21  ;;  %vm8694_vm9 = vcmask 1040384   ;;  %v2344_v17 = vsel %vm2341_vm2, %v8693_v48, %v8695_v33  ;;  %2980 = vrot.lane.b32.xlu1 %v2705_v44, %s8189_s16  ;;  %v2679_v10 = vsel %vm610_vm6, %v2671_v61, %v2559_v54  ;;  %v8704_v49 = vld [vmem:[#allocation326_spill] sm:$0xff]  ;;  %v6657_v54 = vpop.permute.xlu1 %2046  ;;  %v8717_v33 = vld [vmem:[#allocation328_spill] sm:$0xff] }
 0x3ab   : > { %v2460_v62 = vsel %vm8694_vm9, %v8690_v52, %v8682_v34  ;;  %vm8696_vm8 = vmmov %vm8694_vm9  ;;  %vm8699_vm5 = vcmask 883712   ;;  %vm8700_vm3 = vcmask 1044480   ;;  %v6646_v34 = vpop.permute.xlu0 %2321  ;;  %vm8705_vm7 = vcmask 875520   ;;  %8706 = vst [vmem:[#allocation80_spill] sm:$0xff] %v6657_v54  ;;  %v8710_v52 = vld [vmem:[#allocation329_spill] sm:$0xff]  ;;  %v8712_v21 = vld [vmem:[#allocation334_spill] sm:$0xff] }
 0x3ac   : > { %v2463_v41 = vsel %vm8696_vm8, %v2342_v12, %v2355_v45  ;;  %vm8697_vm15 = vmmov %vm8696_vm8  ;;  %v2572_v28 = vsel %vm8699_vm5, %v8666_v18, %v8698_v58  ;;  %v2693_v15 = vsel %vm8700_vm3, %v2685_v6, %v8698_v58  ;;  %v8707_v18 = vld [vmem:[#allocation319_spill] sm:$0xff]  ;;  %vm8709_vm9 = vcmask 490496  }
 0x3ad   : > { %v2466_v27 = vsel %vm8697_vm15, %v2343_v13, %v2356_v31  ;;  %vm8701_vm0 = vmmov %vm8696_vm8  ;;  %v2583_v31 = vsel %vm8705_vm7, %v8671_v59, %v8704_v49  ;;  %v2701_v61 = vsel %vm624_vm10, %v2693_v15, %v8704_v49  ;;  %v2368_v6 = vsel %vm8709_vm9, %v8708_v20, %v8707_v18  ;;  %2986 = vrot.lane.b32.xlu0 %v2747_v47, %s8189_s16  ;;  %v8716_v13 = vld [vmem:[#allocation327_spill] sm:$0xff] }
 0x3ae   : > { %v2469_v24 = vsel %vm8701_vm0, %v2344_v17, %v2357_v39  ;;  %vm8703_vm2 = vmmov %vm8699_vm5  ;;  %vm8713_vm15 = vcmask 867328   ;;  %v2709_v59 = vsel %vm631_vm12, %v2701_v61, %v8712_v21  ;;  %v8714_v39 = vld [vmem:[#allocation317_spill] sm:$0xff]  ;;  %v8723_v15 = vld [vmem:[#allocation335_spill] sm:$0xff]  ;;  %v2475_v49 = vsel %vm596_vm4, %v2466_v27, %v2368_v6 }
 0x3af   : > { %v2570_v45 = vsel %vm8703_vm2, %v8702_v19, %v8667_v1  ;;  %vm8711_vm8 = vmmov %vm8705_vm7  ;;  %v2594_v1 = vsel %vm8713_vm15, %v8677_v26, %v8712_v21  ;;  %v2471_v44 = vsel %vm596_vm4, %v2460_v62, %v8714_v39  ;;  %2984 = vrot.lane.b32.xlu1 %v2709_v59, %s8189_s16  ;;  %v8724_v62 = vld [vmem:[#allocation336_spill] sm:$0xff]  ;;  %v6697_v59 = vpop.permute.xlu1 %2061  ;;  %v8747_v54 = vld [vmem:[#allocation351_spill] sm:$0xff] }
 0x3b0   : > { %v2581_v12 = vsel %vm8711_vm8, %v8710_v52, %v8672_v56  ;;  %vm8715_vm5 = vmmov %vm8700_vm3  ;;  %vm8718_vm3 = vcmask 482304   ;;  %v8719_v56 = vld [vmem:[#allocation337_spill] sm:$0xff]  ;;  %v8726_v61 = vld [vmem:[#allocation348_spill] sm:$0xff]  ;;  %vm8728_vm8 = vcmask 465920  }
 0x3b1   : > { %v2691_v48 = vsel %vm8715_vm5, %v2683_v22, %v2572_v28  ;;  %v2380_v17 = vsel %vm8718_vm3, %v8717_v33, %v8716_v13  ;;  %vm8720_vm0 = vmmov %vm8713_vm15  ;;  %v6688_v28 = vpop.permute.xlu0 %2325  ;;  %v8727_v52 = vld [vmem:[#allocation339_spill] sm:$0xff] }
 0x3b2   : > { %v2592_v58 = vsel %vm8720_vm0, %v8719_v56, %v8678_v36  ;;  %vm8721_vm2 = vmmov %vm8709_vm9  ;;  %vm8725_vm9 = vcmask 474112   ;;  %v2699_v19 = vsel %vm624_vm10, %v2691_v48, %v2583_v31  ;;  %v2402_v21 = vsel %vm8728_vm8, %v8727_v52, %v8726_v61  ;;  %v8732_v56 = vld [vmem:[#allocation20_spill] sm:$0xff]  ;;  %v8737_v48 = vld [vmem:[#allocation333_spill] sm:$0xff] }
 0x3b3   : > { %v2367_v26 = vsel %vm8721_vm2, %v8714_v39, %v8708_v20  ;;  %vm8722_vm7 = vmmov %vm8715_vm5  ;;  %v2391_v22 = vsel %vm8725_vm9, %v8724_v62, %v8723_v15  ;;  %v2707_v20 = vsel %vm631_vm12, %v2699_v19, %v2594_v1  ;;  %vm8731_vm5 = vcmask 1042432   ;;  %v8733_v31 = vld [vmem:[#allocation56_spill] sm:$0xff]  ;;  %v8739_v19 = vld [vmem:[#allocation67_spill] sm:$0xff] }
 0x3b4   : > { %v2687_v47 = vsel %vm8722_vm7, %v2679_v10, %v2570_v45  ;;  %v8729_v10 = vld [vmem:[#allocation325_spill] sm:$0xff]  ;;  %vm8730_vm15 = vmmov %vm8718_vm3  ;;  %v2483_v39 = vsel %vm8731_vm5, %v2475_v49, %v2380_v17  ;;  %vm8734_vm3 = vcmask 334848   ;;  %2982 = vrot.lane.b32.xlu0 %v2707_v20, %s8189_s16  ;;  %v8740_v17 = vld [vmem:[#allocation64_spill] sm:$0xff]  ;;  %vm8741_vm7 = vcmask 326656  }
 0x3b5   : > { %v2695_v36 = vsel %vm624_vm10, %v2687_v47, %v2581_v12  ;;  %v2379_v45 = vsel %vm8730_vm15, %v8729_v10, %v8717_v33  ;;  %v2413_v27 = vsel %vm8734_vm3, %v8733_v31, %v8732_v56  ;;  %v8735_v12 = vld [vmem:[#allocation322_spill] sm:$0xff]  ;;  %vm8736_vm0 = vmmov %vm8721_vm2  ;;  %v2491_v33 = vsel %vm610_vm6, %v2483_v39, %v2391_v22 }
 0x3b6   : > { %v2703_v6 = vsel %vm631_vm12, %v2695_v36, %v2592_v58  ;;  %v2369_v1 = vsel %vm8736_vm0, %v8707_v18, %v8735_v12  ;;  %vm8738_vm2 = vmmov %vm8725_vm9  ;;  %v2424_v49 = vsel %vm8741_vm7, %v8740_v17, %v8739_v19  ;;  %v2473_v20 = vsel %vm596_vm4, %v2463_v41, %v2367_v26  ;;  %v8742_v58 = vld [vmem:[#allocation343_spill] sm:$0xff]  ;;  %v6724_v12 = vpop.permute.xlu0 %2059  ;;  %v8745_v22 = vld [vmem:[#allocation330_spill] sm:$0xff]  ;;  %v6733_v41 = vpop.permute.xlu1 %2057 }
 0x3b7   : > { %v2390_v47 = vsel %vm8738_vm2, %v8737_v48, %v8724_v62  ;;  %2978 = vrot.lane.b32.xlu1 %v2703_v6, %s8189_s16  ;;  %vm8743_vm9 = vmmov %vm8728_vm8  ;;  %vm8744_vm8 = vcmask 1044480   ;;  %vm2327_vm15 = vcmask 637952   ;;  %v2481_v62 = vsel %vm8731_vm5, %v2473_v20, %v2379_v45  ;;  %v8752_v20 = vld [vmem:[#allocation338_spill] sm:$0xff]  ;;  %s3736_s16 = smov 47  }
 0x3b8   : > { %v2401_v36 = vsel %vm8743_vm9, %v8742_v58, %v8727_v52  ;;  %v2499_v18 = vsel %vm8744_vm8, %v2491_v33, %v2402_v21  ;;  %vm8746_vm3 = vcmask 482304   ;;  %vm8748_vm0 = vcmask 334848   ;;  %v8749_v33 = vld [vmem:[#allocation65_spill] sm:$0xff]  ;;  %vm8750_vm2 = vmmov %vm8741_vm7  ;;  %2838 = vrot.lane.b32.xlu0 %v6423_v8, %s3734_s19 }
 0x3b9   : > { %v2381_v39 = vsel %vm8746_vm3, %v8716_v13, %v8745_v22  ;;  %v2412_v6 = vsel %vm8748_vm0, %v8747_v54, %v8733_v31  ;;  %v2507_v26 = vsel %vm624_vm10, %v2499_v18, %v2413_v27  ;;  %v2477_v52 = vsel %vm596_vm4, %v2469_v24, %v2369_v1  ;;  %vm8751_vm7 = vmmov %vm8731_vm5  ;;  %v8754_v1 = vld [vmem:[#allocation66_spill] sm:$0xff] }
 0x3ba   : > { %v2489_v21 = vsel %vm610_vm6, %v2481_v62, %v2390_v47  ;;  %v2423_v45 = vsel %vm8750_vm2, %v8749_v33, %v8740_v17  ;;  %v2515_v13 = vsel %vm631_vm12, %v2507_v26, %v2424_v49  ;;  %v2479_v31 = vsel %vm8751_vm7, %v2471_v44, %v8729_v10  ;;  %v8755_v47 = vld [vmem:[#allocation60_spill] sm:$0xff]  ;;  %vm8757_vm3 = vmmov %vm8751_vm7  ;;  %v8761_v10 = vld [vmem:[#allocation75_spill] sm:$0xff] }
 0x3bb   : > { %vm8753_vm9 = vcmask 474112   ;;  %v2497_v24 = vsel %vm8744_vm8, %v2489_v21, %v2401_v36  ;;  %vm8756_vm5 = vcmask 1022976   ;;  %2953 = vrot.lane.b32.xlu1 %v2515_v13, %s3736_s16  ;;  %v2485_v8 = vsel %vm8757_vm3, %v2477_v52, %v2381_v39  ;;  %v8758_v17 = vld [vmem:[#allocation344_spill] sm:$0xff]  ;;  %v8762_v26 = vld [vmem:[#allocation58_spill] sm:$0xff]  ;;  %v6773_v52 = vpop.permute.xlu1 %2072  ;;  %vm8764_vm7 = vmmov %vm8757_vm3 }
 0x3bc   : > { %v2392_v27 = vsel %vm8753_vm9, %v8723_v15, %v8752_v20  ;;  %v1967_v18 = vsel %vm8756_vm5, %v8755_v47, %v8754_v1  ;;  %vm8759_vm0 = vcmask 465920   ;;  %v8760_v44 = vld [vmem:[#allocation76_spill] sm:$0xff]  ;;  %v6761_v15 = vpop.permute.xlu0 %2063  ;;  %v2505_v36 = vsel %vm624_vm10, %v2497_v24, %v2412_v6  ;;  %v8765_v20 = vld [vmem:[#allocation70_spill] sm:$0xff]  ;;  %vm8767_vm5 = vmmov %vm8744_vm8 }
 0x3bd   : > { %v2403_v49 = vsel %vm8759_vm0, %v8726_v61, %v8758_v17  ;;  %v2252_v62 = vsel %vm1321_vm14, %v8761_v10, %v8760_v44  ;;  %v2487_v22 = vsel %vm610_vm6, %v2479_v31, %v8737_v48  ;;  %vm8763_vm2 = vcmask 334848   ;;  %vm8770_vm0 = vmmov %vm8767_vm5 }
 0x3be   : > { %v2414_v21 = vsel %vm8763_vm2, %v8732_v56, %v8762_v26  ;;  %v2287_v39 = vsel %vm1343_vm1, %v6266_v43, %v6236_v50  ;;  %v2513_v61 = vsel %vm631_vm12, %v2505_v36, %v2423_v45  ;;  %v2493_v13 = vsel %vm610_vm6, %v2485_v8, %v2392_v27 }
 0x3bf   : > { %v6778_v6 = vsel %vm8764_vm7, %v6446_v60, %v1967_v18  ;;  %vm8766_vm9 = vcmask 326656   ;;  %v2307_v56 = vsel %vm1356_vm11, %v6398_v11, %v6490_v40  ;;  %2951 = vrot.lane.b32.xlu0 %v2513_v61, %s3736_s16  ;;  %v2495_v45 = vsel %vm8744_vm8, %v2487_v22, %v8742_v58  ;;  %2810 = vrot.lane.b32.xlu1 %v6402_v25, %s8230_s14  ;;  %v6814_v36 = vpop.permute.xlu1 %2068  ;;  %v8773_v22 = vld [vmem:[#allocation59_spill] sm:$0xff]  ;;  %vm8776_vm8 = vmmov %vm8764_vm7 }
 0x3c0   : > { %v2425_v48 = vsel %vm8766_vm9, %v8739_v19, %v8765_v20  ;;  %v2501_v31 = vsel %vm8767_vm5, %v2493_v13, %v2403_v49  ;;  %v2429_v27 = vsel %vm610_vm6, %v6778_v6, %v2252_v62  ;;  %v2328_v60 = vsel %vm2327_vm15, %v6580_v29, %v6646_v34  ;;  %v8768_v19 = vld [vmem:[#allocation51_spill] sm:$0xff]  ;;  %v6805_v17 = vpop.permute.xlu0 %2070  ;;  %v8771_v49 = vld [vmem:[#allocation72_spill] sm:$0xff]  ;;  %vm8777_vm5 = vmmov %vm8770_vm0 }
 0x3c1   : > { %vm8769_vm3 = vcmask 1031168   ;;  %v2120_v58 = vsel %vm596_vm4, %v6432_v35, %v8768_v19  ;;  %v2509_v18 = vsel %vm624_vm10, %v2501_v31, %v2414_v21  ;;  %v2437_v8 = vsel %vm8770_vm0, %v2429_v27, %v2287_v39  ;;  %v8775_v61 = vld [vmem:[#allocation79_spill] sm:$0xff] }
 0x3c2   : > { %v1957_v24 = vsel %vm8769_vm3, %v8578_v55, %v8768_v19  ;;  %vm8772_vm2 = vcmask 1022976   ;;  %v2289_v25 = vsel %vm1343_vm1, %v6305_v4, %v6276_v53  ;;  %v2517_v55 = vsel %vm631_vm12, %v2509_v18, %v2425_v48  ;;  %vm8781_vm3 = vmmov %vm8770_vm0 }
 0x3c3   : > { %v1966_v62 = vsel %vm8772_vm2, %v8771_v49, %v8755_v47  ;;  %v2445_v35 = vsel %vm624_vm10, %v2437_v8, %v2307_v56  ;;  %v6819_v26 = vsel %vm8764_vm7, %v2120_v58, %v8773_v22  ;;  %vm8774_vm9 = vmmov %vm8772_vm2  ;;  %v2309_v47 = vsel %vm1356_vm11, %v6454_v2, %v6532_v57  ;;  %2955 = vrot.lane.b32.xlu0 %v2517_v55, %s3736_s16  ;;  %v2084_v31 = vpop.permute.xlu1 %2083 }
 0x3c4   : > { %v1968_v21 = vsel %vm8774_vm9, %v8754_v1, %v8773_v22  ;;  %v2453_v53 = vsel %vm631_vm12, %v2445_v35, %v2328_v60  ;;  %v2503_v39 = vsel %vm624_vm10, %v2495_v45, %v8747_v54  ;;  %v2433_v13 = vsel %vm610_vm6, %v6819_v26, %v8775_v61  ;;  %v8787_v35 = vld [vmem:[#allocation99_spill] sm:$0xff]  ;;  %v8789_v22 = vld [vmem:[#allocation78_spill] sm:$0xff] }
 0x3c5   : > { %v2253_v20 = vsel %vm1321_vm14, %v8760_v44, %v8775_v61  ;;  %v2330_v1 = vsel %vm2327_vm15, %v6616_v5, %v6688_v28  ;;  %2943 = vrot.lane.b32.xlu1 %v2453_v53, %s3736_s16  ;;  %v2118_v57 = vsel %vm596_vm4, %v6427_v37, %v1957_v24  ;;  %v6845_v54 = vsel %vm8776_vm8, %v6443_v38, %v1966_v62  ;;  %v6851_v44 = vpop.permute.xlu0 %2074  ;;  %vm8778_vm14 = vmmov %vm8764_vm7  ;;  %v8782_v24 = vld [vmem:[#allocation91_spill] sm:$0xff] }
 0x3c6   : > { %v2288_v48 = vsel %vm1343_vm1, %v6236_v50, %v6305_v4  ;;  %v2441_v56 = vsel %vm8777_vm5, %v2433_v13, %v2289_v25  ;;  %v6854_v45 = vsel %vm8778_vm14, %v2118_v57, %v1968_v21  ;;  %v2308_v28 = vsel %vm1356_vm11, %v6490_v40, %v6454_v2  ;;  %vm8779_vm1 = vmmov %vm8770_vm0  ;;  %v8790_v21 = vld [vmem:[#allocation82_spill] sm:$0xff] }
 0x3c7   : > { %v2449_v37 = vsel %vm624_vm10, %v2441_v56, %v2309_v47  ;;  %v2511_v38 = vsel %vm631_vm12, %v2503_v39, %v8749_v33  ;;  %v2431_v50 = vsel %vm610_vm6, %v6854_v45, %v2253_v20  ;;  %v2329_v4 = vsel %vm2327_vm15, %v6646_v34, %v6616_v5  ;;  %v8780_v33 = vld [vmem:[#allocation87_spill] sm:$0xff]  ;;  %vm8783_vm15 = vmmov %vm8764_vm7 }
 0x3c8   : > { %2949 = vrot.lane.b32.xlu0 %v2511_v38, %s3736_s16  ;;  %v2457_v27 = vsel %vm631_vm12, %v2449_v37, %v2330_v1  ;;  %v2427_v2 = vsel %vm610_vm6, %v6845_v54, %v8761_v10  ;;  %v2439_v40 = vsel %vm8779_vm1, %v2431_v50, %v2288_v48  ;;  %vm510_vm11 = vcmask 850944   ;;  %v8784_v10 = vld [vmem:[#allocation85_spill] sm:$0xff]  ;;  %vm8788_vm9 = vmmov %vm8779_vm1  ;;  %v8793_v39 = vld [vmem:[#allocation103_spill] sm:$0xff] }
 0x3c9   : > { %2947 = vrot.lane.b32.xlu1 %v2457_v27, %s3736_s16  ;;  %v1132_v60 = vsel %vm596_vm4, %v5893_v3, %v8780_v33  ;;  %v2435_v5 = vsel %vm8781_vm3, %v2427_v2, %v6266_v43  ;;  %v6879_v34 = vpop.permute.xlu0 %2081  ;;  %v2447_v19 = vsel %vm624_vm10, %v2439_v40, %v2308_v28  ;;  %v2033_v18 = vsel %vm510_vm11, %v8784_v10, %v6226_v46  ;;  %v6890_v3 = vpop.permute.xlu1 %2079  ;;  %v8785_v43 = vld [vmem:[#allocation95_spill] sm:$0xff]  ;;  %v8797_v28 = vld [vmem:[#allocation109_spill] sm:$0xff] }
 0x3ca   : > { %v1140_v58 = vsel %vm8783_vm15, %v1132_v60, %v8782_v24  ;;  %v2443_v8 = vsel %vm624_vm10, %v2435_v5, %v6398_v11  ;;  %v2455_v49 = vsel %vm631_vm12, %v2447_v19, %v2329_v4  ;;  %vm558_vm0 = vcmask 695296  }
 0x3cb   : > { %v1148_v62 = vsel %vm610_vm6, %v1140_v58, %v8785_v43  ;;  %vm8786_vm2 = vcmask 719872   ;;  %v2451_v55 = vsel %vm631_vm12, %v2443_v8, %v6580_v29  ;;  %vm570_vm7 = vcmask 687104  }
 0x3cc   : > { %v2044_v25 = vsel %vm8786_vm2, %v6391_v30, %v6358_v14  ;;  %2945 = vrot.lane.b32.xlu0 %v2455_v49, %s3736_s16  ;;  %v1156_v11 = vsel %vm8788_vm9, %v1148_v62, %v8787_v35  ;;  %vm8791_vm8 = vcmask 859136   ;;  %vm8792_vm5 = vcmask 711680   ;;  %vm8796_vm3 = vmmov %vm8786_vm2 }
 0x3cd   : > { %v2022_v47 = vsel %vm8791_vm8, %v8790_v21, %v8789_v22  ;;  %v2055_v53 = vsel %vm8792_vm5, %v6569_v42, %v6542_v51  ;;  %2941 = vrot.lane.b32.xlu1 %v2451_v55, %s3736_s16  ;;  %v1164_v61 = vsel %vm624_vm10, %v1156_v11, %v8793_v39  ;;  %v2034_v29 = vsel %vm510_vm11, %v6226_v46, %v6194_v9  ;;  %v2086_v1 = vpop.permute.xlu0 %2085  ;;  %v2095_v37 = vpop.permute.xlu1 %2094  ;;  %vm8798_vm15 = vmmov %vm8791_vm8  ;;  %v8813_v39 = vld [vmem:[#allocation68_spill] sm:$0xff] }
 0x3ce   : > { %vm8794_vm14 = vcmask 1040384   ;;  %vm8795_vm1 = vcmask 703488   ;;  %v2045_v48 = vsel %vm8796_vm3, %v6358_v14, %v6440_v16  ;;  %v2077_v56 = vsel %vm558_vm0, %v6805_v17, %v6773_v52 }
 0x3cf   : > { %v2166_v13 = vsel %vm8794_vm14, %v2022_v47, %v2033_v18  ;;  %v2066_v20 = vsel %vm8795_vm1, %v6724_v12, %v6697_v59  ;;  %v1172_v46 = vsel %vm631_vm12, %v1164_v61, %v8797_v28  ;;  %v2023_v38 = vsel %vm8798_vm15, %v8789_v22, %v6185_v63  ;;  %vm8800_vm9 = vmmov %vm8794_vm14  ;;  %v8810_v22 = vld [vmem:[#allocation3_spill] sm:$0xff]  ;;  %v8823_v28 = vld [vmem:[#allocation4_spill] sm:$0xff] }
 0x3d0   : > { %v2176_v57 = vsel %vm596_vm4, %v2166_v13, %v2044_v25  ;;  %vm8799_vm2 = vcmask 1042432   ;;  %v2088_v4 = vsel %vm570_vm7, %v6879_v34, %v2084_v31  ;;  %2802 = vrot.lane.b32.xlu0 %v1172_v46, %s8230_s14  ;;  %v2172_v14 = vsel %vm8800_vm9, %v6185_v63, %v6194_v9  ;;  %vm8801_vm8 = vmmov %vm8800_vm9  ;;  %v8817_v13 = vld [vmem:[#allocation74_spill] sm:$0xff] }
 0x3d1   : > { %v2184_v50 = vsel %vm8799_vm2, %v2176_v57, %v2055_v53  ;;  %v2169_v27 = vsel %vm8801_vm8, %v2023_v38, %v2034_v29  ;;  %v2056_v2 = vsel %vm8792_vm5, %v6542_v51, %v6605_v0  ;;  %v2180_v60 = vsel %vm596_vm4, %v2172_v14, %v6440_v16  ;;  %vm8802_vm14 = vmmov %vm8795_vm1  ;;  %v2093_v63 = vpop.permute.xlu0 %2092  ;;  %v6956_v18 = vpop.permute.xlu1 %1971  ;;  %v8812_v53 = vld [vmem:[#allocation73_spill] sm:$0xff]  ;;  %v8819_v57 = vld [vmem:[#allocation80_spill] sm:$0xff] }
 0x3d2   : > { %v2192_v40 = vsel %vm610_vm6, %v2184_v50, %v2066_v20  ;;  %v2178_v33 = vsel %vm596_vm4, %v2169_v27, %v2045_v48  ;;  %v2067_v5 = vsel %vm8802_vm14, %v6697_v59, %v6761_v15  ;;  %vm8803_vm1 = vcmask 1044480   ;;  %vm8804_vm3 = vmmov %vm8799_vm2  ;;  %v8816_v29 = vld [vmem:[#allocation77_spill] sm:$0xff] }
 0x3d3   : > { %v2200_v19 = vsel %vm8803_vm1, %v2192_v40, %v2077_v56  ;;  %v2188_v9 = vsel %vm8804_vm3, %v2180_v60, %v6605_v0  ;;  %v2078_v51 = vsel %vm558_vm0, %v6773_v52, %v6851_v44  ;;  %v2099_v58 = vsel %vm7951_vm13, %v2093_v63, %v2095_v37  ;;  %vm8805_vm15 = vmmov %vm8799_vm2  ;;  %v8826_v14 = vld [vmem:[#allocation5_spill] sm:$0xff] }
 0x3d4   : > { %v2208_v24 = vsel %vm624_vm10, %v2200_v19, %v2088_v4  ;;  %v2186_v16 = vsel %vm8805_vm15, %v2178_v33, %v2056_v2  ;;  %v2196_v59 = vsel %vm610_vm6, %v2188_v9, %v6761_v15  ;;  %v2089_v8 = vsel %vm570_vm7, %v2084_v31, %v2086_v1  ;;  %vm8806_vm2 = vmmov %vm8803_vm1 }
 0x3d5   : > { %v2216_v49 = vsel %vm631_vm12, %v2208_v24, %v2099_v58  ;;  %v2194_v0 = vsel %vm610_vm6, %v2186_v16, %v2067_v5  ;;  %v2204_v52 = vsel %vm8806_vm2, %v2196_v59, %v6851_v44  ;;  %vm8807_vm9 = vmmov %vm8803_vm1  ;;  %v2097_v25 = vpop.permute.xlu0 %2096  ;;  %vm8808_vm8 = vcmask 859136   ;;  %v6975_v11 = vpop.permute.xlu1 %1975  ;;  %v8809_v44 = vld [vmem:[#allocation6_spill] sm:$0xff]  ;;  %v8832_v24 = vld [vmem:[#allocation15_spill] sm:$0xff] }
 0x3d6   : > { %2915 = vrot.lane.b32.xlu0 %v2216_v49, %s3694_s15  ;;  %v2202_v43 = vsel %vm8807_vm9, %v2194_v0, %v2078_v51  ;;  %v2212_v62 = vsel %vm624_vm10, %v2204_v52, %v2086_v1  ;;  %v2021_v15 = vsel %vm8808_vm8, %v6350_v32, %v8790_v21  ;;  %v2100_v55 = vsel %vm7951_vm13, %v2095_v37, %v2097_v25  ;;  %v8830_v5 = vld [vmem:[#allocation14_spill] sm:$0xff]  ;;  %v8833_v16 = vld [vmem:[#allocation199_spill] sm:$0xff]  ;;  %v8834_v59 = vld [vmem:[#allocation200_spill] sm:$0xff] }
 0x3d7   : > { %v2210_v31 = vsel %vm624_vm10, %v2202_v43, %v2089_v8  ;;  %v2220_v35 = vsel %vm631_vm12, %v2212_v62, %v2097_v25  ;;  %vm8811_vm5 = vcmask 1040384   ;;  %vm8814_vm14 = vcmask 334848   ;;  %v8835_v49 = vld [vmem:[#allocation202_spill] sm:$0xff]  ;;  %v8836_v43 = vld [vmem:[#allocation201_spill] sm:$0xff]  ;;  %v8837_v25 = vld [vmem:[#allocation208_spill] sm:$0xff] }
 0x3d8   : > { %v856_v47 = vsel %vm8811_vm5, %v8810_v22, %v8809_v44  ;;  %v840_v61 = vsel %vm8814_vm14, %v8813_v39, %v8812_v53  ;;  %vm8815_vm1 = vcmask 719872   ;;  %v2218_v21 = vsel %vm631_vm12, %v2210_v31, %v2100_v55  ;;  %vm8821_vm2 = vmmov %vm8811_vm5  ;;  %v8839_v55 = vld [vmem:[#allocation16_spill] sm:$0xff]  ;;  %v8840_v44 = vld [vmem:[#allocation81_spill] sm:$0xff] }
 0x3d9   : > { %v2043_v32 = vsel %vm8815_vm1, %v6499_v7, %v6391_v30  ;;  %vm8818_vm3 = vcmask 326656   ;;  %v2032_v1 = vsel %vm510_vm11, %v6312_v23, %v8784_v10  ;;  %vm8820_vm15 = vcmask 711680   ;;  %2917 = vrot.lane.b32.xlu1 %v2218_v21, %s3694_s15  ;;  %v7002_v56 = vpop.permute.xlu0 %1973  ;;  %v8824_v23 = vld [vmem:[#allocation69_spill] sm:$0xff]  ;;  %v7012_v38 = vpop.permute.xlu1 %1969  ;;  %v8843_v39 = vld [vmem:[#allocation206_spill] sm:$0xff] }
 0x3da   : > { %v853_v20 = vsel %vm8818_vm3, %v8817_v13, %v8816_v29  ;;  %v2054_v48 = vsel %vm8820_vm15, %v8819_v57, %v6569_v42  ;;  %2919 = vrot.lane.b32.xlu0 %v2220_v35, %s3694_s15  ;;  %v2163_v30 = vsel %vm8821_vm2, %v2021_v15, %v2032_v1  ;;  %vm8822_vm9 = vcmask 703488   ;;  %v8838_v15 = vld [vmem:[#allocation203_spill] sm:$0xff]  ;;  %v8845_v21 = vld [vmem:[#allocation209_spill] sm:$0xff]  ;;  %v8847_v13 = vld [vmem:[#allocation84_spill] sm:$0xff] }
 0x3db   : > { %v2065_v7 = vsel %vm8822_vm9, %v6733_v41, %v6724_v12  ;;  %v858_v46 = vsel %vm596_vm4, %v856_v47, %v8823_v28  ;;  %v932_v10 = vsel %vm624_vm10, %v8824_v23, %v840_v61  ;;  %v2174_v42 = vsel %vm596_vm4, %v2163_v30, %v2043_v32  ;;  %v8842_v47 = vld [vmem:[#allocation205_spill] sm:$0xff]  ;;  %v8844_v32 = vld [vmem:[#allocation214_spill] sm:$0xff]  ;;  %v8849_v1 = vld [vmem:[#allocation211_spill] sm:$0xff] }
 0x3dc   : > { %v2076_v37 = vsel %vm558_vm0, %v6814_v36, %v6805_v17  ;;  %vm8825_vm8 = vcmask 1042432   ;;  %v2087_v12 = vsel %vm570_vm7, %v6890_v3, %v6879_v34  ;;  %v940_v41 = vsel %vm631_vm12, %v932_v10, %v853_v20  ;;  %v8829_v36 = vld [vmem:[#allocation50_spill] sm:$0xff]  ;;  %v8854_v28 = vld [vmem:[#allocation215_spill] sm:$0xff]  ;;  %v8856_v10 = vld [vmem:[#allocation105_spill] sm:$0xff] }
 0x3dd   : > { %v2182_v50 = vsel %vm8825_vm8, %v2174_v42, %v2054_v48  ;;  %2773 = vrot.lane.b32.xlu1 %v940_v41, %s3735_s10  ;;  %vm8827_vm5 = vmmov %vm8825_vm8  ;;  %vm8828_vm14 = vcmask 1044480   ;;  %v2091_v17 = vpop.permute.xlu0 %2090  ;;  %v7028_v34 = vpop.permute.xlu1 %1984  ;;  %vm1583_vm3 = vcmask 916480   ;;  %vm1595_vm15 = vcmask 908288   ;;  %v8851_v48 = vld [vmem:[#allocation212_spill] sm:$0xff]  ;;  %v8860_v41 = vld [vmem:[#allocation217_spill] sm:$0xff] }
 0x3de   : > { %v2190_v4 = vsel %vm610_vm6, %v2182_v50, %v2065_v7  ;;  %v860_v27 = vsel %vm8827_vm5, %v858_v46, %v8826_v14  ;;  %v2098_v60 = vsel %vm7951_vm13, %v2091_v17, %v2093_v63  ;;  %vm8831_vm1 = vmmov %vm8828_vm14  ;;  %v1584_v63 = vsel %vm1583_vm3, %v8834_v59, %v8833_v16  ;;  %v8853_v7 = vld [vmem:[#allocation218_spill] sm:$0xff]  ;;  %v8870_v59 = vld [vmem:[#allocation237_spill] sm:$0xff] }
 0x3df   : > { %v2198_v2 = vsel %vm8828_vm14, %v2190_v4, %v2076_v37  ;;  %v868_v40 = vsel %vm610_vm6, %v860_v27, %v8829_v36  ;;  %v1585_v0 = vsel %vm1583_vm3, %v8833_v16, %v8835_v49  ;;  %vm445_vm2 = vcmask 1014784   ;;  %v8858_v37 = vld [vmem:[#allocation108_spill] sm:$0xff] }
 0x3e0   : > { %v2206_v33 = vsel %vm624_vm10, %v2198_v2, %v2087_v12  ;;  %v873_v19 = vsel %vm8831_vm1, %v868_v40, %v8830_v5  ;;  %v1586_v62 = vsel %vm1583_vm3, %v8835_v49, %v8836_v43  ;;  %v1597_v31 = vsel %vm1595_vm15, %v8838_v15, %v8837_v25  ;;  %v8866_v5 = vld [vmem:[#allocation236_spill] sm:$0xff] }
 0x3e1   : > { %v2214_v3 = vsel %vm631_vm12, %v2206_v33, %v2098_v60  ;;  %v7034_v9 = vpop.permute.xlu0 %1982  ;;  %v7036_v51 = vpop.permute.xlu1 %1980  ;;  %v878_v58 = vsel %vm624_vm10, %v873_v19, %v8832_v24  ;;  %vm8841_vm9 = vcmask 1040384   ;;  %v1596_v53 = vsel %vm1595_vm15, %v8842_v47, %v8838_v15  ;;  %v8875_v15 = vld [vmem:[#allocation231_spill] sm:$0xff] }
 0x3e2   : > { %2913 = vrot.lane.b32.xlu0 %v2214_v3, %s3694_s15  ;;  %v7052_v35 = vsel %vm631_vm12, %v878_v58, %v8839_v55  ;;  %v1813_v22 = vsel %vm8841_vm9, %v8840_v44, %v1584_v63  ;;  %v1598_v61 = vsel %vm1595_vm15, %v8837_v25, %v8843_v39  ;;  %vm8846_vm8 = vcmask 900096   ;;  %vm8848_vm5 = vmmov %vm8841_vm9  ;;  %v8865_v3 = vld [vmem:[#allocation235_spill] sm:$0xff]  ;;  %v8868_v58 = vld [vmem:[#allocation238_spill] sm:$0xff] }
 0x3e3   : > { %v1608_v29 = vsel %vm8846_vm8, %v8845_v21, %v8844_v32  ;;  %v1816_v20 = vsel %vm8848_vm5, %v8847_v13, %v1585_v0  ;;  %vm8850_vm14 = vmmov %vm8846_vm8  ;;  %vm8855_vm3 = vcmask 891904   ;;  %vm1734_vm15 = vcmask 359424   ;;  %v8878_v44 = vld [vmem:[#allocation239_spill] sm:$0xff] }
 0x3e4   : > { %v1607_v57 = vsel %vm8850_vm14, %v8849_v1, %v8845_v21  ;;  %vm8852_vm1 = vmmov %vm8846_vm8  ;;  %v1619_v46 = vsel %vm8855_vm3, %v8854_v28, %v8853_v7  ;;  %v1826_v12 = vsel %vm596_vm4, %v1816_v20, %v1597_v31  ;;  %v1824_v27 = vsel %vm596_vm4, %v1813_v22, %v1596_v53  ;;  %v8876_v31 = vld [vmem:[#allocation232_spill] sm:$0xff]  ;;  %v8884_v21 = vld [vmem:[#allocation233_spill] sm:$0xff] }
 0x3e5   : > { %v7042_v8 = vpop.permute.xlu0 %1986  ;;  %v1996_v52 = vpop.permute.xlu1 %1995  ;;  %v1609_v30 = vsel %vm8852_vm1, %v8844_v32, %v8851_v48  ;;  %vm8857_vm9 = vmmov %vm8848_vm5  ;;  %vm8862_vm14 = vcmask 1042432   ;;  %v1978_v49 = vsel %vm445_vm2, %v6956_v18, %v7002_v56  ;;  %v8879_v22 = vld [vmem:[#allocation240_spill] sm:$0xff] }
 0x3e6   : > { %v1822_v42 = vsel %vm8857_vm9, %v8856_v10, %v8836_v43  ;;  %vm8859_vm8 = vmmov %vm8848_vm5  ;;  %v1834_v36 = vsel %vm8862_vm14, %v1826_v12, %v1608_v29  ;;  %vm8867_vm9 = vcmask 728064   ;;  %v8872_v43 = vld [vmem:[#allocation222_spill] sm:$0xff] }
 0x3e7   : > { %v1819_v50 = vsel %vm8859_vm8, %v8858_v37, %v1586_v62  ;;  %vm8861_vm5 = vmmov %vm8855_vm3  ;;  %v7088_v2 = vsel %vm596_vm4, %v1822_v42, %v8843_v39  ;;  %v7097_v60 = vsel %vm610_vm6, %v1834_v36, %v1619_v46  ;;  %v1675_v19 = vsel %vm8867_vm9, %v8866_v5, %v8865_v3  ;;  %v8873_v62 = vld [vmem:[#allocation219_spill] sm:$0xff]  ;;  %v8891_v10 = vld [vmem:[#allocation242_spill] sm:$0xff] }
 0x3e8   : > { %v1620_v4 = vsel %vm8861_vm5, %v8853_v7, %v8860_v41  ;;  %v1828_v17 = vsel %vm596_vm4, %v1819_v50, %v1598_v61  ;;  %vm8863_vm1 = vmmov %vm8862_vm14  ;;  %vm8874_vm14 = vcmask 883712   ;;  %v8882_v61 = vld [vmem:[#allocation234_spill] sm:$0xff]  ;;  %v2132_v7 = vsel %vm610_vm6, %v6778_v6, %v1978_v49 }
 0x3e9   : > { %v7074_v23 = vpop.permute.xlu0 %1993  ;;  %v1992_v14 = vpop.permute.xlu1 %1991  ;;  %v7093_v40 = vsel %vm8863_vm1, %v1824_v27, %v1607_v57  ;;  %vm8864_vm3 = vmmov %vm8863_vm1  ;;  %v7117_v25 = vsel %vm8874_vm14, %v8873_v62, %v8872_v43  ;;  %vm8877_vm1 = vcmask 736256   ;;  %v1979_v37 = vsel %vm445_vm2, %v7002_v56, %v6975_v11 }
 0x3ea   : > { %v1836_v33 = vsel %vm8864_vm3, %v1828_v17, %v1609_v30  ;;  %vm8869_vm8 = vmmov %vm8867_vm9  ;;  %v1664_v55 = vsel %vm8877_vm1, %v8876_v31, %v8875_v15  ;;  %vm8880_vm3 = vcmask 719872  }
 0x3eb   : > { %v7103_v24 = vsel %vm610_vm6, %v1836_v33, %v1620_v4  ;;  %v1676_v16 = vsel %vm8869_vm8, %v8865_v3, %v8868_v58  ;;  %vm8871_vm5 = vmmov %vm8869_vm8  ;;  %v1686_v47 = vsel %vm8880_vm3, %v8879_v22, %v8878_v44  ;;  %v8894_v4 = vld [vmem:[#allocation241_spill] sm:$0xff]  ;;  %v2136_v3 = vsel %vm610_vm6, %v6819_v26, %v6975_v11 }
 0x3ec   : > { %v1677_v63 = vsel %vm8871_vm5, %v8868_v58, %v8870_v59  ;;  %vm8881_vm9 = vmmov %vm8874_vm14  ;;  %vm8886_vm14 = vcmask 1040384   ;;  %v1977_v11 = vsel %vm445_vm2, %v7012_v38, %v6956_v18 }
 0x3ed   : > { %v1998_v0 = vpop.permute.xlu0 %1997  ;;  %v1989_v53 = vsel %vm8881_vm9, %v7034_v9, %v7028_v34  ;;  %v2007_v39 = vpop.permute.xlu1 %2006  ;;  %vm8883_vm8 = vmmov %vm8877_vm1  ;;  %v1873_v13 = vsel %vm8886_vm14, %v1664_v55, %v1675_v19 }
 0x3ee   : > { %v1665_v32 = vsel %vm8883_vm8, %v8875_v15, %v8882_v61  ;;  %vm8885_vm5 = vmmov %vm8877_vm1  ;;  %vm8887_vm1 = vcmask 875520   ;;  %v1884_v46 = vsel %vm596_vm4, %v1873_v13, %v1686_v47  ;;  %vm8892_vm8 = vcmask 719872   ;;  %v8902_v15 = vld [vmem:[#allocation246_spill] sm:$0xff] }
 0x3ef   : > { %v1666_v29 = vsel %vm8885_vm5, %v8882_v61, %v8884_v21  ;;  %v2000_v20 = vsel %vm8887_vm1, %v7074_v23, %v1996_v52  ;;  %vm8888_vm3 = vmmov %vm8886_vm14  ;;  %v1687_v42 = vsel %vm8892_vm8, %v8878_v44, %v8891_v10  ;;  %vm8893_vm5 = vcmask 1044480   ;;  %v8908_v61 = vld [vmem:[#allocation245_spill] sm:$0xff] }
 0x3f0   : > { %v1882_v1 = vsel %vm8888_vm3, %v8884_v21, %v8870_v59  ;;  %vm8889_vm13 = vmmov %vm8888_vm3  ;;  %v2140_v50 = vsel %vm8893_vm5, %v2132_v7, %v1989_v53  ;;  %vm8896_vm14 = vcmask 867328  }
 0x3f1   : > { %v1876_v57 = vsel %vm8889_vm13, %v1665_v32, %v1676_v16  ;;  %vm8890_vm9 = vmmov %vm8888_vm3  ;;  %v2005_v12 = vpop.permute.xlu0 %2004  ;;  %v7154_v27 = vsel %vm596_vm4, %v1882_v1, %v8894_v4  ;;  %vm8895_vm13 = vcmask 883712   ;;  %v2148_v17 = vsel %vm624_vm10, %v2140_v50, %v2000_v20  ;;  %v2003_v33 = vpop.permute.xlu1 %2002  ;;  %v8900_v16 = vld [vmem:[#allocation244_spill] sm:$0xff]  ;;  %v8917_v1 = vld [vmem:[#allocation249_spill] sm:$0xff] }
 0x3f2   : > { %v1879_v30 = vsel %vm8890_vm9, %v1666_v29, %v1677_v63  ;;  %v1990_v6 = vsel %vm8895_vm13, %v7028_v34, %v7042_v8  ;;  %v2011_v36 = vsel %vm8896_vm14, %v2005_v12, %v2007_v39  ;;  %vm8897_vm1 = vmmov %vm8892_vm8  ;;  %vm8898_vm3 = vcmask 875520   ;;  %v8899_v34 = vld [vmem:[#allocation243_spill] sm:$0xff]  ;;  %v8916_v20 = vld [vmem:[#allocation252_spill] sm:$0xff] }
 0x3f3   : > { %v1688_v56 = vsel %vm8897_vm1, %v8891_v10, %v8894_v4  ;;  %v2001_v5 = vsel %vm8898_vm3, %v1996_v52, %v1998_v0  ;;  %v2156_v19 = vsel %vm631_vm12, %v2148_v17, %v2011_v36  ;;  %v1886_v58 = vsel %vm596_vm4, %v1876_v57, %v1687_v42  ;;  %vm8901_vm9 = vmmov %vm8893_vm5  ;;  %v8919_v57 = vld [vmem:[#allocation251_spill] sm:$0xff]  ;;  %v8921_v50 = vld [vmem:[#allocation256_spill] sm:$0xff] }
 0x3f4   : > { %v1735_v59 = vsel %vm1734_vm15, %v8900_v16, %v8899_v34  ;;  %v2134_v63 = vsel %vm610_vm6, %v6854_v45, %v1979_v37  ;;  %v2144_v49 = vsel %vm8901_vm9, %v2136_v3, %v7042_v8  ;;  %2907 = vrot.lane.b32.xlu1 %v2156_v19, %s3694_s15  ;;  %v1736_v26 = vsel %vm1734_vm15, %v8899_v34, %v8902_v15  ;;  %vm8903_vm8 = vmmov %vm8893_vm5  ;;  %v8927_v3 = vld [vmem:[#allocation257_spill] sm:$0xff]  ;;  %v8929_v19 = vld [vmem:[#allocation259_spill] sm:$0xff] }
 0x3f5   : > { %v2142_v52 = vsel %vm8903_vm8, %v2134_v63, %v1990_v6  ;;  %v2152_v31 = vsel %vm624_vm10, %v2144_v49, %v1998_v0  ;;  %v2009_v55 = vpop.permute.xlu0 %2008  ;;  %vm8904_vm5 = vmmov %vm8895_vm13  ;;  %v7192_v47 = vpop.permute.xlu1 %2844  ;;  %v1888_v53 = vsel %vm596_vm4, %v1879_v30, %v1688_v56  ;;  %v8907_v0 = vld [vmem:[#allocation248_spill] sm:$0xff]  ;;  %vm8909_vm1 = vcmask 351232   ;;  %v8924_v6 = vld [vmem:[#allocation255_spill] sm:$0xff] }
 0x3f6   : > { %v1988_v45 = vsel %vm8904_vm5, %v7036_v51, %v7034_v9  ;;  %v2150_v8 = vsel %vm624_vm10, %v2142_v52, %v2001_v5  ;;  %vm8905_vm13 = vmmov %vm8896_vm14  ;;  %v2160_v22 = vsel %vm631_vm12, %v2152_v31, %v2009_v55  ;;  %vm2848_vm14 = vcmask 367616   ;;  %v8926_v56 = vld [vmem:[#allocation260_spill] sm:$0xff]  ;;  %v8936_v52 = vld [vmem:[#allocation254_spill] sm:$0xff] }
 0x3f7   : > { %v2012_v44 = vsel %vm8905_vm13, %v2007_v39, %v2009_v55  ;;  %vm8906_vm15 = vmmov %vm8898_vm3  ;;  %v1755_v9 = vsel %vm8909_vm1, %v8908_v61, %v8907_v0  ;;  %v2130_v51 = vsel %vm610_vm6, %v6845_v54, %v1977_v11  ;;  %vm8911_vm9 = vcmask 1042432  }
 0x3f8   : > { %v1999_v18 = vsel %vm8906_vm15, %v1992_v14, %v7074_v23  ;;  %v2158_v38 = vsel %vm631_vm12, %v2150_v8, %v2012_v44  ;;  %vm8910_vm3 = vmmov %vm8905_vm13  ;;  %2911 = vrot.lane.b32.xlu1 %v2160_v22, %s3694_s15  ;;  %v1894_v32 = vsel %vm8911_vm9, %v1886_v58, %v1735_v59  ;;  %v8913_v14 = vld [vmem:[#allocation247_spill] sm:$0xff]  ;;  %vm8915_vm13 = vcmask 1044480   ;;  %v8932_v59 = vld [vmem:[#allocation250_spill] sm:$0xff] }
 0x3f9   : > { %v2010_v39 = vsel %vm8910_vm3, %v2003_v33, %v2005_v12  ;;  %2909 = vrot.lane.b32.xlu0 %v2158_v38, %s3694_s15  ;;  %vm8912_vm8 = vmmov %vm8911_vm9  ;;  %v2138_v29 = vsel %vm8915_vm13, %v2130_v51, %v1988_v45  ;;  %v2843_v13 = vpop.permute.xlu0 %2842  ;;  %vm8918_vm15 = vcmask 343040   ;;  %v2835_v42 = vpop.permute.xlu1 %2834  ;;  %v1902_v37 = vsel %vm610_vm6, %v1894_v32, %v1755_v9  ;;  %v8922_v12 = vld [vmem:[#allocation253_spill] sm:$0xff]  ;;  %v8939_v8 = vld [vmem:[#allocation258_spill] sm:$0xff] }
 0x3fa   : > { %v1896_v23 = vsel %vm8912_vm8, %v1888_v53, %v1736_v26  ;;  %vm8914_vm5 = vmmov %vm8909_vm1  ;;  %v1776_v54 = vsel %vm8918_vm15, %v8917_v1, %v8916_v20  ;;  %v2146_v7 = vsel %vm624_vm10, %v2138_v29, %v1999_v18  ;;  %v2853_v10 = vsel %vm2848_vm14, %v2843_v13, %v7192_v47 }
 0x3fb   : > { %v1756_v21 = vsel %vm8914_vm5, %v8907_v0, %v8913_v14  ;;  %vm8920_vm1 = vmmov %vm8918_vm15  ;;  %vm8923_vm3 = vcmask 334848   ;;  %3024 = vmatprep.subr.bf16.mxu0 %v2853_v10  ;;  %v2154_v36 = vsel %vm631_vm12, %v2146_v7, %v2010_v39  ;;  %vm8928_vm8 = vcmask 326656   ;;  %v8941_v0 = vld [vmem:[#allocation262_spill] sm:$0xff] }
 0x3fc   : > { %v1777_v30 = vsel %vm8920_vm1, %v8916_v20, %v8919_v57  ;;  %v1796_v4 = vsel %vm8923_vm3, %v8922_v12, %v8921_v50  ;;  %vm8925_vm9 = vmmov %vm8923_vm3  ;;  %v1904_v33 = vsel %vm610_vm6, %v1896_v23, %v1756_v21  ;;  %v1808_v5 = vsel %vm8928_vm8, %v8927_v3, %v8926_v56  ;;  %2905 = vrot.lane.b32.xlu1 %v2154_v36, %s3694_s15  ;;  %v8947_v21 = vld [vmem:[#allocation223_spill] sm:$0xff]  ;;  %v8949_v10 = vld [vmem:[#allocation230_spill] sm:$0xff] }
 0x3fd   : > { %v1797_v17 = vsel %vm8925_vm9, %v8921_v50, %v8924_v6  ;;  %vm8930_vm5 = vmmov %vm8928_vm8  ;;  %2765 = vrot.lane.b32.xlu0 %v7052_v35, %s3735_s10  ;;  %vm8931_vm13 = vcmask 1042432   ;;  %vm8933_vm15 = vcmask 351232   ;;  %vm8934_vm1 = vcmask 1044480   ;;  %v2841_v11 = vpop.permute.xlu0 %2840  ;;  %v2833_v55 = vpop.permute.xlu1 %2832 }
 0x3fe   : > { %v1809_v58 = vsel %vm8930_vm5, %v8926_v56, %v8929_v19  ;;  %v1892_v34 = vsel %vm8931_vm13, %v1884_v46, %v8900_v16  ;;  %v1757_v63 = vsel %vm8933_vm15, %v8913_v14, %v8932_v59  ;;  %v1910_v49 = vsel %vm8934_vm1, %v1902_v37, %v1776_v54  ;;  %vm8935_vm3 = vmmov %vm8934_vm1  ;;  %v8946_v14 = vld [vmem:[#allocation226_spill] sm:$0xff]  ;;  %v8948_v54 = vld [vmem:[#allocation225_spill] sm:$0xff] }
 0x3ff   : > { %v1912_v26 = vsel %vm8935_vm3, %v1904_v33, %v1777_v30  ;;  %vm8937_vm9 = vcmask 343040   ;;  %v2852_v35 = vsel %vm2848_vm14, %v2841_v11, %v2843_v13  ;;  %v1918_v45 = vsel %vm624_vm10, %v1910_v49, %v1796_v4  ;;  %vm8938_vm8 = vmmov %vm8931_vm13  ;;  %v8950_v37 = vld [vmem:[#allocation227_spill] sm:$0xff]  ;;  %v8961_v11 = vld [vmem:[#allocation228_spill] sm:$0xff] }
 0x400   : > { %v1778_v31 = vsel %vm8937_vm9, %v8919_v57, %v8936_v52  ;;  %v1920_v46 = vsel %vm624_vm10, %v1912_v26, %v1797_v17  ;;  %v1898_v16 = vsel %vm8938_vm8, %v7154_v27, %v8902_v15  ;;  %vm8940_vm5 = vcmask 334848   ;;  %3025 = vmatpush1.bf16.msra.mxu0 %v2852_v35  ;;  %v7271_v27 = vld.sshfl [vmem:[%s7586_s1] sm:$0x33 pattern:$0x76325410]  ;;  %v8943_v15 = vld [vmem:[#allocation221_spill] sm:$0xff]  ;;  %vm8945_vm9 = vmmov %vm8935_vm3 }
 0x401   : > { %v1798_v44 = vsel %vm8940_vm5, %v8924_v6, %v8939_v8  ;;  %v1926_v22 = vsel %vm631_vm12, %v1918_v45, %v1808_v5  ;;  %v1928_v53 = vsel %vm631_vm12, %v1920_v46, %v1809_v58  ;;  %vm1640_vm13 = vcmask 752640   ;;  %v7279_v32 = vpop.permute.xlu0 %2836  ;;  %v8952_v17 = vld [vmem:[#allocation216_spill] sm:$0xff]  ;;  %v3007_v8 = vld [vmem:[%s7587_s2] sm:$0xf] }
 0x402   : > { %v1900_v18 = vsel %vm610_vm6, %v1892_v34, %v8908_v61  ;;  %v1906_v38 = vsel %vm610_vm6, %v1898_v16, %v1757_v63  ;;  %vm8942_vm15 = vcmask 326656   ;;  %2879 = vrot.lane.b32.xlu0 %v1926_v22, %s8306_s11  ;;  %2881 = vrot.lane.b32.xlu1 %v1928_v53, %s8306_s11  ;;  %vm8944_vm1 = vcmask 883712   ;;  %v8956_v5 = vld [vmem:[#allocation220_spill] sm:$0xff] }
 0x403   : > { %v1810_v9 = vsel %vm8942_vm15, %v8929_v19, %v8941_v0  ;;  %v1631_v51 = vsel %vm8944_vm1, %v8872_v43, %v8943_v15  ;;  %v1908_v61 = vsel %vm8935_vm3, %v1900_v18, %v8917_v1  ;;  %v1914_v39 = vsel %vm8945_vm9, %v1906_v38, %v1778_v31  ;;  %v7291_v1 = vpop.permute.xlu1 %2808  ;;  %vm8954_vm15 = vmmov %vm8935_vm3 }
 0x404   : > { %v3021_v23 = vcombine.high %v7271_v27, %v7271_v27  ;;  %v1642_v29 = vsel %vm1640_vm13, %v8947_v21, %v8946_v14  ;;  %v1916_v13 = vsel %vm624_vm10, %v1908_v61, %v8922_v12  ;;  %v1922_v20 = vsel %vm624_vm10, %v1914_v39, %v1798_v44  ;;  %v8951_v12 = vld [vmem:[#allocation229_spill] sm:$0xff]  ;;  %vm8955_vm1 = vmmov %vm8935_vm3  ;;  %v8970_v39 = vld [vmem:[#allocation26_spill] sm:$0xff] }
 0x405   : > { %v2850_v43 = vsel %vm2848_vm14, %v2835_v42, %v7279_v32  ;;  %v1643_v57 = vsel %vm1640_vm13, %v8946_v14, %v8948_v54  ;;  %vm1652_vm8 = vcmask 744448   ;;  %v1930_v30 = vsel %vm631_vm12, %v1922_v20, %v1810_v9  ;;  %v8967_v9 = vld [vmem:[#allocation25_spill] sm:$0xff]  ;;  %v8975_v20 = vld [vmem:[#allocation23_spill] sm:$0xff] }
 0x406   : > { %3026 = vmatprep.subr.bf16.mxu0 %v2850_v43  ;;  %v1924_v7 = vsel %vm631_vm12, %v1916_v13, %v8927_v3  ;;  %3056 = vmatprep.mubr.bf16.mxu0 %v3021_v23  ;;  %v1654_v50 = vsel %vm1652_vm8, %v8950_v37, %v8949_v10  ;;  %v1655_v4 = vsel %vm1652_vm8, %v8949_v10, %v8951_v12  ;;  %vm8953_vm5 = vcmask 891904   ;;  %v2807_v3 = vpop.permute.xlu0 %2806  ;;  %v8969_v61 = vld [vmem:[#allocation29_spill] sm:$0xff] }
 0x407   : > { %2883 = vrot.lane.b32.xlu0 %v1930_v30, %s8306_s11  ;;  %2877 = vrot.lane.b32.xlu1 %v1924_v7, %s8306_s11  ;;  %v2849_v6 = vsel %vm2848_vm14, %v2833_v55, %v2835_v42  ;;  %v1618_v36 = vsel %vm8953_vm5, %v8952_v17, %v8854_v28  ;;  %v1850_v33 = vsel %vm8954_vm15, %v7097_v60, %v7117_v25  ;;  %vm8957_vm3 = vcmask 883712   ;;  %v2799_v58 = vpop.permute.xlu1 %2798  ;;  %vm8963_vm15 = vmmov %vm8955_vm1  ;;  %v8972_v14 = vld [vmem:[#allocation33_spill] sm:$0xff]  ;;  %v8979_v7 = vld [vmem:[#allocation34_spill] sm:$0xff] }
 0x408   : > { %v1852_v56 = vsel %vm8955_vm1, %v7103_v24, %v1631_v51  ;;  %3027 = vmatpush1.bf16.msra.mxu0 %v2849_v6  ;;  %3097 = vmatprep.mubr.bf16.mxu1 %v3021_v23  ;;  %v1629_v19 = vsel %vm8957_vm3, %v8956_v5, %v8873_v62  ;;  %vm8958_vm9 = vcmask 867328   ;;  %v1858_v28 = vsel %vm624_vm10, %v1850_v33, %v1642_v29  ;;  %v8960_v24 = vld [vmem:[#allocation224_spill] sm:$0xff]  ;;  %v8978_v30 = vld [vmem:[#allocation37_spill] sm:$0xff] }
 0x409   : > { %v2816_v42 = vsel %vm8958_vm9, %v2807_v3, %v7291_v1  ;;  %v1860_v34 = vsel %vm624_vm10, %v1852_v56, %v1643_v57  ;;  %v3737_v59 = vmov 0   ;;  %vm8959_vm5 = vcmask 1042432   ;;  %v8983_v17 = vld [vmem:[#allocation41_spill] sm:$0xff]  ;;  %v8985_v56 = vld [vmem:[#allocation12_spill] sm:$0xff] }
 0x40a   : > { %3627 = vset.pattern.permute.xlu0 %v3737_v59  ;;  %v1838_v60 = vsel %vm8959_vm5, %v7088_v2, %v8851_v48  ;;  %v1641_v25 = vsel %vm1640_vm13, %v8960_v24, %v8947_v21  ;;  %3028 = vmatprep.subr.bf16.mxu0 %v2816_v42  ;;  %v1866_v62 = vsel %vm631_vm12, %v1858_v28, %v1654_v50  ;;  %vm8962_vm13 = vmmov %vm8955_vm1  ;;  %v2805_v31 = vpop.permute.xlu0 %2804  ;;  %vm8971_vm5 = vcmask 719872   ;;  %v8973_v21 = vld [vmem:[#allocation30_spill] sm:$0xff]  ;;  %v8990_v28 = vld [vmem:[#allocation45_spill] sm:$0xff] }
 0x40b   : > { %v1868_v63 = vsel %vm631_vm12, %v1860_v34, %v1655_v4  ;;  %v1840_v49 = vsel %vm610_vm6, %v7093_v40, %v1618_v36  ;;  %v1846_v26 = vsel %vm610_vm6, %v1838_v60, %v8860_v41  ;;  %v1653_v52 = vsel %vm1652_vm8, %v8961_v11, %v8950_v37  ;;  %2871 = vrot.lane.b32.xlu0 %v1866_v62, %s8306_s11  ;;  %vm8964_vm1 = vmmov %vm8958_vm9  ;;  %v2797_v55 = vpop.permute.xlu1 %2796  ;;  %v8984_v36 = vld [vmem:[#allocation38_spill] sm:$0xff] }
 0x40c   : > { %2873 = vrot.lane.b32.xlu1 %v1868_v63, %s8306_s11  ;;  %v1848_v48 = vsel %vm8962_vm13, %v1840_v49, %v1629_v19  ;;  %v1854_v2 = vsel %vm8963_vm15, %v1846_v26, %v8943_v15  ;;  %v2815_v41 = vsel %vm8964_vm1, %v2805_v31, %v2807_v3  ;;  %vm8965_vm8 = vmmov %vm8964_vm1  ;;  %vm2775_vm9 = vcmask 547840   ;;  %v8968_v15 = vld [vmem:[#allocation22_spill] sm:$0xff]  ;;  %v8986_v3 = vld [vmem:[#allocation8_spill] sm:$0xff] }
 0x40d   : > { %v1856_v35 = vsel %vm624_vm10, %v1848_v48, %v1641_v25  ;;  %v1862_v40 = vsel %vm624_vm10, %v1854_v2, %v8948_v54  ;;  %3029 = vmatpush1.bf16.msra.mxu0 %v2815_v41  ;;  %vm8966_vm3 = vmmov %vm8964_vm1  ;;  %v512_v51 = vsel %vm510_vm11, %v8968_v15, %v8967_v9  ;;  %v524_v23 = vsel %vm8971_vm5, %v8970_v39, %v8969_v61  ;;  %v8976_v54 = vld [vmem:[#allocation21_spill] sm:$0xff]  ;;  %v8987_v19 = vld [vmem:[#allocation31_spill] sm:$0xff] }
 0x40e   : > { %v1870_v45 = vsel %vm631_vm12, %v1862_v40, %v8951_v12  ;;  %v1864_v46 = vsel %vm631_vm12, %v1856_v35, %v1653_v52  ;;  %v7352_v16 = vpop.permute.xlu0 %2800  ;;  %v2812_v53 = vsel %vm8966_vm3, %v2797_v55, %v2799_v58  ;;  %vm8974_vm13 = vcmask 711680   ;;  %v8981_v12 = vld [vmem:[#allocation27_spill] sm:$0xff]  ;;  %v8991_v34 = vld [vmem:[#allocation42_spill] sm:$0xff]  ;;  %v8996_v49 = vld [vmem:[#allocation49_spill] sm:$0xff] }
 0x40f   : > { %2875 = vrot.lane.b32.xlu0 %v1870_v45, %s8306_s11  ;;  %v2813_v44 = vsel %vm8965_vm8, %v2799_v58, %v7352_v16  ;;  %v7359_v22 = vpop.permute.xlu1 %2771  ;;  %v536_v29 = vsel %vm8974_vm13, %v8973_v21, %v8972_v14  ;;  %v511_v43 = vsel %vm510_vm11, %v8975_v20, %v8968_v15  ;;  %vm8977_vm15 = vcmask 1040384   ;;  %vm8982_vm8 = vmmov %vm8971_vm5  ;;  %v8992_v60 = vld [vmem:[#allocation18_spill] sm:$0xff]  ;;  %v8994_v25 = vld [vmem:[#allocation35_spill] sm:$0xff] }
 0x410   : > { %2869 = vrot.lane.b32.xlu1 %v1864_v46, %s8306_s11  ;;  %3030 = vmatprep.subr.bf16.mxu0 %v2813_v44  ;;  %v646_v57 = vsel %vm8977_vm15, %v8976_v54, %v512_v51  ;;  %vm8980_vm1 = vcmask 703488   ;;  %v523_v4 = vsel %vm8982_vm8, %v8981_v12, %v8970_v39  ;;  %v560_v33 = vsel %vm558_vm0, %v8984_v36, %v8983_v17  ;;  %vm8988_vm3 = vmmov %vm8974_vm13  ;;  %v8997_v26 = vld [vmem:[#allocation46_spill] sm:$0xff]  ;;  %v8999_v2 = vld [vmem:[#allocation39_spill] sm:$0xff] }
 0x411   : > { %3031 = vmatpush1.bf16.msra.mxu0 %v2812_v53  ;;  %v548_v10 = vsel %vm8980_vm1, %v8979_v7, %v8978_v30  ;;  %v653_v6 = vsel %vm596_vm4, %v646_v57, %v524_v23  ;;  %v447_v5 = vsel %vm445_vm2, %v8986_v3, %v8985_v56  ;;  %v535_v42 = vsel %vm8988_vm3, %v8987_v19, %v8973_v21  ;;  %vm8993_vm13 = vmmov %vm8977_vm15  ;;  %v9002_v45 = vld [vmem:[#allocation43_spill] sm:$0xff]  ;;  %v9005_v51 = vld [vmem:[#allocation10_spill] sm:$0xff] }
 0x412   : > { %v2770_v18 = vpop.permute.xlu0 %2769  ;;  %vm8989_vm5 = vcmask 1042432   ;;  %v572_v59 = vsel %vm570_vm7, %v8991_v34, %v8990_v28  ;;  %v643_v24 = vsel %vm8993_vm13, %v8992_v60, %v511_v43  ;;  %vm8995_vm15 = vmmov %vm8980_vm1  ;;  %vm8998_vm1 = vcmask 556032   ;;  %v9006_v23 = vld [vmem:[#allocation341_spill] sm:$0xff] }
 0x413   : > { %3010 = vperm.xlu0 %3627, %v3007_v8   ;;  %v2780_v38 = vsel %vm2775_vm9, %v2770_v18, %v7359_v22  ;;  %v2762_v0 = vpop.permute.xlu1 %2761  ;;  %v659_v58 = vsel %vm8989_vm5, %v653_v6, %v536_v29  ;;  %v547_v62 = vsel %vm8995_vm15, %v8994_v25, %v8979_v7  ;;  %v584_v11 = vsel %vm8998_vm1, %v8997_v26, %v8996_v49  ;;  %vm9001_vm3 = vmmov %vm8989_vm5  ;;  %v9010_v7 = vld [vmem:[#allocation350_spill] sm:$0xff]  ;;  %v9012_v12 = vld [vmem:[#allocation17_spill] sm:$0xff] }
 0x414   : > { %3032 = vmatprep.subr.bf16.mxu0 %v2780_v38  ;;  %v665_v63 = vsel %vm610_vm6, %v659_v58, %v548_v10  ;;  %v651_v48 = vsel %vm596_vm4, %v643_v24, %v523_v4  ;;  %v559_v31 = vsel %vm558_vm0, %v8999_v2, %v8984_v36  ;;  %vm9000_vm8 = vcmask 1044480   ;;  %vm9004_vm5 = vmmov %vm8998_vm1  ;;  %v9013_v6 = vld [vmem:[#allocation345_spill] sm:$0xff] }
 0x415   : > { %v671_v35 = vsel %vm9000_vm8, %v665_v63, %v560_v33  ;;  %v657_v55 = vsel %vm9001_vm3, %v651_v48, %v535_v42  ;;  %v571_v46 = vsel %vm570_vm7, %v9002_v45, %v8991_v34  ;;  %v446_v39 = vsel %vm445_vm2, %v9005_v51, %v8986_v3  ;;  %vm9007_vm13 = vmmov %vm9000_vm8  ;;  %v9016_v19 = vld [vmem:[#allocation349_spill] sm:$0xff] }
 0x416   : > { %v2768_v13 = vpop.permute.xlu0 %2767  ;;  %v677_v44 = vsel %vm624_vm10, %v671_v35, %v572_v59  ;;  %v663_v53 = vsel %vm610_vm6, %v657_v55, %v547_v62  ;;  %v614_v21 = vsel %vm610_vm6, %v9006_v23, %v447_v5  ;;  %vm9009_vm15 = vmmov %vm9000_vm8  ;;  %v9017_v58 = vld [vmem:[#allocation353_spill] sm:$0xff] }
 0x417   : > { %v2779_v37 = vsel %vm2775_vm9, %v2768_v13, %v2770_v18  ;;  %v2760_v50 = vpop.permute.xlu1 %2759  ;;  %v9003_v18 = vld [vmem:[#allocation47_spill] sm:$0xff]  ;;  %v684_v15 = vsel %vm631_vm12, %v677_v44, %v584_v11  ;;  %v9008_v13 = vld [vmem:[#allocation346_spill] sm:$0xff]  ;;  %vm9014_vm1 = vmmov %vm9000_vm8  ;;  %vm9015_vm8 = vcmask 703488  }
 0x418   : > { %3033 = vmatpush1.bf16.msra.mxu0 %v2779_v37  ;;  %v2776_v8 = vsel %vm2775_vm9, %v2760_v50, %v2762_v0  ;;  %v583_v38 = vsel %vm9004_vm5, %v9003_v18, %v8997_v26  ;;  %v621_v20 = vsel %vm9009_vm15, %v614_v21, %v9008_v13  ;;  %v9011_v37 = vld [vmem:[#allocation340_spill] sm:$0xff]  ;;  %vm9018_vm3 = vmmov %vm9015_vm8 }
 0x419   : > { %v628_v10 = vsel %vm624_vm10, %v621_v20, %v9010_v7  ;;  %v612_v50 = vsel %vm610_vm6, %v9011_v37, %v446_v39  ;;  %vm9019_vm5 = vmmov %vm9018_vm3 }
 0x41a   : > { %v7408_v52 = vpop.permute.xlu0 %2763  ;;  %v636_v4 = vsel %vm631_vm12, %v628_v10, %v9012_v12  ;;  %v619_v36 = vsel %vm9014_vm1, %v612_v50, %v9013_v6  ;;  %vm9021_vm15 = vmmov %vm9018_vm3 }
 0x41b   : > { %v2777_v40 = vsel %vm2775_vm9, %v2762_v0, %v7408_v52  ;;  %v2991_v41 = vpop.permute.xlu1 %2990  ;;  %v669_v0 = vsel %vm9007_vm13, %v663_v53, %v559_v31  ;;  %v626_v42 = vsel %vm624_vm10, %v619_v36, %v9016_v19  ;;  %vm9020_vm13 = vmmov %vm9018_vm3  ;;  %v9032_v19 = vld [vmem:[#allocation28_spill] sm:$0xff] }
 0x41c   : > { %3034 = vmatprep.subr.bf16.mxu0 %v2777_v40  ;;  %v675_v54 = vsel %vm624_vm10, %v669_v0, %v571_v46  ;;  %v633_v34 = vsel %vm631_vm12, %v626_v42, %v9017_v58  ;;  %vm9022_vm1 = vmmov %vm9018_vm3  ;;  %v9034_v58 = vld [vmem:[#allocation32_spill] sm:$0xff] }
 0x41d   : > { %3035 = vmatpush1.bf16.msra.mxu0 %v2776_v8  ;;  %v681_v57 = vsel %vm631_vm12, %v675_v54, %v583_v38 }
 0x41e   : > { %v2989_v29 = vpop.permute.xlu0 %2988  ;;  %3036 = vmatprep.subr.bf16.mxu0 %v684_v15 }
 0x41f   : > { %v2847_v43 = vpop.permute.xlu1 %2846  ;;  %v2998_v60 = vsel %vm9018_vm3, %v2989_v29, %v2991_v41  ;;  %vm9023_vm3 = vcmask 867328  }
 0x420   : > { %v2854_v59 = vsel %vm2848_vm14, %v7192_v47, %v2847_v43 }
 0x421   : > { %3037 = vmatpush1.bf16.msra.mxu0 %v681_v57 }
 0x422   : > { %v2993_v33 = vpop.permute.xlu0 %2992  ;;  %3038 = vmatprep.subr.bf16.mxu0 %v636_v4 }
 0x423   : > { %v2999_v3 = vsel %vm9015_vm8, %v2991_v41, %v2993_v33  ;;  %v2981_v5 = vpop.permute.xlu1 %2980  ;;  %vm2957_vm8 = vcmask 384000   ;;  %v9030_v33 = vld [vmem:[#allocation24_spill] sm:$0xff] }
 0x424   : > { %3489 = vmatprep.subr.bf16.mxu1 %v2999_v3 }
 0x425   : > { %3039 = vmatpush1.bf16.msra.mxu0 %v633_v34  ;;  %3490 = vmatpush3.bf16.msra.mxu1 %v2854_v59  ;;  %v9036_v59 = vld [vmem:[#allocation53_spill] sm:$0xff] }
 0x426   : > { %v2987_v24 = vpop.permute.xlu0 %2986  ;;  %3040 = vmatprep.subr.bf16.mxu0 %v2998_v60 }
 0x427   : > { %v2985_v25 = vpop.permute.xlu1 %2984  ;;  %v2997_v62 = vsel %vm9019_vm5, %v2987_v24, %v2989_v29  ;;  %vm9025_vm5 = vcmask 883712   ;;  %v9038_v24 = vld [vmem:[#allocation36_spill] sm:$0xff] }
 0x429   : > { %3041 = vmatpush2.bf16.msra.mxu0 %v2997_v62 }
 0x42a   : > { %v2983_v63 = vpop.permute.xlu0 %2982 }
 0x42b   : > { %v2995_v26 = vsel %vm9020_vm13, %v2981_v5, %v2983_v63  ;;  %v2996_v11 = vsel %vm9021_vm15, %v2983_v63, %v2985_v25  ;;  %v2979_v48 = vpop.permute.xlu1 %2978  ;;  %vm9026_vm13 = vmmov %vm9025_vm5  ;;  %v9040_v63 = vld [vmem:[#allocation40_spill] sm:$0xff] }
 0x42c   : > { %3042 = vmatprep.subr.bf16.mxu0 %v2995_v26  ;;  %3491 = vmatprep.subr.bf16.mxu1 %v2996_v11  ;;  %v2994_v47 = vsel %vm9022_vm1, %v2979_v48, %v2981_v5  ;;  %vm9027_vm15 = vmmov %vm9025_vm5 }
 0x42d   : > { %3043 = vmatpush2.bf16.msra.mxu0 %v2994_v47  ;;  %vm9028_vm1 = vmmov %vm9025_vm5 }
 0x42e   : > { %v2839_v2 = vpop.permute.xlu0 %2838 }
 0x42f   : > { %v2851_v31 = vsel %vm2848_vm14, %v7279_v32, %v2839_v2  ;;  %v2954_v35 = vpop.permute.xlu1 %2953  ;;  %vm9024_vm14 = vmmov %vm9023_vm3 }
 0x430   : > { %3492 = vmatpush3.bf16.msra.mxu1 %v2851_v31 }
 0x432   : > { %v2952_v40 = vpop.permute.xlu0 %2951 }
 0x433   : > { %v2962_v41 = vsel %vm2957_vm8, %v2952_v40, %v2954_v35  ;;  %v2811_v55 = vpop.permute.xlu1 %2810 }
 0x434   : > { %3044 = vmatprep.subr.bf16.mxu0 %v2962_v41  ;;  %v2817_v44 = vsel %vm9023_vm3, %v7291_v1, %v2811_v55  ;;  %vm9031_vm3 = vmmov %vm9028_vm1 }
 0x436   : > { %v2956_v45 = vpop.permute.xlu0 %2955 }
 0x437   : > { %v2963_v46 = vsel %vm2957_vm8, %v2954_v35, %v2956_v45  ;;  %v2944_v8 = vpop.permute.xlu1 %2943  ;;  %v9046_v45 = vld [vmem:[#allocation11_spill] sm:$0xff] }
 0x438   : > { %3493 = vmatprep.subr.bf16.mxu1 %v2963_v46  ;;  %v448_v46 = vsel %vm445_vm2, %v8985_v56, %v9046_v45 }
 0x439   : > { %3494 = vmatpush3.bf16.msra.mxu1 %v2817_v44 }
 0x43a   : > { %v2950_v53 = vpop.permute.xlu0 %2949 }
 0x43b   : > { %v2961_v32 = vsel %vm2957_vm8, %v2950_v53, %v2952_v40  ;;  %v2948_v18 = vpop.permute.xlu1 %2947  ;;  %v9047_v53 = vld [vmem:[#allocation342_spill] sm:$0xff] }
 0x43c   : > { %3045 = vmatpush2.bf16.msra.mxu0 %v2961_v32  ;;  %v616_v32 = vsel %vm610_vm6, %v9047_v53, %v448_v46 }
 0x43e   : > { %v2946_v38 = vpop.permute.xlu0 %2945 }
 0x43f   : > { %v2959_v15 = vsel %vm2957_vm8, %v2944_v8, %v2946_v38  ;;  %v2960_v51 = vsel %vm2957_vm8, %v2946_v38, %v2948_v18  ;;  %v2942_v39 = vpop.permute.xlu1 %2941  ;;  %v9048_v18 = vld [vmem:[#allocation347_spill] sm:$0xff] }
 0x440   : > { %3046 = vmatprep.subr.bf16.mxu0 %v2959_v15  ;;  %3495 = vmatprep.subr.bf16.mxu1 %v2960_v51  ;;  %v2958_v23 = vsel %vm2957_vm8, %v2942_v39, %v2944_v8  ;;  %vm9029_vm8 = vmmov %vm9028_vm1 }
 0x441   : > { %3047 = vmatpush2.bf16.msra.mxu0 %v2958_v23 }
 0x442   : > { %v2803_v21 = vpop.permute.xlu0 %2802 }
 0x443   : > { %v2814_v1 = vsel %vm9024_vm14, %v7352_v16, %v2803_v21  ;;  %vm9033_vm14 = vcmask 719872   ;;  %v9050_v21 = vld [vmem:[#allocation352_spill] sm:$0xff] }
 0x444   : > { %3496 = vmatpush3.bf16.msra.mxu1 %v2814_v1  ;;  %v525_v42 = vsel %vm9033_vm14, %v8969_v61, %v9032_v19  ;;  %v561_v61 = vsel %vm558_vm0, %v8983_v17, %v9040_v63  ;;  %v9051_v1 = vld [vmem:[#allocation19_spill] sm:$0xff] }
 0x448   : > { %v2916_v0 = vpop.permute.xlu0 %2915 }
 0x44b   : > { %v2918_v13 = vpop.permute.xlu1 %2917 }
 0x44c   : > { %v2920_v29 = vpop.permute.xlu0 %2919  ;;  %v2925_v20 = vsel %vm9025_vm5, %v2916_v0, %v2918_v13  ;;  %vm9035_vm5 = vcmask 711680  }
 0x44d   : > { %v2926_v43 = vsel %vm9026_vm13, %v2918_v13, %v2920_v29  ;;  %3048 = vmatprep.subr.bf16.mxu0 %v2925_v20  ;;  %v537_v34 = vsel %vm9035_vm5, %v8972_v14, %v9034_v58  ;;  %vm9037_vm13 = vcmask 1040384   ;;  %v9042_v14 = vld [vmem:[#allocation44_spill] sm:$0xff]  ;;  %v9052_v29 = vlaneseq }
 0x44e   : > { %3497 = vmatprep.subr.bf16.mxu1 %v2926_v43  ;;  %v573_v48 = vsel %vm570_vm7, %v8990_v28, %v9042_v14 }
 0x44f   : > { %v2774_v54 = vpop.permute.xlu1 %2773  ;;  %v3106_v13 = vand.u32 127, %v9052_v29 }
 0x450   : > { %v2781_v57 = vsel %vm2775_vm9, %v7359_v22, %v2774_v54  ;;  %v513_v22 = vsel %vm510_vm11, %v8967_v9, %v9030_v33  ;;  %vm9039_vm11 = vcmask 703488  }
 0x451   : > { %3498 = vmatpush3.bf16.msra.mxu1 %v2781_v57  ;;  %v649_v60 = vsel %vm9037_vm13, %v9036_v59, %v513_v22  ;;  %v549_v9 = vsel %vm9039_vm11, %v8978_v30, %v9038_v24  ;;  %v9043_v30 = vld [vmem:[#allocation48_spill] sm:$0xff]  ;;  %v3108_v20 = vadd.s32 256, %v3106_v13  ;;  %v3107_v43 = vadd.s32 128, %v3106_v13 }
 0x452   : > { %v7529_v54 = vmul.u32.u64.low 3435973837, %v3106_v13  ;;  %v7530_v57 = vmul.u32.u64.high 3435973837, %v3106_v13, %v7529_v54 }
 0x453   : > { %vm3111_vm11 = vcmp.lt.s32.totalorder %v3108_v20, 320 }
 0x454   : > { %v2914_v7 = vpop.permute.xlu0 %2913 }
 0x455   : > { %v2924_v10 = vsel %vm9027_vm15, %v2914_v7, %v2916_v0  ;;  %vm9044_vm15 = vcmask 556032  }
 0x456   : > { %3049 = vmatpush2.bf16.msra.mxu0 %v2924_v10  ;;  %v585_v2 = vsel %vm9044_vm15, %v8996_v49, %v9043_v30  ;;  %v7532_v7 = vmul.u32.u64.low 3435973837, %v3108_v20  ;;  %v7533_v10 = vmul.u32.u64.high 3435973837, %v3108_v20, %v7532_v7 }
 0x466   : > { %v2908_v16 = vpop.permute.xlu1 %2907 }
 0x46a   : > { %v2912_v50 = vpop.permute.xlu1 %2911 }
 0x46b   : > { %v2910_v37 = vpop.permute.xlu0 %2909 }
 0x46c   : > { %v2922_v12 = vsel %vm9028_vm1, %v2908_v16, %v2910_v37  ;;  %v2923_v4 = vsel %vm9029_vm8, %v2910_v37, %v2912_v50  ;;  %v3118_v50 = vshrl.u32 %v7530_v57, 4 }
 0x46d   : > { %3050 = vmatprep.subr.bf16.mxu0 %v2922_v12  ;;  %3499 = vmatprep.subr.bf16.mxu1 %v2923_v4  ;;  %v3140_v12 = vshrl.u32 %v7533_v10, 4 }
 0x46e   : > { %v2906_v36 = vpop.permute.xlu1 %2905 }
 0x46f   : > { %v2766_v6 = vpop.permute.xlu0 %2765  ;;  %v2921_v3 = vsel %vm9031_vm3, %v2906_v36, %v2908_v16  ;;  %v7535_v16 = vmul.u32.u64.low 3435973837, %v3107_v43  ;;  %v7536_v37 = vmul.u32.u64.high 3435973837, %v3107_v43, %v7535_v16 }
 0x470   : > { %v2778_v5 = vsel %vm2775_vm9, %v7408_v52, %v2766_v6  ;;  %3051 = vmatpush2.bf16.msra.mxu0 %v2921_v3  ;;  %v655_v52 = vsel %vm596_vm4, %v649_v60, %v525_v42  ;;  %vm9041_vm9 = vcmask 1042432   ;;  %vm9045_vm4 = vcmask 1044480  }
 0x471   : > { %3500 = vmatpush3.bf16.msra.mxu1 %v2778_v5  ;;  %v661_v11 = vsel %vm9041_vm9, %v655_v52, %v537_v34  ;;  %vm9049_vm0 = vmmov %vm9045_vm4  ;;  %v3129_v4 = vshrl.u32 %v7536_v37, 4  ;;  %v3141_v6 = vmul.u32 20, %v3140_v12 }
 0x472   : > { %v667_v47 = vsel %vm610_vm6, %v661_v11, %v549_v9  ;;  %v623_v38 = vsel %vm9049_vm0, %v616_v32, %v9048_v18  ;;  %v3738_v9 = vmov 0.0   ;;  %vm3195_vm0 = vcmask 7168  }
 0x473   : > { %v673_v31 = vsel %vm9045_vm4, %v667_v47, %v561_v61  ;;  %v630_v56 = vsel %vm624_vm10, %v623_v38, %v9050_v21  ;;  %v3130_v36 = vmul.u32 20, %v3129_v4  ;;  %v3142_v22 = vsub.s32 %v3108_v20, %v3141_v6 }
 0x474   : > { %v2880_v25 = vpop.permute.xlu0 %2879  ;;  %v2882_v62 = vpop.permute.xlu1 %2881  ;;  %v679_v55 = vsel %vm624_vm10, %v673_v31, %v573_v48  ;;  %v639_v0 = vsel %vm631_vm12, %v630_v56, %v9051_v1 }
 0x475   : > { %v2889_v26 = vsel %vm570_vm7, %v2880_v25, %v2882_v62  ;;  %v687_v28 = vsel %vm631_vm12, %v679_v55, %v585_v2  ;;  %v3131_v3 = vsub.s32 %v3107_v43, %v3130_v36  ;;  %vm3150_vm2 = vcmp.lt.s32.totalorder %v3142_v22, 0 }
 0x476   : > { %3052 = vmatprep.subr.bf16.mxu0 %v2889_v26  ;;  %v3156_v19 = vadd.s32 20, %v3142_v22 }
 0x477   : > { %vm3146_vm1 = vcmp.ne.s32.totalorder %v3131_v3, 0  ;;  %vm3149_vm8 = vcmp.lt.s32.totalorder %v3131_v3, 0  ;;  %v3155_v42 = vadd.s32 20, %v3131_v3 }
 0x478   : > { %vm3152_vm5 = vmand %vm3149_vm8, %vm3146_vm1 }
 0x479   : > { %v2884_v35 = vpop.permute.xlu0 %2883  ;;  %v2878_v40 = vpop.permute.xlu1 %2877  ;;  %v3158_v59 = vsel %vm3152_vm5, %v3155_v42, %v3131_v3 }
 0x47a   : > { %v2888_v17 = vsel %vm570_vm7, %v2878_v40, %v2880_v25  ;;  %v2890_v41 = vsel %vm570_vm7, %v2882_v62, %v2884_v35  ;;  %vm3161_vm15 = vcmp.lt.s32.totalorder %v3158_v59, 16 }
 0x47b   : > { %3053 = vmatpush2.bf16.msra.mxu0 %v2888_v17  ;;  %3501 = vmatprep.subr.bf16.mxu1 %v2890_v41  ;;  %v3480_v61 = vsel %vm3161_vm15, 1.0, %v3738_v9 }
 0x47c   : > { %3502 = vmatpush3.bf16.msra.mxu1 %v687_v28 }
 0x47d   : > { %v2872_v49 = vpop.permute.xlu0 %2871 }
 0x47e   : > { %v2874_v8 = vpop.permute.xlu1 %2873 }
 0x47f   : > { %v2886_v44 = vsel %vm570_vm7, %v2872_v49, %v2874_v8 }
 0x480   : > { %3054 = vmatprep.subr.bf16.mxu0 %v2886_v44 }
 0x481   : > { %v2876_v15 = vpop.permute.xlu0 %2875 }
 0x482   : > { %v2870_v51 = vpop.permute.xlu1 %2869  ;;  %v2887_v23 = vsel %vm570_vm7, %v2874_v8, %v2876_v15 }
 0x483   : > { %v2885_v39 = vsel %vm570_vm7, %v2870_v51, %v2872_v49  ;;  %3503 = vmatprep.subr.bf16.mxu1 %v2887_v23  ;;  %vm3147_vm7 = vcmp.ne.s32.totalorder %v3142_v22, 0 }
 0x484   : > { %3055 = vmatpush2.bf16.msra.mxu0 %v2885_v39  ;;  %3504 = vmatpush3.bf16.msra.mxu1 %v639_v0  ;;  %vm3153_vm14 = vmand %vm3150_vm2, %vm3147_vm7 }
 0x485   : > { %v3159_v34 = vsel %vm3153_vm14, %v3156_v19, %v3142_v22 }
 0x486   : > { %vm3162_vm9 = vcmp.lt.s32.totalorder %v3159_v34, 16 }
 0x487   : > { %3057 = vmatmul.mubr.bf16.vlgmr.msra.gmra.mxu0 %v7271_v27  ;;  %3098 = vmatmul.mubr.bf16.vlgmr.msra.gmra.mxu1 %v7271_v27  ;;  %v3119_v27 = vmul.u32 20, %v3118_v50  ;;  %vm3165_vm4 = vmand %vm3111_vm11, %vm3162_vm9 }
 0x488   : > { %v3481_v30 = vsel %vm3165_vm4, 1.0, %v3738_v9 }
 0x489   : > { %v3120_v33 = vsub.s32 %v3106_v13, %v3119_v27 }
 0x48b   : > { %vm3145_vm10 = vcmp.ne.s32.totalorder %v3120_v33, 0  ;;  %vm3148_vm12 = vcmp.lt.s32.totalorder %v3120_v33, 0  ;;  %v3154_v5 = vadd.s32 20, %v3120_v33 }
 0x48c   : > { %vm3151_vm3 = vmand %vm3148_vm12, %vm3145_vm10 }
 0x48d   : > { %v3157_v58 = vsel %vm3151_vm3, %v3154_v5, %v3120_v33 }
 0x48e   : > { %vm3160_vm13 = vcmp.lt.s32.totalorder %v3157_v58, 16  ;;  %v3011_v60 = vpop.permute.xlu0 %3010 }
 0x48f   : > { %v3479_v25 = vsel %vm3160_vm13, 1.0, %v3738_v9 }
 0x547   : > { %v3058_v24 = vpop.f32.mrf.mxu0  ;;  %v3505_v52 = vpop.f32.mrf.mxu1 }
 0x548   : > { %v3059_v62 = vadd.f32 %v3058_v24, %v3011_v60 }
 0x549   : > { %v3060_v63 = vpop.f32.mrf.mxu0  ;;  %v3506_v48 = vpop.f32.mrf.mxu1 }
 0x54a   : > { %v3172_v26 = vmul.f32 %v3479_v25, %v3059_v62  ;;  %v3182_v11 = vmul.f32 %v3059_v62, %v3059_v62  ;;  %v3061_v14 = vadd.f32 %v3060_v63, %v3011_v60  ;;  %v3507_v47 = vadd.f32 %v3506_v48, %v3505_v52 }
 0x54b   : > { %v3062_v2 = vpop.f32.mrf.mxu0  ;;  %v3508_v41 = vpop.f32.mrf.mxu1 }
 0x54c   : > { %v3185_v31 = vmul.f32 %v3479_v25, %v3182_v11  ;;  %v3173_v35 = vmul.f32 %v3480_v61, %v3061_v14  ;;  %v3175_v40 = vsel %vm610_vm6, %v3172_v26, 0.0  ;;  %v3183_v17 = vmul.f32 %v3061_v14, %v3061_v14 }
 0x54d   : > { %v3100_v55 = vadd.f32 %v3507_v47, %v3011_v60  ;;  %v3063_v28 = vpop.f32.mrf.mxu0  ;;  %v3509_v49 = vpop.f32.mrf.mxu1 }
 0x54e   : > { %v3176_v45 = vsel %vm610_vm6, %v3173_v35, 0.0  ;;  %v3186_v46 = vmul.f32 %v3480_v61, %v3183_v17  ;;  %v3188_v8 = vsel %vm610_vm6, %v3185_v31, 0.0 }
 0x54f   : > { %v3177_v44 = vadd.f32 %v3176_v45, %v3175_v40  ;;  %v3174_v53 = vmul.f32 %v3481_v30, %v3100_v55  ;;  %v3184_v32 = vmul.f32 %v3100_v55, %v3100_v55 }
 0x550   : > { %v3189_v18 = vsel %vm610_vm6, %v3186_v46, 0.0 }
 0x551   : > { %v3187_v38 = vmul.f32 %v3481_v30, %v3184_v32  ;;  %v3178_v15 = vsel %vm610_vm6, %v3174_v53, 0.0  ;;  %v3190_v51 = vadd.f32 %v3189_v18, %v3188_v8 }
 0x552   : > { %v3179_v39 = vadd.f32 %v3178_v15, %v3177_v44 }
 0x553   : > { %v3191_v23 = vsel %vm610_vm6, %v3187_v38, 0.0 }
 0x554   : > { %3180 = vadd.xlane.f32.xlu1 %v3179_v39  ;;  %v3192_v21 = vadd.f32 %v3191_v23, %v3190_v51 }
 0x556   : > { %3193 = vadd.xlane.f32.xlu0 %v3192_v21 }
 0x5dc   : > { %3200 = sbr.rel (%p3482_p10) target bundleno = 1507 (0x5e3), region = 36 }
 0x5dd   : > { %v3181_v56 = vpop.xlane.xlu1 %3180 }
 0x5df   : > { %v3194_v1 = vpop.xlane.xlu0 %3193 }
 0x5e0   : > { %v3196_v0 = vsel %vm3195_vm0, %v3181_v56, %v3194_v1 }
 0x5e1   : > { %vm3201_vm10 = vcmask 11264  }
 0x5e2   : > { %3202 = vst.msk [vmem:[%s6177_s8] sm:$0xf] %vm3201_vm10, %v3196_v0 }
 0x5e3 PF: > { %p3483_p11 = scmp.le.s32.totalorder %s3663_s18, 0 }
 0x5e5   : > { %3206 = sbr.rel (%p3483_p11) target bundleno = 1518 (0x5ee), region = 40 }
 0x5ea   : > { %v3207_v29 = vld [vmem:[%s6177_s8] sm:$0xf]  ;;  %vm3209_vm6 = vcmask 11264  }
 0x5eb   : > { %v3208_v13 = vadd.f32 %v3207_v29, %v3196_v0 }
 0x5ed   : > { %3210 = vst.msk [vmem:[%s6177_s8] sm:$0xf] %vm3209_vm6, %v3208_v13 }
 0x5ee PF: > { %s9053_s11 = smov 86   ;;  %v9054_v20 = vld [vmem:[#allocation71_spill] sm:$0xff]  ;;  %v3739_v43 = vmov 1983009808   ;;  %v3213_v57 = vpack.c.bf16 %v3100_v55, %v3100_v55  ;;  %v3484_v7 = vpack.c.bf16 %v3061_v14, %v3059_v62  ;;  %s3488_s6 = smul.u32 6, %s3663_s18  ;;  %v9055_v16 = vld [vmem:[#allocation2_spill] sm:$0xff] }
 0x5ef   : > { %3238 = vrot.lane.b32.xlu0 %v9054_v20, %s9053_s11  ;;  %v3219_v54 = vunpack.c.l.s4 %v3739_v43  ;;  %s3234_s9 = smul.u32 3, %s3663_s18  ;;  %vm9056_vm12 = vcmask 703488  }
 0x5f0   : > { %s3236_s12 = scalar_lea.vmem %s6153_s7, %s3488_s6 }
 0x5f1   : > { %v3220_v10 = vunpack.c.0.s8 %v3219_v54  ;;  %s3243_s13 = scalar_lea.vmem %s302_s29, %s3234_s9 }
 0x5f3   : > { %v3223_v37 = vsub.s32 %v3220_v10, %v9055_v16 }
 0x5f5   : > { %v3224_v50 = vrot.slane %v3484_v7, %v3223_v37  ;;  %v3231_v12 = vrot.slane %v3213_v57, %v3223_v37 }
 0x5f7   : > { %v3232_v4 = vcombine.low %v3224_v50, %v3231_v12 }
 0x5f9   : > { %3237 = vst [vmem:[%s3236_s12] sm:$0x3f] %v3232_v4 }
 0x661   : > { %v3239_v27 = vpop.permute.xlu0 %3238 }
 0x662   : > { %v3240_v6 = vrot.slane %v3239_v27, 1 }
 0x664   : > { %v3241_v36 = vsel %vm9056_vm12, %v3239_v27, %v3240_v6 }
 0x665   : > { %3244 = vst [vmem:[%s3243_s13] sm:$0x7] %v3241_v36 }
 0x666 PF: > { %s16_s24 = sadd.s32 1, %s3687_s24   ;;  %s9057_s18 = smov %s3675_s21 }
 0x667   : > { %p13_p12 = scmp.ge.s32.totalorder %s16_s24, 34   ;;  %s9058_s19 = smov %s3679_s22 }
 0x668   : > { %s9059_s20 = smov %s3683_s23  ;;  %s9060_s21 = smov %s9064_s25 }
 0x669   : > { %s9061_s22 = smov %s9068_s26  ;;  %s9062_s23 = smov %s9072_s27 }
 0x66a   :  { %15 = sbr.rel (!%p13_p12) target bundleno = 4 (0x4), region = 101 }

</bundles_post_ra>
